<compile_context>
chip_gen: v5e
topology: v5e:2x2
jax: 0.10.0
libtpu: 0.0.40
codegen_flags: <defaults>
</compile_context>

<pallas_src>
import math
import functools

import jax
import jax.numpy as jnp
from jax.experimental import pallas as pl
from jax.experimental.pallas import tpu as pltpu


def _qkv_attention_kernel(qkv_ref, out_ref, *, n_heads, ch, scale):
    """qkv_ref: (3*H*C, T) block of one batch element; out_ref: (H*C, T)."""
    # Fold the q/k scale into q only: (q*s) . (k*s) == (q*s^2) . k
    scale2 = jnp.asarray(scale * scale, dtype=qkv_ref.dtype)

    for h in range(n_heads):                        # static unroll; H is small
        q = qkv_ref[pl.ds(h * ch, ch), :] * scale2                   # (C, T)
        k = qkv_ref[pl.ds((n_heads + h) * ch, ch), :]                # (C, T)
        v = qkv_ref[pl.ds((2 * n_heads + h) * ch, ch), :]            # (C, T)

        # w[t, s] = sum_c q[c, t] * k[c, s]   (q^T k, contraction on C), MXU.
        w = jax.lax.dot_general(
            q, k, (((0,), (0,)), ((), ())),
            preferred_element_type=jnp.float32)                      # (T, T)

        # Numerically-stable softmax over the last (lane) axis, in f32.
        # Normalize with a per-row reciprocal (T divides) instead of T*T divides.
        w = w - jnp.max(w, axis=-1, keepdims=True)
        p = jnp.exp(w)                                               # EUP
        p = p * jnp.reciprocal(jnp.sum(p, axis=-1, keepdims=True))   # (T, T)

        # a[c, t] = sum_s p[t, s] * v[c, s]   (v p^T, contraction on T/s), MXU.
        a = jax.lax.dot_general(
            v, p.astype(v.dtype), (((1,), (1,)), ((), ())),
            preferred_element_type=jnp.float32)                      # (C, T)

        out_ref[pl.ds(h * ch, ch), :] = a.astype(out_ref.dtype)


def qkv_attention(qkv, n_heads):
    """Pallas QKVAttention.forward.  qkv: [N, 3*H*C, T] -> [N, H*C, T]."""
    bs, width, length = qkv.shape
    assert width % (3 * n_heads) == 0
    ch = width // (3 * n_heads)
    scale = 1.0 / math.sqrt(math.sqrt(ch))

    kernel = functools.partial(
        _qkv_attention_kernel, n_heads=n_heads, ch=ch, scale=scale)

    return pl.pallas_call(
        kernel,
        out_shape=jax.ShapeDtypeStruct((bs, n_heads * ch, length), qkv.dtype),
        grid=(bs,),
        # `None` squeezes the per-step batch dim out of the kernel refs.
        in_specs=[pl.BlockSpec((None, width, length), lambda b: (b, 0, 0))],
        out_specs=pl.BlockSpec((None, n_heads * ch, length), lambda b: (b, 0, 0)),
        compiler_params=pltpu.CompilerParams(
            dimension_semantics=("parallel",)),
    )(qkv)


def _qkv_attention_ref(qkv, n_heads):
    """Plain-JAX reference mirroring the PyTorch module (true-f32 matmuls)."""
    bs, width, length = qkv.shape
    ch = width // (3 * n_heads)
    q, k, v = jnp.split(qkv, 3, axis=1)
    scale = 1.0 / math.sqrt(math.sqrt(ch))
    q = (q * scale).reshape(bs * n_heads, ch, length)
    k = (k * scale).reshape(bs * n_heads, ch, length)
    v = v.reshape(bs * n_heads, ch, length)
    w = jnp.einsum('bct,bcs->bts', q, k, precision=jax.lax.Precision.HIGHEST)
    w = jax.nn.softmax(w.astype(jnp.float32), axis=-1).astype(w.dtype)
    a = jnp.einsum('bts,bcs->bct', w, v, precision=jax.lax.Precision.HIGHEST)
    return a.reshape(bs, n_heads * ch, length)


if __name__ == "__main__":
    key = jax.random.PRNGKey(0)

    # [N, 3*H*C, T]: batch=2, heads=4, per-head channels=32, length=256
    # (e.g. a 16x16 spatial map flattened), so T is lane-dense (multiple of 128).
    bs, n_heads, ch, length = 2, 4, 32, 256
    qkv = jax.random.normal(key, (bs, 3 * n_heads * ch, length), jnp.float32)

    out = qkv_attention(qkv, n_heads)
    jax.block_until_ready(out)

    ref = _qkv_attention_ref(qkv, n_heads)
    assert out.shape == (bs, n_heads * ch, length)
    max_err = float(jnp.max(jnp.abs(out - ref)))
    assert jnp.allclose(out, ref, atol=1e-4, rtol=1e-4), f"max_err={max_err}"

    print("KERNEL_OK")
</pallas_src>

<mosaic_0001>
module attributes {stable_mosaic.version = 11 : i64} {
  func.func @_qkv_attention_kernel(%arg0: i32, %arg1: memref<1x384x256xf32, #tpu.memory_space<vmem>>, %arg2: memref<1x128x256xf32, #tpu.memory_space<vmem>>) attributes {dimension_semantics = [#tpu.dimension_semantics<parallel>], iteration_bounds = array<i64: 2>, scalar_prefetch = 0 : i64, scratch_operands = 0 : i64, tpu.core_type = #tpu.core_type<tc>, window_params = [{transform_indices = @transform_0, window_bounds = array<i64: 1, 384, 256>}, {transform_indices = @transform_1, window_bounds = array<i64: 1, 128, 256>}]} {
    %c0 = arith.constant 0 : index
    %c0_0 = arith.constant 0 : index
    %c0_1 = arith.constant 0 : index
    %0 = vector.load %arg1[%c0, %c0_0, %c0_1] : memref<1x384x256xf32, #tpu.memory_space<vmem>>, vector<1x32x256xf32>
    %1 = vector.shape_cast %0 : vector<1x32x256xf32> to vector<32x256xf32>
    %cst = arith.constant 0.176776692 : f32
    %2 = vector.broadcast %cst : f32 to vector<32x256xf32>
    %3 = arith.mulf %1, %2 : vector<32x256xf32>
    %c0_2 = arith.constant 0 : index
    %c128 = arith.constant 128 : index
    %c0_3 = arith.constant 0 : index
    %4 = vector.load %arg1[%c0_2, %c128, %c0_3] : memref<1x384x256xf32, #tpu.memory_space<vmem>>, vector<1x32x256xf32>
    %5 = vector.shape_cast %4 : vector<1x32x256xf32> to vector<32x256xf32>
    %c0_4 = arith.constant 0 : index
    %c256 = arith.constant 256 : index
    %c0_5 = arith.constant 0 : index
    %6 = vector.load %arg1[%c0_4, %c256, %c0_5] : memref<1x384x256xf32, #tpu.memory_space<vmem>>, vector<1x32x256xf32>
    %7 = vector.shape_cast %6 : vector<1x32x256xf32> to vector<32x256xf32>
    %cst_6 = arith.constant dense<0.000000e+00> : vector<256x256xf32>
    %8 = tpu.matmul %3, %5, %cst_6 {dimension_numbers = #tpu.dot_dimension_numbers<[0], [0], [1], [1], [0, 1, 1, 1], [], []>} : vector<32x256xf32>, vector<32x256xf32>, vector<256x256xf32> -> vector<256x256xf32>
    %cst_7 = arith.constant dense<0xFF800000> : vector<256xf32>
    %9 = vector.multi_reduction <maximumf>, %8, %cst_7 [1] : vector<256x256xf32> to vector<256xf32>
    %10 = vector.shape_cast %9 : vector<256xf32> to vector<256x1xf32>
    %11 = vector.broadcast %10 : vector<256x1xf32> to vector<256x256xf32>
    %12 = arith.subf %8, %11 : vector<256x256xf32>
    %13 = math.exp %12 : vector<256x256xf32>
    %cst_8 = arith.constant dense<0.000000e+00> : vector<256xf32>
    %14 = vector.multi_reduction <add>, %13, %cst_8 [1] : vector<256x256xf32> to vector<256xf32>
    %15 = vector.shape_cast %14 : vector<256xf32> to vector<256x1xf32>
    %cst_9 = arith.constant 1.000000e+00 : f32
    %16 = vector.broadcast %cst_9 : f32 to vector<256x1xf32>
    %17 = arith.divf %16, %15 : vector<256x1xf32>
    %18 = vector.broadcast %17 : vector<256x1xf32> to vector<256x256xf32>
    %19 = arith.mulf %13, %18 : vector<256x256xf32>
    %cst_10 = arith.constant dense<0.000000e+00> : vector<32x256xf32>
    %20 = tpu.matmul %7, %19, %cst_10 {dimension_numbers = #tpu.dot_dimension_numbers<[1], [1], [0], [0], [0, 0, 1, 0], [], []>} : vector<32x256xf32>, vector<256x256xf32>, vector<32x256xf32> -> vector<32x256xf32>
    %c0_11 = arith.constant 0 : index
    %c0_12 = arith.constant 0 : index
    %c0_13 = arith.constant 0 : index
    %21 = vector.load %arg2[%c0_11, %c0_12, %c0_13] : memref<1x128x256xf32, #tpu.memory_space<vmem>>, vector<1x32x256xf32>
    %22 = vector.shape_cast %21 : vector<1x32x256xf32> to vector<32x256xf32>
    %23 = vector.shape_cast %20 : vector<32x256xf32> to vector<1x32x256xf32>
    tpu.vector_store %arg2[%c0_11, %c0_12, %c0_13], %23 {strides = array<i32>} : memref<1x128x256xf32, #tpu.memory_space<vmem>>, vector<1x32x256xf32>,
    %c0_14 = arith.constant 0 : index
    %c32 = arith.constant 32 : index
    %c0_15 = arith.constant 0 : index
    %24 = vector.load %arg1[%c0_14, %c32, %c0_15] : memref<1x384x256xf32, #tpu.memory_space<vmem>>, vector<1x32x256xf32>
    %25 = vector.shape_cast %24 : vector<1x32x256xf32> to vector<32x256xf32>
    %cst_16 = arith.constant 0.176776692 : f32
    %26 = vector.broadcast %cst_16 : f32 to vector<32x256xf32>
    %27 = arith.mulf %25, %26 : vector<32x256xf32>
    %c0_17 = arith.constant 0 : index
    %c160 = arith.constant 160 : index
    %c0_18 = arith.constant 0 : index
    %28 = vector.load %arg1[%c0_17, %c160, %c0_18] : memref<1x384x256xf32, #tpu.memory_space<vmem>>, vector<1x32x256xf32>
    %29 = vector.shape_cast %28 : vector<1x32x256xf32> to vector<32x256xf32>
    %c0_19 = arith.constant 0 : index
    %c288 = arith.constant 288 : index
    %c0_20 = arith.constant 0 : index
    %30 = vector.load %arg1[%c0_19, %c288, %c0_20] : memref<1x384x256xf32, #tpu.memory_space<vmem>>, vector<1x32x256xf32>
    %31 = vector.shape_cast %30 : vector<1x32x256xf32> to vector<32x256xf32>
    %cst_21 = arith.constant dense<0.000000e+00> : vector<256x256xf32>
    %32 = tpu.matmul %27, %29, %cst_21 {dimension_numbers = #tpu.dot_dimension_numbers<[0], [0], [1], [1], [0, 1, 1, 1], [], []>} : vector<32x256xf32>, vector<32x256xf32>, vector<256x256xf32> -> vector<256x256xf32>
    %cst_22 = arith.constant dense<0xFF800000> : vector<256xf32>
    %33 = vector.multi_reduction <maximumf>, %32, %cst_22 [1] : vector<256x256xf32> to vector<256xf32>
    %34 = vector.shape_cast %33 : vector<256xf32> to vector<256x1xf32>
    %35 = vector.broadcast %34 : vector<256x1xf32> to vector<256x256xf32>
    %36 = arith.subf %32, %35 : vector<256x256xf32>
    %37 = math.exp %36 : vector<256x256xf32>
    %cst_23 = arith.constant dense<0.000000e+00> : vector<256xf32>
    %38 = vector.multi_reduction <add>, %37, %cst_23 [1] : vector<256x256xf32> to vector<256xf32>
    %39 = vector.shape_cast %38 : vector<256xf32> to vector<256x1xf32>
    %cst_24 = arith.constant 1.000000e+00 : f32
    %40 = vector.broadcast %cst_24 : f32 to vector<256x1xf32>
    %41 = arith.divf %40, %39 : vector<256x1xf32>
    %42 = vector.broadcast %41 : vector<256x1xf32> to vector<256x256xf32>
    %43 = arith.mulf %37, %42 : vector<256x256xf32>
    %cst_25 = arith.constant dense<0.000000e+00> : vector<32x256xf32>
    %44 = tpu.matmul %31, %43, %cst_25 {dimension_numbers = #tpu.dot_dimension_numbers<[1], [1], [0], [0], [0, 0, 1, 0], [], []>} : vector<32x256xf32>, vector<256x256xf32>, vector<32x256xf32> -> vector<32x256xf32>
    %c0_26 = arith.constant 0 : index
    %c32_27 = arith.constant 32 : index
    %c0_28 = arith.constant 0 : index
    %45 = vector.load %arg2[%c0_26, %c32_27, %c0_28] : memref<1x128x256xf32, #tpu.memory_space<vmem>>, vector<1x32x256xf32>
    %46 = vector.shape_cast %45 : vector<1x32x256xf32> to vector<32x256xf32>
    %47 = vector.shape_cast %44 : vector<32x256xf32> to vector<1x32x256xf32>
    tpu.vector_store %arg2[%c0_26, %c32_27, %c0_28], %47 {strides = array<i32>} : memref<1x128x256xf32, #tpu.memory_space<vmem>>, vector<1x32x256xf32>,
    %c0_29 = arith.constant 0 : index
    %c64 = arith.constant 64 : index
    %c0_30 = arith.constant 0 : index
    %48 = vector.load %arg1[%c0_29, %c64, %c0_30] : memref<1x384x256xf32, #tpu.memory_space<vmem>>, vector<1x32x256xf32>
    %49 = vector.shape_cast %48 : vector<1x32x256xf32> to vector<32x256xf32>
    %cst_31 = arith.constant 0.176776692 : f32
    %50 = vector.broadcast %cst_31 : f32 to vector<32x256xf32>
    %51 = arith.mulf %49, %50 : vector<32x256xf32>
    %c0_32 = arith.constant 0 : index
    %c192 = arith.constant 192 : index
    %c0_33 = arith.constant 0 : index
    %52 = vector.load %arg1[%c0_32, %c192, %c0_33] : memref<1x384x256xf32, #tpu.memory_space<vmem>>, vector<1x32x256xf32>
    %53 = vector.shape_cast %52 : vector<1x32x256xf32> to vector<32x256xf32>
    %c0_34 = arith.constant 0 : index
    %c320 = arith.constant 320 : index
    %c0_35 = arith.constant 0 : index
    %54 = vector.load %arg1[%c0_34, %c320, %c0_35] : memref<1x384x256xf32, #tpu.memory_space<vmem>>, vector<1x32x256xf32>
    %55 = vector.shape_cast %54 : vector<1x32x256xf32> to vector<32x256xf32>
    %cst_36 = arith.constant dense<0.000000e+00> : vector<256x256xf32>
    %56 = tpu.matmul %51, %53, %cst_36 {dimension_numbers = #tpu.dot_dimension_numbers<[0], [0], [1], [1], [0, 1, 1, 1], [], []>} : vector<32x256xf32>, vector<32x256xf32>, vector<256x256xf32> -> vector<256x256xf32>
    %cst_37 = arith.constant dense<0xFF800000> : vector<256xf32>
    %57 = vector.multi_reduction <maximumf>, %56, %cst_37 [1] : vector<256x256xf32> to vector<256xf32>
    %58 = vector.shape_cast %57 : vector<256xf32> to vector<256x1xf32>
    %59 = vector.broadcast %58 : vector<256x1xf32> to vector<256x256xf32>
    %60 = arith.subf %56, %59 : vector<256x256xf32>
    %61 = math.exp %60 : vector<256x256xf32>
    %cst_38 = arith.constant dense<0.000000e+00> : vector<256xf32>
    %62 = vector.multi_reduction <add>, %61, %cst_38 [1] : vector<256x256xf32> to vector<256xf32>
    %63 = vector.shape_cast %62 : vector<256xf32> to vector<256x1xf32>
    %cst_39 = arith.constant 1.000000e+00 : f32
    %64 = vector.broadcast %cst_39 : f32 to vector<256x1xf32>
    %65 = arith.divf %64, %63 : vector<256x1xf32>
    %66 = vector.broadcast %65 : vector<256x1xf32> to vector<256x256xf32>
    %67 = arith.mulf %61, %66 : vector<256x256xf32>
    %cst_40 = arith.constant dense<0.000000e+00> : vector<32x256xf32>
    %68 = tpu.matmul %55, %67, %cst_40 {dimension_numbers = #tpu.dot_dimension_numbers<[1], [1], [0], [0], [0, 0, 1, 0], [], []>} : vector<32x256xf32>, vector<256x256xf32>, vector<32x256xf32> -> vector<32x256xf32>
    %c0_41 = arith.constant 0 : index
    %c64_42 = arith.constant 64 : index
    %c0_43 = arith.constant 0 : index
    %69 = vector.load %arg2[%c0_41, %c64_42, %c0_43] : memref<1x128x256xf32, #tpu.memory_space<vmem>>, vector<1x32x256xf32>
    %70 = vector.shape_cast %69 : vector<1x32x256xf32> to vector<32x256xf32>
    %71 = vector.shape_cast %68 : vector<32x256xf32> to vector<1x32x256xf32>
    tpu.vector_store %arg2[%c0_41, %c64_42, %c0_43], %71 {strides = array<i32>} : memref<1x128x256xf32, #tpu.memory_space<vmem>>, vector<1x32x256xf32>,
    %c0_44 = arith.constant 0 : index
    %c96 = arith.constant 96 : index
    %c0_45 = arith.constant 0 : index
    %72 = vector.load %arg1[%c0_44, %c96, %c0_45] : memref<1x384x256xf32, #tpu.memory_space<vmem>>, vector<1x32x256xf32>
    %73 = vector.shape_cast %72 : vector<1x32x256xf32> to vector<32x256xf32>
    %cst_46 = arith.constant 0.176776692 : f32
    %74 = vector.broadcast %cst_46 : f32 to vector<32x256xf32>
    %75 = arith.mulf %73, %74 : vector<32x256xf32>
    %c0_47 = arith.constant 0 : index
    %c224 = arith.constant 224 : index
    %c0_48 = arith.constant 0 : index
    %76 = vector.load %arg1[%c0_47, %c224, %c0_48] : memref<1x384x256xf32, #tpu.memory_space<vmem>>, vector<1x32x256xf32>
    %77 = vector.shape_cast %76 : vector<1x32x256xf32> to vector<32x256xf32>
    %c0_49 = arith.constant 0 : index
    %c352 = arith.constant 352 : index
    %c0_50 = arith.constant 0 : index
    %78 = vector.load %arg1[%c0_49, %c352, %c0_50] : memref<1x384x256xf32, #tpu.memory_space<vmem>>, vector<1x32x256xf32>
    %79 = vector.shape_cast %78 : vector<1x32x256xf32> to vector<32x256xf32>
    %cst_51 = arith.constant dense<0.000000e+00> : vector<256x256xf32>
    %80 = tpu.matmul %75, %77, %cst_51 {dimension_numbers = #tpu.dot_dimension_numbers<[0], [0], [1], [1], [0, 1, 1, 1], [], []>} : vector<32x256xf32>, vector<32x256xf32>, vector<256x256xf32> -> vector<256x256xf32>
    %cst_52 = arith.constant dense<0xFF800000> : vector<256xf32>
    %81 = vector.multi_reduction <maximumf>, %80, %cst_52 [1] : vector<256x256xf32> to vector<256xf32>
    %82 = vector.shape_cast %81 : vector<256xf32> to vector<256x1xf32>
    %83 = vector.broadcast %82 : vector<256x1xf32> to vector<256x256xf32>
    %84 = arith.subf %80, %83 : vector<256x256xf32>
    %85 = math.exp %84 : vector<256x256xf32>
    %cst_53 = arith.constant dense<0.000000e+00> : vector<256xf32>
    %86 = vector.multi_reduction <add>, %85, %cst_53 [1] : vector<256x256xf32> to vector<256xf32>
    %87 = vector.shape_cast %86 : vector<256xf32> to vector<256x1xf32>
    %cst_54 = arith.constant 1.000000e+00 : f32
    %88 = vector.broadcast %cst_54 : f32 to vector<256x1xf32>
    %89 = arith.divf %88, %87 : vector<256x1xf32>
    %90 = vector.broadcast %89 : vector<256x1xf32> to vector<256x256xf32>
    %91 = arith.mulf %85, %90 : vector<256x256xf32>
    %cst_55 = arith.constant dense<0.000000e+00> : vector<32x256xf32>
    %92 = tpu.matmul %79, %91, %cst_55 {dimension_numbers = #tpu.dot_dimension_numbers<[1], [1], [0], [0], [0, 0, 1, 0], [], []>} : vector<32x256xf32>, vector<256x256xf32>, vector<32x256xf32> -> vector<32x256xf32>
    %c0_56 = arith.constant 0 : index
    %c96_57 = arith.constant 96 : index
    %c0_58 = arith.constant 0 : index
    %93 = vector.load %arg2[%c0_56, %c96_57, %c0_58] : memref<1x128x256xf32, #tpu.memory_space<vmem>>, vector<1x32x256xf32>
    %94 = vector.shape_cast %93 : vector<1x32x256xf32> to vector<32x256xf32>
    %95 = vector.shape_cast %92 : vector<32x256xf32> to vector<1x32x256xf32>
    tpu.vector_store %arg2[%c0_56, %c96_57, %c0_58], %95 {strides = array<i32>} : memref<1x128x256xf32, #tpu.memory_space<vmem>>, vector<1x32x256xf32>,
    return
  }
  func.func @transform_0(%arg0: i32) -> (i32, i32, i32) {
    %c0_i32 = arith.constant 0 : i32
    %c0_i32_0 = arith.constant 0 : i32
    %c0_i32_1 = arith.constant 0 : i32
    return %arg0, %c0_i32, %c0_i32_0 : i32, i32, i32
  }
  func.func @transform_1(%arg0: i32) -> (i32, i32, i32) {
    %c0_i32 = arith.constant 0 : i32
    %c0_i32_0 = arith.constant 0 : i32
    %c0_i32_1 = arith.constant 0 : i32
    return %arg0, %c0_i32, %c0_i32_0 : i32, i32, i32
  }
}

</mosaic_0001>

<bundles_post_ra>
// kernel: tpu_custom_call.1
= control target key start
LH: loop header
LB: loop body
LE: loop exit
PB: predicated region body
PF: predicated region fallthrough
CT: control target
= control target key end

     0   :  { %6 = vsyncpa [#allocation3], 0  ;;  %s12609_s0 = inlined_call_operand.hbm [shape: f32[2,384,256], index: 0, kind: input, shape index: {}]   ;;  %s12610_s1 = inlined_call_operand.hbm [shape: f32[2,128,256], index: 1, kind: output, shape index: {}]  }
   0x1   :  { %8 = vsyncpa [#allocation3 + $0x1], 0 }
   0x2   :  { %9 = vsyncpa [#allocation4], 0 }
   0x3   :  { %11 = vsyncpa [#allocation4 + $0x1], 0  ;;  %s7309_s6 = smov 0   ;;  %s7311_s7 = smov 0  }
   0x4   :  { %s7313_s8 = smov 0   ;;  %s7315_s9 = smov 0  }
   0x5 LB: > { %s7330_s10 = sadd.s32 4294967295, %s7293_s9   ;;  %s6107_s11 = sadd.s32 4294967294, %s7293_s9   ;;  %s7293_s9 = sphi %s7315_s9, %s13382_s9   ;;  %s7289_s8 = sphi %s7313_s8, %s13381_s8   ;;  %s7285_s7 = sphi %s7311_s7, %s13380_s7   ;;  %s7281_s6 = sphi %s7309_s6, %s13379_s6  }
   0x6   : > { %s7334_s12 = sadd.s32 1, %s7293_s9   ;;  %s24_s13 = sadd.s32 1, %s7289_s8 }
   0x7   : > { %s21_s14 = ssub.s32 %s7293_s9, %s7334_s12  ;;  %p31_p0 = scmp.ne.s32.totalorder %s7289_s8, %s7285_s7 }
   0x8   : > { %p22_p1 = scmp.eq.s32.totalorder %s21_s14, 0  ;;  %p32_p2 = scmp.eq.s32.totalorder %s7293_s9, 0 }
   0x9   : > { %p37_p3 = scmp.ne.s32.totalorder %s7285_s7, %s7281_s6  ;;  %p38_p4 = scmp.eq.s32.totalorder %s7330_s10, 0 }
   0xa   : > { %s7346_s15 = scalar_select %p22_p1, %s7289_s8, %s24_s13  }
   0xb   : > { %p33_p5 = por %p32_p2, %p31_p0  ;;  %p7348_p6 = por %p38_p4, %p37_p3 }
   0xc   : > { %p61_p7 = scmp.eq.s32.totalorder %s7330_s10, 1  ;;  %p67_p8 = scmp.eq.s32.totalorder %s6107_s11, 1 }
   0xd   : > { %p6109_p9 = scmp.ge.s32.totalorder %s7293_s9, 2  ;;  %p6390_p10 = scmp.lt.s32.totalorder %s7293_s9, 2 }
   0xe   : > { %p7355_p11 = por %p61_p7, %p31_p0  ;;  %p7359_p12 = por %p67_p8, %p37_p3 }
   0xf   : > { %s87_s19 = sand.u32 1, %s7289_s8   ;;  %s6376_s20 = smul.u32 768, %s7293_s9 }
  0x10   : > { %s6375_s21 = smul.u32 768, %s87_s19  ;;  %p7368_p13 = pnand %p6390_p10, %p33_p5 }
  0x11   : > { %s96_s24 = scalar_lea.hbm %s12609_s0, %s6376_s20  ;;  %s88_s29 = scalar_lea.sflag [#allocation3], %s87_s19 }
  0x12   : > { %s97_s26 = sshll.u32 %s96_s24, 4  ;;  %s91_s27 = scalar_lea.vmem [#allocation2], %s6375_s21  ;;  %s98_s26 = int_to_ptr.hbm [resolvable:$true] %s97_s26 }
  0x13   : > { %s99_s28 = sshll.u32 %s91_s27, 4  ;;  %s7197_s30 = sshra.s32 %s98_s26, 4  ;;  %s100_s28 = int_to_ptr.vmem [resolvable:$true] %s99_s28  ;;  %s7198_s30 = int_to_ptr.hbm [resolvable:$true] %s7197_s30 }
  0x14   : > { %s7199_s2 = scalar_lea.hbm %s7198_s30, 768  ;;  %p7201_p1 = pneg %p7368_p13 }
  0x15   : > { %p7200_p0 = scmp.ne.s32.totalorder %s7198_s30, %s7199_s2  ;;  %s7204_s5 = scalar_lea.hbm %s12609_s0, 1536 }
  0x16   : > { %p7205_p4 = scmp.lt.s32.totalorder %s7198_s30, %s12609_s0  ;;  %p7206_p5 = scmp.lt.s32.totalorder %s7204_s5, %s7199_s2 }
  0x17   : > { %p7202_p2 = pnand %p7201_p1, %p7200_p0 }
  0x18   : > { %p7207_p7 = por %p7206_p5, %p7205_p4 }
  0x19   : > { %p7203_p3 = pneg %p7202_p2 }
  0x1b   : > { %p7208_p8 = pnand %p7207_p7, %p7203_p3 }
  0x1d   : > { %7211 = shalt.err (!%p7208_p8)
}
  0x1e   : > { %s7295_s14 = smov 256   ;;  %s7296_s19 = smov 16  }
  0x1f   : > { %6385 = dma.hbm_to_vmem [thread:$0]  (!%p7368_p13), %s98_s26, 12288, %s100_s28, %s88_s29, %s7295_s14, %s7295_s14, %s7296_s19  }
  0x20   : > { %p6111_p10 = scmp.ge.s32.totalorder %s7293_s9, 1  ;;  %p107_p0 = scmp.lt.s32.totalorder %s7293_s9, 3 }
  0x22   : > { %p108_p1 = pnand %p6111_p10, %p107_p0 }
  0x24   : > { %111 = sbr.rel (%p108_p1) target bundleno = 3850 (0xf0a), region = 24 }
  0x29   : > { %s7385_s20 = sand.u32 1, %s7285_s7  }
  0x2a   : > { %s6377_s21 = smul.u32 768, %s7385_s20  ;;  %s114_s22 = scalar_lea.sflag [#allocation3], %s7385_s20 }
  0x2c   : > { %s7389_s23 = scalar_lea.vmem [#allocation2], %s6377_s21 }
  0x2d   : > { %7272 = dma.done.wait (%p7348_p6), %s114_s22, 12288  }
  0x2e   : > { %7274 = vsyncadd (%p7348_p6), %s114_s22, 4294955008  ;;  %v137_v0 = vld [vmem:[%s7389_s23] sm:$0xff]  ;;  %v138_v2 = vld [vmem:[%s7389_s23 + $0x8] sm:$0xff]  ;;  %vm233_vm0 = vcmask 261120   ;;  %s6112_s16 = sshll.u32 %s7385_s20, 8  ;;  %s6374_s25 = sshll.u32 %s7330_s10, 8 }
  0x2f   : > { %v145_v1 = vmul.f32 0.17677669, %v137_v0  ;;  %v146_v3 = vmul.f32 0.17677669, %v138_v2  ;;  %v139_v4 = vld [vmem:[%s7389_s23 + $0x10] sm:$0xff]  ;;  %v160_v6 = vld [vmem:[%s7389_s23 + $0x138] sm:$0xff]  ;;  %s6030_s28 = scalar_lea.hbm %s12610_s1, %s6374_s25 }
  0x30   : > { %v159_v5 = vld [vmem:[%s7389_s23 + $0x130] sm:$0xff]  ;;  %v157_v7 = vld [vmem:[%s7389_s23 + $0x120] sm:$0xff]  ;;  %v158_v8 = vld [vmem:[%s7389_s23 + $0x128] sm:$0xff]  ;;  %455 = vmatpush.msra.mxu1 %v160_v6  ;;  %v147_v11 = vmul.f32 0.17677669, %v139_v4  ;;  %s8730_s24 = scalar_lea.vmem [#allocation5], %s6112_s16 }
  0x31   : > { %169 = vxpose.xlu0.b32.start [1/4] (short) %v145_v1, 128  ;;  %201 = vxpose.xlu1.b32.start [1/4] (short) %v146_v3, 128  ;;  %v140_v9 = vld [vmem:[%s7389_s23 + $0x18] sm:$0xff]  ;;  %v155_v10 = vld [vmem:[%s7389_s23 + $0x110] sm:$0xff]  ;;  %v153_v13 = vld [vmem:[%s7389_s23 + $0x100] sm:$0xff]  ;;  %s6031_s29 = sshll.u32 %s8730_s24, 4  ;;  %s6033_s30 = sshll.u32 %s6030_s28, 4  ;;  %s6032_s29 = int_to_ptr.vmem [resolvable:$true] %s6031_s29  ;;  %s6034_s30 = int_to_ptr.hbm [resolvable:$true] %s6033_s30 }
  0x32   : > { %342 = vmatpush.msra.mxu0 %v159_v5  ;;  %v156_v12 = vld [vmem:[%s7389_s23 + $0x118] sm:$0xff]  ;;  %456 = vmatpush.msra.mxu1 %v158_v8  ;;  %v148_v14 = vmul.f32 0.17677669, %v140_v9  ;;  %v154_v15 = vld [vmem:[%s7389_s23 + $0x108] sm:$0xff]  ;;  %v141_v16 = vld [vmem:[%s7389_s23 + $0x20] sm:$0xff]  ;;  %s6019_s2 = scalar_lea.sflag [#allocation4], %s7385_s20 }
  0x33   : > { %v142_v17 = vld [vmem:[%s7389_s23 + $0x28] sm:$0xff]  ;;  %v149_v18 = vmul.f32 0.17677669, %v141_v16  ;;  %v143_v20 = vld [vmem:[%s7389_s23 + $0x30] sm:$0xff]  ;;  %v144_v21 = vld [vmem:[%s7389_s23 + $0x38] sm:$0xff]  ;;  %s7241_s3 = sshra.s32 %s6034_s30, 4  ;;  %s7242_s3 = int_to_ptr.hbm [resolvable:$true] %s7241_s3 }
  0x34   : > { %343 = vmatpush.msra.mxu0 %v157_v7  ;;  %457 = vmatpush.msra.mxu1 %v156_v12  ;;  %v150_v19 = vmul.f32 0.17677669, %v142_v17  ;;  %v151_v22 = vmul.f32 0.17677669, %v143_v20  ;;  %v152_v23 = vmul.f32 0.17677669, %v144_v21  ;;  %p7248_p3 = scmp.lt.s32.totalorder %s7242_s3, %s12610_s1 }
  0x35   : > { %s7243_s10 = scalar_lea.hbm %s7242_s3, 256  ;;  %s7247_s11 = scalar_lea.hbm %s12610_s1, 512 }
  0x36   : > { %344 = vmatpush.msra.mxu0 %v155_v10  ;;  %458 = vmatpush.msra.mxu1 %v154_v15  ;;  %p7244_p6 = scmp.ne.s32.totalorder %s7242_s3, %s7243_s10  ;;  %p7249_p4 = scmp.lt.s32.totalorder %s7247_s11, %s7243_s10 }
  0x38   : > { %345 = vmatpush.msra.mxu0 %v153_v13  ;;  %p7245_p13 = pnand %p7244_p6, %p7355_p11  ;;  %p7250_p5 = por %p7249_p4, %p7248_p3 }
  0x39   : > { %170 = vxpose.xlu0.b32.cont [2/4] (short) %v147_v11, 128  ;;  %202 = vxpose.xlu1.b32.cont [2/4] (short) %v148_v14, 128 }
  0x3a   : > { %p7246_p2 = pneg %p7245_p13 }
  0x3c   : > { %p7251_p7 = pnand %p7250_p5, %p7246_p2 }
  0x41   : > { %171 = vxpose.xlu0.b32.cont [3/4] (short) %v149_v18, 128  ;;  %203 = vxpose.xlu1.b32.cont [3/4] (short) %v150_v19, 128 }
  0x49   : > { %172 = vxpose.xlu0.b32.end [4/4] (short) %v151_v22, 128  ;;  %204 = vxpose.xlu1.b32.end [4/4] (short) %v152_v23, 128 }
  0xd5   : > { %v185_v24 = vpop.trf.xlu0  ;;  %v217_v37 = vpop.trf.xlu1 }
  0xd6   : > { %6113 = vmatmul.msk.f32.vlgmr.msra.gmra.mxu0 %vm233_vm0, %v185_v24  ;;  %6145 = vmatmul.msk.f32.vlgmr.msra.gmra.mxu1 %vm233_vm0, %v185_v24 }
  0xdd   : > { %v186_v25 = vpop.trf.xlu0  ;;  %v218_v40 = vpop.trf.xlu1 }
  0xde   : > { %6114 = vmatmul.msk.f32.gmra.mxu0 %vm233_vm0, %v186_v25  ;;  %6146 = vmatmul.msk.f32.gmra.mxu1 %vm233_vm0, %v186_v25 }
  0xe5   : > { %v187_v26 = vpop.trf.xlu0  ;;  %v219_v42 = vpop.trf.xlu1 }
  0xe6   : > { %6115 = vmatmul.msk.f32.gmra.mxu0 %vm233_vm0, %v187_v26  ;;  %6147 = vmatmul.msk.f32.gmra.mxu1 %vm233_vm0, %v187_v26 }
  0xed   : > { %v188_v27 = vpop.trf.xlu0  ;;  %v220_v45 = vpop.trf.xlu1 }
  0xee   : > { %6116 = vmatmul.msk.f32.gmra.mxu0 %vm233_vm0, %v188_v27  ;;  %6148 = vmatmul.msk.f32.gmra.mxu1 %vm233_vm0, %v188_v27 }
  0xf5   : > { %v189_v28 = vpop.trf.xlu0  ;;  %v221_v50 = vpop.trf.xlu1 }
  0xf6   : > { %6117 = vmatmul.msk.f32.gmra.mxu0 %vm233_vm0, %v189_v28  ;;  %6149 = vmatmul.msk.f32.gmra.mxu1 %vm233_vm0, %v189_v28 }
  0xfd   : > { %v190_v29 = vpop.trf.xlu0  ;;  %v222_v53 = vpop.trf.xlu1 }
  0xfe   : > { %6118 = vmatmul.msk.f32.gmra.mxu0 %vm233_vm0, %v190_v29  ;;  %6150 = vmatmul.msk.f32.gmra.mxu1 %vm233_vm0, %v190_v29 }
 0x105   : > { %v191_v30 = vpop.trf.xlu0  ;;  %v223_v56 = vpop.trf.xlu1 }
 0x106   : > { %6119 = vmatmul.msk.f32.gmra.mxu0 %vm233_vm0, %v191_v30  ;;  %6151 = vmatmul.msk.f32.gmra.mxu1 %vm233_vm0, %v191_v30 }
 0x10d   : > { %v192_v31 = vpop.trf.xlu0  ;;  %v224_v59 = vpop.trf.xlu1 }
 0x10e   : > { %6120 = vmatmul.msk.f32.gmra.mxu0 %vm233_vm0, %v192_v31  ;;  %6152 = vmatmul.msk.f32.gmra.mxu1 %vm233_vm0, %v192_v31 }
 0x115   : > { %v193_v32 = vpop.trf.xlu0  ;;  %v225_v0 = vpop.trf.xlu1 }
 0x116   : > { %6121 = vmatmul.msk.f32.gmra.mxu0 %vm233_vm0, %v193_v32  ;;  %6153 = vmatmul.msk.f32.gmra.mxu1 %vm233_vm0, %v193_v32 }
 0x11d   : > { %v194_v33 = vpop.trf.xlu0  ;;  %v226_v3 = vpop.trf.xlu1 }
 0x11e   : > { %6122 = vmatmul.msk.f32.gmra.mxu0 %vm233_vm0, %v194_v33  ;;  %6154 = vmatmul.msk.f32.gmra.mxu1 %vm233_vm0, %v194_v33 }
 0x125   : > { %v195_v34 = vpop.trf.xlu0  ;;  %v227_v7 = vpop.trf.xlu1 }
 0x126   : > { %6123 = vmatmul.msk.f32.gmra.mxu0 %vm233_vm0, %v195_v34  ;;  %6155 = vmatmul.msk.f32.gmra.mxu1 %vm233_vm0, %v195_v34 }
 0x12d   : > { %v196_v35 = vpop.trf.xlu0  ;;  %v228_v12 = vpop.trf.xlu1 }
 0x12e   : > { %6124 = vmatmul.msk.f32.gmra.mxu0 %vm233_vm0, %v196_v35  ;;  %6156 = vmatmul.msk.f32.gmra.mxu1 %vm233_vm0, %v196_v35 }
 0x135   : > { %v197_v36 = vpop.trf.xlu0  ;;  %v229_v20 = vpop.trf.xlu1 }
 0x136   : > { %6125 = vmatmul.msk.f32.gmra.mxu0 %vm233_vm0, %v197_v36  ;;  %6157 = vmatmul.msk.f32.gmra.mxu1 %vm233_vm0, %v197_v36 }
 0x13d   : > { %v198_v38 = vpop.trf.xlu0  ;;  %v230_v30 = vpop.trf.xlu1 }
 0x13e   : > { %6126 = vmatmul.msk.f32.gmra.mxu0 %vm233_vm0, %v198_v38  ;;  %6158 = vmatmul.msk.f32.gmra.mxu1 %vm233_vm0, %v198_v38 }
 0x145   : > { %v199_v39 = vpop.trf.xlu0 }
 0x146   : > { %6127 = vmatmul.msk.f32.gmra.mxu0 %vm233_vm0, %v199_v39  ;;  %6159 = vmatmul.msk.f32.gmra.mxu1 %vm233_vm0, %v199_v39 }
 0x14d   : > { %v200_v41 = vpop.trf.xlu0 }
 0x14e   : > { %6128 = vmatmul.msk.f32.gmra.mxu0 %vm233_vm0, %v200_v41  ;;  %6160 = vmatmul.msk.f32.gmra.mxu1 %vm233_vm0, %v200_v41 }
 0x153   : > { %v7443_v43 = vpop.f32.mrf.mxu0  ;;  %v7445_v44 = vpop.f32.mrf.mxu1 }
 0x154   : > { %12799 = vst [vmem:[#allocation8_spill] sm:$0xff] %v7445_v44 }
 0x156   : > { %6129 = vmatmul.msk.f32.gmra.mxu0 %vm233_vm0, %v217_v37  ;;  %6161 = vmatmul.msk.f32.gmra.mxu1 %vm233_vm0, %v217_v37  ;;  %v231_v37 = vpop.trf.xlu1 }
 0x15b   : > { %v7449_v46 = vpop.f32.mrf.mxu0  ;;  %v7451_v47 = vpop.f32.mrf.mxu1 }
 0x15c   : > { %v559_v36 = vmax.f32 %v7449_v46, %v7451_v47 }
 0x15e   : > { %6130 = vmatmul.msk.f32.gmra.mxu0 %vm233_vm0, %v218_v40  ;;  %6162 = vmatmul.msk.f32.gmra.mxu1 %vm233_vm0, %v218_v40  ;;  %v556_v40 = vmax.f32 %v7443_v43, %v7445_v44 }
 0x163   : > { %v7455_v48 = vpop.f32.mrf.mxu0  ;;  %v7457_v49 = vpop.f32.mrf.mxu1 }
 0x164   : > { %v562_v33 = vmax.f32 %v7455_v48, %v7457_v49 }
 0x166   : > { %6131 = vmatmul.msk.f32.gmra.mxu0 %vm233_vm0, %v219_v42  ;;  %6163 = vmatmul.msk.f32.gmra.mxu1 %vm233_vm0, %v219_v42 }
 0x16b   : > { %v7461_v51 = vpop.f32.mrf.mxu0  ;;  %v7463_v52 = vpop.f32.mrf.mxu1 }
 0x16c   : > { %v565_v29 = vmax.f32 %v7461_v51, %v7463_v52 }
 0x16e   : > { %6132 = vmatmul.msk.f32.gmra.mxu0 %vm233_vm0, %v220_v45  ;;  %6164 = vmatmul.msk.f32.gmra.mxu1 %vm233_vm0, %v220_v45 }
 0x173   : > { %v7467_v54 = vpop.f32.mrf.mxu0  ;;  %v7469_v55 = vpop.f32.mrf.mxu1 }
 0x174   : > { %v568_v26 = vmax.f32 %v7467_v54, %v7469_v55 }
 0x176   : > { %6133 = vmatmul.msk.f32.gmra.mxu0 %vm233_vm0, %v221_v50  ;;  %6165 = vmatmul.msk.f32.gmra.mxu1 %vm233_vm0, %v221_v50  ;;  %v232_v50 = vpop.trf.xlu1 }
 0x17b   : > { %v7473_v57 = vpop.f32.mrf.mxu0  ;;  %v7475_v58 = vpop.f32.mrf.mxu1 }
 0x17c   : > { %v571_v23 = vmax.f32 %v7473_v57, %v7475_v58 }
 0x17e   : > { %6134 = vmatmul.msk.f32.gmra.mxu0 %vm233_vm0, %v222_v53  ;;  %6166 = vmatmul.msk.f32.gmra.mxu1 %vm233_vm0, %v222_v53 }
 0x183   : > { %v7479_v60 = vpop.f32.mrf.mxu0  ;;  %v7481_v61 = vpop.f32.mrf.mxu1 }
 0x184   : > { %v574_v19 = vmax.f32 %v7479_v60, %v7481_v61 }
 0x186   : > { %6135 = vmatmul.msk.f32.gmra.mxu0 %vm233_vm0, %v223_v56  ;;  %6167 = vmatmul.msk.f32.gmra.mxu1 %vm233_vm0, %v223_v56 }
 0x18b   : > { %v7485_v62 = vpop.f32.mrf.mxu0  ;;  %v7487_v63 = vpop.f32.mrf.mxu1 }
 0x18c   : > { %v577_v15 = vmax.f32 %v7485_v62, %v7487_v63 }
 0x18e   : > { %6136 = vmatmul.msk.f32.gmra.mxu0 %vm233_vm0, %v224_v59  ;;  %6168 = vmatmul.msk.f32.gmra.mxu1 %vm233_vm0, %v224_v59 }
 0x193   : > { %v7491_v1 = vpop.f32.mrf.mxu0  ;;  %v7493_v2 = vpop.f32.mrf.mxu1 }
 0x194   : > { %v580_v10 = vmax.f32 %v7491_v1, %v7493_v2 }
 0x196   : > { %6137 = vmatmul.msk.f32.gmra.mxu0 %vm233_vm0, %v225_v0  ;;  %6169 = vmatmul.msk.f32.gmra.mxu1 %vm233_vm0, %v225_v0 }
 0x19b   : > { %v7497_v4 = vpop.f32.mrf.mxu0  ;;  %v7499_v5 = vpop.f32.mrf.mxu1 }
 0x19c   : > { %v583_v6 = vmax.f32 %v7497_v4, %v7499_v5 }
 0x19e   : > { %584 = vmax.xlane.f32.xlu2 %v583_v6  ;;  %6138 = vmatmul.msk.f32.gmra.mxu0 %vm233_vm0, %v226_v3 }
 0x19f   : > { %6170 = vmatmul.msk.f32.gmra.mxu1 %vm233_vm0, %v226_v3 }
 0x1a3   : > { %v7505_v8 = vpop.f32.mrf.mxu0  ;;  %v7507_v9 = vpop.f32.mrf.mxu1 }
 0x1a4   : > { %v586_v11 = vmax.f32 %v7505_v8, %v7507_v9 }
 0x1a6   : > { %581 = vmax.xlane.f32.xlu2 %v580_v10  ;;  %587 = vmax.xlane.f32.xlu1 %v586_v11 }
 0x1a7   : > { %6139 = vmatmul.msk.f32.gmra.mxu0 %vm233_vm0, %v227_v7  ;;  %6171 = vmatmul.msk.f32.gmra.mxu1 %vm233_vm0, %v227_v7 }
 0x1ab   : > { %v7515_v13 = vpop.f32.mrf.mxu0  ;;  %v7517_v14 = vpop.f32.mrf.mxu1 }
 0x1ac   : > { %v589_v16 = vmax.f32 %v7515_v13, %v7517_v14 }
 0x1ae   : > { %578 = vmax.xlane.f32.xlu2 %v577_v15  ;;  %590 = vmax.xlane.f32.xlu0 %v589_v16 }
 0x1af   : > { %6140 = vmatmul.msk.f32.gmra.mxu0 %vm233_vm0, %v228_v12  ;;  %6172 = vmatmul.msk.f32.gmra.mxu1 %vm233_vm0, %v228_v12 }
 0x1b3   : > { %v7525_v17 = vpop.f32.mrf.mxu0  ;;  %v7527_v18 = vpop.f32.mrf.mxu1 }
 0x1b4   : > { %v592_v45 = vmax.f32 %v7525_v17, %v7527_v18 }
 0x1b6   : > { %575 = vmax.xlane.f32.xlu2 %v574_v19 }
 0x1b7   : > { %6141 = vmatmul.msk.f32.gmra.mxu0 %vm233_vm0, %v229_v20  ;;  %6173 = vmatmul.msk.f32.gmra.mxu1 %vm233_vm0, %v229_v20 }
 0x1bb   : > { %v7533_v21 = vpop.f32.mrf.mxu0  ;;  %v7535_v22 = vpop.f32.mrf.mxu1 }
 0x1bc   : > { %v595_v59 = vmax.f32 %v7533_v21, %v7535_v22 }
 0x1be   : > { %572 = vmax.xlane.f32.xlu2 %v571_v23 }
 0x1bf   : > { %6142 = vmatmul.msk.f32.gmra.mxu0 %vm233_vm0, %v230_v30  ;;  %6174 = vmatmul.msk.f32.gmra.mxu1 %vm233_vm0, %v230_v30 }
 0x1c3   : > { %v7539_v24 = vpop.f32.mrf.mxu0  ;;  %v7541_v25 = vpop.f32.mrf.mxu1 }
 0x1c4   : > { %v598_v6 = vmax.f32 %v7539_v24, %v7541_v25 }
 0x1c6   : > { %569 = vmax.xlane.f32.xlu2 %v568_v26 }
 0x1c7   : > { %6143 = vmatmul.msk.f32.gmra.mxu0 %vm233_vm0, %v231_v37  ;;  %6175 = vmatmul.msk.f32.gmra.mxu1 %vm233_vm0, %v231_v37 }
 0x1cb   : > { %v7545_v27 = vpop.f32.mrf.mxu0  ;;  %v7547_v28 = vpop.f32.mrf.mxu1 }
 0x1cc   : > { %v601_v11 = vmax.f32 %v7545_v27, %v7547_v28 }
 0x1ce   : > { %566 = vmax.xlane.f32.xlu2 %v565_v29 }
 0x1cf   : > { %6144 = vmatmul.msk.f32.gmra.mxu0 %vm233_vm0, %v232_v50  ;;  %6176 = vmatmul.msk.f32.gmra.mxu1 %vm233_vm0, %v232_v50 }
 0x1d3   : > { %v7553_v31 = vpop.f32.mrf.mxu0  ;;  %v7555_v32 = vpop.f32.mrf.mxu1 }
 0x1d4   : > { %12800 = vst [vmem:[#allocation9_spill] sm:$0xff] %v7553_v31 }
 0x1d5   : > { %12801 = vst [vmem:[#allocation10_spill] sm:$0xff] %v7555_v32 }
 0x1d6   : > { %563 = vmax.xlane.f32.xlu2 %v562_v33 }
 0x1db   : > { %v7559_v34 = vpop.f32.mrf.mxu0  ;;  %v7561_v35 = vpop.f32.mrf.mxu1 }
 0x1dc   : > { %12802 = vst [vmem:[#allocation11_spill] sm:$0xff] %v7561_v35 }
 0x1de   : > { %560 = vmax.xlane.f32.xlu2 %v559_v36 }
 0x1e3   : > { %v7567_v38 = vpop.f32.mrf.mxu0  ;;  %v7569_v39 = vpop.f32.mrf.mxu1 }
 0x1e6   : > { %557 = vmax.xlane.f32.xlu2 %v556_v40 }
 0x1eb   : > { %v7573_v41 = vpop.f32.mrf.mxu0  ;;  %v7575_v42 = vpop.f32.mrf.mxu1 }
 0x1ee   : > { %593 = vmax.xlane.f32.xlu2 %v592_v45 }
 0x1f3   : > { %v7581_v53 = vpop.f32.mrf.mxu0  ;;  %v7583_v56 = vpop.f32.mrf.mxu1 }
 0x1f6   : > { %596 = vmax.xlane.f32.xlu2 %v595_v59 }
 0x1fb   : > { %v7587_v0 = vpop.f32.mrf.mxu0  ;;  %v7589_v3 = vpop.f32.mrf.mxu1 }
 0x1fe   : > { %599 = vmax.xlane.f32.xlu2 %v598_v6 }
 0x203   : > { %v7593_v7 = vpop.f32.mrf.mxu0  ;;  %v7595_v10 = vpop.f32.mrf.mxu1 }
 0x204   : > { %12803 = vst [vmem:[#allocation12_spill] sm:$0xff] %v7593_v7  ;;  %v622_v12 = vmax.f32 %v7593_v7, %v7595_v10 }
 0x205   : > { %12804 = vst [vmem:[#allocation13_spill] sm:$0xff] %v7595_v10 }
 0x206   : > { %602 = vmax.xlane.f32.xlu2 %v601_v11 }
 0x20b   : > { %v7601_v15 = vpop.f32.mrf.mxu0  ;;  %v7603_v16 = vpop.f32.mrf.mxu1 }
 0x20c   : > { %v625_v20 = vmax.f32 %v7601_v15, %v7603_v16 }
 0x20e   : > { %623 = vmax.xlane.f32.xlu2 %v622_v12 }
 0x211   : > { %v585_v19 = vpop.xlane.xlu2 %584 }
 0x213   : > { %v7607_v23 = vpop.f32.mrf.mxu0  ;;  %v7609_v26 = vpop.f32.mrf.mxu1 }
 0x214   : > { %v628_v36 = vmax.f32 %v7607_v23, %v7609_v26 }
 0x216   : > { %626 = vmax.xlane.f32.xlu2 %v625_v20 }
 0x219   : > { %v582_v29 = vpop.xlane.xlu2 %581  ;;  %v588_v12 = vpop.xlane.xlu1 %587 }
 0x21a   : > { %v668_v30 = vsub.f32 %v7491_v1, %v582_v29  ;;  %v669_v33 = vsub.f32 %v7493_v2, %v582_v29 }
 0x21b   : > { %v7615_v37 = vpop.f32.mrf.mxu0 }
 0x21c   : > { %v748_v40 = vmul.f32 1.442695, %v668_v30  ;;  %v750_v45 = vmul.f32 1.442695, %v669_v33  ;;  %v7617_v50 = vpop.f32.mrf.mxu1 }
 0x21d   : > { %v631_v2 = vmax.f32 %v7615_v37, %v7617_v50 }
 0x21e   : > { %6429 = vpow2.f32 %v748_v40  ;;  %629 = vmax.xlane.f32.xlu2 %v628_v36 }
 0x21f   : > { %6431 = vpow2.f32 %v750_v45  ;;  %v672_v45 = vsub.f32 %v7505_v8, %v588_v12 }
 0x221   : > { %v7619_v59 = vpop.xlane.xlu2 %578  ;;  %v591_v6 = vpop.xlane.xlu0 %590 }
 0x222   : > { %v674_v11 = vsub.f32 %v7515_v13, %v591_v6  ;;  %v675_v1 = vsub.f32 %v7517_v14, %v591_v6  ;;  %v673_v14 = vsub.f32 %v7507_v9, %v588_v12  ;;  %v671_v12 = vsub.f32 %v7499_v5, %v585_v19 }
 0x224   : > { %v7625_v20 = vpop.eup %6429  ;;  %v760_v29 = vmul.f32 1.442695, %v674_v11  ;;  %v7627_v30 = vpop.f32.mrf.mxu0  ;;  %v762_v40 = vmul.f32 1.442695, %v675_v1  ;;  %v756_v11 = vmul.f32 1.442695, %v672_v45 }
 0x225   : > { %12805 = vst [vmem:[#allocation14_spill] sm:$0xff] %v7625_v20  ;;  %v7629_v33 = vpop.f32.mrf.mxu1  ;;  %v7631_v36 = vpop.eup %6431  ;;  %v758_v7 = vmul.f32 1.442695, %v673_v14  ;;  %v754_v14 = vmul.f32 1.442695, %v671_v12 }
 0x226   : > { %12806 = vst [vmem:[#allocation15_spill] sm:$0xff] %v7631_v36  ;;  %632 = vmax.xlane.f32.xlu2 %v631_v2  ;;  %v868_v13 = vadd.f32 %v7631_v36, %v7625_v20  ;;  %6433 = vpow2.f32 %v760_v29  ;;  %v634_v10 = vmax.f32 %v7627_v30, %v7629_v33  ;;  %v670_v2 = vsub.f32 %v7497_v4, %v585_v19 }
 0x227   : > { %6435 = vpow2.f32 %v762_v40 }
 0x228   : > { %869 = vadd.xlane.f32.xlu0 %v868_v13  ;;  %6437 = vpow2.f32 %v756_v11  ;;  %v752_v45 = vmul.f32 1.442695, %v670_v2 }
 0x229   : > { %v7637_v6 = vpop.xlane.xlu2 %575  ;;  %6439 = vpow2.f32 %v758_v7 }
 0x22a   : > { %6441 = vpow2.f32 %v752_v45 }
 0x22b   : > { %6443 = vpow2.f32 %v754_v14 }
 0x22c   : > { %v7641_v44 = vpop.f32.mrf.mxu0  ;;  %v7645_v8 = vpop.eup %6433 }
 0x22d   : > { %v7643_v1 = vpop.f32.mrf.mxu1  ;;  %12807 = vst [vmem:[#allocation16_spill] sm:$0xff] %v7645_v8  ;;  %v7648_v9 = vpop.eup %6435 }
 0x22e   : > { %635 = vmax.xlane.f32.xlu2 %v634_v10  ;;  %12808 = vst [vmem:[#allocation17_spill] sm:$0xff] %v7648_v9  ;;  %v877_v29 = vadd.f32 %v7648_v9, %v7645_v8  ;;  %v637_v13 = vmax.f32 %v7641_v44, %v7643_v1  ;;  %v7657_v36 = vpop.eup %6437 }
 0x22f   : > { %12809 = vst [vmem:[#allocation18_spill] sm:$0xff] %v7657_v36  ;;  %v7659_v4 = vpop.eup %6439 }
 0x230   : > { %878 = vadd.xlane.f32.xlu1 %v877_v29  ;;  %12810 = vst [vmem:[#allocation19_spill] sm:$0xff] %v7659_v4  ;;  %v874_v10 = vadd.f32 %v7659_v4, %v7657_v36  ;;  %v7669_v2 = vpop.eup %6441  ;;  %v607_v4 = vmax.f32 %v7559_v34, %v7561_v35 }
 0x231   : > { %v7653_v40 = vpop.xlane.xlu2 %572  ;;  %12811 = vst [vmem:[#allocation20_spill] sm:$0xff] %v7669_v2  ;;  %v7671_v12 = vpop.eup %6443 }
 0x232   : > { %12812 = vst [vmem:[#allocation21_spill] sm:$0xff] %v7671_v12  ;;  %v871_v29 = vadd.f32 %v7671_v12, %v7669_v2 }
 0x234   : > { %v7661_v5 = vpop.f32.mrf.mxu0 }
 0x235   : > { %v7663_v7 = vpop.f32.mrf.mxu1 }
 0x236   : > { %638 = vmax.xlane.f32.xlu2 %v637_v13  ;;  %v640_v11 = vmax.f32 %v7661_v5, %v7663_v7  ;;  %v610_v13 = vmax.f32 %v7567_v38, %v7569_v39 }
 0x238   : > { %875 = vadd.xlane.f32.xlu1 %v874_v10 }
 0x239   : > { %v570_v19 = vpop.xlane.xlu2 %569 }
 0x23a   : > { %v660_v10 = vsub.f32 %v7467_v54, %v570_v19  ;;  %v661_v20 = vsub.f32 %v7469_v55, %v570_v19 }
 0x23c   : > { %v732_v36 = vmul.f32 1.442695, %v660_v10  ;;  %v734_v12 = vmul.f32 1.442695, %v661_v20 }
 0x23e   : > { %641 = vmax.xlane.f32.xlu2 %v640_v11  ;;  %6445 = vpow2.f32 %v732_v36 }
 0x23f   : > { %6447 = vpow2.f32 %v734_v12 }
 0x240   : > { %872 = vadd.xlane.f32.xlu1 %v871_v29  ;;  %v604_v29 = vmax.f32 %v7553_v31, %v7555_v32  ;;  %v619_v31 = vmax.f32 %v7587_v0, %v7589_v3 }
 0x241   : > { %v7675_v45 = vpop.xlane.xlu2 %566 }
 0x248   : > { %611 = vmax.xlane.f32.xlu1 %v610_v13  ;;  %v7691_v13 = vpop.eup %6445 }
 0x249   : > { %v7679_v14 = vpop.xlane.xlu2 %563  ;;  %12813 = vst [vmem:[#allocation22_spill] sm:$0xff] %v7691_v13  ;;  %v7693_v54 = vpop.eup %6447 }
 0x24a   : > { %12814 = vst [vmem:[#allocation23_spill] sm:$0xff] %v7693_v54  ;;  %v856_v55 = vadd.f32 %v7693_v54, %v7691_v13 }
 0x250   : > { %608 = vmax.xlane.f32.xlu1 %v607_v4 }
 0x251   : > { %v7685_v11 = vpop.xlane.xlu2 %560 }
 0x258   : > { %605 = vmax.xlane.f32.xlu1 %v604_v29 }
 0x259   : > { %v7689_v2 = vpop.xlane.xlu2 %557 }
 0x260   : > { %857 = vadd.xlane.f32.xlu1 %v856_v55 }
 0x261   : > { %v594_v19 = vpop.xlane.xlu2 %593 }
 0x262   : > { %v676_v4 = vsub.f32 %v7525_v17, %v594_v19  ;;  %v677_v20 = vsub.f32 %v7527_v18, %v594_v19  ;;  %v7707_v17 = vpop.f32.mrf.mxu0 }
 0x264   : > { %v764_v36 = vmul.f32 1.442695, %v676_v4  ;;  %v766_v12 = vmul.f32 1.442695, %v677_v20  ;;  %v7709_v4 = vpop.f32.mrf.mxu1 }
 0x265   : > { %v643_v20 = vmax.f32 %v7707_v17, %v7709_v4 }
 0x266   : > { %6449 = vpow2.f32 %v764_v36 }
 0x267   : > { %6451 = vpow2.f32 %v766_v12 }
 0x269   : > { %v597_v10 = vpop.xlane.xlu2 %596 }
 0x26a   : > { %v678_v29 = vsub.f32 %v7533_v21, %v597_v10  ;;  %v679_v32 = vsub.f32 %v7535_v22, %v597_v10 }
 0x26c   : > { %v7699_v9 = vpop.eup %6449  ;;  %v768_v54 = vmul.f32 1.442695, %v678_v29  ;;  %v770_v18 = vmul.f32 1.442695, %v679_v32 }
 0x26d   : > { %12815 = vst [vmem:[#allocation24_spill] sm:$0xff] %v7699_v9  ;;  %v7702_v8 = vpop.eup %6451 }
 0x26e   : > { %12816 = vst [vmem:[#allocation25_spill] sm:$0xff] %v7702_v8  ;;  %v880_v55 = vadd.f32 %v7702_v8, %v7699_v9  ;;  %6453 = vpow2.f32 %v768_v54  ;;  %v7721_v54 = vpop.f32.mrf.mxu0 }
 0x26f   : > { %6455 = vpow2.f32 %v770_v18  ;;  %v7725_v18 = vpop.f32.mrf.mxu1 }
 0x270   : > { %881 = vadd.xlane.f32.xlu2 %v880_v55 }
 0x271   : > { %v600_v19 = vpop.xlane.xlu2 %599 }
 0x272   : > { %v680_v12 = vsub.f32 %v7539_v24, %v600_v19  ;;  %v681_v10 = vsub.f32 %v7541_v25, %v600_v19 }
 0x274   : > { %v7713_v36 = vpop.eup %6453  ;;  %v772_v29 = vmul.f32 1.442695, %v680_v12  ;;  %v774_v55 = vmul.f32 1.442695, %v681_v10 }
 0x275   : > { %12817 = vst [vmem:[#allocation26_spill] sm:$0xff] %v7713_v36  ;;  %v7715_v22 = vpop.eup %6455 }
 0x276   : > { %12818 = vst [vmem:[#allocation27_spill] sm:$0xff] %v7715_v22  ;;  %v883_v32 = vadd.f32 %v7715_v22, %v7713_v36  ;;  %6457 = vpow2.f32 %v772_v29  ;;  %v7737_v10 = vpop.f32.mrf.mxu0 }
 0x277   : > { %6459 = vpow2.f32 %v774_v55  ;;  %v7739_v8 = vpop.f32.mrf.mxu1 }
 0x278   : > { %644 = vmax.xlane.f32.xlu2 %v643_v20  ;;  %v646_v20 = vmax.f32 %v7721_v54, %v7725_v18  ;;  %v649_v29 = vmax.f32 %v7737_v10, %v7739_v8 }
 0x279   : > { %v603_v21 = vpop.xlane.xlu2 %602 }
 0x27a   : > { %v683_v9 = vsub.f32 %v7547_v28, %v603_v21 }
 0x27c   : > { %v7731_v25 = vpop.eup %6457 }
 0x27d   : > { %12819 = vst [vmem:[#allocation28_spill] sm:$0xff] %v7731_v25  ;;  %v7733_v19 = vpop.eup %6459 }
 0x27e   : > { %12820 = vst [vmem:[#allocation29_spill] sm:$0xff] %v7733_v19  ;;  %v886_v12 = vadd.f32 %v7733_v19, %v7731_v25  ;;  %v616_v19 = vmax.f32 %v7581_v53, %v7583_v56 }
 0x280   : > { %884 = vadd.xlane.f32.xlu2 %v883_v32 }
 0x281   : > { %v7723_v13 = vpop.xlane.xlu2 %623 }
 0x288   : > { %647 = vmax.xlane.f32.xlu2 %v646_v20  ;;  %v682_v20 = vsub.f32 %v7545_v27, %v603_v21  ;;  %v666_v27 = vsub.f32 %v7485_v62, %v7619_v59 }
 0x289   : > { %v7729_v24 = vpop.xlane.xlu2 %626 }
 0x28a   : > { %v776_v22 = vmul.f32 1.442695, %v682_v20  ;;  %v744_v35 = vmul.f32 1.442695, %v666_v27 }
 0x28c   : > { %6461 = vpow2.f32 %v776_v22  ;;  %v654_v22 = vsub.f32 %v7449_v46, %v7685_v11  ;;  %v665_v46 = vsub.f32 %v7481_v61, %v7637_v6 }
 0x290   : > { %887 = vadd.xlane.f32.xlu2 %v886_v12  ;;  %v778_v12 = vmul.f32 1.442695, %v683_v9  ;;  %v667_v9 = vsub.f32 %v7487_v63, %v7619_v59  ;;  %v664_v63 = vsub.f32 %v7479_v60, %v7637_v6 }
 0x291   : > { %v630_v32 = vpop.xlane.xlu2 %629 }
 0x292   : > { %6463 = vpow2.f32 %v778_v12  ;;  %v7753_v25 = vpop.eup %6461  ;;  %v655_v12 = vsub.f32 %v7451_v47, %v7685_v11  ;;  %v746_v62 = vmul.f32 1.442695, %v667_v9  ;;  %v700_v47 = vsub.f32 %v7607_v23, %v630_v32 }
 0x293   : > { %v701_v27 = vsub.f32 %v7609_v26, %v630_v32  ;;  %v662_v32 = vsub.f32 %v7473_v57, %v7653_v40 }
 0x294   : > { %v812_v61 = vmul.f32 1.442695, %v700_v47 }
 0x295   : > { %v814_v23 = vmul.f32 1.442695, %v701_v27 }
 0x298   : > { %650 = vmax.xlane.f32.xlu2 %v649_v29 }
 0x299   : > { %v7743_v55 = vpop.xlane.xlu2 %632 }
 0x2a0   : > { %620 = vmax.xlane.f32.xlu2 %v619_v31  ;;  %v7759_v31 = vpop.eup %6463 }
 0x2a1   : > { %v7749_v36 = vpop.xlane.xlu2 %635 }
 0x2a8   : > { %617 = vmax.xlane.f32.xlu2 %v616_v19 }
 0x2a9   : > { %v639_v29 = vpop.xlane.xlu2 %638 }
 0x2aa   : > { %v706_v28 = vsub.f32 %v7641_v44, %v639_v29  ;;  %v707_v21 = vsub.f32 %v7643_v1, %v639_v29  ;;  %v889_v44 = vadd.f32 %v7759_v31, %v7753_v25  ;;  %v720_v1 = vmul.f32 1.442695, %v654_v22 }
 0x2ab   : > { %v722_v29 = vmul.f32 1.442695, %v655_v12 }
 0x2ac   : > { %v824_v20 = vmul.f32 1.442695, %v706_v28  ;;  %v826_v19 = vmul.f32 1.442695, %v707_v21  ;;  %v740_v28 = vmul.f32 1.442695, %v664_v63 }
 0x2ad   : > { %v742_v21 = vmul.f32 1.442695, %v665_v46 }
 0x2ae   : > { %6465 = vpow2.f32 %v824_v20  ;;  %v663_v20 = vsub.f32 %v7475_v58, %v7653_v40 }
 0x2af   : > { %6467 = vpow2.f32 %v826_v19 }
 0x2b0   : > { %890 = vadd.xlane.f32.xlu2 %v889_v44  ;;  %6469 = vpow2.f32 %v744_v35  ;;  %v613_v35 = vmax.f32 %v7573_v41, %v7575_v42 }
 0x2b1   : > { %6471 = vpow2.f32 %v746_v62  ;;  %v736_v62 = vmul.f32 1.442695, %v662_v32  ;;  %v642_v57 = vpop.xlane.xlu2 %641 }
 0x2b2   : > { %6473 = vpow2.f32 %v720_v1  ;;  %v708_v58 = vsub.f32 %v7661_v5, %v642_v57  ;;  %v709_v40 = vsub.f32 %v7663_v7, %v642_v57  ;;  %v656_v5 = vsub.f32 %v7455_v48, %v7679_v14 }
 0x2b3   : > { %6475 = vpow2.f32 %v722_v29  ;;  %v738_v29 = vmul.f32 1.442695, %v663_v20  ;;  %v657_v7 = vsub.f32 %v7457_v49, %v7679_v14  ;;  %v703_v48 = vsub.f32 %v7617_v50, %v7743_v55 }
 0x2b4   : > { %v7773_v59 = vpop.eup %6465  ;;  %6477 = vpow2.f32 %v740_v28  ;;  %v828_v28 = vmul.f32 1.442695, %v708_v58  ;;  %v698_v58 = vsub.f32 %v7601_v15, %v7729_v24 }
 0x2b5   : > { %12821 = vst [vmem:[#allocation30_spill] sm:$0xff] %v7773_v59  ;;  %v7776_v11 = vpop.eup %6467  ;;  %6479 = vpow2.f32 %v742_v21  ;;  %v726_v32 = vmul.f32 1.442695, %v657_v7  ;;  %v7857_v7 = vpop.xlane.xlu1 %878 }
 0x2b6   : > { %12822 = vst [vmem:[#allocation31_spill] sm:$0xff] %v7776_v11  ;;  %v925_v60 = vadd.f32 %v7776_v11, %v7773_v59  ;;  %v7783_v9 = vpop.eup %6469  ;;  %6481 = vpow2.f32 %v812_v61  ;;  %vm1110_vm9 = vweird.f32 %v7857_v7 }
 0x2b7   : > { %v7785_v6 = vpop.eup %6471  ;;  %6483 = vpow2.f32 %v814_v23  ;;  %v724_v23 = vmul.f32 1.442695, %v656_v5 }
 0x2b8   : > { %614 = vmax.xlane.f32.xlu2 %v613_v35  ;;  %926 = vadd.xlane.f32.xlu1 %v925_v60  ;;  %v7787_v22 = vpop.eup %6473  ;;  %v865_v19 = vadd.f32 %v7785_v6, %v7783_v9  ;;  %6485 = vpow2.f32 %v736_v62  ;;  %v830_v35 = vmul.f32 1.442695, %v709_v40  ;;  %v818_v62 = vmul.f32 1.442695, %v703_v48 }
 0x2b9   : > { %v7789_v26 = vpop.eup %6475  ;;  %6487 = vpow2.f32 %v738_v29 }
 0x2ba   : > { %v847_v12 = vadd.f32 %v7789_v26, %v7787_v22  ;;  %v7799_v44 = vpop.eup %6477  ;;  %6489 = vpow2.f32 %v828_v28 }
 0x2bb   : > { %v7801_v1 = vpop.eup %6479  ;;  %6491 = vpow2.f32 %v830_v35 }
 0x2bc   : > { %v7803_v63 = vpop.eup %6481  ;;  %v862_v47 = vadd.f32 %v7801_v1, %v7799_v44  ;;  %6493 = vpow2.f32 %v724_v23 }
 0x2bd   : > { %12823 = vst [vmem:[#allocation32_spill] sm:$0xff] %v7803_v63  ;;  %v7805_v46 = vpop.eup %6483  ;;  %6495 = vpow2.f32 %v726_v32  ;;  %v7863_v48 = vpop.xlane.xlu1 %875 }
 0x2be   : > { %12824 = vst [vmem:[#allocation33_spill] sm:$0xff] %v7805_v46  ;;  %v916_v27 = vadd.f32 %v7805_v46, %v7803_v63  ;;  %v7813_v60 = vpop.eup %6485 }
 0x2bf   : > { %v7815_v21 = vpop.eup %6487 }
 0x2c0   : > { %866 = vadd.xlane.f32.xlu2 %v865_v19  ;;  %848 = vadd.xlane.f32.xlu1 %v847_v12  ;;  %v859_v61 = vadd.f32 %v7815_v21, %v7813_v60  ;;  %v7823_v20 = vpop.eup %6489  ;;  %v702_v12 = vsub.f32 %v7615_v37, %v7743_v55  ;;  %v699_v37 = vsub.f32 %v7603_v16, %v7729_v24  ;;  %v808_v55 = vmul.f32 1.442695, %v698_v58 }
 0x2c1   : > { %v7825_v19 = vpop.eup %6491 }
 0x2c2   : > { %12825 = vst [vmem:[#allocation34_spill] sm:$0xff] %v7825_v19  ;;  %v928_v49 = vadd.f32 %v7825_v19, %v7823_v20  ;;  %v816_v14 = vmul.f32 1.442695, %v702_v12  ;;  %v7833_v29 = vpop.eup %6493  ;;  %v810_v40 = vmul.f32 1.442695, %v699_v37  ;;  %v659_v37 = vsub.f32 %v7463_v52, %v7675_v45  ;;  %v12831_v52 = vld [vmem:[#allocation12_spill] sm:$0xff] }
 0x2c3   : > { %v7835_v57 = vpop.eup %6495 }
 0x2c4   : > { %6497 = vpow2.f32 %v816_v14  ;;  %v850_v50 = vadd.f32 %v7835_v57, %v7833_v29 }
 0x2c5   : > { %6499 = vpow2.f32 %v818_v62  ;;  %v658_v62 = vsub.f32 %v7461_v51, %v7675_v45  ;;  %v696_v45 = vsub.f32 %v12831_v52, %v7723_v13 }
 0x2c6   : > { %6501 = vpow2.f32 %v808_v55 }
 0x2c7   : > { %6503 = vpow2.f32 %v810_v40  ;;  %v728_v55 = vmul.f32 1.442695, %v658_v62  ;;  %v12830_v40 = vld [vmem:[#allocation8_spill] sm:$0xff] }
 0x2c8   : > { %863 = vadd.xlane.f32.xlu2 %v862_v47  ;;  %917 = vadd.xlane.f32.xlu1 %v916_v27 }
 0x2ca   : > { %v7843_v47 = vpop.eup %6497 }
 0x2cb   : > { %12826 = vst [vmem:[#allocation35_spill] sm:$0xff] %v7843_v47  ;;  %v7845_v27 = vpop.eup %6499 }
 0x2cc   : > { %12827 = vst [vmem:[#allocation36_spill] sm:$0xff] %v7845_v27  ;;  %v919_v15 = vadd.f32 %v7845_v27, %v7843_v47  ;;  %v7851_v16 = vpop.eup %6501 }
 0x2cd   : > { %12828 = vst [vmem:[#allocation37_spill] sm:$0xff] %v7851_v16  ;;  %v7853_v24 = vpop.eup %6503 }
 0x2ce   : > { %12829 = vst [vmem:[#allocation38_spill] sm:$0xff] %v7853_v24  ;;  %v913_v5 = vadd.f32 %v7853_v24, %v7851_v16 }
 0x2d0   : > { %860 = vadd.xlane.f32.xlu2 %v859_v61 }
 0x2d8   : > { %929 = vadd.xlane.f32.xlu2 %v928_v49 }
 0x2e0   : > { %851 = vadd.xlane.f32.xlu2 %v850_v50  ;;  %v652_v50 = vsub.f32 %v7443_v43, %v7689_v2 }
 0x2e3   : > { %v7847_v28 = vpop.xlane.xlu2 %881 }
 0x2e4   : > { %vm1125_vm15 = vweird.f32 %v7847_v28 }
 0x2e8   : > { %920 = vadd.xlane.f32.xlu2 %v919_v15  ;;  %v653_v15 = vsub.f32 %v12830_v40, %v7689_v2 }
 0x2ea   : > { %v718_v43 = vmul.f32 1.442695, %v653_v15 }
 0x2eb   : > { %v645_v35 = vpop.xlane.xlu2 %644 }
 0x2ec   : > { %v710_v40 = vsub.f32 %v7707_v17, %v645_v35  ;;  %v711_v15 = vsub.f32 %v7709_v4, %v645_v35 }
 0x2ee   : > { %v834_v17 = vmul.f32 1.442695, %v711_v15 }
 0x2f0   : > { %914 = vadd.xlane.f32.xlu2 %v913_v5  ;;  %v7879_v5 = vpop.xlane.xlu1 %872 }
 0x2f3   : > { %v7859_v61 = vpop.xlane.xlu2 %884 }
 0x2f4   : > { %vm1140_vm11 = vweird.f32 %v7859_v61 }
 0x2fb   : > { %v648_v23 = vpop.xlane.xlu2 %647 }
 0x2fc   : > { %v712_v32 = vsub.f32 %v7721_v54, %v648_v23  ;;  %v713_v12 = vsub.f32 %v7725_v18, %v648_v23  ;;  %v730_v23 = vmul.f32 1.442695, %v659_v37  ;;  %v704_v37 = vsub.f32 %v7627_v30, %v7749_v36 }
 0x2fd   : > { %v832_v30 = vmul.f32 1.442695, %v710_v40 }
 0x2fe   : > { %v836_v49 = vmul.f32 1.442695, %v712_v32  ;;  %v838_v14 = vmul.f32 1.442695, %v713_v12  ;;  %v716_v32 = vmul.f32 1.442695, %v652_v50 }
 0x2ff   : > { %v12832_v12 = vld [vmem:[#allocation13_spill] sm:$0xff]  ;;  %v804_v50 = vmul.f32 1.442695, %v696_v45 }
 0x300   : > { %6505 = vpow2.f32 %v836_v49  ;;  %v697_v49 = vsub.f32 %v12832_v12, %v7723_v13 }
 0x301   : > { %6507 = vpow2.f32 %v838_v14 }
 0x302   : > { %6509 = vpow2.f32 %v728_v55  ;;  %v806_v55 = vmul.f32 1.442695, %v697_v49 }
 0x303   : > { %v7867_v58 = vpop.xlane.xlu2 %887  ;;  %6511 = vpow2.f32 %v730_v23  ;;  %v7895_v23 = vpop.xlane.xlu0 %869 }
 0x304   : > { %6513 = vpow2.f32 %v716_v32  ;;  %vm1155_vm3 = vweird.f32 %v7867_v58 }
 0x305   : > { %6515 = vpow2.f32 %v718_v43 }
 0x306   : > { %v7873_v54 = vpop.eup %6505 }
 0x307   : > { %v7875_v18 = vpop.eup %6507 }
 0x308   : > { %v934_v51 = vadd.f32 %v7875_v18, %v7873_v54  ;;  %v7893_v13 = vpop.eup %6509 }
 0x309   : > { %v7897_v32 = vpop.eup %6511 }
 0x30a   : > { %935 = vadd.xlane.f32.xlu0 %v934_v51  ;;  %v7899_v45 = vpop.eup %6513 }
 0x30b   : > { %v651_v14 = vpop.xlane.xlu2 %650  ;;  %v7905_v49 = vpop.eup %6515 }
 0x30c   : > { %v714_v2 = vsub.f32 %v7737_v10, %v651_v14  ;;  %v715_v62 = vsub.f32 %v7739_v8, %v651_v14  ;;  %v820_v10 = vmul.f32 1.442695, %v704_v37  ;;  %v612_v8 = vpop.xlane.xlu1 %611 }
 0x30d   : > { %v688_v4 = vsub.f32 %v7567_v38, %v612_v8 }
 0x30e   : > { %v840_v52 = vmul.f32 1.442695, %v714_v2  ;;  %v842_v51 = vmul.f32 1.442695, %v715_v62  ;;  %v689_v2 = vsub.f32 %v7569_v39, %v612_v8 }
 0x30f   : > { %v788_v38 = vmul.f32 1.442695, %v688_v4 }
 0x310   : > { %6517 = vpow2.f32 %v840_v52  ;;  %v705_v52 = vsub.f32 %v7629_v33, %v7749_v36 }
 0x311   : > { %6519 = vpow2.f32 %v842_v51  ;;  %v790_v51 = vmul.f32 1.442695, %v689_v2 }
 0x312   : > { %6521 = vpow2.f32 %v804_v50 }
 0x313   : > { %6523 = vpow2.f32 %v806_v55  ;;  %v621_v43 = vpop.xlane.xlu2 %620 }
 0x314   : > { %6525 = vrcp.f32 %v7895_v23  ;;  %v694_v35 = vsub.f32 %v7587_v0, %v621_v43  ;;  %v695_v12 = vsub.f32 %v7589_v3, %v621_v43  ;;  %v609_v15 = vpop.xlane.xlu1 %608 }
 0x315   : > { %6527 = vpow2.f32 %v820_v10  ;;  %v686_v4 = vsub.f32 %v7559_v34, %v609_v15 }
 0x316   : > { %v7907_v14 = vpop.eup %6517  ;;  %6529 = vpow2.f32 %v832_v30  ;;  %v800_v62 = vmul.f32 1.442695, %v694_v35  ;;  %v802_v37 = vmul.f32 1.442695, %v695_v12 }
 0x317   : > { %v7910_v50 = vpop.eup %6519  ;;  %6531 = vpow2.f32 %v834_v17  ;;  %v822_v17 = vmul.f32 1.442695, %v705_v52  ;;  %v784_v52 = vmul.f32 1.442695, %v686_v4 }
 0x318   : > { %v7912_v40 = vpop.eup %6521  ;;  %6533 = vpow2.f32 %v800_v62  ;;  %v937_v0 = vadd.f32 %v7910_v50, %v7907_v14  ;;  %v12838_v62 = vld [vmem:[#allocation11_spill] sm:$0xff] }
 0x319   : > { %12833 = vst [vmem:[#allocation8_spill] sm:$0xff] %v7912_v40  ;;  %v7916_v3 = vpop.eup %6523  ;;  %6535 = vpow2.f32 %v802_v37  ;;  %v687_v37 = vsub.f32 %v12838_v62, %v609_v15 }
 0x31a   : > { %12834 = vst [vmem:[#allocation12_spill] sm:$0xff] %v7916_v3  ;;  %v7920_v39 = vpop.eup %6525  ;;  %6537 = vrcp.f32 %v7867_v58  ;;  %938 = vadd.xlane.f32.xlu0 %v937_v0 }
 0x31b   : > { %v7923_v55 = vpop.eup %6527  ;;  %6539 = vrcp.f32 %v7857_v7  ;;  %v618_v10 = vpop.xlane.xlu2 %617  ;;  %v786_v15 = vmul.f32 1.442695, %v687_v37 }
 0x31c   : > { %12835 = vst [vmem:[#allocation13_spill] sm:$0xff] %v7923_v55  ;;  %v7926_v8 = vpop.eup %6529  ;;  %6541 = vpow2.f32 %v788_v38  ;;  %v692_v30 = vsub.f32 %v7581_v53, %v618_v10  ;;  %v693_v33 = vsub.f32 %v7583_v56, %v618_v10 }
 0x31d   : > { %v7930_v36 = vpop.eup %6531  ;;  %6543 = vrcp.f32 %v7859_v61 }
 0x31e   : > { %v7933_v43 = vpop.eup %6533  ;;  %6545 = vpow2.f32 %v790_v51  ;;  %v796_v35 = vmul.f32 1.442695, %v692_v30  ;;  %v798_v12 = vmul.f32 1.442695, %v693_v33  ;;  %v931_v56 = vadd.f32 %v7930_v36, %v7926_v8 }
 0x31f   : > { %12836 = vst [vmem:[#allocation39_spill] sm:$0xff] %v7933_v43  ;;  %v7936_v2 = vpop.eup %6535  ;;  %6547 = vrcp.f32 %v7847_v28 }
 0x320   : > { %12837 = vst [vmem:[#allocation40_spill] sm:$0xff] %v7936_v2  ;;  %v7940_v53 = vpop.eup %6537  ;;  %6549 = vpow2.f32 %v796_v35  ;;  %v907_v38 = vadd.f32 %v7936_v2, %v7933_v43 }
 0x321   : > { %v7946_v0 = vpop.eup %6539  ;;  %6551 = vpow2.f32 %v798_v12  ;;  %v1151_v10 = vmul.f32 %v7940_v53, %v7867_v58  ;;  %vm1156_vm1 = vweird.f32 %v7940_v53 }
 0x322   : > { %v7948_v34 = vpop.eup %6541  ;;  %6553 = vpow2.f32 %v822_v17  ;;  %932 = vadd.xlane.f32.xlu0 %v931_v56  ;;  %908 = vadd.xlane.f32.xlu1 %v907_v38  ;;  %v7972_v56 = vmul.f32 %v7920_v39, %v7895_v23  ;;  %v853_v38 = vadd.f32 %v7897_v32, %v7893_v13  ;;  %v1106_v43 = vmul.f32 %v7946_v0, %v7857_v7  ;;  %vm8023_vm6 = vmor %vm1155_vm3, %vm1156_vm1 }
 0x323   : > { %12839 = vst [vmem:[#allocation11_spill] sm:$0xff] %v7948_v34  ;;  %v7950_v51 = vpop.eup %6543  ;;  %6555 = vrcp.f32 %v7863_v48  ;;  %v7955_v30 = vpop.xlane.xlu2 %890  ;;  %v1152_v62 = vsub.f32 1.0, %v1151_v10  ;;  %vm1111_vm4 = vweird.f32 %v7946_v0 }
 0x324   : > { %v7957_v33 = vpop.eup %6545  ;;  %6557 = vrcp.f32 %v7955_v30  ;;  %v1136_v4 = vmul.f32 %v7950_v51, %v7859_v61  ;;  %vm1170_vm5 = vweird.f32 %v7955_v30  ;;  %vm1141_vm8 = vweird.f32 %v7950_v51  ;;  %vm8088_vm3 = vmor %vm1110_vm9, %vm1111_vm4 }
 0x325   : > { %12840 = vst [vmem:[#allocation41_spill] sm:$0xff] %v7957_v33  ;;  %v7960_v35 = vpop.eup %6547  ;;  %6559 = vpow2.f32 %v784_v52  ;;  %v1153_v46 = vmul.f32 %v7940_v53, %v1152_v62  ;;  %v1174_v62 = vand.u32 2147483647, %v7955_v30  ;;  %vm8055_vm13 = vmor %vm1140_vm11, %vm1141_vm8  ;;  %vm1065_vm8 = vweird.f32 %v7895_v23 }
 0x326   : > { %v7962_v17 = vpop.eup %6549  ;;  %6561 = vpow2.f32 %v786_v15  ;;  %v898_v15 = vadd.f32 %v7957_v33, %v7948_v34  ;;  %v1121_v24 = vmul.f32 %v7960_v35, %v7847_v28  ;;  %v1137_v16 = vsub.f32 1.0, %v1136_v4 }
 0x327   : > { %12841 = vst [vmem:[#allocation42_spill] sm:$0xff] %v7962_v17  ;;  %v7966_v12 = vpop.eup %6551  ;;  %6563 = vrcp.f32 %v7879_v5  ;;  %vm1175_vm10 = vcmp.eq.f32.partialorder %v1174_v62, 8.507059e+37  ;;  %vm1126_vm14 = vweird.f32 %v7960_v35  ;;  %v12859_v62 = vld [vmem:[#allocation27_spill] sm:$0xff]  ;;  %vm1080_vm11 = vweird.f32 %v7879_v5 }
 0x328   : > { %12842 = vst [vmem:[#allocation43_spill] sm:$0xff] %v7966_v12  ;;  %v7968_v37 = vpop.eup %6553  ;;  %v904_v2 = vadd.f32 %v7966_v12, %v7962_v17  ;;  %v7992_v17 = vadd.f32 %v7905_v49, %v7899_v45  ;;  %v1122_v33 = vsub.f32 1.0, %v1121_v24  ;;  %v1138_v11 = vmul.f32 %v7950_v51, %v1137_v16 }
 0x329   : > { %12843 = vst [vmem:[#allocation44_spill] sm:$0xff] %v7968_v37  ;;  %v7978_v52 = vpop.eup %6555  ;;  %v922_v4 = vadd.f32 %v7968_v37, %v7923_v55  ;;  %v1176_v37 = vand.u32 2147483648, %v7955_v30 }
 0x32a   : > { %v6558_v10 = vpop.eup %6557  ;;  %854 = vadd.xlane.f32.xlu0 %v853_v38  ;;  %905 = vadd.xlane.f32.xlu2 %v904_v2  ;;  %v8001_v2 = vadd.f32 %v7916_v3, %v7912_v40  ;;  %v8008_v34 = vmul.f32 %v7978_v52, %v7863_v48 }
 0x32b   : > { %v1166_v63 = vmul.f32 %v6558_v10, %v7955_v30  ;;  %899 = vadd.xlane.f32.xlu1 %v898_v15  ;;  %v7988_v12 = vpop.xlane.xlu2 %614  ;;  %v7994_v27 = vpop.eup %6559  ;;  %v1107_v15 = vsub.f32 1.0, %v1106_v43  ;;  %vm1171_vm2 = vweird.f32 %v6558_v10  ;;  %v1154_v43 = vadd.f32 %v7940_v53, %v1153_v46 }
 0x32c   : > { %12844 = vst [vmem:[#allocation45_spill] sm:$0xff] %v7994_v27  ;;  %v8004_v38 = vpop.eup %6561  ;;  %v1159_v46 = vand.u32 2147483647, %v7867_v58  ;;  %v1092_v55 = vsub.f32 1.0, %v8008_v34  ;;  %vm1172_vm7 = vmor %vm1170_vm5, %vm1171_vm2  ;;  %v1139_v34 = vadd.f32 %v7950_v51, %v1138_v11  ;;  %v690_v11 = vsub.f32 %v7573_v41, %v7988_v12 }
 0x32d   : > { %12845 = vst [vmem:[#allocation46_spill] sm:$0xff] %v8004_v38  ;;  %v1167_v47 = vsub.f32 1.0, %v1166_v63  ;;  %v895_v40 = vadd.f32 %v8004_v38, %v7994_v27  ;;  %v1161_v63 = vand.u32 2147483648, %v7867_v58  ;;  %v1108_v16 = vmul.f32 %v7946_v0, %v1107_v15  ;;  %vm8073_vm2 = vmor %vm1125_vm15, %vm1126_vm14 }
 0x32e   : > { %v1123_v38 = vmul.f32 %v7960_v35, %v1122_v33  ;;  %v1177_v27 = vor.u32 1.1754944e-38, %v1176_v37  ;;  %v1158_v58 = vsel %vm8023_vm6, %v7940_v53, %v1154_v43  ;;  %vm1160_vm12 = vcmp.eq.f32.partialorder %v1159_v46, 8.507059e+37 }
 0x32f   : > { %v1168_v3 = vmul.f32 %v6558_v10, %v1167_v47  ;;  %v1162_v37 = vor.u32 1.1754944e-38, %v1161_v63  ;;  %v1131_v43 = vand.u32 2147483648, %v7847_v28  ;;  %v1109_v63 = vadd.f32 %v7946_v0, %v1108_v16 }
 0x330   : > { %v1124_v41 = vadd.f32 %v7960_v35, %v1123_v38  ;;  %v1093_v16 = vmul.f32 %v7978_v52, %v1092_v55  ;;  %vm1096_vm5 = vweird.f32 %v7978_v52  ;;  %vm1066_vm14 = vweird.f32 %v7920_v39 }
 0x331   : > { %v1169_v24 = vadd.f32 %v6558_v10, %v1168_v3  ;;  %v8033_v3 = vpop.eup %6563 }
 0x332   : > { %923 = vadd.xlane.f32.xlu0 %v922_v4  ;;  %896 = vadd.xlane.f32.xlu2 %v895_v40  ;;  %v8041_v40 = vpop.xlane.xlu1 %605  ;;  %v1146_v4 = vand.u32 2147483648, %v7859_v61  ;;  %v1076_v53 = vmul.f32 %v8033_v3, %v7879_v5 }
 0x333   : > { %v8035_v30 = vpop.xlane.xlu2 %866  ;;  %v1173_v15 = vsel %vm1172_vm7, %v6558_v10, %v1169_v24  ;;  %v1144_v10 = vand.u32 2147483647, %v7859_v61  ;;  %v12850_v24 = vld [vmem:[#allocation28_spill] sm:$0xff]  ;;  %vm1095_vm7 = vweird.f32 %v7863_v48 }
 0x334   : > { %v1178_v33 = vsel %vm1175_vm10, %v1177_v27, %v1173_v15  ;;  %6565 = vrcp.f32 %v8035_v30  ;;  %v1163_v27 = vsel %vm1160_vm12, %v1162_v37, %v1158_v58  ;;  %v1147_v61 = vor.u32 1.1754944e-38, %v1146_v4  ;;  %vm8128_vm9 = vmor %vm1095_vm7, %vm1096_vm5 }
 0x335   : > { %v1450_v59 = vmul.f32 %v7753_v25, %v1178_v33  ;;  %v1451_v19 = vmul.f32 %v7759_v31, %v1178_v33  ;;  %v691_v25 = vsub.f32 %v7575_v42, %v7988_v12  ;;  %v1143_v31 = vsel %vm8055_vm13, %v7950_v51, %v1139_v34  ;;  %v12851_v42 = vld [vmem:[#allocation29_spill] sm:$0xff] }
 0x336   : > { %v1448_v47 = vmul.f32 %v12850_v24, %v1163_v27  ;;  %vm1145_vm1 = vcmp.eq.f32.partialorder %v1144_v10, 8.507059e+37  ;;  %v1077_v12 = vsub.f32 1.0, %v1076_v53  ;;  %v792_v51 = vmul.f32 1.442695, %v690_v11  ;;  %v12858_v11 = vld [vmem:[#allocation26_spill] sm:$0xff] }
 0x337   : > { %1484 = vmatpush.xpose.msra.mxu2 %v1450_v59  ;;  %1513 = vmatpush.xpose.msra.mxu3 %v1451_v19  ;;  %v1449_v59 = vmul.f32 %v12851_v42, %v1163_v27  ;;  %v1129_v19 = vand.u32 2147483647, %v7847_v28  ;;  %v1148_v38 = vsel %vm1145_vm1, %v1147_v61, %v1143_v31  ;;  %v1114_v15 = vand.u32 2147483647, %v7857_v7  ;;  %v12860_v31 = vld [vmem:[#allocation9_spill] sm:$0xff]  ;;  %vm8175_vm1 = vmor %vm1065_vm8, %vm1066_vm14 }
 0x338   : > { %v794_v58 = vmul.f32 1.442695, %v691_v25  ;;  %v1128_v28 = vsel %vm8073_vm2, %v7960_v35, %v1124_v41  ;;  %v12856_v33 = vsub.f32 1.0, %v7972_v56  ;;  %v1132_v4 = vor.u32 1.1754944e-38, %v1131_v43 }
 0x339   : > { %v1113_v35 = vsel %vm8088_vm3, %v7946_v0, %v1109_v63  ;;  %v12857_v10 = vand.u32 2147483648, %v7857_v7  ;;  %v1446_v27 = vmul.f32 %v12858_v11, %v1148_v38  ;;  %v1447_v25 = vmul.f32 %v12859_v62, %v1148_v38  ;;  %v12861_v0 = vld [vmem:[#allocation10_spill] sm:$0xff]  ;;  %v12866_v11 = vld [vmem:[#allocation16_spill] sm:$0xff]  ;;  %v12867_v62 = vld [vmem:[#allocation17_spill] sm:$0xff] }
 0x33a   : > { %845 = vadd.xlane.f32.xlu0 %v7992_v17  ;;  %v1063_v55 = vmul.f32 %v7920_v39, %v12856_v33  ;;  %v8095_v37 = vpop.eup %6565  ;;  %vm1130_vm4 = vcmp.eq.f32.partialorder %v1129_v19, 8.507059e+37  ;;  %v1078_v56 = vmul.f32 %v8033_v3, %v1077_v12  ;;  %v684_v41 = vsub.f32 %v12860_v31, %v8041_v40  ;;  %v8109_v61 = vpop.xlane.xlu1 %857  ;;  %v12863_v19 = vld [vmem:[#allocation25_spill] sm:$0xff] }
 0x33b   : > { %1485 = vmatpush.xpose.msra.mxu2 %v1448_v47  ;;  %1514 = vmatpush.xpose.msra.mxu3 %v1449_v59  ;;  %v8079_v34 = vpop.xlane.xlu2 %863  ;;  %v1117_v53 = vor.u32 1.1754944e-38, %v12857_v10  ;;  %v1133_v43 = vsel %vm1130_vm4, %v1132_v4, %v1128_v28  ;;  %v685_v7 = vsub.f32 %v12861_v0, %v8041_v40  ;;  %v1046_v63 = vmul.f32 %v8095_v37, %v8035_v30  ;;  %v12862_v40 = vld [vmem:[#allocation24_spill] sm:$0xff] }
 0x33c   : > { %6567 = vrcp.f32 %v8079_v34  ;;  %v1094_v24 = vadd.f32 %v7978_v52, %v1093_v16  ;;  %vm1115_vm6 = vcmp.eq.f32.partialorder %v1114_v15, 8.507059e+37  ;;  %v1099_v47 = vand.u32 2147483647, %v7863_v48 }
 0x33d   : > { %6569 = vpow2.f32 %v792_v51  ;;  %v1101_v42 = vand.u32 2147483648, %v7863_v48  ;;  %v1444_v59 = vmul.f32 %v12862_v40, %v1133_v43  ;;  %v1445_v12 = vmul.f32 %v12863_v19, %v1133_v43 }
 0x33e   : > { %6571 = vpow2.f32 %v794_v58  ;;  %v1118_v51 = vsel %vm1115_vm6, %v1117_v53, %v1113_v35  ;;  %v780_v46 = vmul.f32 1.442695, %v684_v41  ;;  %v1079_v48 = vadd.f32 %v8033_v3, %v1078_v56 }
 0x33f   : > { %1486 = vmatpush.xpose.msra.mxu2 %v1446_v27  ;;  %1515 = vmatpush.xpose.msra.mxu3 %v1447_v25  ;;  %6573 = vrcp.f32 %v8109_v61  ;;  %vm1081_vm10 = vweird.f32 %v8033_v3  ;;  %v1086_v16 = vand.u32 2147483648, %v7879_v5  ;;  %v782_v58 = vmul.f32 1.442695, %v685_v7 }
 0x340   : > { %v1047_v28 = vsub.f32 1.0, %v1046_v63  ;;  %v1098_v33 = vsel %vm8128_vm9, %v7978_v52, %v1094_v24  ;;  %v1102_v35 = vor.u32 1.1754944e-38, %v1101_v42  ;;  %v1084_v10 = vand.u32 2147483647, %v7879_v5  ;;  %vm8153_vm13 = vmor %vm1080_vm11, %vm1081_vm10 }
 0x341   : > { %v1442_v27 = vmul.f32 %v12866_v11, %v1118_v51  ;;  %v1443_v25 = vmul.f32 %v12867_v62, %v1118_v51  ;;  %vm1100_vm12 = vcmp.eq.f32.partialorder %v1099_v47, 8.507059e+37  ;;  %v1083_v5 = vsel %vm8153_vm13, %v8033_v3, %v1079_v48  ;;  %v12870_v3 = vld [vmem:[#allocation18_spill] sm:$0xff] }
 0x342   : > { %v8123_v38 = vpop.eup %6567  ;;  %911 = vadd.xlane.f32.xlu0 %v8001_v2  ;;  %v1103_v56 = vsel %vm1100_vm12, %v1102_v35, %v1098_v33  ;;  %v1064_v31 = vadd.f32 %v7920_v39, %v1063_v55  ;;  %v1048_v43 = vmul.f32 %v8095_v37, %v1047_v28  ;;  %v1087_v7 = vor.u32 1.1754944e-38, %v1086_v16  ;;  %v12871_v55 = vld [vmem:[#allocation19_spill] sm:$0xff] }
 0x343   : > { %v1031_v17 = vmul.f32 %v8123_v38, %v8079_v34  ;;  %1487 = vmatpush.xpose.msra.mxu2 %v1444_v59  ;;  %1516 = vmatpush.xpose.msra.mxu3 %v1445_v12  ;;  %v8137_v2 = vpop.xlane.xlu2 %860  ;;  %v8142_v4 = vpop.eup %6569  ;;  %vm1085_vm15 = vcmp.eq.f32.partialorder %v1084_v10, 8.507059e+37  ;;  %v1069_v24 = vand.u32 2147483647, %v7895_v23  ;;  %v1071_v47 = vand.u32 2147483648, %v7895_v23  ;;  %v12875_v10 = vld [vmem:[#allocation21_spill] sm:$0xff] }
 0x344   : > { %6575 = vrcp.f32 %v8137_v2  ;;  %v8147_v53 = vpop.eup %6571  ;;  %v1440_v42 = vmul.f32 %v12870_v3, %v1103_v56  ;;  %v1441_v40 = vmul.f32 %v12871_v55, %v1103_v56  ;;  %v1088_v59 = vsel %vm1085_vm15, %v1087_v7, %v1083_v5 }
 0x345   : > { %6577 = vpow2.f32 %v780_v46  ;;  %v8162_v41 = vpop.eup %6573  ;;  %v1032_v0 = vsub.f32 1.0, %v1031_v17  ;;  %v901_v63 = vadd.f32 %v8147_v53, %v8142_v4  ;;  %v1068_v46 = vsel %vm8175_vm1, %v7920_v39, %v1064_v31 }
 0x346   : > { %6579 = vpow2.f32 %v782_v58  ;;  %v1001_v51 = vmul.f32 %v8162_v41, %v8109_v61  ;;  %v1049_v23 = vadd.f32 %v8095_v37, %v1048_v43  ;;  %vm1051_vm2 = vweird.f32 %v8095_v37  ;;  %v12874_v58 = vld [vmem:[#allocation20_spill] sm:$0xff] }
 0x347   : > { %1488 = vmatpush.xpose.msra.mxu2 %v1442_v27  ;;  %1517 = vmatpush.xpose.msra.mxu3 %v1443_v25  ;;  %v1033_v48 = vmul.f32 %v8123_v38, %v1032_v0  ;;  %v1438_v28 = vmul.f32 %v12874_v58, %v1088_v59  ;;  %vm1070_vm3 = vcmp.eq.f32.partialorder %v1069_v24, 8.507059e+37  ;;  %v1072_v17 = vor.u32 1.1754944e-38, %v1071_v47  ;;  %v12879_v47 = vld [vmem:[#allocation15_spill] sm:$0xff] }
 0x348   : > { %v1056_v33 = vand.u32 2147483648, %v8035_v30  ;;  %v1439_v11 = vmul.f32 %v12875_v10, %v1088_v59  ;;  %vm1050_vm4 = vweird.f32 %v8035_v30  ;;  %v1054_v27 = vand.u32 2147483647, %v8035_v30 }
 0x349   : > { %v1002_v62 = vsub.f32 1.0, %v1001_v51  ;;  %v1073_v25 = vsel %vm1070_vm3, %v1072_v17, %v1068_v46  ;;  %vm8200_vm5 = vmor %vm1050_vm4, %vm1051_vm2  ;;  %v1034_v5 = vadd.f32 %v8123_v38, %v1033_v48  ;;  %vm1036_vm6 = vweird.f32 %v8123_v38 }
 0x34a   : > { %v8179_v12 = vpop.eup %6575  ;;  %902 = vadd.xlane.f32.xlu0 %v901_v63  ;;  %v1053_v56 = vsel %vm8200_vm5, %v8095_v37, %v1049_v23  ;;  %v1057_v43 = vor.u32 1.1754944e-38, %v1056_v33  ;;  %v1039_v0 = vand.u32 2147483647, %v8079_v34  ;;  %v1041_v7 = vand.u32 2147483648, %v8079_v34  ;;  %v12878_v63 = vld [vmem:[#allocation14_spill] sm:$0xff] }
 0x34b   : > { %v1016_v15 = vmul.f32 %v8179_v12, %v8137_v2  ;;  %1489 = vmatpush.xpose.msra.mxu2 %v1440_v42  ;;  %1518 = vmatpush.xpose.msra.mxu3 %v1441_v40  ;;  %v8191_v16 = vpop.eup %6577  ;;  %v1436_v24 = vmul.f32 %v12878_v63, %v1073_v25  ;;  %v1437_v3 = vmul.f32 %v12879_v47, %v1073_v25  ;;  %vm1055_vm7 = vcmp.eq.f32.partialorder %v1054_v27, 8.507059e+37 }
 0x34c   : > { %v8195_v39 = vpop.eup %6579  ;;  %vm1035_vm8 = vweird.f32 %v8079_v34  ;;  %v1058_v37 = vsel %vm1055_vm7, %v1057_v43, %v1053_v56  ;;  %vm1021_vm10 = vweird.f32 %v8179_v12  ;;  %v1003_v40 = vmul.f32 %v8162_v41, %v1002_v62 }
 0x34d   : > { %v1017_v35 = vsub.f32 1.0, %v1016_v15  ;;  %v892_v30 = vadd.f32 %v8195_v39, %v8191_v16  ;;  %vm1037_vm9 = vmor %vm1035_vm8, %vm1036_vm6  ;;  %vm1040_vm11 = vcmp.eq.f32.partialorder %v1039_v0, 8.507059e+37  ;;  %v1042_v59 = vor.u32 1.1754944e-38, %v1041_v7 }
 0x34e   : > { %v1038_v42 = vsel %vm1037_vm9, %v8123_v38, %v1034_v5  ;;  %v1026_v19 = vand.u32 2147483648, %v8137_v2  ;;  %v1434_v51 = vmul.f32 %v7783_v9, %v1058_v37  ;;  %v1435_v34 = vmul.f32 %v7785_v6, %v1058_v37 }
 0x34f   : > { %1490 = vmatpush.xpose.msra.mxu2 %v1438_v28  ;;  %1519 = vmatpush.xpose.msra.mxu3 %v1439_v11  ;;  %v1018_v31 = vmul.f32 %v8179_v12, %v1017_v35  ;;  %vm1020_vm12 = vweird.f32 %v8137_v2  ;;  %v1024_v46 = vand.u32 2147483647, %v8137_v2  ;;  %v1043_v15 = vsel %vm1040_vm11, %v1042_v59, %v1038_v42  ;;  %v12881_v11 = vld [vmem:[#allocation23_spill] sm:$0xff] }
 0x350   : > { %vm1022_vm13 = vmor %vm1020_vm12, %vm1021_vm10  ;;  %v1004_v23 = vadd.f32 %v8162_v41, %v1003_v40  ;;  %vm1006_vm14 = vweird.f32 %v8162_v41  ;;  %v1027_v48 = vor.u32 1.1754944e-38, %v1026_v19  ;;  %vm1005_vm15 = vweird.f32 %v8109_v61 }
 0x351   : > { %v1019_v55 = vadd.f32 %v8179_v12, %v1018_v31  ;;  %v1011_v9 = vand.u32 2147483648, %v8109_v61  ;;  %v1432_v6 = vmul.f32 %v7799_v44, %v1043_v15  ;;  %v1433_v2 = vmul.f32 %v7801_v1, %v1043_v15  ;;  %vm1007_vm2 = vmor %vm1005_vm15, %vm1006_vm14  ;;  %v1608_v1 = vld [vmem:[%s7389_s23 + $0x40] sm:$0xff]  ;;  %v8245_v31 = vpop.xlane.xlu1 %926 }
 0x352   : > { %893 = vadd.xlane.f32.xlu0 %v892_v30  ;;  %vm1025_vm1 = vcmp.eq.f32.partialorder %v1024_v46, 8.507059e+37  ;;  %v1009_v58 = vand.u32 2147483647, %v8109_v61  ;;  %v12880_v61 = vld [vmem:[#allocation22_spill] sm:$0xff]  ;;  %v1616_v62 = vmul.f32 0.17677669, %v1608_v1  ;;  %v8247_v30 = vpop.xlane.xlu2 %929 }
 0x353   : > { %1491 = vmatpush.xpose.msra.mxu2 %v1436_v24  ;;  %1520 = vmatpush.xpose.msra.mxu3 %v1437_v3  ;;  %v1023_v38 = vsel %vm1022_vm13, %v8179_v12, %v1019_v55  ;;  %v1008_v12 = vsel %vm1007_vm2, %v8162_v41, %v1004_v23  ;;  %v1012_v17 = vor.u32 1.1754944e-38, %v1011_v9  ;;  %v1610_v41 = vld [vmem:[%s7389_s23 + $0x50] sm:$0xff] }
 0x354   : > { %v1028_v28 = vsel %vm1025_vm1, %v1027_v48, %v1023_v38  ;;  %vm1010_vm3 = vcmp.eq.f32.partialorder %v1009_v58, 8.507059e+37  ;;  %v1618_v25 = vmul.f32 0.17677669, %v1610_v41 }
 0x355   : > { %v1430_v33 = vmul.f32 %v7813_v60, %v1028_v28  ;;  %v1431_v35 = vmul.f32 %v7815_v21, %v1028_v28  ;;  %v1013_v44 = vsel %vm1010_vm3, %v1012_v17, %v1008_v12  ;;  %v1612_v60 = vld [vmem:[%s7389_s23 + $0x60] sm:$0xff]  ;;  %v1614_v21 = vld [vmem:[%s7389_s23 + $0x70] sm:$0xff] }
 0x356   : > { %v1428_v10 = vmul.f32 %v12880_v61, %v1013_v44  ;;  %v1429_v27 = vmul.f32 %v12881_v11, %v1013_v44  ;;  %v1620_v52 = vmul.f32 0.17677669, %v1612_v60  ;;  %v1622_v56 = vmul.f32 0.17677669, %v1614_v21 }
 0x357   : > { %1492 = vmatpush.xpose.msra.mxu2 %v1434_v51  ;;  %1521 = vmatpush.xpose.msra.mxu3 %v1435_v34 }
 0x359   : > { %v8251_v0 = vpop.xlane.xlu1 %848 }
 0x35a   : > { %v8253_v7 = vpop.xlane.xlu2 %851  ;;  %6581 = vrcp.f32 %v8251_v0  ;;  %vm960_vm4 = vweird.f32 %v8251_v0  ;;  %v964_v48 = vand.u32 2147483647, %v8251_v0  ;;  %v966_v9 = vand.u32 2147483648, %v8251_v0 }
 0x35b   : > { %1493 = vmatpush.xpose.msra.mxu2 %v1432_v6  ;;  %1522 = vmatpush.xpose.msra.mxu3 %v1433_v2  ;;  %6583 = vrcp.f32 %v8253_v7  ;;  %v981_v44 = vand.u32 2147483648, %v8253_v7  ;;  %vm975_vm8 = vweird.f32 %v8253_v7  ;;  %v979_v61 = vand.u32 2147483647, %v8253_v7 }
 0x35c   : > { %6585 = vrcp.f32 %v8245_v31  ;;  %v967_v11 = vor.u32 1.1754944e-38, %v966_v9  ;;  %vm965_vm14 = vcmp.eq.f32.partialorder %v964_v48, 8.507059e+37 }
 0x35d   : > { %vm980_vm15 = vcmp.eq.f32.partialorder %v979_v61, 8.507059e+37 }
 0x35f   : > { %1494 = vmatpush.xpose.msra.mxu2 %v1430_v33  ;;  %1523 = vmatpush.xpose.msra.mxu3 %v1431_v35 }
 0x360   : > { %v8259_v24 = vpop.eup %6581 }
 0x361   : > { %v8261_v47 = vpop.eup %6583  ;;  %v956_v3 = vmul.f32 %v8259_v24, %v8251_v0  ;;  %vm961_vm5 = vweird.f32 %v8259_v24 }
 0x362   : > { %v971_v42 = vmul.f32 %v8261_v47, %v8253_v7  ;;  %v8269_v59 = vpop.eup %6585  ;;  %vm976_vm6 = vweird.f32 %v8261_v47  ;;  %vm8298_vm9 = vmor %vm960_vm4, %vm961_vm5 }
 0x363   : > { %1495 = vmatpush.xpose.msra.mxu2 %v1428_v10  ;;  %1524 = vmatpush.xpose.msra.mxu3 %v1429_v27  ;;  %v957_v55 = vsub.f32 1.0, %v956_v3  ;;  %v1346_v38 = vmul.f32 %v8269_v59, %v8245_v31  ;;  %vm8306_vm11 = vmor %vm975_vm8, %vm976_vm6  ;;  %v8322_v3 = vpop.xlane.xlu2 %920 }
 0x364   : > { %v972_v40 = vsub.f32 1.0, %v971_v42  ;;  %v982_v42 = vor.u32 1.1754944e-38, %v981_v44 }
 0x365   : > { %1640 = vxpose.xlu1.b32.start [1/4] (short) %v1616_v62, 128  ;;  %v958_v51 = vmul.f32 %v8259_v24, %v957_v55  ;;  %v1347_v1 = vsub.f32 1.0, %v1346_v38 }
 0x366   : > { %v973_v46 = vmul.f32 %v8261_v47, %v972_v40  ;;  %v8324_v40 = vpop.xlane.xlu1 %917 }
 0x367   : > { %v959_v2 = vadd.f32 %v8259_v24, %v958_v51  ;;  %v8334_v48 = vmul.f32 %v8269_v59, %v1347_v1 }
 0x368   : > { %v974_v17 = vadd.f32 %v8261_v47, %v973_v46 }
 0x369   : > { %v963_v60 = vsel %vm8298_vm9, %v8259_v24, %v959_v2 }
 0x36a   : > { %v978_v0 = vsel %vm8306_vm11, %v8261_v47, %v974_v17  ;;  %v968_v55 = vsel %vm965_vm14, %v967_v11, %v963_v60 }
 0x36b   : > { %v1423_v2 = vmul.f32 %v7789_v26, %v968_v55  ;;  %v8353_v61 = vpop.xlane.xlu2 %914 }
 0x36d   : > { %1641 = vxpose.xlu1.b32.cont [2/4] (short) %v1618_v25, 128 }
 0x375   : > { %1642 = vxpose.xlu1.b32.cont [3/4] (short) %v1620_v52, 128 }
 0x37d   : > { %1643 = vxpose.xlu1.b32.end [4/4] (short) %v1622_v56, 128  ;;  %v8243_v5 = vpop.xlane.xlu0 %935 }
 0x37e   : > { %v1399_v26 = vand.u32 2147483647, %v8243_v5  ;;  %vm1395_vm6 = vweird.f32 %v8243_v5 }
 0x380   : > { %vm8383_vm11 = vcmp.eq.f32.partialorder %v1399_v26, 8.507059e+37 }
 0x38d   : > { %v8249_v43 = vpop.xlane.xlu0 %938 }
 0x38e   : > { %vm1410_vm2 = vweird.f32 %v8249_v43 }
 0x395   : > { %v8257_v63 = vpop.xlane.xlu0 %932 }
 0x396   : > { %vm1380_vm14 = vweird.f32 %v8257_v63 }
 0x39d   : > { %v855_v37 = vpop.xlane.xlu0 %854 }
 0x39e   : > { %6587 = vrcp.f32 %v855_v37  ;;  %v996_v12 = vand.u32 2147483648, %v855_v37  ;;  %v994_v35 = vand.u32 2147483647, %v855_v37  ;;  %vm990_vm10 = vweird.f32 %v855_v37 }
 0x39f   : > { %6589 = vrcp.f32 %v8249_v43 }
 0x3a0   : > { %6591 = vrcp.f32 %v8243_v5  ;;  %v997_v56 = vor.u32 1.1754944e-38, %v996_v12  ;;  %vm995_vm13 = vcmp.eq.f32.partialorder %v994_v35, 8.507059e+37 }
 0x3a1   : > { %6593 = vrcp.f32 %v8247_v30 }
 0x3a2   : > { %6595 = vrcp.f32 %v8257_v63 }
 0x3a4   : > { %v6588_v34 = vpop.eup %6587 }
 0x3a5   : > { %v8272_v19 = vpop.xlane.xlu0 %923  ;;  %v8276_v15 = vpop.eup %6589  ;;  %v986_v23 = vmul.f32 %v6588_v34, %v855_v37  ;;  %vm991_vm7 = vweird.f32 %v6588_v34 }
 0x3a6   : > { %v8287_v58 = vpop.eup %6591  ;;  %v1406_v28 = vmul.f32 %v8276_v15, %v8249_v43  ;;  %vm992_vm12 = vmor %vm990_vm10, %vm991_vm7  ;;  %vm1411_vm1 = vweird.f32 %v8276_v15 }
 0x3a7   : > { %v987_v6 = vsub.f32 1.0, %v986_v23  ;;  %v1391_v27 = vmul.f32 %v8287_v58, %v8243_v5  ;;  %v8313_v52 = vpop.eup %6593  ;;  %v983_v23 = vsel %vm980_vm15, %v982_v42, %v978_v0  ;;  %vm1396_vm3 = vweird.f32 %v8287_v58  ;;  %vm8358_vm5 = vmor %vm1410_vm2, %vm1411_vm1 }
 0x3a8   : > { %v1407_v21 = vsub.f32 1.0, %v1406_v28  ;;  %v8320_v7 = vpop.eup %6595  ;;  %v1361_v47 = vmul.f32 %v8313_v52, %v8247_v30  ;;  %v1425_v12 = vmul.f32 %v7835_v57, %v983_v23  ;;  %v1414_v57 = vand.u32 2147483647, %v8249_v43  ;;  %vm8376_vm8 = vmor %vm1395_vm6, %vm1396_vm3 }
 0x3a9   : > { %v988_v33 = vmul.f32 %v6588_v34, %v987_v6  ;;  %v1392_v51 = vsub.f32 1.0, %v1391_v27  ;;  %vm1366_vm1 = vweird.f32 %v8313_v52  ;;  %vm1351_vm2 = vweird.f32 %v8269_v59 }
 0x3aa   : > { %v1408_v9 = vmul.f32 %v8276_v15, %v1407_v21  ;;  %vm1415_vm10 = vcmp.eq.f32.partialorder %v1414_v57, 8.507059e+37  ;;  %vm1365_vm3 = vweird.f32 %v8247_v30  ;;  %v1369_v57 = vand.u32 2147483647, %v8247_v30 }
 0x3ab   : > { %v989_v41 = vadd.f32 %v6588_v34, %v988_v33  ;;  %v1393_v17 = vmul.f32 %v8287_v58, %v1392_v51  ;;  %v1362_v33 = vsub.f32 1.0, %v1361_v47  ;;  %vm1350_vm6 = vweird.f32 %v8245_v31 }
 0x3ac   : > { %v1409_v44 = vadd.f32 %v8276_v15, %v1408_v9 }
 0x3ad   : > { %v8304_v62 = vpop.xlane.xlu0 %845  ;;  %v993_v37 = vsel %vm992_vm12, %v6588_v34, %v989_v41  ;;  %v1376_v34 = vmul.f32 %v8320_v7, %v8257_v63  ;;  %v1394_v41 = vadd.f32 %v8287_v58, %v1393_v17  ;;  %v1363_v21 = vmul.f32 %v8313_v52, %v1362_v33 }
 0x3ae   : > { %6597 = vrcp.f32 %v8304_v62  ;;  %v998_v24 = vsel %vm995_vm13, %v997_v56, %v993_v37  ;;  %v951_v1 = vand.u32 2147483648, %v8304_v62  ;;  %v949_v11 = vand.u32 2147483647, %v8304_v62 }
 0x3af   : > { %v1426_v46 = vmul.f32 %v7893_v13, %v998_v24  ;;  %v1427_v38 = vmul.f32 %v7897_v32, %v998_v24  ;;  %6599 = vrcp.f32 %v8324_v40  ;;  %v1424_v13 = vmul.f32 %v7833_v29, %v983_v23 }
 0x3b0   : > { %v1422_v32 = vmul.f32 %v7787_v22, %v968_v55  ;;  %6601 = vrcp.f32 %v8272_v19  ;;  %v1377_v35 = vsub.f32 1.0, %v1376_v34  ;;  %v1416_v22 = vand.u32 2147483648, %v8249_v43  ;;  %v8472_v55 = vld [vmem:[%s7389_s23 + $0x218] sm:$0xff] }
 0x3b1   : > { %1496 = vmatpush.xpose.msra.mxu2 %v1426_v46  ;;  %1525 = vmatpush.xpose.msra.mxu3 %v1427_v38  ;;  %6603 = vrcp.f32 %v8322_v3  ;;  %v1413_v43 = vsel %vm8358_vm5, %v8276_v15, %v1409_v44  ;;  %vm945_vm7 = vweird.f32 %v8304_v62  ;;  %v1401_v15 = vand.u32 2147483648, %v8243_v5  ;;  %vm8443_vm5 = vmor %vm1365_vm3, %vm1366_vm1 }
 0x3b2   : > { %v1378_v60 = vmul.f32 %v8320_v7, %v1377_v35  ;;  %v1417_v37 = vor.u32 1.1754944e-38, %v1416_v22  ;;  %6605 = vrcp.f32 %v8353_v61  ;;  %v952_v24 = vor.u32 1.1754944e-38, %v951_v1 }
 0x3b3   : > { %vm950_vm12 = vcmp.eq.f32.partialorder %v949_v11, 8.507059e+37  ;;  %v1398_v38 = vsel %vm8376_vm8, %v8287_v58, %v1394_v41  ;;  %vm1381_vm13 = vweird.f32 %v8320_v7  ;;  %v1364_v35 = vadd.f32 %v8313_v52, %v1363_v21 }
 0x3b4   : > { %v6598_v6 = vpop.eup %6597  ;;  %v1418_v46 = vsel %vm1415_vm10, %v1417_v37, %v1413_v43  ;;  %v1379_v47 = vadd.f32 %v8320_v7, %v1378_v60  ;;  %vm8405_vm15 = vmor %vm1380_vm14, %vm1381_vm13  ;;  %v1371_v22 = vand.u32 2147483648, %v8247_v30  ;;  %v1354_v41 = vand.u32 2147483647, %v8245_v31 }
 0x3b5   : > { %v941_v28 = vmul.f32 %v6598_v6, %v8304_v62  ;;  %1497 = vmatpush.xpose.msra.mxu2 %v1424_v13  ;;  %1526 = vmatpush.xpose.msra.mxu3 %v1425_v12  ;;  %vm946_vm4 = vweird.f32 %v6598_v6  ;;  %v8363_v25 = vpop.eup %6599  ;;  %v1386_v13 = vand.u32 2147483648, %v8257_v63  ;;  %v1483_v58 = vmul.f32 %v7910_v50, %v1418_v46  ;;  %v8417_v50 = vld [vmem:[%s7389_s23 + $0x208] sm:$0xff]  ;;  %v8423_v33 = vpop.xlane.xlu0 %911 }
 0x3b6   : > { %v8371_v56 = vpop.eup %6601  ;;  %vm947_vm9 = vmor %vm945_vm7, %vm946_vm4  ;;  %v1301_v44 = vmul.f32 %v8363_v25, %v8324_v40  ;;  %6607 = vrcp.f32 %v8423_v33  ;;  %v1368_v30 = vsel %vm8443_vm5, %v8313_v52, %v1364_v35  ;;  %v1372_v21 = vor.u32 1.1754944e-38, %v1371_v22  ;;  %v12902_v35 = vld [vmem:[#allocation31_spill] sm:$0xff] }
 0x3b7   : > { %v942_v29 = vsub.f32 1.0, %v941_v28  ;;  %v8387_v62 = vpop.eup %6603  ;;  %v1331_v5 = vmul.f32 %v8371_v56, %v8272_v19  ;;  %vm8454_vm7 = vmor %vm1350_vm6, %vm1351_vm2  ;;  %vm1370_vm8 = vcmp.eq.f32.partialorder %v1369_v57, 8.507059e+37  ;;  %vm1336_vm10 = vweird.f32 %v8371_v56  ;;  %v8524_v57 = vld [vmem:[%s7389_s23 + $0x220] sm:$0xff] }
 0x3b8   : > { %v1316_v12 = vmul.f32 %v8387_v62, %v8322_v3  ;;  %v1302_v60 = vsub.f32 1.0, %v1301_v44  ;;  %vm1305_vm13 = vweird.f32 %v8324_v40  ;;  %vm1306_vm14 = vweird.f32 %v8363_v25 }
 0x3b9   : > { %v943_v10 = vmul.f32 %v6598_v6, %v942_v29  ;;  %1498 = vmatpush.xpose.msra.mxu2 %v1422_v32  ;;  %1527 = vmatpush.xpose.msra.mxu3 %v1423_v2  ;;  %v1482_v32 = vmul.f32 %v7907_v14, %v1418_v46  ;;  %v1384_v2 = vand.u32 2147483647, %v8257_v63  ;;  %v8414_v14 = vld [vmem:[%s7389_s23 + $0x200] sm:$0xff]  ;;  %v8419_v63 = vpop.eup %6605  ;;  %v1332_v17 = vsub.f32 1.0, %v1331_v5 }
 0x3ba   : > { %v1387_v29 = vor.u32 1.1754944e-38, %v1386_v13  ;;  %v1286_v42 = vmul.f32 %v8419_v63, %v8353_v61  ;;  %v1303_v5 = vmul.f32 %v8363_v25, %v1302_v60  ;;  %vm1320_vm2 = vweird.f32 %v8322_v3 }
 0x3bb   : > { %v944_v0 = vadd.f32 %v6598_v6, %v943_v10  ;;  %vm1385_vm4 = vcmp.eq.f32.partialorder %v1384_v2, 8.507059e+37  ;;  %v1333_v43 = vmul.f32 %v8371_v56, %v1332_v17  ;;  %v12901_v17 = vld [vmem:[#allocation30_spill] sm:$0xff]  ;;  %vm1291_vm6 = vweird.f32 %v8419_v63 }
 0x3bd   : > { %v948_v51 = vsel %vm947_vm9, %v6598_v6, %v944_v0  ;;  %v1402_v6 = vor.u32 1.1754944e-38, %v1401_v15  ;;  %v1373_v15 = vsel %vm1370_vm8, %v1372_v21, %v1368_v30  ;;  %vm1355_vm9 = vcmp.eq.f32.partialorder %v1354_v41, 8.507059e+37  ;;  %v12908_v21 = vld [vmem:[#allocation44_spill] sm:$0xff] }
 0x3be   : > { %v953_v23 = vsel %vm950_vm12, %v952_v24, %v948_v51  ;;  %v8469_v24 = vld [vmem:[%s7389_s23 + $0x210] sm:$0xff]  ;;  %v8474_v51 = vpop.xlane.xlu2 %905  ;;  %vm1290_vm8 = vweird.f32 %v8353_v61 }
 0x3bf   : > { %v1420_v34 = vmul.f32 %v7899_v45, %v953_v23  ;;  %v1421_v9 = vmul.f32 %v7905_v49, %v953_v23  ;;  %v1403_v28 = vsel %vm8383_vm11, %v1402_v6, %v1398_v38  ;;  %v1349_v49 = vadd.f32 %v8269_v59, %v8334_v48 }
 0x3c0   : > { %v1383_v48 = vsel %vm8405_vm15, %v8320_v7, %v1379_v47  ;;  %v1480_v26 = vmul.f32 %v7873_v54, %v1403_v28  ;;  %v1481_v1 = vmul.f32 %v7875_v18, %v1403_v28  ;;  %v8438_v7 = vpop.xlane.xlu1 %908  ;;  %v1356_v54 = vand.u32 2147483648, %v8245_v31  ;;  %v12898_v47 = vld [vmem:[#allocation34_spill] sm:$0xff] }
 0x3c1   : > { %1499 = vmatpush.xpose.msra.mxu2 %v1420_v34  ;;  %1528 = vmatpush.xpose.msra.mxu3 %v1421_v9  ;;  %v1388_v10 = vsel %vm1385_vm4, %v1387_v29, %v1383_v48  ;;  %v1317_v18 = vsub.f32 1.0, %v1316_v12  ;;  %v1353_v0 = vsel %vm8454_vm7, %v8269_v59, %v1349_v49  ;;  %6609 = vrcp.f32 %v8438_v7  ;;  %vm8536_vm4 = vmor %vm1305_vm13, %vm1306_vm14 }
 0x3c2   : > { %v1478_v52 = vmul.f32 %v7926_v8, %v1388_v10  ;;  %v1479_v37 = vmul.f32 %v7930_v36, %v1388_v10  ;;  %v1357_v31 = vor.u32 1.1754944e-38, %v1356_v54  ;;  %v1334_v59 = vadd.f32 %v8371_v56, %v1333_v43  ;;  %v8479_v36 = vpop.eup %6607  ;;  %v8527_v10 = vld [vmem:[%s7389_s23 + $0x228] sm:$0xff] }
 0x3c3   : > { %v1318_v8 = vmul.f32 %v8387_v62, %v1317_v18  ;;  %v1341_v38 = vand.u32 2147483648, %v8272_v19  ;;  %v1476_v23 = vmul.f32 %v7823_v20, %v1373_v15  ;;  %v1477_v34 = vmul.f32 %v12898_v47, %v1373_v15  ;;  %v12907_v43 = vld [vmem:[#allocation13_spill] sm:$0xff] }
 0x3c4   : > { %1500 = vmatmul.f32.vlgmr.msra.gmra.mxu2 %v8414_v14  ;;  %1529 = vmatmul.f32.vlgmr.msra.gmra.mxu3 %v8417_v50  ;;  %v1358_v46 = vsel %vm1355_vm9, %v1357_v31, %v1353_v0  ;;  %vm1335_vm11 = vweird.f32 %v8272_v19  ;;  %v1339_v9 = vand.u32 2147483647, %v8272_v19  ;;  %v1287_v6 = vsub.f32 1.0, %v1286_v42  ;;  %vm8567_vm9 = vmor %vm1290_vm8, %vm1291_vm6 }
 0x3c5   : > { %1542 = vmatpush.xpose.msrb.mxu2 %v1482_v32  ;;  %1571 = vmatpush.xpose.msrb.mxu3 %v1483_v58  ;;  %6611 = vrcp.f32 %v8474_v51  ;;  %vm8490_vm12 = vmor %vm1335_vm11, %vm1336_vm10  ;;  %v1271_v19 = vmul.f32 %v8479_v36, %v8423_v33  ;;  %v8500_v32 = vpop.xlane.xlu0 %902  ;;  %v1319_v2 = vadd.f32 %v8387_v62, %v1318_v8  ;;  %vm1321_vm15 = vweird.f32 %v8387_v62 }
 0x3c6   : > { %v1338_v58 = vsel %vm8490_vm12, %v8371_v56, %v1334_v59  ;;  %v1342_v28 = vor.u32 1.1754944e-38, %v1341_v38  ;;  %v1324_v45 = vand.u32 2147483647, %v8322_v3  ;;  %v1326_v49 = vand.u32 2147483648, %v8322_v3  ;;  %vm8518_vm3 = vmor %vm1320_vm2, %vm1321_vm15  ;;  %v8553_v42 = vpop.xlane.xlu2 %896  ;;  %v12909_v38 = vld [vmem:[#allocation35_spill] sm:$0xff] }
 0x3c7   : > { %v8496_v20 = vpop.eup %6609  ;;  %v1304_v12 = vadd.f32 %v8363_v25, %v1303_v5  ;;  %v1474_v48 = vmul.f32 %v12901_v17, %v1358_v46  ;;  %v1475_v44 = vmul.f32 %v12902_v35, %v1358_v46  ;;  %vm1340_vm1 = vcmp.eq.f32.partialorder %v1339_v9, 8.507059e+37  ;;  %v12914_v35 = vld [vmem:[#allocation33_spill] sm:$0xff] }
 0x3c8   : > { %v1256_v56 = vmul.f32 %v8496_v20, %v8438_v7  ;;  %v8515_v29 = vpop.xlane.xlu1 %899  ;;  %6613 = vrcp.f32 %v8500_v32  ;;  %v1343_v22 = vsel %vm1340_vm1, %v1342_v28, %v1338_v58  ;;  %v1272_v11 = vsub.f32 1.0, %v1271_v19  ;;  %v8576_v58 = vld [vmem:[%s7389_s23 + $0x230] sm:$0xff] }
 0x3c9   : > { %1543 = vmatpush.xpose.msrb.mxu2 %v1480_v26  ;;  %1572 = vmatpush.xpose.msrb.mxu3 %v1481_v1  ;;  %v1288_v1 = vmul.f32 %v8419_v63, %v1287_v6  ;;  %v1323_v3 = vsel %vm8518_vm3, %v8387_v62, %v1319_v2  ;;  %v1311_v18 = vand.u32 2147483648, %v8324_v40  ;;  %vm1325_vm5 = vcmp.eq.f32.partialorder %v1324_v45, 8.507059e+37 }
 0x3ca   : > { %v1327_v27 = vor.u32 1.1754944e-38, %v1326_v49  ;;  %v1308_v41 = vsel %vm8536_vm4, %v8363_v25, %v1304_v12  ;;  %v1309_v62 = vand.u32 2147483647, %v8324_v40  ;;  %6615 = vrcp.f32 %v8515_v29 }
 0x3cb   : > { %v8541_v30 = vpop.eup %6611  ;;  %v1472_v60 = vmul.f32 %v12907_v43, %v1343_v22  ;;  %v1473_v0 = vmul.f32 %v12908_v21, %v1343_v22  ;;  %v1289_v25 = vadd.f32 %v8419_v63, %v1288_v1  ;;  %v1312_v31 = vor.u32 1.1754944e-38, %v1311_v18 }
 0x3cc   : > { %1503 = vmatmul.f32.gmra.mxu2 %v8469_v24  ;;  %1532 = vmatmul.f32.gmra.mxu3 %v8472_v55  ;;  %v1328_v15 = vsel %vm1325_vm5, %v1327_v27, %v1323_v3  ;;  %v1241_v40 = vmul.f32 %v8541_v30, %v8474_v51  ;;  %v1273_v59 = vmul.f32 %v8479_v36, %v1272_v11  ;;  %vm1310_vm7 = vcmp.eq.f32.partialorder %v1309_v62, 8.507059e+37  ;;  %v12917_v62 = vld [vmem:[#allocation37_spill] sm:$0xff] }
 0x3cd   : > { %1544 = vmatpush.xpose.msrb.mxu2 %v1478_v52  ;;  %1573 = vmatpush.xpose.msrb.mxu3 %v1479_v37  ;;  %v1296_v52 = vand.u32 2147483648, %v8353_v61  ;;  %v1257_v37 = vsub.f32 1.0, %v1256_v56  ;;  %v1294_v46 = vand.u32 2147483647, %v8353_v61  ;;  %6617 = vrcp.f32 %v8553_v42  ;;  %v8579_v61 = vld [vmem:[%s7389_s23 + $0x238] sm:$0xff]  ;;  %v8585_v49 = vpop.xlane.xlu0 %893 }
 0x3ce   : > { %v8560_v8 = vpop.eup %6613  ;;  %v1470_v5 = vmul.f32 %v12909_v38, %v1328_v15  ;;  %v1293_v6 = vsel %vm8567_vm9, %v8419_v63, %v1289_v25  ;;  %v1242_v28 = vsub.f32 1.0, %v1241_v40  ;;  %v1274_v12 = vadd.f32 %v8479_v36, %v1273_v59  ;;  %v12913_v63 = vld [vmem:[#allocation32_spill] sm:$0xff]  ;;  %v1609_v40 = vld [vmem:[%s7389_s23 + $0x48] sm:$0xff] }
 0x3cf   : > { %v1297_v13 = vor.u32 1.1754944e-38, %v1296_v52  ;;  %v1258_v19 = vmul.f32 %v8496_v20, %v1257_v37  ;;  %v1226_v45 = vmul.f32 %v8560_v8, %v8500_v32  ;;  %vm1276_vm10 = vweird.f32 %v8479_v36 }
 0x3d0   : > { %v8581_v2 = vpop.eup %6615  ;;  %vm1295_vm11 = vcmp.eq.f32.partialorder %v1294_v46, 8.507059e+37  ;;  %vm1275_vm12 = vweird.f32 %v8423_v33  ;;  %v1279_v22 = vand.u32 2147483647, %v8423_v33  ;;  %6619 = vrcp.f32 %v8585_v49 }
 0x3d1   : > { %1545 = vmatpush.xpose.msrb.mxu2 %v1476_v23  ;;  %1574 = vmatpush.xpose.msrb.mxu3 %v1477_v34  ;;  %v12910_v23 = vld [vmem:[#allocation36_spill] sm:$0xff]  ;;  %v1313_v34 = vsel %vm1310_vm7, %v1312_v31, %v1308_v41  ;;  %v1298_v56 = vsel %vm1295_vm11, %v1297_v13, %v1293_v6  ;;  %v1211_v26 = vmul.f32 %v8581_v2, %v8515_v29  ;;  %vm8599_vm13 = vmor %vm1275_vm12, %vm1276_vm10  ;;  %vm1261_vm14 = vweird.f32 %v8496_v20 }
 0x3d2   : > { %v1471_v47 = vmul.f32 %v12910_v23, %v1328_v15  ;;  %v1468_v17 = vmul.f32 %v12913_v63, %v1313_v34  ;;  %v1259_v11 = vadd.f32 %v8496_v20, %v1258_v19  ;;  %v1278_v54 = vsel %vm8599_vm13, %v8479_v36, %v1274_v12  ;;  %v12935_v19 = vld [vmem:[#allocation45_spill] sm:$0xff] }
 0x3d3   : > { %v8605_v3 = vpop.eup %6617  ;;  %v1243_v18 = vmul.f32 %v8541_v30, %v1242_v28  ;;  %vm1260_vm15 = vweird.f32 %v8438_v7  ;;  %v1266_v41 = vand.u32 2147483648, %v8438_v7  ;;  %v1466_v43 = vmul.f32 %v12917_v62, %v1298_v56  ;;  %v12929_v62 = vld [vmem:[#allocation42_spill] sm:$0xff] }
 0x3d4   : > { %1506 = vmatmul.f32.gmra.mxu2 %v8524_v57  ;;  %1535 = vmatmul.f32.gmra.mxu3 %v8527_v10  ;;  %vm1280_vm1 = vcmp.eq.f32.partialorder %v1279_v22, 8.507059e+37  ;;  %vm8615_vm2 = vmor %vm1260_vm15, %vm1261_vm14  ;;  %v1264_v52 = vand.u32 2147483647, %v8438_v7  ;;  %v1212_v37 = vsub.f32 1.0, %v1211_v26  ;;  %v1196_v36 = vmul.f32 %v8605_v3, %v8553_v42 }
 0x3d5   : > { %1546 = vmatpush.xpose.msrb.mxu2 %v1474_v48  ;;  %1575 = vmatpush.xpose.msrb.mxu3 %v1475_v44  ;;  %v1281_v48 = vand.u32 2147483648, %v8423_v33  ;;  %v1469_v44 = vmul.f32 %v12914_v35, %v1313_v34  ;;  %v1227_v33 = vsub.f32 1.0, %v1226_v45  ;;  %v1263_v25 = vsel %vm8615_vm2, %v8496_v20, %v1259_v11  ;;  %v12922_v20 = vld [vmem:[#allocation12_spill] sm:$0xff]  ;;  %v1611_v11 = vld [vmem:[%s7389_s23 + $0x58] sm:$0xff] }
 0x3d6   : > { %v1244_v31 = vadd.f32 %v8541_v30, %v1243_v18  ;;  %vm1246_vm3 = vweird.f32 %v8541_v30  ;;  %v1617_v46 = vmul.f32 0.17677669, %v1609_v40  ;;  %v8629_v7 = vpop.eup %6619  ;;  %v1267_v38 = vor.u32 1.1754944e-38, %v1266_v41 }
 0x3d7   : > { %v1282_v27 = vor.u32 1.1754944e-38, %v1281_v48  ;;  %v1228_v59 = vmul.f32 %v8560_v8, %v1227_v33  ;;  %v1251_v23 = vand.u32 2147483648, %v8474_v51  ;;  %vm1265_vm4 = vcmp.eq.f32.partialorder %v1264_v52, 8.507059e+37  ;;  %v12925_v48 = vld [vmem:[#allocation39_spill] sm:$0xff] }
 0x3d8   : > { %vm1245_vm5 = vweird.f32 %v8474_v51  ;;  %1672 = vxpose.xlu2.b32.start [1/4] (short) %v1617_v46, 128  ;;  %v1197_v6 = vsub.f32 1.0, %v1196_v36  ;;  %v1268_v13 = vsel %vm1265_vm4, %v1267_v38, %v1263_v25  ;;  %v1213_v28 = vmul.f32 %v8581_v2, %v1212_v37  ;;  %v1613_v46 = vld [vmem:[%s7389_s23 + $0x68] sm:$0xff] }
 0x3d9   : > { %1547 = vmatpush.xpose.msrb.mxu2 %v1472_v60  ;;  %1576 = vmatpush.xpose.msrb.mxu3 %v1473_v0  ;;  %v12918_v60 = vld [vmem:[#allocation38_spill] sm:$0xff]  ;;  %v1283_v15 = vsel %vm1280_vm1, %v1282_v27, %v1278_v54  ;;  %vm8636_vm6 = vmor %vm1245_vm5, %vm1246_vm3  ;;  %v1181_v45 = vmul.f32 %v8629_v7, %v8585_v49  ;;  %vm1231_vm7 = vweird.f32 %v8560_v8  ;;  %v1252_v63 = vor.u32 1.1754944e-38, %v1251_v23  ;;  %v12933_v23 = vld [vmem:[#allocation11_spill] sm:$0xff] }
 0x3da   : > { %v1467_v21 = vmul.f32 %v12918_v60, %v1298_v56  ;;  %v1465_v9 = vmul.f32 %v12922_v20, %v1283_v15  ;;  %v1248_v12 = vsel %vm8636_vm6, %v8541_v30, %v1244_v31  ;;  %v1462_v35 = vmul.f32 %v12925_v48, %v1268_v13  ;;  %v12930_v60 = vld [vmem:[#allocation43_spill] sm:$0xff]  ;;  %v1630_v48 = vld [vmem:[%s7389_s23 + $0x170] sm:$0xff] }
 0x3db   : > { %vm1230_vm9 = vweird.f32 %v8500_v32  ;;  %v1234_v22 = vand.u32 2147483647, %v8500_v32  ;;  %v1214_v30 = vadd.f32 %v8581_v2, %v1213_v28  ;;  %vm1216_vm11 = vweird.f32 %v8581_v2 }
 0x3dc   : > { %1509 = vmatmul.f32.gmra.mxu2 %v8576_v58  ;;  %1538 = vmatmul.f32.gmra.mxu3 %v8579_v61  ;;  %vm8653_vm10 = vmor %vm1230_vm9, %vm1231_vm7  ;;  %v1182_v33 = vsub.f32 1.0, %v1181_v45  ;;  %v1198_v18 = vmul.f32 %v8605_v3, %v1197_v6  ;;  %vm1215_vm12 = vweird.f32 %v8515_v29  ;;  %v1221_v41 = vand.u32 2147483648, %v8515_v29  ;;  %v12936_v45 = vld [vmem:[#allocation46_spill] sm:$0xff] }
 0x3dd   : > { %1548 = vmatpush.xpose.msrb.mxu2 %v1470_v5  ;;  %1577 = vmatpush.xpose.msrb.mxu3 %v1471_v47  ;;  %v1249_v5 = vand.u32 2147483647, %v8474_v51  ;;  %v12921_v47 = vld [vmem:[#allocation8_spill] sm:$0xff]  ;;  %v1229_v51 = vadd.f32 %v8560_v8, %v1228_v59  ;;  %vm1235_vm13 = vcmp.eq.f32.partialorder %v1234_v22, 8.507059e+37  ;;  %v1219_v0 = vand.u32 2147483647, %v8515_v29  ;;  %vm1217_vm14 = vmor %vm1215_vm12, %vm1216_vm11 }
 0x3de   : > { %v1464_v34 = vmul.f32 %v12921_v47, %v1283_v15  ;;  %v1199_v37 = vadd.f32 %v8605_v3, %v1198_v18  ;;  %vm1201_vm15 = vweird.f32 %v8605_v3  ;;  %v1183_v36 = vmul.f32 %v8629_v7, %v1182_v33  ;;  %v1626_v22 = vld [vmem:[%s7389_s23 + $0x150] sm:$0xff] }
 0x3df   : > { %vm1250_vm8 = vcmp.eq.f32.partialorder %v1249_v5, 8.507059e+37  ;;  %v1233_v54 = vsel %vm8653_vm10, %v8560_v8, %v1229_v51  ;;  %v1218_v8 = vsel %vm1217_vm14, %v8581_v2, %v1214_v30  ;;  %v1222_v15 = vor.u32 1.1754944e-38, %v1221_v41 }
 0x3e0   : > { %v1253_v26 = vsel %vm1250_vm8, %v1252_v63, %v1248_v12  ;;  %v1204_v25 = vand.u32 2147483647, %v8553_v42  ;;  %v1206_v29 = vand.u32 2147483648, %v8553_v42  ;;  %vm1220_vm1 = vcmp.eq.f32.partialorder %v1219_v0, 8.507059e+37 }
 0x3e1   : > { %1549 = vmatpush.xpose.msrb.mxu2 %v1468_v17  ;;  %1578 = vmatpush.xpose.msrb.mxu3 %v1469_v44  ;;  %v1236_v17 = vand.u32 2147483648, %v8500_v32  ;;  %v12926_v44 = vld [vmem:[#allocation40_spill] sm:$0xff]  ;;  %v1619_v32 = vmul.f32 0.17677669, %v1611_v11  ;;  %vm1200_vm2 = vweird.f32 %v8553_v42  ;;  %v1223_v59 = vsel %vm1220_vm1, %v1222_v15, %v1218_v8 }
 0x3e2   : > { %v1463_v56 = vmul.f32 %v12926_v44, %v1268_v13  ;;  %vm8680_vm3 = vmor %vm1200_vm2, %vm1201_vm15  ;;  %v1184_v5 = vadd.f32 %v8629_v7, %v1183_v36  ;;  %vm1186_vm4 = vweird.f32 %v8629_v7  ;;  %vm1205_vm5 = vcmp.eq.f32.partialorder %v1204_v25, 8.507059e+37  ;;  %v1628_v44 = vld [vmem:[%s7389_s23 + $0x160] sm:$0xff] }
 0x3e3   : > { %v1237_v27 = vor.u32 1.1754944e-38, %v1236_v17  ;;  %1673 = vxpose.xlu2.b32.cont [2/4] (short) %v1619_v32, 128  ;;  %v1203_v38 = vsel %vm8680_vm3, %v8605_v3, %v1199_v37  ;;  %v1191_v42 = vand.u32 2147483648, %v8585_v49  ;;  %v1456_v47 = vmul.f32 %v12933_v23, %v1223_v59 }
 0x3e4   : > { %vm1185_vm6 = vweird.f32 %v8585_v49 }
 0x3e5   : > { %1550 = vmatpush.xpose.msrb.mxu2 %v1466_v43  ;;  %1579 = vmatpush.xpose.msrb.mxu3 %v1467_v21  ;;  %v1460_v43 = vmul.f32 %v12929_v62, %v1253_v26  ;;  %v1461_v21 = vmul.f32 %v12930_v60, %v1253_v26  ;;  %v1238_v52 = vsel %vm1235_vm13, %v1237_v27, %v1233_v54  ;;  %vm1187_vm7 = vmor %vm1185_vm6, %vm1186_vm4  ;;  %v1192_v13 = vor.u32 1.1754944e-38, %v1191_v42  ;;  %v1625_v26 = vld [vmem:[%s7389_s23 + $0x148] sm:$0xff] }
 0x3e6   : > { %v1458_v40 = vmul.f32 %v8142_v4, %v1238_v52  ;;  %v1459_v31 = vmul.f32 %v8147_v53, %v1238_v52  ;;  %v1621_v4 = vmul.f32 0.17677669, %v1613_v46  ;;  %v1207_v53 = vor.u32 1.1754944e-38, %v1206_v29 }
 0x3e7   : > { %v1188_v6 = vsel %vm1187_vm7, %v8629_v7, %v1184_v5  ;;  %v1631_v7 = vld [vmem:[%s7389_s23 + $0x178] sm:$0xff] }
 0x3e8   : > { %v1208_v3 = vsel %vm1205_vm5, %v1207_v53, %v1203_v38 }
 0x3e9   : > { %1551 = vmatpush.xpose.msrb.mxu2 %v1464_v34  ;;  %1580 = vmatpush.xpose.msrb.mxu3 %v1465_v9  ;;  %v12934_v34 = vld [vmem:[#allocation41_spill] sm:$0xff]  ;;  %v1189_v9 = vand.u32 2147483647, %v8585_v49  ;;  %v1454_v28 = vmul.f32 %v12935_v19, %v1208_v3  ;;  %v1455_v12 = vmul.f32 %v12936_v45, %v1208_v3  ;;  %v1615_v49 = vld [vmem:[%s7389_s23 + $0x78] sm:$0xff] }
 0x3ea   : > { %v1457_v20 = vmul.f32 %v12934_v34, %v1223_v59 }
 0x3eb   : > { %1674 = vxpose.xlu2.b32.cont [3/4] (short) %v1621_v4, 128  ;;  %vm1190_vm8 = vcmp.eq.f32.partialorder %v1189_v9, 8.507059e+37 }
 0x3ec   : > { %v1193_v51 = vsel %vm1190_vm8, %v1192_v13, %v1188_v6 }
 0x3ed   : > { %1552 = vmatpush.xpose.msrb.mxu2 %v1462_v35  ;;  %1581 = vmatpush.xpose.msrb.mxu3 %v1463_v56  ;;  %v1452_v63 = vmul.f32 %v8191_v16, %v1193_v51  ;;  %v1453_v17 = vmul.f32 %v8195_v39, %v1193_v51  ;;  %v1623_v35 = vmul.f32 0.17677669, %v1615_v49  ;;  %v1629_v56 = vld [vmem:[%s7389_s23 + $0x168] sm:$0xff]  ;;  %v1627_v16 = vld [vmem:[%s7389_s23 + $0x158] sm:$0xff]  ;;  %v1624_v39 = vld [vmem:[%s7389_s23 + $0x140] sm:$0xff] }
 0x3f1   : > { %1553 = vmatpush.xpose.msrb.mxu2 %v1460_v43  ;;  %1582 = vmatpush.xpose.msrb.mxu3 %v1461_v21 }
 0x3f3   : > { %1675 = vxpose.xlu2.b32.end [4/4] (short) %v1623_v35, 128 }
 0x3f5   : > { %1554 = vmatpush.xpose.msrb.mxu2 %v1458_v40  ;;  %1583 = vmatpush.xpose.msrb.mxu3 %v1459_v31 }
 0x3f9   : > { %1555 = vmatpush.xpose.msrb.mxu2 %v1456_v47  ;;  %1584 = vmatpush.xpose.msrb.mxu3 %v1457_v20 }
 0x3fd   : > { %1556 = vmatpush.xpose.msrb.mxu2 %v1454_v28  ;;  %1585 = vmatpush.xpose.msrb.mxu3 %v1455_v12 }
 0x401   : > { %1557 = vmatpush.xpose.msrb.mxu2 %v1452_v63  ;;  %1586 = vmatpush.xpose.msrb.mxu3 %v1453_v17 }
 0x404   : > { %1558 = vmatmul.f32.vlgmr.msrb.gmra.mxu2 %v8414_v14  ;;  %1587 = vmatmul.f32.vlgmr.msrb.gmra.mxu3 %v8417_v50 }
 0x405   : > { %1812 = vmatpush.msra.mxu2 %v1630_v48  ;;  %1925 = vmatpush.msra.mxu3 %v1631_v7 }
 0x407   : > { %1813 = vmatpush.msra.mxu2 %v1628_v44  ;;  %1926 = vmatpush.msra.mxu3 %v1629_v56 }
 0x409   : > { %1814 = vmatpush.msra.mxu2 %v1626_v22  ;;  %1927 = vmatpush.msra.mxu3 %v1627_v16  ;;  %v1656_v1 = vpop.trf.xlu1 }
 0x40b   : > { %1815 = vmatpush.msra.mxu2 %v1624_v39  ;;  %1928 = vmatpush.msra.mxu3 %v1625_v26 }
 0x40c   : > { %1561 = vmatmul.f32.gmra.mxu2 %v8469_v24  ;;  %1590 = vmatmul.f32.gmra.mxu3 %v8472_v55 }
 0x411   : > { %v1657_v14 = vpop.trf.xlu1 }
 0x414   : > { %1564 = vmatmul.f32.gmra.mxu2 %v8524_v57  ;;  %1593 = vmatmul.f32.gmra.mxu3 %v8527_v10 }
 0x419   : > { %v1658_v50 = vpop.trf.xlu1 }
 0x41c   : > { %1567 = vmatmul.f32.gmra.mxu2 %v8576_v58  ;;  %1596 = vmatmul.f32.gmra.mxu3 %v8579_v61 }
 0x421   : > { %v1659_v30 = vpop.trf.xlu1 }
 0x424   : > { %6177 = vmatmul.msk.f32.vlgmr.msra.gmra.mxu2 %vm233_vm0, %v1656_v1  ;;  %6209 = vmatmul.msk.f32.vlgmr.msra.gmra.mxu3 %vm233_vm0, %v1656_v1 }
 0x429   : > { %v1660_v24 = vpop.trf.xlu1 }
 0x42c   : > { %6178 = vmatmul.msk.f32.gmra.mxu2 %vm233_vm0, %v1657_v14  ;;  %6210 = vmatmul.msk.f32.gmra.mxu3 %vm233_vm0, %v1657_v14 }
 0x431   : > { %v1661_v55 = vpop.trf.xlu1 }
 0x434   : > { %6179 = vmatmul.msk.f32.gmra.mxu2 %vm233_vm0, %v1658_v50  ;;  %6211 = vmatmul.msk.f32.gmra.mxu3 %vm233_vm0, %v1658_v50 }
 0x439   : > { %v1662_v57 = vpop.trf.xlu1 }
 0x43c   : > { %6180 = vmatmul.msk.f32.gmra.mxu2 %vm233_vm0, %v1659_v30  ;;  %6212 = vmatmul.msk.f32.gmra.mxu3 %vm233_vm0, %v1659_v30 }
 0x441   : > { %v1663_v10 = vpop.trf.xlu1 }
 0x444   : > { %6181 = vmatmul.msk.f32.gmra.mxu2 %vm233_vm0, %v1660_v24  ;;  %6213 = vmatmul.msk.f32.gmra.mxu3 %vm233_vm0, %v1660_v24 }
 0x447   : > { %v1501_v58 = vpop.f32.mrf.mxu2  ;;  %v1530_v61 = vpop.f32.mrf.mxu3 }
 0x448   : > { %v1531_v11 = vadd.f32 %v1530_v61, %v1501_v58 }
 0x449   : > { %v1664_v33 = vpop.trf.xlu1 }
 0x44a   : > { %1600 = vst [vmem:[%s8730_s24] sm:$0xff] %v1531_v11 }
 0x44c   : > { %6182 = vmatmul.msk.f32.gmra.mxu2 %vm233_vm0, %v1661_v55  ;;  %6214 = vmatmul.msk.f32.gmra.mxu3 %vm233_vm0, %v1661_v55 }
 0x44f   : > { %v1504_v54 = vpop.f32.mrf.mxu2  ;;  %v1533_v18 = vpop.f32.mrf.mxu3 }
 0x450   : > { %v1534_v32 = vadd.f32 %v1533_v18, %v1504_v54 }
 0x451   : > { %v1665_v43 = vpop.trf.xlu1 }
 0x452   : > { %1602 = vst [vmem:[%s8730_s24 + $0x10] sm:$0xff] %v1534_v32 }
 0x454   : > { %6183 = vmatmul.msk.f32.gmra.mxu2 %vm233_vm0, %v1662_v57  ;;  %6215 = vmatmul.msk.f32.gmra.mxu3 %vm233_vm0, %v1662_v57 }
 0x457   : > { %v1507_v27 = vpop.f32.mrf.mxu2  ;;  %v1536_v41 = vpop.f32.mrf.mxu3 }
 0x458   : > { %v1537_v62 = vadd.f32 %v1536_v41, %v1507_v27 }
 0x459   : > { %v1666_v52 = vpop.trf.xlu1 }
 0x45a   : > { %1604 = vst [vmem:[%s8730_s24 + $0x20] sm:$0xff] %v1537_v62 }
 0x45c   : > { %6184 = vmatmul.msk.f32.gmra.mxu2 %vm233_vm0, %v1663_v10  ;;  %6216 = vmatmul.msk.f32.gmra.mxu3 %vm233_vm0, %v1663_v10 }
 0x45f   : > { %v1510_v60 = vpop.f32.mrf.mxu2  ;;  %v1539_v21 = vpop.f32.mrf.mxu3 }
 0x460   : > { %v1540_v0 = vadd.f32 %v1539_v21, %v1510_v60 }
 0x461   : > { %v1667_v8 = vpop.trf.xlu1 }
 0x462   : > { %1606 = vst [vmem:[%s8730_s24 + $0x30] sm:$0xff] %v1540_v0 }
 0x464   : > { %6185 = vmatmul.msk.f32.gmra.mxu2 %vm233_vm0, %v1664_v33  ;;  %6217 = vmatmul.msk.f32.gmra.mxu3 %vm233_vm0, %v1664_v33 }
 0x469   : > { %v1668_v37 = vpop.trf.xlu1 }
 0x46c   : > { %6186 = vmatmul.msk.f32.gmra.mxu2 %vm233_vm0, %v1665_v43  ;;  %6218 = vmatmul.msk.f32.gmra.mxu3 %vm233_vm0, %v1665_v43 }
 0x471   : > { %v1669_v36 = vpop.trf.xlu1 }
 0x474   : > { %6187 = vmatmul.msk.f32.gmra.mxu2 %vm233_vm0, %v1666_v52  ;;  %6219 = vmatmul.msk.f32.gmra.mxu3 %vm233_vm0, %v1666_v52  ;;  %v1688_v15 = vpop.trf.xlu2 }
 0x479   : > { %v1670_v59 = vpop.trf.xlu1 }
 0x47c   : > { %6188 = vmatmul.msk.f32.gmra.mxu2 %vm233_vm0, %v1667_v8  ;;  %6220 = vmatmul.msk.f32.gmra.mxu3 %vm233_vm0, %v1667_v8  ;;  %v1689_v31 = vpop.trf.xlu2 }
 0x481   : > { %v1671_v23 = vpop.trf.xlu1 }
 0x484   : > { %6189 = vmatmul.msk.f32.gmra.mxu2 %vm233_vm0, %v1668_v37  ;;  %6221 = vmatmul.msk.f32.gmra.mxu3 %vm233_vm0, %v1668_v37  ;;  %v1690_v5 = vpop.trf.xlu2 }
 0x487   : > { %v1559_v25 = vpop.f32.mrf.mxu2  ;;  %v1588_v29 = vpop.f32.mrf.mxu3 }
 0x488   : > { %v1589_v40 = vadd.f32 %v1588_v29, %v1559_v25 }
 0x48a   : > { %1601 = vst [vmem:[%s8730_s24 + $0x8] sm:$0xff] %v1589_v40 }
 0x48c   : > { %6190 = vmatmul.msk.f32.gmra.mxu2 %vm233_vm0, %v1669_v36  ;;  %6222 = vmatmul.msk.f32.gmra.mxu3 %vm233_vm0, %v1669_v36  ;;  %v1691_v9 = vpop.trf.xlu2 }
 0x48f   : > { %v1562_v2 = vpop.f32.mrf.mxu2  ;;  %v1591_v46 = vpop.f32.mrf.mxu3 }
 0x490   : > { %v1592_v38 = vadd.f32 %v1591_v46, %v1562_v2 }
 0x492   : > { %1603 = vst [vmem:[%s8730_s24 + $0x18] sm:$0xff] %v1592_v38 }
 0x494   : > { %6191 = vmatmul.msk.f32.gmra.mxu2 %vm233_vm0, %v1670_v59  ;;  %6223 = vmatmul.msk.f32.gmra.mxu3 %vm233_vm0, %v1670_v59  ;;  %v1692_v13 = vpop.trf.xlu2 }
 0x497   : > { %v1565_v4 = vpop.f32.mrf.mxu2  ;;  %v1594_v53 = vpop.f32.mrf.mxu3 }
 0x498   : > { %v1595_v42 = vadd.f32 %v1594_v53, %v1565_v4 }
 0x49a   : > { %1605 = vst [vmem:[%s8730_s24 + $0x28] sm:$0xff] %v1595_v42 }
 0x49c   : > { %6192 = vmatmul.msk.f32.gmra.mxu2 %vm233_vm0, %v1671_v23  ;;  %6224 = vmatmul.msk.f32.gmra.mxu3 %vm233_vm0, %v1671_v23  ;;  %v1693_v45 = vpop.trf.xlu2 }
 0x49f   : > { %v1568_v47 = vpop.f32.mrf.mxu2  ;;  %v1597_v34 = vpop.f32.mrf.mxu3 }
 0x4a0   : > { %v1598_v20 = vadd.f32 %v1597_v34, %v1568_v47 }
 0x4a2   : > { %1607 = vst [vmem:[%s8730_s24 + $0x38] sm:$0xff] %v1598_v20 }
 0x4a4   : > { %6193 = vmatmul.msk.f32.gmra.mxu2 %vm233_vm0, %v1688_v15  ;;  %6225 = vmatmul.msk.f32.gmra.mxu3 %vm233_vm0, %v1688_v15  ;;  %v1694_v49 = vpop.trf.xlu2 }
 0x4a7   : > { %v8762_v3 = vpop.f32.mrf.mxu2  ;;  %v8764_v6 = vpop.f32.mrf.mxu3 }
 0x4ac   : > { %6194 = vmatmul.msk.f32.gmra.mxu2 %vm233_vm0, %v1689_v31  ;;  %6226 = vmatmul.msk.f32.gmra.mxu3 %vm233_vm0, %v1689_v31  ;;  %v1695_v35 = vpop.trf.xlu2 }
 0x4af   : > { %v8768_v19 = vpop.f32.mrf.mxu2  ;;  %v8770_v28 = vpop.f32.mrf.mxu3 }
 0x4b4   : > { %6195 = vmatmul.msk.f32.gmra.mxu2 %vm233_vm0, %v1690_v5  ;;  %6227 = vmatmul.msk.f32.gmra.mxu3 %vm233_vm0, %v1690_v5  ;;  %v1696_v16 = vpop.trf.xlu2 }
 0x4b7   : > { %v8774_v12 = vpop.f32.mrf.mxu2  ;;  %v8776_v51 = vpop.f32.mrf.mxu3 }
 0x4bc   : > { %6196 = vmatmul.msk.f32.gmra.mxu2 %vm233_vm0, %v1691_v9  ;;  %6228 = vmatmul.msk.f32.gmra.mxu3 %vm233_vm0, %v1691_v9  ;;  %v1697_v1 = vpop.trf.xlu2 }
 0x4bf   : > { %v8780_v63 = vpop.f32.mrf.mxu2  ;;  %v8782_v17 = vpop.f32.mrf.mxu3 }
 0x4c4   : > { %6197 = vmatmul.msk.f32.gmra.mxu2 %vm233_vm0, %v1692_v13  ;;  %6229 = vmatmul.msk.f32.gmra.mxu3 %vm233_vm0, %v1692_v13  ;;  %v1698_v24 = vpop.trf.xlu2 }
 0x4c7   : > { %v8786_v48 = vpop.f32.mrf.mxu2  ;;  %v8788_v7 = vpop.f32.mrf.mxu3 }
 0x4cc   : > { %6198 = vmatmul.msk.f32.gmra.mxu2 %vm233_vm0, %v1693_v45  ;;  %6230 = vmatmul.msk.f32.gmra.mxu3 %vm233_vm0, %v1693_v45  ;;  %v1699_v33 = vpop.trf.xlu2 }
 0x4cf   : > { %v8792_v44 = vpop.f32.mrf.mxu2  ;;  %v8794_v56 = vpop.f32.mrf.mxu3 }
 0x4d0   : > { %v2041_v22 = vmax.f32 %v8792_v44, %v8794_v56 }
 0x4d2   : > { %2042 = vmax.xlane.f32.xlu1 %v2041_v22 }
 0x4d4   : > { %6199 = vmatmul.msk.f32.gmra.mxu2 %vm233_vm0, %v1694_v49  ;;  %6231 = vmatmul.msk.f32.gmra.mxu3 %vm233_vm0, %v1694_v49  ;;  %v1700_v27 = vpop.trf.xlu2 }
 0x4d7   : > { %v8800_v39 = vpop.f32.mrf.mxu2  ;;  %v8802_v26 = vpop.f32.mrf.mxu3 }
 0x4d8   : > { %v2044_v4 = vmax.f32 %v8800_v39, %v8802_v26 }
 0x4dc   : > { %6200 = vmatmul.msk.f32.gmra.mxu2 %vm233_vm0, %v1695_v35  ;;  %6232 = vmatmul.msk.f32.gmra.mxu3 %vm233_vm0, %v1695_v35  ;;  %v1701_v60 = vpop.trf.xlu2 }
 0x4df   : > { %v8806_v14 = vpop.f32.mrf.mxu2  ;;  %v8808_v50 = vpop.f32.mrf.mxu3 }
 0x4e0   : > { %v2047_v30 = vmax.f32 %v8806_v14, %v8808_v50 }
 0x4e2   : > { %2048 = vmax.xlane.f32.xlu0 %v2047_v30 }
 0x4e4   : > { %6201 = vmatmul.msk.f32.gmra.mxu2 %vm233_vm0, %v1696_v16  ;;  %6233 = vmatmul.msk.f32.gmra.mxu3 %vm233_vm0, %v1696_v16  ;;  %v1702_v8 = vpop.trf.xlu2 }
 0x4e7   : > { %v8814_v55 = vpop.f32.mrf.mxu2  ;;  %v8816_v57 = vpop.f32.mrf.mxu3 }
 0x4e8   : > { %12937 = vst [vmem:[#allocation28_spill] sm:$0xff] %v8814_v55  ;;  %v2050_v10 = vmax.f32 %v8814_v55, %v8816_v57 }
 0x4e9   : > { %12938 = vst [vmem:[#allocation29_spill] sm:$0xff] %v8816_v57 }
 0x4ea   : > { %2051 = vmax.xlane.f32.xlu0 %v2050_v10 }
 0x4ec   : > { %6202 = vmatmul.msk.f32.gmra.mxu2 %vm233_vm0, %v1697_v1  ;;  %6234 = vmatmul.msk.f32.gmra.mxu3 %vm233_vm0, %v1697_v1  ;;  %v1703_v31 = vpop.trf.xlu2 }
 0x4ef   : > { %v8822_v58 = vpop.f32.mrf.mxu2  ;;  %v8824_v61 = vpop.f32.mrf.mxu3 }
 0x4f0   : > { %v2053_v11 = vmax.f32 %v8822_v58, %v8824_v61 }
 0x4f2   : > { %2054 = vmax.xlane.f32.xlu0 %v2053_v11 }
 0x4f4   : > { %6203 = vmatmul.msk.f32.gmra.mxu2 %vm233_vm0, %v1698_v24  ;;  %6235 = vmatmul.msk.f32.gmra.mxu3 %vm233_vm0, %v1698_v24 }
 0x4f7   : > { %v8830_v54 = vpop.f32.mrf.mxu2  ;;  %v8832_v18 = vpop.f32.mrf.mxu3 }
 0x4f8   : > { %v2056_v32 = vmax.f32 %v8830_v54, %v8832_v18 }
 0x4fa   : > { %2057 = vmax.xlane.f32.xlu0 %v2056_v32 }
 0x4fc   : > { %6204 = vmatmul.msk.f32.gmra.mxu2 %vm233_vm0, %v1699_v33  ;;  %6236 = vmatmul.msk.f32.gmra.mxu3 %vm233_vm0, %v1699_v33 }
 0x4ff   : > { %v8838_v41 = vpop.f32.mrf.mxu2  ;;  %v8840_v62 = vpop.f32.mrf.mxu3 }
 0x500   : > { %v2059_v43 = vmax.f32 %v8838_v41, %v8840_v62 }
 0x502   : > { %2060 = vmax.xlane.f32.xlu0 %v2059_v43 }
 0x504   : > { %6205 = vmatmul.msk.f32.gmra.mxu2 %vm233_vm0, %v1700_v27  ;;  %6237 = vmatmul.msk.f32.gmra.mxu3 %vm233_vm0, %v1700_v27 }
 0x507   : > { %v8846_v21 = vpop.f32.mrf.mxu2  ;;  %v8848_v0 = vpop.f32.mrf.mxu3 }
 0x508   : > { %v2062_v52 = vmax.f32 %v8846_v21, %v8848_v0 }
 0x50a   : > { %2063 = vmax.xlane.f32.xlu0 %v2062_v52 }
 0x50c   : > { %6206 = vmatmul.msk.f32.gmra.mxu2 %vm233_vm0, %v1701_v60  ;;  %6238 = vmatmul.msk.f32.gmra.mxu3 %vm233_vm0, %v1701_v60 }
 0x50f   : > { %v8854_v37 = vpop.f32.mrf.mxu2  ;;  %v8856_v36 = vpop.f32.mrf.mxu3 }
 0x510   : > { %v2065_v15 = vmax.f32 %v8854_v37, %v8856_v36 }
 0x512   : > { %2066 = vmax.xlane.f32.xlu0 %v2065_v15 }
 0x514   : > { %6207 = vmatmul.msk.f32.gmra.mxu2 %vm233_vm0, %v1702_v8  ;;  %6239 = vmatmul.msk.f32.gmra.mxu3 %vm233_vm0, %v1702_v8 }
 0x517   : > { %v8862_v25 = vpop.f32.mrf.mxu2  ;;  %v8864_v29 = vpop.f32.mrf.mxu3 }
 0x518   : > { %v2068_v40 = vmax.f32 %v8862_v25, %v8864_v29 }
 0x51a   : > { %2069 = vmax.xlane.f32.xlu0 %v2068_v40 }
 0x51c   : > { %6208 = vmatmul.msk.f32.gmra.mxu2 %vm233_vm0, %v1703_v31  ;;  %6240 = vmatmul.msk.f32.gmra.mxu3 %vm233_vm0, %v1703_v31 }
 0x51f   : > { %v8870_v59 = vpop.f32.mrf.mxu2  ;;  %v8872_v2 = vpop.f32.mrf.mxu3 }
 0x520   : > { %12939 = vst [vmem:[#allocation26_spill] sm:$0xff] %v8870_v59  ;;  %v2071_v46 = vmax.f32 %v8870_v59, %v8872_v2 }
 0x521   : > { %12940 = vst [vmem:[#allocation27_spill] sm:$0xff] %v8872_v2 }
 0x522   : > { %2072 = vmax.xlane.f32.xlu0 %v2071_v46 }
 0x527   : > { %v8876_v38 = vpop.f32.mrf.mxu2  ;;  %v8878_v5 = vpop.f32.mrf.mxu3 }
 0x528   : > { %12941 = vst [vmem:[#allocation9_spill] sm:$0xff] %v8876_v38  ;;  %v2074_v35 = vmax.f32 %v8876_v38, %v8878_v5 }
 0x529   : > { %12942 = vst [vmem:[#allocation10_spill] sm:$0xff] %v8878_v5 }
 0x52a   : > { %2045 = vmax.xlane.f32.xlu0 %v2044_v4 }
 0x52f   : > { %v8882_v53 = vpop.f32.mrf.mxu2  ;;  %v8884_v42 = vpop.f32.mrf.mxu3 }
 0x530   : > { %12943 = vst [vmem:[#allocation24_spill] sm:$0xff] %v8882_v53  ;;  %v2077_v13 = vmax.f32 %v8882_v53, %v8884_v42 }
 0x531   : > { %12944 = vst [vmem:[#allocation25_spill] sm:$0xff] %v8884_v42 }
 0x537   : > { %v8886_v23 = vpop.f32.mrf.mxu2  ;;  %v8888_v47 = vpop.f32.mrf.mxu3 }
 0x538   : > { %12945 = vst [vmem:[#allocation16_spill] sm:$0xff] %v8886_v23  ;;  %v2080_v34 = vmax.f32 %v8886_v23, %v8888_v47 }
 0x539   : > { %12946 = vst [vmem:[#allocation17_spill] sm:$0xff] %v8888_v47 }
 0x53a   : > { %2081 = vmax.xlane.f32.xlu1 %v2080_v34 }
 0x53f   : > { %v8892_v20 = vpop.f32.mrf.mxu2  ;;  %v8894_v9 = vpop.f32.mrf.mxu3 }
 0x540   : > { %12947 = vst [vmem:[#allocation18_spill] sm:$0xff] %v8892_v20 }
 0x541   : > { %12948 = vst [vmem:[#allocation19_spill] sm:$0xff] %v8894_v9 }
 0x542   : > { %2078 = vmax.xlane.f32.xlu1 %v2077_v13 }
 0x547   : > { %v8898_v45 = vpop.f32.mrf.mxu2  ;;  %v8900_v49 = vpop.f32.mrf.mxu3 }
 0x548   : > { %12949 = vst [vmem:[#allocation20_spill] sm:$0xff] %v8898_v45 }
 0x549   : > { %12950 = vst [vmem:[#allocation21_spill] sm:$0xff] %v8900_v49 }
 0x54a   : > { %2075 = vmax.xlane.f32.xlu1 %v2074_v35 }
 0x54f   : > { %v8904_v22 = vpop.f32.mrf.mxu2  ;;  %v8906_v16 = vpop.f32.mrf.mxu3 }
 0x555   : > { %v2049_v1 = vpop.xlane.xlu0 %2048 }
 0x556   : > { %v2136_v23 = vsub.f32 %v8806_v14, %v2049_v1  ;;  %v2137_v20 = vsub.f32 %v8808_v50, %v2049_v1 }
 0x557   : > { %v8908_v30 = vpop.f32.mrf.mxu2  ;;  %v8910_v24 = vpop.f32.mrf.mxu3 }
 0x558   : > { %v2216_v45 = vmul.f32 1.442695, %v2137_v20 }
 0x55d   : > { %v8912_v10 = vpop.xlane.xlu0 %2051 }
 0x55e   : > { %12951 = vst [vmem:[#allocation14_spill] sm:$0xff] %v8912_v10  ;;  %v2214_v10 = vmul.f32 1.442695, %v2136_v23 }
 0x55f   : > { %v8914_v11 = vpop.f32.mrf.mxu2  ;;  %v8916_v33 = vpop.f32.mrf.mxu3 }
 0x560   : > { %6621 = vpow2.f32 %v2214_v10 }
 0x561   : > { %6623 = vpow2.f32 %v2216_v45 }
 0x565   : > { %v8918_v32 = vpop.xlane.xlu0 %2054 }
 0x566   : > { %v8974_v10 = vpop.eup %6621 }
 0x567   : > { %v8920_v27 = vpop.f32.mrf.mxu2  ;;  %v8922_v43 = vpop.f32.mrf.mxu3 }
 0x56d   : > { %v8924_v60 = vpop.xlane.xlu0 %2057 }
 0x56f   : > { %v8926_v52 = vpop.f32.mrf.mxu2  ;;  %v8928_v8 = vpop.f32.mrf.mxu3 }
 0x575   : > { %v8930_v15 = vpop.xlane.xlu0 %2060 }
 0x577   : > { %v8932_v40 = vpop.f32.mrf.mxu2  ;;  %v8934_v31 = vpop.f32.mrf.mxu3 }
 0x57d   : > { %v8936_v46 = vpop.xlane.xlu0 %2063 }
 0x57f   : > { %v8938_v4 = vpop.f32.mrf.mxu2  ;;  %v8940_v34 = vpop.f32.mrf.mxu3 }
 0x585   : > { %v8942_v13 = vpop.xlane.xlu0 %2066 }
 0x587   : > { %v8944_v35 = vpop.f32.mrf.mxu2  ;;  %v8946_v5 = vpop.f32.mrf.mxu3 }
 0x58d   : > { %v8948_v38 = vpop.xlane.xlu0 %2069 }
 0x58f   : > { %v8950_v42 = vpop.f32.mrf.mxu2  ;;  %v8952_v53 = vpop.f32.mrf.mxu3 }
 0x590   : > { %12952 = vst [vmem:[#allocation15_spill] sm:$0xff] %v8952_v53 }
 0x595   : > { %v8954_v47 = vpop.xlane.xlu0 %2072 }
 0x597   : > { %v8958_v9 = vpop.f32.mrf.mxu2  ;;  %v8960_v57 = vpop.f32.mrf.mxu3 }
 0x598   : > { %12953 = vst [vmem:[#allocation22_spill] sm:$0xff] %v8960_v57  ;;  %v2116_v55 = vmax.f32 %v8958_v9, %v8960_v57  ;;  %v2113_v57 = vmax.f32 %v8950_v42, %v8952_v53 }
 0x59a   : > { %2117 = vmax.xlane.f32.xlu0 %v2116_v55  ;;  %v2043_v55 = vpop.xlane.xlu1 %2042 }
 0x59b   : > { %v2133_v45 = vsub.f32 %v8794_v56, %v2043_v55 }
 0x59d   : > { %v2046_v49 = vpop.xlane.xlu0 %2045 }
 0x59e   : > { %v2134_v2 = vsub.f32 %v8800_v39, %v2046_v49  ;;  %v2135_v59 = vsub.f32 %v8802_v26, %v2046_v49  ;;  %v8976_v39 = vpop.eup %6623  ;;  %v2132_v26 = vsub.f32 %v8792_v44, %v2043_v55  ;;  %v2038_v49 = vmax.f32 %v8786_v48, %v8788_v7 }
 0x59f   : > { %v8966_v14 = vpop.f32.mrf.mxu2  ;;  %v8968_v50 = vpop.f32.mrf.mxu3  ;;  %v2110_v44 = vmax.f32 %v8944_v35, %v8946_v5 }
 0x5a0   : > { %v2119_v1 = vmax.f32 %v8966_v14, %v8968_v50  ;;  %v2210_v23 = vmul.f32 1.442695, %v2134_v2  ;;  %v2212_v20 = vmul.f32 1.442695, %v2135_v59  ;;  %v2335_v2 = vadd.f32 %v8976_v39, %v8974_v10 }
 0x5a1   : > { %v2208_v59 = vmul.f32 1.442695, %v2133_v45  ;;  %v2107_v45 = vmax.f32 %v8938_v4, %v8940_v34 }
 0x5a2   : > { %2114 = vmax.xlane.f32.xlu0 %v2113_v57  ;;  %2120 = vmax.xlane.f32.xlu2 %v2119_v1  ;;  %6625 = vpow2.f32 %v2210_v23  ;;  %v2206_v57 = vmul.f32 1.442695, %v2132_v26 }
 0x5a3   : > { %6627 = vpow2.f32 %v2212_v20  ;;  %v2035_v20 = vmax.f32 %v8780_v63, %v8782_v17 }
 0x5a4   : > { %6629 = vpow2.f32 %v2206_v57  ;;  %v2150_v57 = vsub.f32 %v8862_v25, %v8948_v38 }
 0x5a5   : > { %6631 = vpow2.f32 %v2208_v59  ;;  %v2151_v59 = vsub.f32 %v8864_v29, %v8948_v38  ;;  %v2148_v29 = vsub.f32 %v8854_v37, %v8942_v13  ;;  %v2149_v38 = vsub.f32 %v8856_v36, %v8942_v13 }
 0x5a6   : > { %v2146_v37 = vsub.f32 %v8846_v21, %v8936_v46  ;;  %v2147_v36 = vsub.f32 %v8848_v0, %v8936_v46  ;;  %v2144_v0 = vsub.f32 %v8838_v41, %v8930_v15  ;;  %v2145_v46 = vsub.f32 %v8840_v62, %v8930_v15 }
 0x5a7   : > { %v2142_v62 = vsub.f32 %v8830_v54, %v8924_v60 }
 0x5a8   : > { %v8984_v1 = vpop.eup %6625 }
 0x5a9   : > { %v8986_v53 = vpop.eup %6627 }
 0x5aa   : > { %2039 = vmax.xlane.f32.xlu0 %v2038_v49  ;;  %2336 = vadd.xlane.f32.xlu2 %v2335_v2  ;;  %v2332_v56 = vadd.f32 %v8986_v53, %v8984_v1  ;;  %v8992_v23 = vpop.eup %6629  ;;  %v2032_v49 = vmax.f32 %v8774_v12, %v8776_v51  ;;  %v2104_v2 = vmax.f32 %v8932_v40, %v8934_v31 }
 0x5ab   : > { %v8994_v55 = vpop.eup %6631 }
 0x5ac   : > { %v2329_v26 = vadd.f32 %v8994_v55, %v8992_v23 }
 0x5b2   : > { %2111 = vmax.xlane.f32.xlu0 %v2110_v44  ;;  %2333 = vadd.xlane.f32.xlu2 %v2332_v56  ;;  %v2029_v44 = vmax.f32 %v8768_v19, %v8770_v28  ;;  %v2242_v56 = vmul.f32 1.442695, %v2150_v57  ;;  %v2238_v57 = vmul.f32 1.442695, %v2148_v29  ;;  %v2095_v29 = vmax.f32 %v8914_v11, %v8916_v33 }
 0x5b4   : > { %6633 = vpow2.f32 %v2242_v56 }
 0x5ba   : > { %2036 = vmax.xlane.f32.xlu0 %v2035_v20  ;;  %2330 = vadd.xlane.f32.xlu2 %v2329_v26  ;;  %v2244_v20 = vmul.f32 1.442695, %v2151_v59  ;;  %v2101_v26 = vmax.f32 %v8926_v52, %v8928_v8  ;;  %v2240_v59 = vmul.f32 1.442695, %v2149_v38 }
 0x5bc   : > { %6635 = vpow2.f32 %v2244_v20 }
 0x5bd   : > { %6637 = vpow2.f32 %v2238_v57 }
 0x5be   : > { %6639 = vpow2.f32 %v2240_v59  ;;  %v2230_v59 = vmul.f32 1.442695, %v2144_v0 }
 0x5c2   : > { %2108 = vmax.xlane.f32.xlu0 %v2107_v45  ;;  %v9014_v45 = vpop.eup %6633 }
 0x5ca   : > { %2033 = vmax.xlane.f32.xlu0 %v2032_v49  ;;  %v9016_v49 = vpop.eup %6635 }
 0x5cb   : > { %v2356_v25 = vadd.f32 %v9016_v49, %v9014_v45  ;;  %v9028_v56 = vpop.eup %6637 }
 0x5cc   : > { %v9030_v20 = vpop.eup %6639 }
 0x5cd   : > { %v2353_v13 = vadd.f32 %v9030_v20, %v9028_v56 }
 0x5d2   : > { %2105 = vmax.xlane.f32.xlu0 %v2104_v2  ;;  %v2026_v2 = vmax.f32 %v8762_v3, %v8764_v6 }
 0x5da   : > { %2030 = vmax.xlane.f32.xlu0 %v2029_v44  ;;  %v2098_v44 = vmax.f32 %v8920_v27, %v8922_v43 }
 0x5e2   : > { %2102 = vmax.xlane.f32.xlu0 %v2101_v26  ;;  %v2234_v26 = vmul.f32 1.442695, %v2146_v37 }
 0x5e4   : > { %6641 = vpow2.f32 %v2234_v26 }
 0x5ea   : > { %2357 = vadd.xlane.f32.xlu0 %v2356_v25  ;;  %v2236_v25 = vmul.f32 1.442695, %v2147_v36  ;;  %v9040_v38 = vpop.eup %6641  ;;  %v2092_v36 = vmax.f32 %v8908_v30, %v8910_v24 }
 0x5ec   : > { %6643 = vpow2.f32 %v2236_v25 }
 0x5ed   : > { %6645 = vpow2.f32 %v2230_v59  ;;  %v2226_v59 = vmul.f32 1.442695, %v2142_v62 }
 0x5f2   : > { %2027 = vmax.xlane.f32.xlu0 %v2026_v2  ;;  %v9042_v2 = vpop.eup %6643 }
 0x5f3   : > { %v2350_v57 = vadd.f32 %v9042_v2, %v9040_v38 }
 0x5fa   : > { %2099 = vmax.xlane.f32.xlu0 %v2098_v44  ;;  %v2232_v44 = vmul.f32 1.442695, %v2145_v46 }
 0x5fc   : > { %6647 = vpow2.f32 %v2232_v44 }
 0x602   : > { %2354 = vadd.xlane.f32.xlu0 %v2353_v13  ;;  %v9056_v13 = vpop.eup %6645 }
 0x603   : > { %v9058_v41 = vpop.eup %6647 }
 0x60a   : > { %2096 = vmax.xlane.f32.xlu0 %v2095_v29  ;;  %v2143_v29 = vsub.f32 %v8832_v18, %v8924_v60  ;;  %v2089_v18 = vmax.f32 %v8904_v22, %v8906_v16 }
 0x60c   : > { %v2228_v44 = vmul.f32 1.442695, %v2143_v29  ;;  %v2140_v29 = vsub.f32 %v8822_v58, %v8918_v32  ;;  %v12958_v58 = vld [vmem:[#allocation26_spill] sm:$0xff] }
 0x60d   : > { %v9044_v21 = vpop.xlane.xlu0 %2117 }
 0x612   : > { %2351 = vadd.xlane.f32.xlu0 %v2350_v57  ;;  %v2347_v57 = vadd.f32 %v9058_v41, %v9056_v13 }
 0x615   : > { %v9052_v37 = vpop.xlane.xlu0 %2114 }
 0x61a   : > { %2093 = vmax.xlane.f32.xlu0 %v2092_v36 }
 0x61d   : > { %v2040_v26 = vpop.xlane.xlu0 %2039 }
 0x61e   : > { %v2130_v15 = vsub.f32 %v8786_v48, %v2040_v26  ;;  %v2131_v25 = vsub.f32 %v8788_v7, %v2040_v26 }
 0x620   : > { %v2202_v0 = vmul.f32 1.442695, %v2130_v15  ;;  %v2204_v46 = vmul.f32 1.442695, %v2131_v25 }
 0x622   : > { %6649 = vpow2.f32 %v2202_v0  ;;  %2348 = vadd.xlane.f32.xlu0 %v2347_v57  ;;  %v2141_v0 = vsub.f32 %v8824_v61, %v8918_v32 }
 0x623   : > { %6651 = vpow2.f32 %v2204_v46 }
 0x624   : > { %6653 = vpow2.f32 %v2226_v59 }
 0x625   : > { %v2112_v36 = vpop.xlane.xlu0 %2111  ;;  %6655 = vpow2.f32 %v2228_v44  ;;  %v2222_v44 = vmul.f32 1.442695, %v2140_v29  ;;  %v12961_v29 = vld [vmem:[#allocation20_spill] sm:$0xff] }
 0x626   : > { %v2178_v54 = vsub.f32 %v8944_v35, %v2112_v36  ;;  %v2179_v48 = vsub.f32 %v8946_v5, %v2112_v36 }
 0x628   : > { %v9070_v7 = vpop.eup %6649  ;;  %v2298_v60 = vmul.f32 1.442695, %v2178_v54  ;;  %v2300_v26 = vmul.f32 1.442695, %v2179_v48  ;;  %v2224_v54 = vmul.f32 1.442695, %v2141_v0 }
 0x629   : > { %12954 = vst [vmem:[#allocation23_spill] sm:$0xff] %v9070_v7  ;;  %v9074_v15 = vpop.eup %6651 }
 0x62a   : > { %12955 = vst [vmem:[#allocation34_spill] sm:$0xff] %v9074_v15  ;;  %6657 = vpow2.f32 %v2298_v60  ;;  %2090 = vmax.xlane.f32.xlu0 %v2089_v18  ;;  %v2326_v62 = vadd.f32 %v9074_v15, %v9070_v7  ;;  %v9078_v25 = vpop.eup %6653  ;;  %v2152_v18 = vsub.f32 %v12958_v58, %v8954_v47  ;;  %v12959_v60 = vld [vmem:[#allocation27_spill] sm:$0xff] }
 0x62b   : > { %6659 = vpow2.f32 %v2300_v26  ;;  %v9080_v5 = vpop.eup %6655  ;;  %v2153_v26 = vsub.f32 %v12959_v60, %v8954_v47  ;;  %v12964_v60 = vld [vmem:[#allocation14_spill] sm:$0xff] }
 0x62c   : > { %2327 = vadd.xlane.f32.xlu1 %v2326_v62  ;;  %v2344_v57 = vadd.f32 %v9080_v5, %v9078_v25  ;;  %6661 = vpow2.f32 %v2222_v44  ;;  %v12960_v62 = vld [vmem:[#allocation21_spill] sm:$0xff]  ;;  %v2246_v0 = vmul.f32 1.442695, %v2152_v18 }
 0x62d   : > { %v9082_v35 = vpop.xlane.xlu0 %2036  ;;  %6663 = vpow2.f32 %v2224_v54  ;;  %v2248_v44 = vmul.f32 1.442695, %v2153_v26  ;;  %v12965_v26 = vld [vmem:[#allocation28_spill] sm:$0xff] }
 0x630   : > { %v9088_v46 = vpop.eup %6657 }
 0x631   : > { %12956 = vst [vmem:[#allocation30_spill] sm:$0xff] %v9088_v46  ;;  %v9092_v59 = vpop.eup %6659 }
 0x632   : > { %12957 = vst [vmem:[#allocation31_spill] sm:$0xff] %v9092_v59  ;;  %2345 = vadd.xlane.f32.xlu0 %v2344_v57  ;;  %v2398_v36 = vadd.f32 %v9092_v59, %v9088_v46  ;;  %v2086_v57 = vmax.f32 %v12961_v29, %v12960_v62 }
 0x634   : > { %2399 = vadd.xlane.f32.xlu2 %v2398_v36  ;;  %v9104_v36 = vpop.eup %6661 }
 0x635   : > { %v2109_v48 = vpop.xlane.xlu0 %2108  ;;  %v9106_v58 = vpop.eup %6663 }
 0x636   : > { %v2176_v61 = vsub.f32 %v8938_v4, %v2109_v48  ;;  %v2177_v32 = vsub.f32 %v8940_v34, %v2109_v48 }
 0x638   : > { %v2294_v15 = vmul.f32 1.442695, %v2176_v61  ;;  %v2296_v59 = vmul.f32 1.442695, %v2177_v32 }
 0x63a   : > { %6665 = vpow2.f32 %v2294_v15  ;;  %2087 = vmax.xlane.f32.xlu0 %v2086_v57  ;;  %v2341_v15 = vadd.f32 %v9106_v58, %v9104_v36  ;;  %v2138_v57 = vsub.f32 %v12965_v26, %v12964_v60  ;;  %v2182_v26 = vsub.f32 %v8958_v9, %v9044_v21 }
 0x63b   : > { %6667 = vpow2.f32 %v2296_v59 }
 0x63c   : > { %6669 = vpow2.f32 %v2246_v0  ;;  %v12966_v0 = vld [vmem:[#allocation29_spill] sm:$0xff] }
 0x63d   : > { %v2034_v4 = vpop.xlane.xlu0 %2033  ;;  %6671 = vpow2.f32 %v2248_v44  ;;  %v2139_v44 = vsub.f32 %v12966_v0, %v12964_v60 }
 0x63e   : > { %v2126_v34 = vsub.f32 %v8774_v12, %v2034_v4  ;;  %v2127_v47 = vsub.f32 %v8776_v51, %v2034_v4 }
 0x640   : > { %v9110_v54 = vpop.eup %6665  ;;  %v2194_v48 = vmul.f32 1.442695, %v2126_v34  ;;  %v2196_v61 = vmul.f32 1.442695, %v2127_v47 }
 0x641   : > { %12962 = vst [vmem:[#allocation13_spill] sm:$0xff] %v9110_v54  ;;  %v9114_v18 = vpop.eup %6667 }
 0x642   : > { %12963 = vst [vmem:[#allocation44_spill] sm:$0xff] %v9114_v18  ;;  %6673 = vpow2.f32 %v2194_v48  ;;  %2342 = vadd.xlane.f32.xlu0 %v2341_v15  ;;  %v2395_v59 = vadd.f32 %v9114_v18, %v9110_v54  ;;  %v9118_v32 = vpop.eup %6669  ;;  %v2218_v48 = vmul.f32 1.442695, %v2138_v57  ;;  %v2220_v15 = vmul.f32 1.442695, %v2139_v44  ;;  %v12968_v18 = vld [vmem:[#allocation22_spill] sm:$0xff] }
 0x643   : > { %6675 = vpow2.f32 %v2196_v61  ;;  %v9120_v12 = vpop.eup %6671  ;;  %v2183_v54 = vsub.f32 %v12968_v18, %v9044_v21  ;;  %v12969_v57 = vld [vmem:[#allocation19_spill] sm:$0xff]  ;;  %v2306_v44 = vmul.f32 1.442695, %v2182_v26 }
 0x644   : > { %2396 = vadd.xlane.f32.xlu1 %v2395_v59  ;;  %v2359_v34 = vadd.f32 %v9120_v12, %v9118_v32  ;;  %6677 = vpow2.f32 %v2218_v48 }
 0x645   : > { %v9122_v51 = vpop.xlane.xlu0 %2105  ;;  %6679 = vpow2.f32 %v2220_v15  ;;  %v2308_v48 = vmul.f32 1.442695, %v2183_v54 }
 0x648   : > { %v9128_v4 = vpop.eup %6673 }
 0x649   : > { %v9132_v47 = vpop.eup %6675 }
 0x64a   : > { %12967 = vst [vmem:[#allocation35_spill] sm:$0xff] %v9132_v47  ;;  %2360 = vadd.xlane.f32.xlu0 %v2359_v34  ;;  %v2320_v61 = vadd.f32 %v9132_v47, %v9128_v4  ;;  %v12970_v34 = vld [vmem:[#allocation18_spill] sm:$0xff]  ;;  %v9144_v9 = vpop.eup %6677 }
 0x64b   : > { %v2083_v46 = vmax.f32 %v12970_v34, %v12969_v57 }
 0x64c   : > { %2321 = vadd.xlane.f32.xlu2 %v2320_v61  ;;  %v2121_v61 = vpop.xlane.xlu2 %2120 }
 0x64d   : > { %v2031_v59 = vpop.xlane.xlu0 %2030  ;;  %v2184_v15 = vsub.f32 %v8966_v14, %v2121_v61 }
 0x64e   : > { %v2124_v60 = vsub.f32 %v8768_v19, %v2031_v59  ;;  %v2125_v0 = vsub.f32 %v8770_v28, %v2031_v59  ;;  %v9146_v19 = vpop.eup %6679  ;;  %v2185_v59 = vsub.f32 %v8968_v50, %v2121_v61 }
 0x650   : > { %v2190_v7 = vmul.f32 1.442695, %v2124_v60  ;;  %v2192_v47 = vmul.f32 1.442695, %v2125_v0  ;;  %v2310_v60 = vmul.f32 1.442695, %v2184_v15 }
 0x651   : > { %v2312_v14 = vmul.f32 1.442695, %v2185_v59 }
 0x652   : > { %6681 = vpow2.f32 %v2190_v7  ;;  %2084 = vmax.xlane.f32.xlu0 %v2083_v46 }
 0x653   : > { %6683 = vpow2.f32 %v2192_v47  ;;  %v2338_v47 = vadd.f32 %v9146_v19, %v9144_v9 }
 0x654   : > { %6685 = vpow2.f32 %v2306_v44  ;;  %v2180_v44 = vsub.f32 %v8950_v42, %v9052_v37 }
 0x655   : > { %v2103_v28 = vpop.xlane.xlu0 %2102  ;;  %6687 = vpow2.f32 %v2308_v48  ;;  %v12973_v48 = vld [vmem:[#allocation15_spill] sm:$0xff] }
 0x656   : > { %v2172_v21 = vsub.f32 %v8926_v52, %v2103_v28  ;;  %v2173_v18 = vsub.f32 %v8928_v8, %v2103_v28  ;;  %v2181_v61 = vsub.f32 %v12973_v48, %v9052_v37 }
 0x658   : > { %v9152_v7 = vpop.eup %6681  ;;  %v2286_v46 = vmul.f32 1.442695, %v2172_v21  ;;  %v2288_v54 = vmul.f32 1.442695, %v2173_v18  ;;  %v2302_v18 = vmul.f32 1.442695, %v2180_v44 }
 0x659   : > { %v9156_v26 = vpop.eup %6683 }
 0x65a   : > { %6689 = vpow2.f32 %v2286_v46  ;;  %2339 = vadd.xlane.f32.xlu0 %v2338_v47  ;;  %v2317_v52 = vadd.f32 %v9156_v26, %v9152_v7  ;;  %v9160_v8 = vpop.eup %6685  ;;  %v2304_v46 = vmul.f32 1.442695, %v2181_v61  ;;  %v2128_v47 = vsub.f32 %v8780_v63, %v9082_v35 }
 0x65b   : > { %6691 = vpow2.f32 %v2288_v54  ;;  %12971 = vst [vmem:[#allocation36_spill] sm:$0xff] %v9160_v8  ;;  %v9162_v50 = vpop.eup %6687 }
 0x65c   : > { %2318 = vadd.xlane.f32.xlu1 %v2317_v52  ;;  %12972 = vst [vmem:[#allocation32_spill] sm:$0xff] %v9162_v50  ;;  %6693 = vpow2.f32 %v2310_v60  ;;  %v2404_v15 = vadd.f32 %v9162_v50, %v9160_v8  ;;  %v2129_v60 = vsub.f32 %v8782_v17, %v9082_v35  ;;  %v2175_v17 = vsub.f32 %v8934_v31, %v9122_v51 }
 0x65d   : > { %v9164_v0 = vpop.xlane.xlu0 %2357  ;;  %6695 = vpow2.f32 %v2312_v14  ;;  %v2198_v14 = vmul.f32 1.442695, %v2128_v47 }
 0x65e   : > { %6697 = vpow2.f32 %v2302_v18  ;;  %v2200_v44 = vmul.f32 1.442695, %v2129_v60  ;;  %v2174_v18 = vsub.f32 %v8932_v40, %v9122_v51  ;;  %vm2625_vm9 = vweird.f32 %v9164_v0 }
 0x65f   : > { %6699 = vpow2.f32 %v2304_v46 }
 0x660   : > { %v9170_v28 = vpop.eup %6689  ;;  %6701 = vpow2.f32 %v2198_v14  ;;  %v2290_v60 = vmul.f32 1.442695, %v2174_v18 }
 0x661   : > { %12974 = vst [vmem:[#allocation33_spill] sm:$0xff] %v9170_v28  ;;  %v9174_v21 = vpop.eup %6691  ;;  %6703 = vpow2.f32 %v2200_v44 }
 0x662   : > { %12975 = vst [vmem:[#allocation37_spill] sm:$0xff] %v9174_v21  ;;  %2405 = vadd.xlane.f32.xlu0 %v2404_v15  ;;  %v2389_v59 = vadd.f32 %v9174_v21, %v9170_v28  ;;  %v9178_v54 = vpop.eup %6693 }
 0x663   : > { %12976 = vst [vmem:[#allocation38_spill] sm:$0xff] %v9178_v54  ;;  %v9180_v42 = vpop.eup %6695 }
 0x664   : > { %2390 = vadd.xlane.f32.xlu2 %v2389_v59  ;;  %12977 = vst [vmem:[#allocation8_spill] sm:$0xff] %v9180_v42  ;;  %v2407_v52 = vadd.f32 %v9180_v42, %v9178_v54  ;;  %v9188_v48 = vpop.eup %6697 }
 0x665   : > { %v2028_v37 = vpop.xlane.xlu0 %2027  ;;  %12978 = vst [vmem:[#allocation12_spill] sm:$0xff] %v9188_v48  ;;  %v9190_v61 = vpop.eup %6699 }
 0x666   : > { %12979 = vst [vmem:[#allocation39_spill] sm:$0xff] %v9190_v61  ;;  %v2401_v47 = vadd.f32 %v9190_v61, %v9188_v48  ;;  %v9200_v14 = vpop.eup %6701  ;;  %v2123_v31 = vsub.f32 %v8764_v6, %v2028_v37 }
 0x667   : > { %v9202_v40 = vpop.eup %6703 }
 0x668   : > { %v2323_v44 = vadd.f32 %v9202_v40, %v9200_v14 }
 0x66a   : > { %2408 = vadd.xlane.f32.xlu0 %v2407_v52  ;;  %v2292_v52 = vmul.f32 1.442695, %v2175_v17 }
 0x66d   : > { %v2100_v15 = vpop.xlane.xlu0 %2099 }
 0x66e   : > { %v2170_v63 = vsub.f32 %v8920_v27, %v2100_v15  ;;  %v2171_v59 = vsub.f32 %v8922_v43, %v2100_v15  ;;  %v2122_v43 = vsub.f32 %v8762_v3, %v2028_v37 }
 0x670   : > { %v2282_v35 = vmul.f32 1.442695, %v2170_v63  ;;  %v2284_v46 = vmul.f32 1.442695, %v2171_v59  ;;  %v2186_v18 = vmul.f32 1.442695, %v2122_v43 }
 0x671   : > { %v2188_v59 = vmul.f32 1.442695, %v2123_v31 }
 0x672   : > { %6705 = vpow2.f32 %v2282_v35  ;;  %2402 = vadd.xlane.f32.xlu0 %v2401_v47 }
 0x673   : > { %6707 = vpow2.f32 %v2284_v46 }
 0x674   : > { %6709 = vpow2.f32 %v2290_v60 }
 0x675   : > { %v9204_v27 = vpop.xlane.xlu0 %2354  ;;  %6711 = vpow2.f32 %v2292_v52 }
 0x676   : > { %6713 = vpow2.f32 %v2186_v18  ;;  %vm2610_vm2 = vweird.f32 %v9204_v27 }
 0x677   : > { %6715 = vpow2.f32 %v2188_v59 }
 0x678   : > { %v9208_v51 = vpop.eup %6705 }
 0x679   : > { %12980 = vst [vmem:[#allocation40_spill] sm:$0xff] %v9208_v51  ;;  %v9212_v15 = vpop.eup %6707 }
 0x67a   : > { %12981 = vst [vmem:[#allocation42_spill] sm:$0xff] %v9212_v15  ;;  %2324 = vadd.xlane.f32.xlu0 %v2323_v44  ;;  %v2386_v63 = vadd.f32 %v9212_v15, %v9208_v51  ;;  %v9216_v17 = vpop.eup %6709 }
 0x67b   : > { %12982 = vst [vmem:[#allocation43_spill] sm:$0xff] %v9216_v17  ;;  %v9218_v3 = vpop.eup %6711 }
 0x67c   : > { %2387 = vadd.xlane.f32.xlu1 %v2386_v63  ;;  %12983 = vst [vmem:[#allocation11_spill] sm:$0xff] %v9218_v3  ;;  %v2392_v60 = vadd.f32 %v9218_v3, %v9216_v17  ;;  %v9224_v52 = vpop.eup %6713 }
 0x67d   : > { %v2097_v35 = vpop.xlane.xlu0 %2096  ;;  %v9226_v43 = vpop.eup %6715 }
 0x67e   : > { %v2168_v6 = vsub.f32 %v8914_v11, %v2097_v35  ;;  %v2169_v37 = vsub.f32 %v8916_v33, %v2097_v35  ;;  %v2314_v11 = vadd.f32 %v9226_v43, %v9224_v52 }
 0x680   : > { %v2278_v46 = vmul.f32 1.442695, %v2168_v6  ;;  %v2280_v47 = vmul.f32 1.442695, %v2169_v37 }
 0x682   : > { %6717 = vpow2.f32 %v2278_v46  ;;  %2393 = vadd.xlane.f32.xlu0 %v2392_v60 }
 0x683   : > { %6719 = vpow2.f32 %v2280_v47 }
 0x685   : > { %v9228_v31 = vpop.xlane.xlu0 %2351 }
 0x686   : > { %vm2595_vm7 = vweird.f32 %v9228_v31 }
 0x688   : > { %v9230_v44 = vpop.eup %6717 }
 0x689   : > { %12984 = vst [vmem:[#allocation41_spill] sm:$0xff] %v9230_v44  ;;  %v9234_v33 = vpop.eup %6719 }
 0x68a   : > { %12985 = vst [vmem:[#allocation45_spill] sm:$0xff] %v9234_v33  ;;  %2315 = vadd.xlane.f32.xlu0 %v2314_v11  ;;  %v2383_v18 = vadd.f32 %v9234_v33, %v9230_v44 }
 0x68c   : > { %2384 = vadd.xlane.f32.xlu2 %v2383_v18  ;;  %v2082_v18 = vpop.xlane.xlu1 %2081 }
 0x68d   : > { %v2094_v63 = vpop.xlane.xlu0 %2093 }
 0x68e   : > { %v2166_v59 = vsub.f32 %v8908_v30, %v2094_v63  ;;  %v2167_v35 = vsub.f32 %v8910_v24, %v2094_v63  ;;  %v12988_v63 = vld [vmem:[#allocation16_spill] sm:$0xff] }
 0x690   : > { %v2274_v6 = vmul.f32 1.442695, %v2166_v59  ;;  %v2276_v37 = vmul.f32 1.442695, %v2167_v35  ;;  %v2158_v59 = vsub.f32 %v12988_v63, %v2082_v18  ;;  %v12994_v63 = vld [vmem:[#allocation24_spill] sm:$0xff] }
 0x692   : > { %6721 = vpow2.f32 %v2274_v6  ;;  %v2258_v15 = vmul.f32 1.442695, %v2158_v59 }
 0x693   : > { %6723 = vpow2.f32 %v2276_v37  ;;  %v12989_v37 = vld [vmem:[#allocation17_spill] sm:$0xff] }
 0x694   : > { %v2159_v44 = vsub.f32 %v12989_v37, %v2082_v18 }
 0x695   : > { %v9240_v46 = vpop.xlane.xlu0 %2348 }
 0x696   : > { %v2260_v51 = vmul.f32 1.442695, %v2159_v44 }
 0x698   : > { %v9242_v47 = vpop.eup %6721 }
 0x699   : > { %12986 = vst [vmem:[#allocation46_spill] sm:$0xff] %v9242_v47  ;;  %v9244_v60 = vpop.eup %6723 }
 0x69a   : > { %12987 = vst [vmem:[#allocation26_spill] sm:$0xff] %v9244_v60  ;;  %v2380_v11 = vadd.f32 %v9244_v60, %v9242_v47 }
 0x69c   : > { %2381 = vadd.xlane.f32.xlu0 %v2380_v11 }
 0x69d   : > { %v2091_v33 = vpop.xlane.xlu0 %2090 }
 0x69e   : > { %v2164_v30 = vsub.f32 %v8904_v22, %v2091_v33  ;;  %v2165_v24 = vsub.f32 %v8906_v16, %v2091_v33  ;;  %v2079_v16 = vpop.xlane.xlu1 %2078 }
 0x69f   : > { %v2156_v59 = vsub.f32 %v12994_v63, %v2079_v16 }
 0x6a0   : > { %v2270_v35 = vmul.f32 1.442695, %v2164_v30  ;;  %v2272_v6 = vmul.f32 1.442695, %v2165_v24 }
 0x6a2   : > { %6725 = vpow2.f32 %v2270_v35 }
 0x6a3   : > { %6727 = vpow2.f32 %v2272_v6  ;;  %v12995_v6 = vld [vmem:[#allocation25_spill] sm:$0xff] }
 0x6a4   : > { %6729 = vpow2.f32 %v2258_v15 }
 0x6a5   : > { %v9252_v21 = vpop.xlane.xlu0 %2345  ;;  %6731 = vpow2.f32 %v2260_v51  ;;  %v2157_v51 = vsub.f32 %v12995_v6, %v2079_v16  ;;  %v9288_v6 = vpop.xlane.xlu2 %2336 }
 0x6a6   : > { %6733 = vrcp.f32 %v9164_v0 }
 0x6a8   : > { %v9254_v60 = vpop.eup %6725 }
 0x6a9   : > { %12990 = vst [vmem:[#allocation27_spill] sm:$0xff] %v9254_v60  ;;  %v9256_v11 = vpop.eup %6727 }
 0x6aa   : > { %12991 = vst [vmem:[#allocation21_spill] sm:$0xff] %v9256_v11  ;;  %v2377_v22 = vadd.f32 %v9256_v11, %v9254_v60  ;;  %v9260_v30 = vpop.eup %6729 }
 0x6ab   : > { %12992 = vst [vmem:[#allocation20_spill] sm:$0xff] %v9260_v30  ;;  %v9264_v24 = vpop.eup %6731 }
 0x6ac   : > { %2378 = vadd.xlane.f32.xlu1 %v2377_v22  ;;  %12993 = vst [vmem:[#allocation14_spill] sm:$0xff] %v9264_v24  ;;  %v2368_v37 = vadd.f32 %v9264_v24, %v9260_v30  ;;  %v2254_v22 = vmul.f32 1.442695, %v2156_v59 }
 0x6ad   : > { %v2088_v33 = vpop.xlane.xlu0 %2087 }
 0x6ae   : > { %v2162_v18 = vsub.f32 %v12961_v29, %v2088_v33  ;;  %v2163_v44 = vsub.f32 %v12960_v62, %v2088_v33  ;;  %v2256_v29 = vmul.f32 1.442695, %v2157_v51  ;;  %v9274_v62 = vpop.eup %6733 }
 0x6af   : > { %vm2626_vm10 = vweird.f32 %v9274_v62 }
 0x6b0   : > { %v2266_v15 = vmul.f32 1.442695, %v2162_v18  ;;  %v2268_v35 = vmul.f32 1.442695, %v2163_v44  ;;  %v2076_v18 = vpop.xlane.xlu1 %2075  ;;  %v2621_v44 = vmul.f32 %v9274_v62, %v9164_v0  ;;  %vm9325_vm12 = vmor %vm2625_vm9, %vm2626_vm10 }
 0x6b2   : > { %6735 = vpow2.f32 %v2266_v15  ;;  %v12998_v15 = vld [vmem:[#allocation9_spill] sm:$0xff] }
 0x6b3   : > { %6737 = vpow2.f32 %v2268_v35  ;;  %v2154_v35 = vsub.f32 %v12998_v15, %v2076_v18 }
 0x6b4   : > { %2369 = vadd.xlane.f32.xlu1 %v2368_v37  ;;  %6739 = vrcp.f32 %v9204_v27 }
 0x6b5   : > { %v9271_v11 = vpop.xlane.xlu0 %2342  ;;  %6741 = vpow2.f32 %v2254_v22  ;;  %v2622_v22 = vsub.f32 1.0, %v2621_v44  ;;  %v2250_v15 = vmul.f32 1.442695, %v2154_v35  ;;  %v2631_v35 = vand.u32 2147483648, %v9164_v0 }
 0x6b6   : > { %6743 = vpow2.f32 %v2256_v29 }
 0x6b7   : > { %6745 = vrcp.f32 %v9228_v31  ;;  %v2623_v60 = vmul.f32 %v9274_v62, %v2622_v22  ;;  %v9311_v22 = vpop.xlane.xlu2 %2333 }
 0x6b8   : > { %v9276_v33 = vpop.eup %6735  ;;  %6747 = vrcp.f32 %v9240_v46 }
 0x6b9   : > { %12996 = vst [vmem:[#allocation28_spill] sm:$0xff] %v9276_v33  ;;  %v9278_v16 = vpop.eup %6737 }
 0x6ba   : > { %12997 = vst [vmem:[#allocation29_spill] sm:$0xff] %v9278_v16  ;;  %v2374_v63 = vadd.f32 %v9278_v16, %v9276_v33  ;;  %v9285_v59 = vpop.eup %6739  ;;  %v13001_v16 = vld [vmem:[#allocation10_spill] sm:$0xff] }
 0x6bb   : > { %v9291_v37 = vpop.eup %6741  ;;  %v2606_v24 = vmul.f32 %v9285_v59, %v9204_v27  ;;  %v2155_v33 = vsub.f32 %v13001_v16, %v2076_v18  ;;  %vm2611_vm13 = vweird.f32 %v9285_v59 }
 0x6bc   : > { %2375 = vadd.xlane.f32.xlu2 %v2374_v63  ;;  %12999 = vst [vmem:[#allocation22_spill] sm:$0xff] %v9291_v37  ;;  %v9293_v29 = vpop.eup %6743  ;;  %vm9352_vm4 = vmor %vm2610_vm2, %vm2611_vm13 }
 0x6bd   : > { %v2361_v51 = vpop.xlane.xlu0 %2360  ;;  %13000 = vst [vmem:[#allocation19_spill] sm:$0xff] %v9293_v29  ;;  %v9297_v30 = vpop.eup %6745  ;;  %v2365_v63 = vadd.f32 %v9293_v29, %v9291_v37  ;;  %v2607_v28 = vsub.f32 1.0, %v2606_v24  ;;  %v2252_v17 = vmul.f32 1.442695, %v2155_v33  ;;  %v2624_v37 = vadd.f32 %v9274_v62, %v2623_v60 }
 0x6be   : > { %6749 = vrcp.f32 %v2361_v51  ;;  %v9303_v47 = vpop.eup %6747  ;;  %v2591_v44 = vmul.f32 %v9297_v30, %v9228_v31  ;;  %v2646_v8 = vand.u32 2147483648, %v2361_v51  ;;  %vm2640_vm14 = vweird.f32 %v2361_v51 }
 0x6bf   : > { %6751 = vrcp.f32 %v9252_v21  ;;  %v2608_v61 = vmul.f32 %v9285_v59, %v2607_v28  ;;  %v2628_v28 = vsel %vm9325_vm12, %v9274_v62, %v2624_v37  ;;  %vm2596_vm5 = vweird.f32 %v9297_v30 }
 0x6c0   : > { %6753 = vpow2.f32 %v2250_v15  ;;  %v2592_v33 = vsub.f32 1.0, %v2591_v44  ;;  %v2576_v15 = vmul.f32 %v9303_v47, %v9240_v46  ;;  %v2629_v44 = vand.u32 2147483647, %v9164_v0  ;;  %vm9383_vm8 = vmor %vm2595_vm7, %vm2596_vm5 }
 0x6c1   : > { %6755 = vrcp.f32 %v9288_v6  ;;  %vm2581_vm9 = vweird.f32 %v9303_v47 }
 0x6c2   : > { %6757 = vrcp.f32 %v9271_v11  ;;  %v2577_v54 = vsub.f32 1.0, %v2576_v15  ;;  %v2593_v60 = vmul.f32 %v9297_v30, %v2592_v33  ;;  %vm2630_vm3 = vcmp.eq.f32.partialorder %v2629_v44, 8.507059e+37  ;;  %v9364_v44 = vpop.xlane.xlu2 %2330 }
 0x6c4   : > { %v6750_v3 = vpop.eup %6749  ;;  %2366 = vadd.xlane.f32.xlu2 %v2365_v63 }
 0x6c5   : > { %v2636_v16 = vmul.f32 %v6750_v3, %v2361_v51  ;;  %v2085_v18 = vpop.xlane.xlu0 %2084  ;;  %v9321_v42 = vpop.eup %6751  ;;  %vm2641_vm11 = vweird.f32 %v6750_v3 }
 0x6c6   : > { %v2160_v24 = vsub.f32 %v12970_v34, %v2085_v18  ;;  %v2161_v29 = vsub.f32 %v12969_v57, %v2085_v18  ;;  %v2644_v57 = vand.u32 2147483647, %v2361_v51  ;;  %v2561_v0 = vmul.f32 %v9321_v42, %v9252_v21  ;;  %vm2642_vm15 = vmor %vm2640_vm14, %vm2641_vm11 }
 0x6c7   : > { %v2637_v63 = vsub.f32 1.0, %v2636_v16  ;;  %v9330_v16 = vpop.eup %6753  ;;  %vm2580_vm11 = vweird.f32 %v9240_v46  ;;  %vm2566_vm13 = vweird.f32 %v9321_v42 }
 0x6c8   : > { %v2262_v48 = vmul.f32 1.442695, %v2160_v24  ;;  %v2264_v50 = vmul.f32 1.442695, %v2161_v29  ;;  %v2632_v29 = vor.u32 1.1754944e-38, %v2631_v35  ;;  %v9336_v18 = vpop.eup %6755  ;;  %vm2645_vm1 = vcmp.eq.f32.partialorder %v2644_v57, 8.507059e+37  ;;  %vm9413_vm12 = vmor %vm2580_vm11, %vm2581_vm9 }
 0x6c9   : > { %v2638_v34 = vmul.f32 %v6750_v3, %v2637_v63  ;;  %v2609_v63 = vadd.f32 %v9285_v59, %v2608_v61  ;;  %v9347_v51 = vpop.eup %6757  ;;  %v2614_v35 = vand.u32 2147483647, %v9204_v27  ;;  %vm2521_vm11 = vweird.f32 %v9336_v18 }
 0x6ca   : > { %6759 = vpow2.f32 %v2262_v48  ;;  %v2647_v48 = vor.u32 1.1754944e-38, %v2646_v8  ;;  %v2633_v15 = vsel %vm2630_vm3, %v2632_v29, %v2628_v28  ;;  %v2599_v29 = vand.u32 2147483647, %v9228_v31 }
 0x6cb   : > { %6761 = vpow2.f32 %v2264_v50  ;;  %v2639_v24 = vadd.f32 %v6750_v3, %v2638_v34  ;;  %v2616_v50 = vand.u32 2147483648, %v9204_v27  ;;  %v2613_v34 = vsel %vm9352_vm4, %v9285_v59, %v2609_v63 }
 0x6cc   : > { %v2578_v27 = vmul.f32 %v9303_v47, %v2577_v54  ;;  %v2601_v59 = vand.u32 2147483648, %v9228_v31  ;;  %vm2615_vm6 = vcmp.eq.f32.partialorder %v2614_v35, 8.507059e+37  ;;  %v2918_v54 = vmul.f32 %v9014_v45, %v2633_v15 }
 0x6cd   : > { %v9343_v62 = vpop.xlane.xlu0 %2339  ;;  %v2643_v37 = vsel %vm2642_vm15, %v6750_v3, %v2639_v24  ;;  %v2562_v24 = vsub.f32 1.0, %v2561_v0  ;;  %vm2600_vm10 = vcmp.eq.f32.partialorder %v2599_v29, 8.507059e+37  ;;  %v2571_v29 = vand.u32 2147483648, %v9252_v21 }
 0x6ce   : > { %6763 = vrcp.f32 %v9343_v62  ;;  %v2648_v61 = vsel %vm2645_vm1, %v2647_v48, %v2643_v37  ;;  %v2594_v48 = vadd.f32 %v9297_v30, %v2593_v60  ;;  %v2579_v45 = vadd.f32 %v9303_v47, %v2578_v27 }
 0x6cf   : > { %v2920_v3 = vmul.f32 %v9118_v32, %v2648_v61  ;;  %v2921_v33 = vmul.f32 %v9120_v12, %v2648_v61  ;;  %6765 = vpow2.f32 %v2252_v17  ;;  %v2546_v32 = vmul.f32 %v9347_v51, %v9271_v11 }
 0x6d0   : > { %v9362_v57 = vpop.eup %6759  ;;  %v2617_v12 = vor.u32 1.1754944e-38, %v2616_v50  ;;  %6767 = vrcp.f32 %v9311_v22  ;;  %v2919_v17 = vmul.f32 %v9016_v49, %v2633_v15  ;;  %v9389_v50 = vpop.xlane.xlu1 %2327  ;;  %v2598_v31 = vsel %vm9383_vm8, %v9297_v30, %v2594_v48 }
 0x6d1   : > { %v9369_v37 = vpop.eup %6761  ;;  %2954 = vmatpush.xpose.msrb.mxu0 %v2920_v3  ;;  %2983 = vmatpush.xpose.msrb.mxu1 %v2921_v33  ;;  %v2563_v49 = vmul.f32 %v9321_v42, %v2562_v24  ;;  %v2547_v61 = vsub.f32 1.0, %v2546_v32  ;;  %v2602_v3 = vor.u32 1.1754944e-38, %v2601_v59  ;;  %v2586_v33 = vand.u32 2147483648, %v9240_v46 }
 0x6d2   : > { %v2371_v28 = vadd.f32 %v9369_v37, %v9362_v57  ;;  %v2618_v63 = vsel %vm2615_vm6, %v2617_v12, %v2613_v34  ;;  %v2516_v30 = vmul.f32 %v9336_v18, %v9288_v6  ;;  %v2584_v15 = vand.u32 2147483647, %v9240_v46  ;;  %v9418_v12 = vpop.xlane.xlu2 %2399 }
 0x6d3   : > { %6769 = vrcp.f32 %v9364_v44  ;;  %v2916_v24 = vmul.f32 %v9028_v56, %v2618_v63  ;;  %v2917_v48 = vmul.f32 %v9030_v20, %v2618_v63  ;;  %v2603_v27 = vsel %vm2600_vm10, %v2602_v3, %v2598_v31 }
 0x6d4   : > { %v9387_v60 = vpop.eup %6763  ;;  %2372 = vadd.xlane.f32.xlu0 %v2371_v28  ;;  %6771 = vrcp.f32 %v9389_v50  ;;  %v2583_v46 = vsel %vm9413_vm12, %v9303_v47, %v2579_v45  ;;  %v2564_v59 = vadd.f32 %v9321_v42, %v2563_v49  ;;  %v2587_v28 = vor.u32 1.1754944e-38, %v2586_v33 }
 0x6d5   : > { %v2531_v8 = vmul.f32 %v9387_v60, %v9343_v62  ;;  %2955 = vmatpush.xpose.msrb.mxu0 %v2918_v54  ;;  %2984 = vmatpush.xpose.msrb.mxu1 %v2919_v17  ;;  %v9399_v35 = vpop.xlane.xlu0 %2405  ;;  %v9406_v34 = vpop.eup %6765  ;;  %v2548_v54 = vmul.f32 %v9347_v51, %v2547_v61  ;;  %vm2585_vm14 = vcmp.eq.f32.partialorder %v2584_v15, 8.507059e+37  ;;  %vm2565_vm15 = vweird.f32 %v9252_v21 }
 0x6d6   : > { %v9425_v56 = vpop.eup %6767  ;;  %v2362_v17 = vadd.f32 %v9406_v34, %v9330_v16  ;;  %v2569_v47 = vand.u32 2147483647, %v9252_v21  ;;  %v2914_v63 = vmul.f32 %v9040_v38, %v2603_v27  ;;  %v2915_v0 = vmul.f32 %v9042_v2, %v2603_v27  ;;  %vm9437_vm1 = vmor %vm2565_vm15, %vm2566_vm13 }
 0x6d7   : > { %v2532_v20 = vsub.f32 1.0, %v2531_v8  ;;  %v2588_v31 = vsel %vm2585_vm14, %v2587_v28, %v2583_v46  ;;  %v2517_v49 = vsub.f32 1.0, %v2516_v30  ;;  %v2501_v61 = vmul.f32 %v9425_v56, %v9311_v22 }
 0x6d8   : > { %v9443_v8 = vpop.xlane.xlu1 %2396  ;;  %v2568_v38 = vsel %vm9437_vm1, %v9321_v42, %v2564_v59  ;;  %v2572_v3 = vor.u32 1.1754944e-38, %v2571_v29  ;;  %v2549_v33 = vadd.f32 %v9347_v51, %v2548_v54  ;;  %vm2551_vm2 = vweird.f32 %v9347_v51 }
 0x6d9   : > { %2956 = vmatpush.xpose.msrb.mxu0 %v2916_v24  ;;  %2985 = vmatpush.xpose.msrb.mxu1 %v2917_v48  ;;  %v9448_v21 = vpop.eup %6769  ;;  %v2533_v30 = vmul.f32 %v9387_v60, %v2532_v20  ;;  %v2912_v24 = vmul.f32 %v9056_v13, %v2588_v31  ;;  %vm2570_vm3 = vcmp.eq.f32.partialorder %v2569_v47, 8.507059e+37  ;;  %v2556_v42 = vand.u32 2147483648, %v9271_v11 }
 0x6da   : > { %v9455_v15 = vpop.eup %6771  ;;  %v2913_v48 = vmul.f32 %v9058_v41, %v2588_v31  ;;  %v2573_v27 = vsel %vm2570_vm3, %v2572_v3, %v2568_v38  ;;  %vm2550_vm4 = vweird.f32 %v9271_v11  ;;  %v2554_v32 = vand.u32 2147483647, %v9271_v11  ;;  %v9465_v28 = vpop.xlane.xlu2 %2321 }
 0x6db   : > { %v2518_v46 = vmul.f32 %v9336_v18, %v2517_v49  ;;  %v2502_v59 = vsub.f32 1.0, %v2501_v61  ;;  %v2486_v20 = vmul.f32 %v9448_v21, %v9364_v44  ;;  %vm9467_vm5 = vmor %vm2550_vm4, %vm2551_vm2  ;;  %vm2520_vm6 = vweird.f32 %v9288_v6 }
 0x6dc   : > { %2363 = vadd.xlane.f32.xlu0 %v2362_v17  ;;  %v2471_v41 = vmul.f32 %v9455_v15, %v9389_v50  ;;  %v2553_v11 = vsel %vm9467_vm5, %v9347_v51, %v2549_v33  ;;  %v2534_v29 = vadd.f32 %v9387_v60, %v2533_v30  ;;  %vm2536_vm7 = vweird.f32 %v9387_v60  ;;  %vm9511_vm13 = vmor %vm2520_vm6, %vm2521_vm11 }
 0x6dd   : > { %2957 = vmatpush.xpose.msrb.mxu0 %v2914_v63  ;;  %2986 = vmatpush.xpose.msrb.mxu1 %v2915_v0  ;;  %v9450_v2 = vpop.xlane.xlu0 %2408  ;;  %v2910_v54 = vmul.f32 %v9078_v25, %v2573_v27  ;;  %v2911_v17 = vmul.f32 %v9080_v5, %v2573_v27  ;;  %v2557_v47 = vor.u32 1.1754944e-38, %v2556_v42  ;;  %v2541_v63 = vand.u32 2147483648, %v9343_v62 }
 0x6de   : > { %6773 = vrcp.f32 %v9465_v28  ;;  %vm2555_vm8 = vcmp.eq.f32.partialorder %v2554_v32, 8.507059e+37  ;;  %vm2535_vm9 = vweird.f32 %v9343_v62  ;;  %v2539_v0 = vand.u32 2147483647, %v9343_v62  ;;  %v3078_v32 = vld [vmem:[%s7389_s23 + $0x80] sm:$0xff] }
 0x6df   : > { %v2487_v31 = vsub.f32 1.0, %v2486_v20  ;;  %v2558_v45 = vsel %vm2555_vm8, %v2557_v47, %v2553_v11  ;;  %vm9487_vm10 = vmor %vm2535_vm9, %vm2536_vm7  ;;  %v2519_v25 = vadd.f32 %v9336_v18, %v2518_v46  ;;  %v2472_v5 = vsub.f32 1.0, %v2471_v41 }
 0x6e0   : > { %v9485_v51 = vpop.xlane.xlu1 %2318  ;;  %v2538_v62 = vsel %vm9487_vm10, %v9387_v60, %v2534_v29  ;;  %v2524_v38 = vand.u32 2147483647, %v9288_v6  ;;  %v2503_v3 = vmul.f32 %v9425_v56, %v2502_v59  ;;  %v2542_v33 = vor.u32 1.1754944e-38, %v2541_v63  ;;  %v3082_v29 = vld [vmem:[%s7389_s23 + $0xa0] sm:$0xff] }
 0x6e1   : > { %2958 = vmatpush.xpose.msrb.mxu0 %v2912_v24  ;;  %2987 = vmatpush.xpose.msrb.mxu1 %v2913_v48  ;;  %v2526_v30 = vand.u32 2147483648, %v9288_v6  ;;  %v2509_v24 = vand.u32 2147483647, %v9311_v22  ;;  %v2511_v42 = vand.u32 2147483648, %v9311_v22  ;;  %6775 = vrcp.f32 %v9485_v51 }
 0x6e2   : > { %v2908_v48 = vmul.f32 %v9104_v36, %v2558_v45  ;;  %v2909_v27 = vmul.f32 %v9106_v58, %v2558_v45  ;;  %vm2540_vm12 = vcmp.eq.f32.partialorder %v2539_v0, 8.507059e+37  ;;  %v2523_v59 = vsel %vm9511_vm13, %v9336_v18, %v2519_v25 }
 0x6e3   : > { %v2543_v46 = vsel %vm2540_vm12, %v2542_v33, %v2538_v62  ;;  %v2488_v20 = vmul.f32 %v9448_v21, %v2487_v31  ;;  %6777 = vrcp.f32 %v9418_v12  ;;  %v2504_v58 = vadd.f32 %v9425_v56, %v2503_v3 }
 0x6e4   : > { %v9519_v36 = vpop.eup %6773  ;;  %vm2506_vm14 = vweird.f32 %v9425_v56  ;;  %v2473_v6 = vmul.f32 %v9455_v15, %v2472_v5  ;;  %v3086_v13 = vmul.f32 0.17677669, %v3078_v32  ;;  %vm2525_vm15 = vcmp.eq.f32.partialorder %v2524_v38, 8.507059e+37  ;;  %v3080_v38 = vld [vmem:[%s7389_s23 + $0x90] sm:$0xff] }
 0x6e5   : > { %2959 = vmatpush.xpose.msrb.mxu0 %v2910_v54  ;;  %2988 = vmatpush.xpose.msrb.mxu1 %v2911_v17  ;;  %v9493_v61 = vpop.xlane.xlu0 %2402  ;;  %v2527_v41 = vor.u32 1.1754944e-38, %v2526_v30  ;;  %vm2505_vm1 = vweird.f32 %v9311_v22  ;;  %v2906_v18 = vmul.f32 %v9144_v9, %v2543_v46  ;;  %v2907_v11 = vmul.f32 %v9146_v19, %v2543_v46 }
 0x6e6   : > { %vm9528_vm2 = vcmp.eq.f32.partialorder %v2509_v24, 8.507059e+37  ;;  %v2512_v54 = vor.u32 1.1754944e-38, %v2511_v42  ;;  %v2441_v17 = vmul.f32 %v9519_v36, %v9465_v28  ;;  %vm9534_vm3 = vmor %vm2505_vm1, %vm2506_vm14  ;;  %v2489_v0 = vadd.f32 %v9448_v21, %v2488_v20 }
 0x6e7   : > { %v2528_v47 = vsel %vm2525_vm15, %v2527_v41, %v2523_v59  ;;  %vm2491_vm4 = vweird.f32 %v9448_v21  ;;  %v9540_v9 = vpop.eup %6775  ;;  %v2508_v22 = vsel %vm9534_vm3, %v9425_v56, %v2504_v58  ;;  %v2496_v31 = vand.u32 2147483648, %v9364_v44 }
 0x6e8   : > { %v2474_v45 = vadd.f32 %v9455_v15, %v2473_v6  ;;  %vm2476_vm5 = vweird.f32 %v9455_v15  ;;  %vm2490_vm6 = vweird.f32 %v9364_v44  ;;  %v2494_v49 = vand.u32 2147483647, %v9364_v44 }
 0x6e9   : > { %2960 = vmatpush.xpose.msrb.mxu0 %v2908_v48  ;;  %2989 = vmatpush.xpose.msrb.mxu1 %v2909_v27  ;;  %v2481_v25 = vand.u32 2147483648, %v9389_v50  ;;  %v9554_v5 = vpop.eup %6777  ;;  %v2904_v62 = vmul.f32 %v8974_v10, %v2528_v47  ;;  %v2905_v56 = vmul.f32 %v8976_v39, %v2528_v47  ;;  %vm9561_vm7 = vmor %vm2490_vm6, %vm2491_vm4  ;;  %vm2475_vm8 = vweird.f32 %v9389_v50 }
 0x6ea   : > { %v2479_v33 = vand.u32 2147483647, %v9389_v50  ;;  %v2442_v44 = vsub.f32 1.0, %v2441_v17  ;;  %v2426_v30 = vmul.f32 %v9540_v9, %v9485_v51  ;;  %v2513_v10 = vsel %vm9528_vm2, %v2512_v54, %v2508_v22  ;;  %vm9576_vm9 = vmor %vm2475_vm8, %vm2476_vm5  ;;  %v13026_v54 = vld [vmem:[#allocation23_spill] sm:$0xff] }
 0x6eb   : > { %v2493_v39 = vsel %vm9561_vm7, %v9448_v21, %v2489_v0  ;;  %v2497_v50 = vor.u32 1.1754944e-38, %v2496_v31  ;;  %v2478_v42 = vsel %vm9576_vm9, %v9455_v15, %v2474_v45  ;;  %v9586_v48 = vmul.f32 %v9554_v5, %v9418_v12 }
 0x6ec   : > { %v3088_v21 = vmul.f32 0.17677669, %v3080_v38  ;;  %vm2495_vm10 = vcmp.eq.f32.partialorder %v2494_v49, 8.507059e+37  ;;  %v2482_v27 = vor.u32 1.1754944e-38, %v2481_v25  ;;  %v2902_v32 = vmul.f32 %v8984_v1, %v2513_v10 }
 0x6ed   : > { %2961 = vmatpush.xpose.msrb.mxu0 %v2906_v18  ;;  %2990 = vmatpush.xpose.msrb.mxu1 %v2907_v11  ;;  %v9542_v19 = vpop.xlane.xlu0 %2324  ;;  %v2903_v60 = vmul.f32 %v8986_v53, %v2513_v10  ;;  %v2498_v46 = vsel %vm2495_vm10, %v2497_v50, %v2493_v39  ;;  %vm2480_vm11 = vcmp.eq.f32.partialorder %v2479_v33, 8.507059e+37  ;;  %v2427_v20 = vsub.f32 1.0, %v2426_v30 }
 0x6ee   : > { %3110 = vxpose.xlu1.b32.start [1/4] (short) %v3086_v13, 128  ;;  %6779 = vrcp.f32 %v9542_v19  ;;  %v2483_v58 = vsel %vm2480_vm11, %v2482_v27, %v2478_v42  ;;  %v2443_v15 = vmul.f32 %v9519_v36, %v2442_v44  ;;  %v2832_v1 = vsub.f32 1.0, %v9586_v48 }
 0x6ef   : > { %6781 = vrcp.f32 %v9450_v2  ;;  %v2900_v53 = vmul.f32 %v8992_v23, %v2498_v46  ;;  %v2901_v41 = vmul.f32 %v8994_v55, %v2498_v46  ;;  %v2898_v17 = vmul.f32 %v13026_v54, %v2483_v58  ;;  %v9700_v44 = vpop.xlane.xlu1 %2387 }
 0x6f0   : > { %6783 = vrcp.f32 %v9399_v35  ;;  %v2449_v47 = vand.u32 2147483647, %v9465_v28  ;;  %v2451_v63 = vand.u32 2147483648, %v9465_v28  ;;  %v2466_v0 = vand.u32 2147483648, %v9542_v19 }
 0x6f1   : > { %2962 = vmatpush.xpose.msrb.mxu0 %v2904_v62  ;;  %2991 = vmatpush.xpose.msrb.mxu1 %v2905_v56  ;;  %v2444_v22 = vadd.f32 %v9519_v36, %v2443_v15  ;;  %vm2446_vm12 = vweird.f32 %v9519_v36  ;;  %v2428_v23 = vmul.f32 %v9540_v9, %v2427_v20  ;;  %6785 = vrcp.f32 %v9493_v61  ;;  %v13027_v62 = vld [vmem:[#allocation34_spill] sm:$0xff] }
 0x6f2   : > { %v2464_v31 = vand.u32 2147483647, %v9542_v19  ;;  %v3090_v25 = vmul.f32 0.17677669, %v3082_v29  ;;  %v2899_v56 = vmul.f32 %v13027_v62, %v2483_v58  ;;  %vm2445_vm14 = vweird.f32 %v9465_v28  ;;  %v13036_v29 = vld [vmem:[#allocation35_spill] sm:$0xff] }
 0x6f3   : > { %6787 = vrcp.f32 %v9443_v8  ;;  %vm2460_vm15 = vweird.f32 %v9542_v19  ;;  %vm9620_vm1 = vmor %vm2445_vm14, %vm2446_vm12  ;;  %vm9624_vm2 = vcmp.eq.f32.partialorder %v2449_v47, 8.507059e+37  ;;  %v2467_v28 = vor.u32 1.1754944e-38, %v2466_v0 }
 0x6f4   : > { %v6780_v59 = vpop.eup %6779  ;;  %v2448_v30 = vsel %vm9620_vm1, %v9519_v36, %v2444_v22  ;;  %vm2431_vm4 = vweird.f32 %v9540_v9  ;;  %vm2465_vm5 = vcmp.eq.f32.partialorder %v2464_v31, 8.507059e+37  ;;  %v2429_v50 = vadd.f32 %v9540_v9, %v2428_v23 }
 0x6f5   : > { %v2456_v6 = vmul.f32 %v6780_v59, %v9542_v19  ;;  %v9593_v13 = vpop.xlane.xlu0 %2393  ;;  %2963 = vmatpush.xpose.msrb.mxu0 %v2902_v32  ;;  %2992 = vmatpush.xpose.msrb.mxu1 %v2903_v60  ;;  %v9598_v18 = vpop.eup %6781  ;;  %vm2461_vm13 = vweird.f32 %v6780_v59  ;;  %v2452_v19 = vor.u32 1.1754944e-38, %v2451_v63  ;;  %v2436_v48 = vand.u32 2147483648, %v9485_v51  ;;  %v3084_v60 = vld [vmem:[%s7389_s23 + $0xb0] sm:$0xff] }
 0x6f6   : > { %3111 = vxpose.xlu1.b32.cont [2/4] (short) %v3088_v21, 128  ;;  %v9610_v45 = vpop.eup %6783  ;;  %v2876_v49 = vmul.f32 %v9598_v18, %v9450_v2  ;;  %vm9628_vm3 = vmor %vm2460_vm15, %vm2461_vm13  ;;  %vm2430_vm6 = vweird.f32 %v9485_v51  ;;  %v2434_v46 = vand.u32 2147483647, %v9485_v51  ;;  %v2833_v58 = vmul.f32 %v9554_v5, %v2832_v1 }
 0x6f7   : > { %v2457_v11 = vsub.f32 1.0, %v2456_v6  ;;  %v2861_v10 = vmul.f32 %v9610_v45, %v9399_v35  ;;  %v9645_v21 = vpop.eup %6785  ;;  %vm9656_vm7 = vmor %vm2430_vm6, %vm2431_vm4  ;;  %v2869_v63 = vand.u32 2147483647, %v9399_v35  ;;  %v2871_v23 = vand.u32 2147483648, %v9399_v35 }
 0x6f8   : > { %v2877_v42 = vsub.f32 1.0, %v2876_v49  ;;  %v2846_v6 = vmul.f32 %v9645_v21, %v9493_v61  ;;  %vm2435_vm8 = vcmp.eq.f32.partialorder %v2434_v46, 8.507059e+37  ;;  %v9679_v0 = vadd.f32 %v9554_v5, %v2833_v58 }
 0x6f9   : > { %v2458_v55 = vmul.f32 %v6780_v59, %v2457_v11  ;;  %2964 = vmatpush.xpose.msrb.mxu0 %v2900_v53  ;;  %2993 = vmatpush.xpose.msrb.mxu1 %v2901_v41  ;;  %v9661_v15 = vpop.eup %6787  ;;  %v3092_v53 = vmul.f32 0.17677669, %v3084_v60  ;;  %v2437_v41 = vor.u32 1.1754944e-38, %v2436_v48  ;;  %v9669_v11 = vpop.xlane.xlu2 %2390  ;;  %vm2881_vm9 = vweird.f32 %v9598_v18 }
 0x6fa   : > { %v2878_v51 = vmul.f32 %v9598_v18, %v2877_v42  ;;  %v9675_v47 = vmul.f32 %v9661_v15, %v9443_v8  ;;  %v2886_v49 = vand.u32 2147483648, %v9450_v2  ;;  %vm2836_vm10 = vweird.f32 %v9554_v5 }
 0x6fb   : > { %v2459_v38 = vadd.f32 %v6780_v59, %v2458_v55  ;;  %v2847_v55 = vsub.f32 1.0, %v2846_v6  ;;  %vm2880_vm11 = vweird.f32 %v9450_v2  ;;  %v2884_v3 = vand.u32 2147483647, %v9450_v2  ;;  %v13044_v6 = vld [vmem:[#allocation8_spill] sm:$0xff] }
 0x6fc   : > { %v2879_v31 = vadd.f32 %v9598_v18, %v2878_v51  ;;  %vm2866_vm12 = vweird.f32 %v9610_v45  ;;  %vm9696_vm13 = vmor %vm2880_vm11, %vm2881_vm9  ;;  %vm2865_vm15 = vweird.f32 %v9399_v35  ;;  %v2872_v48 = vor.u32 1.1754944e-38, %v2871_v23  ;;  %v13043_v51 = vld [vmem:[#allocation38_spill] sm:$0xff] }
 0x6fd   : > { %v9638_v39 = vpop.xlane.xlu0 %2315  ;;  %2965 = vmatpush.xpose.msrb.mxu0 %v2898_v17  ;;  %2994 = vmatpush.xpose.msrb.mxu1 %v2899_v56  ;;  %v2463_v24 = vsel %vm9628_vm3, %v6780_v59, %v2459_v38  ;;  %v2453_v59 = vsel %vm9624_vm2, %v2452_v19, %v2448_v30  ;;  %v2817_v30 = vsub.f32 1.0, %v9675_v47  ;;  %v2848_v19 = vmul.f32 %v9645_v21, %v2847_v55  ;;  %vm9715_vm2 = vmor %vm2865_vm15, %vm2866_vm12  ;;  %v13049_v55 = vld [vmem:[#allocation36_spill] sm:$0xff] }
 0x6fe   : > { %3112 = vxpose.xlu1.b32.cont [3/4] (short) %v3090_v25, 128  ;;  %6789 = vrcp.f32 %v9638_v39  ;;  %v2468_v36 = vsel %vm2465_vm5, %v2467_v28, %v2463_v24  ;;  %v2894_v1 = vmul.f32 %v9128_v4, %v2453_v59  ;;  %v2895_v54 = vmul.f32 %v13036_v29, %v2453_v59 }
 0x6ff   : > { %v2896_v27 = vmul.f32 %v9200_v14, %v2468_v36  ;;  %v2897_v32 = vmul.f32 %v9202_v40, %v2468_v36  ;;  %v2862_v14 = vsub.f32 1.0, %v2861_v10  ;;  %v2433_v40 = vsel %vm9656_vm7, %v9540_v9, %v2429_v50 }
 0x700   : > { %v2438_v9 = vsel %vm2435_vm8, %v2437_v41, %v2433_v40  ;;  %6791 = vrcp.f32 %v9593_v13  ;;  %v2421_v38 = vand.u32 2147483648, %v9638_v39  ;;  %v2883_v2 = vsel %vm9696_vm13, %v9598_v18, %v2879_v31 }
 0x701   : > { %2966 = vmatpush.xpose.msrb.mxu0 %v2896_v27  ;;  %2995 = vmatpush.xpose.msrb.mxu1 %v2897_v32  ;;  %v2863_v4 = vmul.f32 %v9610_v45, %v2862_v14  ;;  %6793 = vrcp.f32 %v9669_v11  ;;  %v2892_v62 = vmul.f32 %v9152_v7, %v2438_v9  ;;  %v2893_v56 = vmul.f32 %v9156_v26, %v2438_v9 }
 0x702   : > { %v2419_v7 = vand.u32 2147483647, %v9638_v39  ;;  %v2887_v24 = vor.u32 1.1754944e-38, %v2886_v49  ;;  %vm2415_vm1 = vweird.f32 %v9638_v39  ;;  %vm9719_vm3 = vcmp.eq.f32.partialorder %v2869_v63, 8.507059e+37  ;;  %v13050_v49 = vld [vmem:[#allocation32_spill] sm:$0xff] }
 0x703   : > { %v2864_v26 = vadd.f32 %v9610_v45, %v2863_v4  ;;  %6795 = vrcp.f32 %v9700_v44  ;;  %v2422_v35 = vor.u32 1.1754944e-38, %v2421_v38  ;;  %vm2885_vm5 = vcmp.eq.f32.partialorder %v2884_v3, 8.507059e+37 }
 0x704   : > { %v6790_v17 = vpop.eup %6789  ;;  %vm2420_vm6 = vcmp.eq.f32.partialorder %v2419_v7, 8.507059e+37  ;;  %v2888_v32 = vsel %vm2885_vm5, %v2887_v24, %v2883_v2  ;;  %v2849_v20 = vadd.f32 %v9645_v21, %v2848_v19  ;;  %vm2851_vm7 = vweird.f32 %v9645_v21 }
 0x705   : > { %v2411_v22 = vmul.f32 %v6790_v17, %v9638_v39  ;;  %2967 = vmatpush.xpose.msrb.mxu0 %v2894_v1  ;;  %2996 = vmatpush.xpose.msrb.mxu1 %v2895_v54  ;;  %vm2416_vm14 = vweird.f32 %v6790_v17  ;;  %v9727_v39 = vpop.xlane.xlu2 %2384  ;;  %v2868_v60 = vsel %vm9715_vm2, %v9610_v45, %v2864_v26  ;;  %vm2850_vm8 = vweird.f32 %v9493_v61  ;;  %v13052_v26 = vld [vmem:[#allocation39_spill] sm:$0xff] }
 0x706   : > { %3113 = vxpose.xlu1.b32.end [4/4] (short) %v3092_v53, 128  ;;  %v9710_v10 = vpop.eup %6791  ;;  %vm2417_vm4 = vmor %vm2415_vm1, %vm2416_vm14  ;;  %v2856_v40 = vand.u32 2147483648, %v9493_v61  ;;  %6797 = vrcp.f32 %v9727_v39  ;;  %v2952_v45 = vmul.f32 %v13043_v51, %v2888_v32  ;;  %v2953_v53 = vmul.f32 %v13044_v6, %v2888_v32  ;;  %v13055_v32 = vld [vmem:[#allocation30_spill] sm:$0xff] }
 0x707   : > { %v2412_v25 = vsub.f32 1.0, %v2411_v22  ;;  %v9723_v18 = vpop.eup %6793  ;;  %v2801_v46 = vmul.f32 %v9710_v10, %v9593_v13  ;;  %v2854_v41 = vand.u32 2147483647, %v9493_v61  ;;  %v2873_v1 = vsel %vm9719_vm3, %v2872_v48, %v2868_v60  ;;  %vm9746_vm9 = vmor %vm2850_vm8, %vm2851_vm7 }
 0x708   : > { %vm2835_vm11 = vweird.f32 %v9418_v12  ;;  %v2786_v54 = vmul.f32 %v9723_v18, %v9669_v11  ;;  %v2853_v47 = vsel %vm9746_vm9, %v9645_v21, %v2849_v20  ;;  %v2841_v63 = vand.u32 2147483648, %v9418_v12 }
 0x709   : > { %v2413_v28 = vmul.f32 %v6790_v17, %v2412_v25  ;;  %2968 = vmatpush.xpose.msrb.mxu0 %v2892_v62  ;;  %2997 = vmatpush.xpose.msrb.mxu1 %v2893_v56  ;;  %v9752_v29 = vpop.eup %6795  ;;  %vm9763_vm12 = vmor %vm2835_vm11, %vm2836_vm10  ;;  %v2857_v22 = vor.u32 1.1754944e-38, %v2856_v40  ;;  %v2839_v23 = vand.u32 2147483647, %v9418_v12  ;;  %v2950_v31 = vmul.f32 %v13049_v55, %v2873_v1 }
 0x70a   : > { %v2838_v4 = vsel %vm9763_vm12, %v9554_v5, %v9679_v0  ;;  %v2951_v21 = vmul.f32 %v13050_v49, %v2873_v1  ;;  %vm2855_vm13 = vcmp.eq.f32.partialorder %v2854_v41, 8.507059e+37  ;;  %vm2821_vm10 = vweird.f32 %v9661_v15  ;;  %v13059_v41 = vld [vmem:[#allocation13_spill] sm:$0xff] }
 0x70b   : > { %v2414_v50 = vadd.f32 %v6790_v17, %v2413_v28  ;;  %v2771_v25 = vmul.f32 %v9752_v29, %v9700_v44  ;;  %v2858_v62 = vsel %vm2855_vm13, %v2857_v22, %v2853_v47  ;;  %v2787_v5 = vsub.f32 1.0, %v2786_v54  ;;  %v13051_v28 = vld [vmem:[#allocation12_spill] sm:$0xff] }
 0x70c   : > { %v9780_v38 = vpop.eup %6797  ;;  %v2842_v0 = vor.u32 1.1754944e-38, %v2841_v63  ;;  %v2826_v3 = vand.u32 2147483648, %v9443_v8  ;;  %vm2840_vm14 = vcmp.eq.f32.partialorder %v2839_v23, 8.507059e+37  ;;  %vm2820_vm15 = vweird.f32 %v9443_v8 }
 0x70d   : > { %v2418_v27 = vsel %vm2417_vm4, %v6790_v17, %v2414_v50  ;;  %v2802_v17 = vsub.f32 1.0, %v2801_v46  ;;  %v2824_v33 = vand.u32 2147483647, %v9443_v8  ;;  %v2948_v7 = vmul.f32 %v13051_v28, %v2858_v62  ;;  %vm9790_vm1 = vmor %vm2820_vm15, %vm2821_vm10  ;;  %v13056_v46 = vld [vmem:[#allocation31_spill] sm:$0xff] }
 0x70e   : > { %v2423_v59 = vsel %vm2420_vm6, %v2422_v35, %v2418_v27  ;;  %v2843_v2 = vsel %vm2840_vm14, %v2842_v0, %v2838_v4  ;;  %v2772_v24 = vsub.f32 1.0, %v2771_v25  ;;  %v2756_v50 = vmul.f32 %v9780_v38, %v9727_v39 }
 0x70f   : > { %v2890_v58 = vmul.f32 %v9224_v52, %v2423_v59  ;;  %v2891_v14 = vmul.f32 %v9226_v43, %v2423_v59  ;;  %v2818_v43 = vmul.f32 %v9661_v15, %v2817_v30  ;;  %v9756_v61 = vpop.xlane.xlu0 %2381  ;;  %v2803_v12 = vmul.f32 %v9710_v10, %v2802_v17  ;;  %v13060_v52 = vld [vmem:[#allocation44_spill] sm:$0xff] }
 0x710   : > { %6799 = vrcp.f32 %v9756_v61  ;;  %v2949_v30 = vmul.f32 %v13052_v26, %v2858_v62  ;;  %v2827_v8 = vor.u32 1.1754944e-38, %v2826_v3  ;;  %vm2806_vm2 = vweird.f32 %v9710_v10  ;;  %v13068_v26 = vld [vmem:[#allocation37_spill] sm:$0xff] }
 0x711   : > { %2969 = vmatpush.xpose.msrb.mxu0 %v2890_v58  ;;  %2998 = vmatpush.xpose.msrb.mxu1 %v2891_v14  ;;  %v2819_v56 = vadd.f32 %v9661_v15, %v2818_v43  ;;  %v2804_v36 = vadd.f32 %v9710_v10, %v2803_v12  ;;  %v2788_v35 = vmul.f32 %v9723_v18, %v2787_v5  ;;  %v2811_v27 = vand.u32 2147483648, %v9593_v13  ;;  %v13073_v14 = vld [vmem:[#allocation41_spill] sm:$0xff] }
 0x712   : > { %v2946_v60 = vmul.f32 %v13055_v32, %v2843_v2  ;;  %vm2825_vm3 = vcmp.eq.f32.partialorder %v2824_v33, 8.507059e+37  ;;  %vm2805_vm4 = vweird.f32 %v9593_v13  ;;  %v2809_v20 = vand.u32 2147483647, %v9593_v13 }
 0x713   : > { %v2823_v42 = vsel %vm9790_vm1, %v9661_v15, %v2819_v56  ;;  %v2947_v15 = vmul.f32 %v13056_v46, %v2843_v2  ;;  %v2757_v58 = vsub.f32 1.0, %v2756_v50  ;;  %vm9809_vm5 = vmor %vm2805_vm4, %vm2806_vm2  ;;  %v2773_v40 = vmul.f32 %v9752_v29, %v2772_v24 }
 0x714   : > { %v2828_v59 = vsel %vm2825_vm3, %v2827_v8, %v2823_v42  ;;  %v2789_v6 = vadd.f32 %v9723_v18, %v2788_v35  ;;  %vm2791_vm6 = vweird.f32 %v9723_v18  ;;  %v2812_v13 = vor.u32 1.1754944e-38, %v2811_v27  ;;  %v13070_v27 = vld [vmem:[#allocation42_spill] sm:$0xff] }
 0x715   : > { %3012 = vmatpush.xpose.msra.mxu0 %v2952_v45  ;;  %3041 = vmatpush.xpose.msra.mxu1 %v2953_v53  ;;  %v2808_v45 = vsel %vm9809_vm5, %v9710_v10, %v2804_v36  ;;  %v2944_v1 = vmul.f32 %v13059_v41, %v2828_v59  ;;  %v2945_v43 = vmul.f32 %v13060_v52, %v2828_v59  ;;  %v2796_v54 = vand.u32 2147483648, %v9669_v11  ;;  %v13069_v36 = vld [vmem:[#allocation40_spill] sm:$0xff] }
 0x716   : > { %v9802_v48 = vpop.eup %6799  ;;  %vm2810_vm7 = vcmp.eq.f32.partialorder %v2809_v20, 8.507059e+37  ;;  %vm2790_vm8 = vweird.f32 %v9669_v11  ;;  %v2794_v10 = vand.u32 2147483647, %v9669_v11  ;;  %v2774_v9 = vadd.f32 %v9752_v29, %v2773_v40 }
 0x717   : > { %v2741_v51 = vmul.f32 %v9802_v48, %v9756_v61  ;;  %v2813_v17 = vsel %vm2810_vm7, %v2812_v13, %v2808_v45  ;;  %vm9829_vm9 = vmor %vm2790_vm8, %vm2791_vm6  ;;  %vm2776_vm11 = vweird.f32 %v9752_v29  ;;  %v2758_v63 = vmul.f32 %v9780_v38, %v2757_v58 }
 0x718   : > { %v2793_v4 = vsel %vm9829_vm9, %v9723_v18, %v2789_v6  ;;  %v2781_v11 = vand.u32 2147483648, %v9700_v44  ;;  %v2797_v23 = vor.u32 1.1754944e-38, %v2796_v54  ;;  %vm2775_vm12 = vweird.f32 %v9700_v44 }
 0x719   : > { %3013 = vmatpush.xpose.msra.mxu0 %v2950_v31  ;;  %3042 = vmatpush.xpose.msra.mxu1 %v2951_v21  ;;  %v2742_v22 = vsub.f32 1.0, %v2741_v51  ;;  %v2779_v55 = vand.u32 2147483647, %v9700_v44  ;;  %v13063_v31 = vld [vmem:[#allocation43_spill] sm:$0xff]  ;;  %vm2795_vm13 = vcmp.eq.f32.partialorder %v2794_v10, 8.507059e+37  ;;  %vm9844_vm10 = vmor %vm2775_vm12, %vm2776_vm11  ;;  %v2759_v5 = vadd.f32 %v9780_v38, %v2758_v63  ;;  %v13074_v51 = vld [vmem:[#allocation45_spill] sm:$0xff] }
 0x71a   : > { %v2942_v49 = vmul.f32 %v13063_v31, %v2813_v17  ;;  %v13064_v21 = vld [vmem:[#allocation11_spill] sm:$0xff]  ;;  %v2798_v56 = vsel %vm2795_vm13, %v2797_v23, %v2793_v4  ;;  %v2778_v18 = vsel %vm9844_vm10, %v9752_v29, %v2774_v9  ;;  %vm2761_vm14 = vweird.f32 %v9780_v38  ;;  %v13067_v29 = vld [vmem:[#allocation33_spill] sm:$0xff] }
 0x71b   : > { %v2943_v25 = vmul.f32 %v13064_v21, %v2813_v17  ;;  %v2743_v44 = vmul.f32 %v9802_v48, %v2742_v22  ;;  %v2782_v0 = vor.u32 1.1754944e-38, %v2781_v11  ;;  %v2766_v3 = vand.u32 2147483648, %v9727_v39  ;;  %v13077_v9 = vld [vmem:[#allocation27_spill] sm:$0xff]  ;;  %v13078_v22 = vld [vmem:[#allocation21_spill] sm:$0xff] }
 0x71c   : > { %vm2780_vm15 = vcmp.eq.f32.partialorder %v2779_v55, 8.507059e+37  ;;  %vm2760_vm1 = vweird.f32 %v9727_v39  ;;  %v2764_v28 = vand.u32 2147483647, %v9727_v39  ;;  %vm2746_vm3 = vweird.f32 %v9802_v48  ;;  %v9891_v21 = vld [vmem:[%s7389_s23 + $0x248] sm:$0xff] }
 0x71d   : > { %3014 = vmatpush.xpose.msra.mxu0 %v2948_v7  ;;  %3043 = vmatpush.xpose.msra.mxu1 %v2949_v30  ;;  %v2940_v7 = vmul.f32 %v13067_v29, %v2798_v56  ;;  %v2941_v30 = vmul.f32 %v13068_v26, %v2798_v56  ;;  %v2783_v2 = vsel %vm2780_vm15, %v2782_v0, %v2778_v18  ;;  %vm2762_vm2 = vmor %vm2760_vm1, %vm2761_vm14  ;;  %v2767_v50 = vor.u32 1.1754944e-38, %v2766_v3  ;;  %v13079_v3 = vld [vmem:[#allocation28_spill] sm:$0xff]  ;;  %v9906_v26 = vld [vmem:[%s7389_s23 + $0x258] sm:$0xff] }
 0x71e   : > { %v2763_v24 = vsel %vm2762_vm2, %v9780_v38, %v2759_v5  ;;  %v2744_v42 = vadd.f32 %v9802_v48, %v2743_v44  ;;  %v2751_v8 = vand.u32 2147483648, %v9756_v61  ;;  %v2938_v39 = vmul.f32 %v13069_v36, %v2783_v2  ;;  %2999 = vmatmul.f32.vlgmr.msrb.gmra.mxu1 %v9891_v21 }
 0x71f   : > { %v9821_v53 = vpop.xlane.xlu1 %2378  ;;  %vm2765_vm4 = vcmp.eq.f32.partialorder %v2764_v28, 8.507059e+37  ;;  %vm2745_vm5 = vweird.f32 %v9756_v61  ;;  %v2939_v32 = vmul.f32 %v13070_v27, %v2783_v2  ;;  %v2749_v38 = vand.u32 2147483647, %v9756_v61  ;;  %v13080_v28 = vld [vmem:[#allocation29_spill] sm:$0xff] }
 0x720   : > { %6801 = vrcp.f32 %v9821_v53  ;;  %vm9868_vm6 = vmor %vm2745_vm5, %vm2746_vm3  ;;  %v2752_v20 = vor.u32 1.1754944e-38, %v2751_v8  ;;  %v2736_v61 = vand.u32 2147483648, %v9821_v53  ;;  %vm2730_vm9 = vweird.f32 %v9821_v53  ;;  %v9920_v8 = vld [vmem:[%s7389_s23 + $0x268] sm:$0xff] }
 0x721   : > { %3015 = vmatpush.xpose.msra.mxu0 %v2946_v60  ;;  %3044 = vmatpush.xpose.msra.mxu1 %v2947_v15  ;;  %v2768_v60 = vsel %vm2765_vm4, %v2767_v50, %v2763_v24  ;;  %v2748_v15 = vsel %vm9868_vm6, %v9802_v48, %v2744_v42  ;;  %vm2750_vm8 = vcmp.eq.f32.partialorder %v2749_v38, 8.507059e+37  ;;  %v2734_v6 = vand.u32 2147483647, %v9821_v53  ;;  %v3081_v24 = vld [vmem:[%s7389_s23 + $0x98] sm:$0xff]  ;;  %v9917_v42 = vld [vmem:[%s7389_s23 + $0x260] sm:$0xff]  ;;  %v3083_v27 = vld [vmem:[%s7389_s23 + $0xa8] sm:$0xff] }
 0x722   : > { %v2936_v40 = vmul.f32 %v13073_v14, %v2768_v60  ;;  %v2937_v45 = vmul.f32 %v13074_v51, %v2768_v60  ;;  %v2753_v13 = vsel %vm2750_vm8, %v2752_v20, %v2748_v15  ;;  %v2737_v41 = vor.u32 1.1754944e-38, %v2736_v61  ;;  %v9941_v51 = vld [vmem:[%s7389_s23 + $0x270] sm:$0xff] }
 0x723   : > { %vm2735_vm12 = vcmp.eq.f32.partialorder %v2734_v6, 8.507059e+37  ;;  %v3089_v36 = vmul.f32 0.17677669, %v3081_v24 }
 0x725   : > { %3016 = vmatpush.xpose.msra.mxu0 %v2944_v1  ;;  %3045 = vmatpush.xpose.msra.mxu1 %v2945_v43  ;;  %v13075_v1 = vld [vmem:[#allocation46_spill] sm:$0xff] }
 0x726   : > { %v6802_v12 = vpop.eup %6801  ;;  %v2934_v52 = vmul.f32 %v13075_v1, %v2753_v13  ;;  %v13076_v43 = vld [vmem:[#allocation26_spill] sm:$0xff]  ;;  %3002 = vmatmul.f32.gmra.mxu1 %v9906_v26 }
 0x727   : > { %v2726_v33 = vmul.f32 %v6802_v12, %v9821_v53  ;;  %vm2731_vm7 = vweird.f32 %v6802_v12  ;;  %v2935_v54 = vmul.f32 %v13076_v43, %v2753_v13  ;;  %v9882_v47 = vpop.xlane.xlu1 %2369  ;;  %v3085_v43 = vld [vmem:[%s7389_s23 + $0xb8] sm:$0xff] }
 0x728   : > { %vm2732_vm11 = vmor %vm2730_vm9, %vm2731_vm7  ;;  %vm2685_vm2 = vweird.f32 %v9882_v47  ;;  %v2691_v20 = vand.u32 2147483648, %v9882_v47 }
 0x729   : > { %3017 = vmatpush.xpose.msra.mxu0 %v2942_v49  ;;  %3046 = vmatpush.xpose.msra.mxu1 %v2943_v25  ;;  %v2727_v19 = vsub.f32 1.0, %v2726_v33  ;;  %v9888_v49 = vld [vmem:[%s7389_s23 + $0x240] sm:$0xff] }
 0x72a   : > { %2970 = vmatmul.f32.vlgmr.msrb.gmra.mxu0 %v9888_v49  ;;  %v2692_v1 = vor.u32 1.1754944e-38, %v2691_v20 }
 0x72b   : > { %v2728_v35 = vmul.f32 %v6802_v12, %v2727_v19 }
 0x72d   : > { %3018 = vmatpush.xpose.msra.mxu0 %v2940_v7  ;;  %3047 = vmatpush.xpose.msra.mxu1 %v2941_v30  ;;  %v2729_v59 = vadd.f32 %v6802_v12, %v2728_v35  ;;  %v9903_v7 = vld [vmem:[%s7389_s23 + $0x250] sm:$0xff] }
 0x72e   : > { %3005 = vmatmul.f32.gmra.mxu1 %v9920_v8 }
 0x72f   : > { %v2376_v58 = vpop.xlane.xlu2 %2375  ;;  %v2733_v48 = vsel %vm2732_vm11, %v6802_v12, %v2729_v59  ;;  %v3079_v12 = vld [vmem:[%s7389_s23 + $0x88] sm:$0xff]  ;;  %v3091_v59 = vmul.f32 0.17677669, %v3083_v27  ;;  %v3101_v27 = vld [vmem:[%s7389_s23 + $0x1b8] sm:$0xff] }
 0x730   : > { %6803 = vrcp.f32 %v2376_v58  ;;  %v2738_v10 = vsel %vm2735_vm12, %v2737_v41, %v2733_v48  ;;  %v2721_v23 = vand.u32 2147483648, %v2376_v58  ;;  %v2719_v31 = vand.u32 2147483647, %v2376_v58 }
 0x731   : > { %3019 = vmatpush.xpose.msra.mxu0 %v2938_v39  ;;  %3048 = vmatpush.xpose.msra.mxu1 %v2939_v32  ;;  %v2932_v63 = vmul.f32 %v13077_v9, %v2738_v10  ;;  %v2933_v4 = vmul.f32 %v13078_v22, %v2738_v10  ;;  %6805 = vrcp.f32 %v9882_v47  ;;  %vm2715_vm10 = vweird.f32 %v2376_v58 }
 0x732   : > { %v2722_v62 = vor.u32 1.1754944e-38, %v2721_v23  ;;  %vm2720_vm15 = vcmp.eq.f32.partialorder %v2719_v31, 8.507059e+37  ;;  %v3087_v0 = vmul.f32 0.17677669, %v3079_v12  ;;  %2973 = vmatmul.f32.gmra.mxu0 %v9903_v7  ;;  %v13085_v12 = vld [vmem:[#allocation20_spill] sm:$0xff] }
 0x734   : > { %3142 = vxpose.xlu2.b32.start [1/4] (short) %v3087_v0, 128 }
 0x735   : > { %3020 = vmatpush.xpose.msra.mxu0 %v2936_v40  ;;  %3049 = vmatpush.xpose.msra.mxu1 %v2937_v45  ;;  %v2689_v40 = vand.u32 2147483647, %v9882_v47  ;;  %v9944_v45 = vld [vmem:[%s7389_s23 + $0x278] sm:$0xff] }
 0x736   : > { %v6804_v17 = vpop.eup %6803  ;;  %3008 = vmatmul.f32.gmra.mxu1 %v9944_v45 }
 0x737   : > { %v2711_v53 = vmul.f32 %v6804_v17, %v2376_v58  ;;  %vm2716_vm13 = vweird.f32 %v6804_v17  ;;  %v9895_v56 = vpop.eup %6805  ;;  %v9897_v18 = vpop.xlane.xlu2 %2366  ;;  %vm2690_vm6 = vcmp.eq.f32.partialorder %v2689_v40, 8.507059e+37 }
 0x738   : > { %vm2717_vm14 = vmor %vm2715_vm10, %vm2716_vm13  ;;  %v2681_v30 = vmul.f32 %v9895_v56, %v9882_v47  ;;  %6807 = vrcp.f32 %v9897_v18  ;;  %vm2686_vm1 = vweird.f32 %v9895_v56  ;;  %vm2670_vm11 = vweird.f32 %v9897_v18 }
 0x739   : > { %3021 = vmatpush.xpose.msra.mxu0 %v2934_v52  ;;  %3050 = vmatpush.xpose.msra.mxu1 %v2935_v54  ;;  %v2712_v11 = vsub.f32 1.0, %v2711_v53  ;;  %vm9935_vm3 = vmor %vm2685_vm2, %vm2686_vm1  ;;  %v2676_v22 = vand.u32 2147483648, %v9897_v18  ;;  %v2674_v31 = vand.u32 2147483647, %v9897_v18 }
 0x73a   : > { %v2682_v2 = vsub.f32 1.0, %v2681_v30  ;;  %2976 = vmatmul.f32.gmra.mxu0 %v9917_v42  ;;  %v13087_v30 = vld [vmem:[#allocation22_spill] sm:$0xff] }
 0x73b   : > { %v2713_v55 = vmul.f32 %v6804_v17, %v2712_v11  ;;  %v2677_v0 = vor.u32 1.1754944e-38, %v2676_v22 }
 0x73c   : > { %v2683_v39 = vmul.f32 %v9895_v56, %v2682_v2  ;;  %3143 = vxpose.xlu2.b32.cont [2/4] (short) %v3089_v36, 128 }
 0x73d   : > { %3022 = vmatpush.xpose.msra.mxu0 %v2932_v63  ;;  %3051 = vmatpush.xpose.msra.mxu1 %v2933_v4  ;;  %v2714_v25 = vadd.f32 %v6804_v17, %v2713_v55  ;;  %v3093_v4 = vmul.f32 0.17677669, %v3085_v43 }
 0x73e   : > { %v9914_v50 = vpop.eup %6807  ;;  %v2684_v60 = vadd.f32 %v9895_v56, %v2683_v39 }
 0x73f   : > { %v2718_v5 = vsel %vm2717_vm14, %v6804_v17, %v2714_v25  ;;  %v2666_v35 = vmul.f32 %v9914_v50, %v9897_v18  ;;  %vm2671_vm8 = vweird.f32 %v9914_v50  ;;  %vm2675_vm14 = vcmp.eq.f32.partialorder %v2674_v31, 8.507059e+37 }
 0x740   : > { %v2723_v44 = vsel %vm2720_vm15, %v2722_v62, %v2718_v5  ;;  %v2688_v6 = vsel %vm9935_vm3, %v9895_v56, %v2684_v60  ;;  %vm9961_vm12 = vmor %vm2670_vm11, %vm2671_vm8  ;;  %v3099_v60 = vld [vmem:[%s7389_s23 + $0x1a8] sm:$0xff] }
 0x741   : > { %v2930_v33 = vmul.f32 %v13079_v3, %v2723_v44  ;;  %v2931_v29 = vmul.f32 %v13080_v28, %v2723_v44  ;;  %v2667_v38 = vsub.f32 1.0, %v2666_v35  ;;  %v2693_v17 = vsel %vm2690_vm6, %v2692_v1, %v2688_v6  ;;  %v13086_v44 = vld [vmem:[#allocation14_spill] sm:$0xff] }
 0x742   : > { %2979 = vmatmul.f32.gmra.mxu0 %v9941_v51  ;;  %v3100_v35 = vld [vmem:[%s7389_s23 + $0x1b0] sm:$0xff] }
 0x743   : > { %3023 = vmatpush.xpose.msra.mxu0 %v2930_v33  ;;  %3052 = vmatpush.xpose.msra.mxu1 %v2931_v29  ;;  %v2668_v41 = vmul.f32 %v9914_v50, %v2667_v38  ;;  %v3096_v38 = vld [vmem:[%s7389_s23 + $0x190] sm:$0xff] }
 0x744   : > { %3144 = vxpose.xlu2.b32.cont [3/4] (short) %v3091_v59, 128 }
 0x745   : > { %v2669_v9 = vadd.f32 %v9914_v50, %v2668_v41 }
 0x747   : > { %v2373_v19 = vpop.xlane.xlu0 %2372  ;;  %v2673_v56 = vsel %vm9961_vm12, %v9914_v50, %v2669_v9 }
 0x748   : > { %6809 = vrcp.f32 %v2373_v19  ;;  %v2706_v61 = vand.u32 2147483648, %v2373_v19  ;;  %v2704_v48 = vand.u32 2147483647, %v2373_v19  ;;  %vm2700_vm5 = vweird.f32 %v2373_v19 }
 0x749   : > { %v2678_v33 = vsel %vm2675_vm14, %v2677_v0, %v2673_v56 }
 0x74a   : > { %v2707_v10 = vor.u32 1.1754944e-38, %v2706_v61  ;;  %vm2705_vm9 = vcmp.eq.f32.partialorder %v2704_v48, 8.507059e+37  ;;  %v2924_v2 = vmul.f32 %v13087_v30, %v2678_v33 }
 0x74c   : > { %3145 = vxpose.xlu2.b32.end [4/4] (short) %v3093_v4, 128 }
 0x74e   : > { %v6810_v32 = vpop.eup %6809 }
 0x74f   : > { %v2696_v46 = vmul.f32 %v6810_v32, %v2373_v19  ;;  %v9930_v15 = vpop.xlane.xlu0 %2363  ;;  %vm2701_vm4 = vweird.f32 %v6810_v32  ;;  %v13088_v19 = vld [vmem:[#allocation19_spill] sm:$0xff] }
 0x750   : > { %6811 = vrcp.f32 %v9930_v15  ;;  %vm2702_vm7 = vmor %vm2700_vm5, %vm2701_vm4  ;;  %v2661_v5 = vand.u32 2147483648, %v9930_v15  ;;  %vm2655_vm10 = vweird.f32 %v9930_v15  ;;  %v2659_v3 = vand.u32 2147483647, %v9930_v15 }
 0x751   : > { %v2697_v58 = vsub.f32 1.0, %v2696_v46  ;;  %v2925_v24 = vmul.f32 %v13088_v19, %v2678_v33  ;;  %v3097_v46 = vld [vmem:[%s7389_s23 + $0x198] sm:$0xff] }
 0x752   : > { %v2662_v29 = vor.u32 1.1754944e-38, %v2661_v5  ;;  %vm2660_vm1 = vcmp.eq.f32.partialorder %v2659_v3, 8.507059e+37 }
 0x753   : > { %v2698_v13 = vmul.f32 %v6810_v32, %v2697_v58 }
 0x755   : > { %v2699_v52 = vadd.f32 %v6810_v32, %v2698_v13 }
 0x756   : > { %v6812_v54 = vpop.eup %6811 }
 0x757   : > { %v2651_v47 = vmul.f32 %v6812_v54, %v9930_v15  ;;  %v2703_v53 = vsel %vm2702_vm7, %v6810_v32, %v2699_v52  ;;  %vm2656_vm13 = vweird.f32 %v6812_v54  ;;  %v3098_v32 = vld [vmem:[%s7389_s23 + $0x1a0] sm:$0xff] }
 0x758   : > { %v2708_v63 = vsel %vm2705_vm9, %v2707_v10, %v2703_v53  ;;  %vm2657_vm15 = vmor %vm2655_vm10, %vm2656_vm13 }
 0x759   : > { %v2652_v11 = vsub.f32 1.0, %v2651_v47  ;;  %v2928_v23 = vmul.f32 %v9362_v57, %v2708_v63  ;;  %v2929_v55 = vmul.f32 %v9369_v37, %v2708_v63  ;;  %v2926_v57 = vmul.f32 %v13085_v12, %v2693_v17 }
 0x75a   : > { %v2927_v37 = vmul.f32 %v13086_v44, %v2693_v17 }
 0x75b   : > { %v2653_v62 = vmul.f32 %v6812_v54, %v2652_v11  ;;  %3024 = vmatpush.xpose.msra.mxu0 %v2928_v23  ;;  %3053 = vmatpush.xpose.msra.mxu1 %v2929_v55 }
 0x75d   : > { %v2654_v18 = vadd.f32 %v6812_v54, %v2653_v62 }
 0x75f   : > { %3025 = vmatpush.xpose.msra.mxu0 %v2926_v57  ;;  %3054 = vmatpush.xpose.msra.mxu1 %v2927_v37  ;;  %v2658_v28 = vsel %vm2657_vm15, %v6812_v54, %v2654_v18 }
 0x760   : > { %v2663_v50 = vsel %vm2660_vm1, %v2662_v29, %v2658_v28 }
 0x761   : > { %v2922_v36 = vmul.f32 %v9330_v16, %v2663_v50  ;;  %v2923_v39 = vmul.f32 %v9406_v34, %v2663_v50  ;;  %v3094_v16 = vld [vmem:[%s7389_s23 + $0x180] sm:$0xff]  ;;  %v3095_v34 = vld [vmem:[%s7389_s23 + $0x188] sm:$0xff] }
 0x763   : > { %3026 = vmatpush.xpose.msra.mxu0 %v2924_v2  ;;  %3055 = vmatpush.xpose.msra.mxu1 %v2925_v24 }
 0x767   : > { %3027 = vmatpush.xpose.msra.mxu0 %v2922_v36  ;;  %3056 = vmatpush.xpose.msra.mxu1 %v2923_v39 }
 0x76a   : > { %3028 = vmatmul.f32.vlgmr.msra.gmra.mxu0 %v9888_v49  ;;  %3057 = vmatmul.f32.vlgmr.msra.gmra.mxu1 %v9891_v21 }
 0x76b   : > { %3282 = vmatpush.msrb.mxu0 %v3100_v35  ;;  %3395 = vmatpush.msrb.mxu1 %v3101_v27 }
 0x76d   : > { %3283 = vmatpush.msrb.mxu0 %v3098_v32  ;;  %3396 = vmatpush.msrb.mxu1 %v3099_v60 }
 0x76f   : > { %3284 = vmatpush.msrb.mxu0 %v3096_v38  ;;  %3397 = vmatpush.msrb.mxu1 %v3097_v46 }
 0x771   : > { %3285 = vmatpush.msrb.mxu0 %v3094_v16  ;;  %3398 = vmatpush.msrb.mxu1 %v3095_v34 }
 0x772   : > { %3031 = vmatmul.f32.gmra.mxu0 %v9903_v7  ;;  %3060 = vmatmul.f32.gmra.mxu1 %v9906_v26 }
 0x77a   : > { %3034 = vmatmul.f32.gmra.mxu0 %v9917_v42  ;;  %3063 = vmatmul.f32.gmra.mxu1 %v9920_v8 }
 0x782   : > { %3037 = vmatmul.f32.gmra.mxu0 %v9941_v51  ;;  %3066 = vmatmul.f32.gmra.mxu1 %v9944_v45 }
 0x792   : > { %v3126_v49 = vpop.trf.xlu1 }
 0x793   : > { %6241 = vmatmul.msk.f32.vlgmr.msrb.gmra.mxu0 %vm233_vm0, %v3126_v49  ;;  %6273 = vmatmul.msk.f32.vlgmr.msrb.gmra.mxu1 %vm233_vm0, %v3126_v49 }
 0x79a   : > { %v3127_v21 = vpop.trf.xlu1 }
 0x79b   : > { %6242 = vmatmul.msk.f32.gmra.mxu0 %vm233_vm0, %v3127_v21  ;;  %6274 = vmatmul.msk.f32.gmra.mxu1 %vm233_vm0, %v3127_v21  ;;  %v3000_v15 = vpop.f32.mrf.mxu1 }
 0x7a2   : > { %v3128_v7 = vpop.trf.xlu1 }
 0x7a3   : > { %6243 = vmatmul.msk.f32.gmra.mxu0 %vm233_vm0, %v3128_v7  ;;  %6275 = vmatmul.msk.f32.gmra.mxu1 %vm233_vm0, %v3128_v7  ;;  %v3003_v14 = vpop.f32.mrf.mxu1 }
 0x7a7   : > { %v2971_v8 = vpop.f32.mrf.mxu0 }
 0x7a8   : > { %v3001_v20 = vadd.f32 %v3000_v15, %v2971_v8 }
 0x7aa   : > { %v3129_v26 = vpop.trf.xlu1  ;;  %3070 = vst [vmem:[%s8730_s24 + $0x40] sm:$0xff] %v3001_v20 }
 0x7ab   : > { %6244 = vmatmul.msk.f32.gmra.mxu0 %vm233_vm0, %v3129_v26  ;;  %6276 = vmatmul.msk.f32.gmra.mxu1 %vm233_vm0, %v3129_v26  ;;  %v3006_v61 = vpop.f32.mrf.mxu1 }
 0x7af   : > { %v2974_v58 = vpop.f32.mrf.mxu0 }
 0x7b0   : > { %v3004_v51 = vadd.f32 %v3003_v14, %v2974_v58 }
 0x7b2   : > { %v3130_v42 = vpop.trf.xlu1  ;;  %3072 = vst [vmem:[%s8730_s24 + $0x50] sm:$0xff] %v3004_v51 }
 0x7b3   : > { %6245 = vmatmul.msk.f32.gmra.mxu0 %vm233_vm0, %v3130_v42  ;;  %6277 = vmatmul.msk.f32.gmra.mxu1 %vm233_vm0, %v3130_v42  ;;  %v3009_v41 = vpop.f32.mrf.mxu1 }
 0x7b7   : > { %v2977_v45 = vpop.f32.mrf.mxu0 }
 0x7b8   : > { %v3007_v13 = vadd.f32 %v3006_v61, %v2977_v45 }
 0x7ba   : > { %v3131_v59 = vpop.trf.xlu1  ;;  %3074 = vst [vmem:[%s8730_s24 + $0x60] sm:$0xff] %v3007_v13 }
 0x7bb   : > { %6246 = vmatmul.msk.f32.gmra.mxu0 %vm233_vm0, %v3131_v59  ;;  %6278 = vmatmul.msk.f32.gmra.mxu1 %vm233_vm0, %v3131_v59 }
 0x7bf   : > { %v2980_v48 = vpop.f32.mrf.mxu0 }
 0x7c0   : > { %v3010_v52 = vadd.f32 %v3009_v41, %v2980_v48 }
 0x7c2   : > { %v3132_v40 = vpop.trf.xlu1  ;;  %3076 = vst [vmem:[%s8730_s24 + $0x70] sm:$0xff] %v3010_v52 }
 0x7c3   : > { %6247 = vmatmul.msk.f32.gmra.mxu0 %vm233_vm0, %v3132_v40  ;;  %6279 = vmatmul.msk.f32.gmra.mxu1 %vm233_vm0, %v3132_v40 }
 0x7ca   : > { %v3133_v6 = vpop.trf.xlu1 }
 0x7cb   : > { %6248 = vmatmul.msk.f32.gmra.mxu0 %vm233_vm0, %v3133_v6  ;;  %6280 = vmatmul.msk.f32.gmra.mxu1 %vm233_vm0, %v3133_v6 }
 0x7cd   : > { %v3158_v11 = vpop.trf.xlu2 }
 0x7d2   : > { %v3134_v1 = vpop.trf.xlu1 }
 0x7d3   : > { %6249 = vmatmul.msk.f32.gmra.mxu0 %vm233_vm0, %v3134_v1  ;;  %6281 = vmatmul.msk.f32.gmra.mxu1 %vm233_vm0, %v3134_v1 }
 0x7d5   : > { %v3159_v62 = vpop.trf.xlu2 }
 0x7da   : > { %v3135_v43 = vpop.trf.xlu1 }
 0x7db   : > { %6250 = vmatmul.msk.f32.gmra.mxu0 %vm233_vm0, %v3135_v43  ;;  %6282 = vmatmul.msk.f32.gmra.mxu1 %vm233_vm0, %v3135_v43 }
 0x7dd   : > { %v3160_v44 = vpop.trf.xlu2 }
 0x7e2   : > { %v3136_v54 = vpop.trf.xlu1 }
 0x7e3   : > { %6251 = vmatmul.msk.f32.gmra.mxu0 %vm233_vm0, %v3136_v54  ;;  %6283 = vmatmul.msk.f32.gmra.mxu1 %vm233_vm0, %v3136_v54 }
 0x7e5   : > { %v3161_v3 = vpop.trf.xlu2 }
 0x7e7   : > { %v3029_v10 = vpop.f32.mrf.mxu0  ;;  %v3058_v17 = vpop.f32.mrf.mxu1 }
 0x7e8   : > { %v3059_v47 = vadd.f32 %v3058_v17, %v3029_v10 }
 0x7ea   : > { %v3137_v53 = vpop.trf.xlu1  ;;  %3071 = vst [vmem:[%s8730_s24 + $0x48] sm:$0xff] %v3059_v47 }
 0x7eb   : > { %6252 = vmatmul.msk.f32.gmra.mxu0 %vm233_vm0, %v3137_v53  ;;  %6284 = vmatmul.msk.f32.gmra.mxu1 %vm233_vm0, %v3137_v53 }
 0x7ed   : > { %v3162_v29 = vpop.trf.xlu2 }
 0x7ef   : > { %v3032_v9 = vpop.f32.mrf.mxu0  ;;  %v3061_v63 = vpop.f32.mrf.mxu1 }
 0x7f0   : > { %v3062_v22 = vadd.f32 %v3061_v63, %v3032_v9 }
 0x7f2   : > { %v3138_v4 = vpop.trf.xlu1  ;;  %3073 = vst [vmem:[%s8730_s24 + $0x58] sm:$0xff] %v3062_v22 }
 0x7f3   : > { %6253 = vmatmul.msk.f32.gmra.mxu0 %vm233_vm0, %v3138_v4  ;;  %6285 = vmatmul.msk.f32.gmra.mxu1 %vm233_vm0, %v3138_v4 }
 0x7f5   : > { %v3163_v19 = vpop.trf.xlu2 }
 0x7f7   : > { %v3035_v23 = vpop.f32.mrf.mxu0  ;;  %v3064_v55 = vpop.f32.mrf.mxu1 }
 0x7f8   : > { %v3065_v31 = vadd.f32 %v3064_v55, %v3035_v23 }
 0x7fa   : > { %v3139_v25 = vpop.trf.xlu1  ;;  %3075 = vst [vmem:[%s8730_s24 + $0x68] sm:$0xff] %v3065_v31 }
 0x7fb   : > { %6254 = vmatmul.msk.f32.gmra.mxu0 %vm233_vm0, %v3139_v25  ;;  %6286 = vmatmul.msk.f32.gmra.mxu1 %vm233_vm0, %v3139_v25 }
 0x7fd   : > { %v3164_v36 = vpop.trf.xlu2 }
 0x7ff   : > { %v3038_v56 = vpop.f32.mrf.mxu0  ;;  %v3067_v5 = vpop.f32.mrf.mxu1 }
 0x800   : > { %v3068_v12 = vadd.f32 %v3067_v5, %v3038_v56 }
 0x802   : > { %v3140_v57 = vpop.trf.xlu1  ;;  %3077 = vst [vmem:[%s8730_s24 + $0x78] sm:$0xff] %v3068_v12 }
 0x803   : > { %6255 = vmatmul.msk.f32.gmra.mxu0 %vm233_vm0, %v3140_v57  ;;  %6287 = vmatmul.msk.f32.gmra.mxu1 %vm233_vm0, %v3140_v57 }
 0x805   : > { %v3165_v60 = vpop.trf.xlu2 }
 0x80a   : > { %v3141_v37 = vpop.trf.xlu1 }
 0x80b   : > { %6256 = vmatmul.msk.f32.gmra.mxu0 %vm233_vm0, %v3141_v37  ;;  %6288 = vmatmul.msk.f32.gmra.mxu1 %vm233_vm0, %v3141_v37 }
 0x80d   : > { %v3166_v34 = vpop.trf.xlu2 }
 0x810   : > { %v10033_v0 = vpop.f32.mrf.mxu0  ;;  %v10035_v18 = vpop.f32.mrf.mxu1 }
 0x813   : > { %6257 = vmatmul.msk.f32.gmra.mxu0 %vm233_vm0, %v3158_v11  ;;  %6289 = vmatmul.msk.f32.gmra.mxu1 %vm233_vm0, %v3158_v11 }
 0x815   : > { %v3167_v26 = vpop.trf.xlu2 }
 0x818   : > { %v10039_v33 = vpop.f32.mrf.mxu0  ;;  %v10041_v28 = vpop.f32.mrf.mxu1 }
 0x81b   : > { %6258 = vmatmul.msk.f32.gmra.mxu0 %vm233_vm0, %v3159_v62  ;;  %6290 = vmatmul.msk.f32.gmra.mxu1 %vm233_vm0, %v3159_v62 }
 0x81d   : > { %v3168_v59 = vpop.trf.xlu2 }
 0x820   : > { %v10045_v30 = vpop.f32.mrf.mxu0  ;;  %v10047_v2 = vpop.f32.mrf.mxu1 }
 0x823   : > { %6259 = vmatmul.msk.f32.gmra.mxu0 %vm233_vm0, %v3160_v44  ;;  %6291 = vmatmul.msk.f32.gmra.mxu1 %vm233_vm0, %v3160_v44 }
 0x825   : > { %v3169_v61 = vpop.trf.xlu2 }
 0x828   : > { %v10051_v24 = vpop.f32.mrf.mxu0  ;;  %v10053_v50 = vpop.f32.mrf.mxu1 }
 0x829   : > { %13089 = vst [vmem:[#allocation18_spill] sm:$0xff] %v10051_v24 }
 0x82a   : > { %13090 = vst [vmem:[#allocation15_spill] sm:$0xff] %v10053_v50 }
 0x82b   : > { %6260 = vmatmul.msk.f32.gmra.mxu0 %vm233_vm0, %v3161_v3  ;;  %6292 = vmatmul.msk.f32.gmra.mxu1 %vm233_vm0, %v3161_v3 }
 0x82d   : > { %v3170_v41 = vpop.trf.xlu2 }
 0x830   : > { %v10057_v39 = vpop.f32.mrf.mxu0  ;;  %v10059_v35 = vpop.f32.mrf.mxu1 }
 0x833   : > { %6261 = vmatmul.msk.f32.gmra.mxu0 %vm233_vm0, %v3162_v29  ;;  %6293 = vmatmul.msk.f32.gmra.mxu1 %vm233_vm0, %v3162_v29 }
 0x835   : > { %v3171_v54 = vpop.trf.xlu2 }
 0x838   : > { %v10063_v27 = vpop.f32.mrf.mxu0  ;;  %v10065_v32 = vpop.f32.mrf.mxu1 }
 0x839   : > { %v3511_v25 = vmax.f32 %v10063_v27, %v10065_v32 }
 0x83b   : > { %6262 = vmatmul.msk.f32.gmra.mxu0 %vm233_vm0, %v3163_v19  ;;  %6294 = vmatmul.msk.f32.gmra.mxu1 %vm233_vm0, %v3163_v19 }
 0x83d   : > { %v3172_v53 = vpop.trf.xlu2 }
 0x840   : > { %v10069_v38 = vpop.f32.mrf.mxu0  ;;  %v10071_v46 = vpop.f32.mrf.mxu1 }
 0x841   : > { %v3514_v16 = vmax.f32 %v10069_v38, %v10071_v46 }
 0x843   : > { %3515 = vmax.xlane.f32.xlu0 %v3514_v16  ;;  %6263 = vmatmul.msk.f32.gmra.mxu0 %vm233_vm0, %v3164_v36 }
 0x844   : > { %6295 = vmatmul.msk.f32.gmra.mxu1 %vm233_vm0, %v3164_v36 }
 0x845   : > { %v3173_v5 = vpop.trf.xlu2 }
 0x848   : > { %v10077_v49 = vpop.f32.mrf.mxu0  ;;  %v10079_v21 = vpop.f32.mrf.mxu1 }
 0x849   : > { %v3517_v7 = vmax.f32 %v10077_v49, %v10079_v21 }
 0x84b   : > { %3518 = vmax.xlane.f32.xlu2 %v3517_v7  ;;  %6264 = vmatmul.msk.f32.gmra.mxu0 %vm233_vm0, %v3165_v60 }
 0x84c   : > { %6296 = vmatmul.msk.f32.gmra.mxu1 %vm233_vm0, %v3165_v60 }
 0x850   : > { %v10085_v42 = vpop.f32.mrf.mxu0  ;;  %v10087_v8 = vpop.f32.mrf.mxu1 }
 0x851   : > { %v3520_v15 = vmax.f32 %v10085_v42, %v10087_v8 }
 0x853   : > { %3521 = vmax.xlane.f32.xlu0 %v3520_v15  ;;  %6265 = vmatmul.msk.f32.gmra.mxu0 %vm233_vm0, %v3166_v34 }
 0x854   : > { %6297 = vmatmul.msk.f32.gmra.mxu1 %vm233_vm0, %v3166_v34 }
 0x858   : > { %v10093_v20 = vpop.f32.mrf.mxu0  ;;  %v10095_v58 = vpop.f32.mrf.mxu1 }
 0x859   : > { %v3523_v14 = vmax.f32 %v10093_v20, %v10095_v58 }
 0x85b   : > { %3524 = vmax.xlane.f32.xlu0 %v3523_v14  ;;  %6266 = vmatmul.msk.f32.gmra.mxu0 %vm233_vm0, %v3167_v26 }
 0x85c   : > { %6298 = vmatmul.msk.f32.gmra.mxu1 %vm233_vm0, %v3167_v26 }
 0x860   : > { %v10101_v40 = vpop.f32.mrf.mxu0  ;;  %v10103_v51 = vpop.f32.mrf.mxu1 }
 0x861   : > { %v3526_v45 = vmax.f32 %v10101_v40, %v10103_v51 }
 0x863   : > { %3527 = vmax.xlane.f32.xlu0 %v3526_v45  ;;  %6267 = vmatmul.msk.f32.gmra.mxu0 %vm233_vm0, %v3168_v59 }
 0x864   : > { %6299 = vmatmul.msk.f32.gmra.mxu1 %vm233_vm0, %v3168_v59 }
 0x868   : > { %v10109_v6 = vpop.f32.mrf.mxu0  ;;  %v10111_v13 = vpop.f32.mrf.mxu1 }
 0x869   : > { %v3529_v48 = vmax.f32 %v10109_v6, %v10111_v13 }
 0x86b   : > { %3530 = vmax.xlane.f32.xlu0 %v3529_v48  ;;  %6268 = vmatmul.msk.f32.gmra.mxu0 %vm233_vm0, %v3169_v61 }
 0x86c   : > { %6300 = vmatmul.msk.f32.gmra.mxu1 %vm233_vm0, %v3169_v61 }
 0x870   : > { %v10117_v1 = vpop.f32.mrf.mxu0  ;;  %v10119_v52 = vpop.f32.mrf.mxu1 }
 0x871   : > { %v3532_v43 = vmax.f32 %v10117_v1, %v10119_v52 }
 0x873   : > { %3533 = vmax.xlane.f32.xlu0 %v3532_v43  ;;  %6269 = vmatmul.msk.f32.gmra.mxu0 %vm233_vm0, %v3170_v41 }
 0x874   : > { %6301 = vmatmul.msk.f32.gmra.mxu1 %vm233_vm0, %v3170_v41 }
 0x878   : > { %v10125_v10 = vpop.f32.mrf.mxu0  ;;  %v10127_v17 = vpop.f32.mrf.mxu1 }
 0x879   : > { %v3535_v47 = vmax.f32 %v10125_v10, %v10127_v17 }
 0x87b   : > { %3536 = vmax.xlane.f32.xlu0 %v3535_v47  ;;  %6270 = vmatmul.msk.f32.gmra.mxu0 %vm233_vm0, %v3171_v54 }
 0x87c   : > { %6302 = vmatmul.msk.f32.gmra.mxu1 %vm233_vm0, %v3171_v54 }
 0x880   : > { %v10133_v9 = vpop.f32.mrf.mxu0  ;;  %v10135_v63 = vpop.f32.mrf.mxu1 }
 0x881   : > { %v3538_v22 = vmax.f32 %v10133_v9, %v10135_v63 }
 0x883   : > { %3539 = vmax.xlane.f32.xlu0 %v3538_v22  ;;  %6271 = vmatmul.msk.f32.gmra.mxu0 %vm233_vm0, %v3172_v53 }
 0x884   : > { %6303 = vmatmul.msk.f32.gmra.mxu1 %vm233_vm0, %v3172_v53 }
 0x888   : > { %v10141_v4 = vpop.f32.mrf.mxu0  ;;  %v10143_v11 = vpop.f32.mrf.mxu1 }
 0x889   : > { %v3541_v23 = vmax.f32 %v10141_v4, %v10143_v11 }
 0x88b   : > { %3542 = vmax.xlane.f32.xlu0 %v3541_v23  ;;  %6272 = vmatmul.msk.f32.gmra.mxu0 %vm233_vm0, %v3173_v5 }
 0x88c   : > { %6304 = vmatmul.msk.f32.gmra.mxu1 %vm233_vm0, %v3173_v5 }
 0x890   : > { %v10147_v55 = vpop.f32.mrf.mxu0  ;;  %v10149_v31 = vpop.f32.mrf.mxu1 }
 0x891   : > { %13091 = vst [vmem:[#allocation16_spill] sm:$0xff] %v10147_v55  ;;  %v3544_v60 = vmax.f32 %v10147_v55, %v10149_v31 }
 0x892   : > { %13092 = vst [vmem:[#allocation17_spill] sm:$0xff] %v10149_v31 }
 0x893   : > { %3512 = vmax.xlane.f32.xlu0 %v3511_v25 }
 0x898   : > { %v10153_v62 = vpop.f32.mrf.mxu0  ;;  %v10155_v56 = vpop.f32.mrf.mxu1 }
 0x899   : > { %13093 = vst [vmem:[#allocation24_spill] sm:$0xff] %v10153_v62  ;;  %v3547_v29 = vmax.f32 %v10153_v62, %v10155_v56 }
 0x89a   : > { %13094 = vst [vmem:[#allocation25_spill] sm:$0xff] %v10155_v56 }
 0x8a0   : > { %v10159_v12 = vpop.f32.mrf.mxu0  ;;  %v10161_v57 = vpop.f32.mrf.mxu1 }
 0x8a1   : > { %13095 = vst [vmem:[#allocation9_spill] sm:$0xff] %v10161_v57  ;;  %v3550_v44 = vmax.f32 %v10159_v12, %v10161_v57 }
 0x8a3   : > { %3551 = vmax.xlane.f32.xlu2 %v3550_v44 }
 0x8a8   : > { %v10165_v37 = vpop.f32.mrf.mxu0  ;;  %v10167_v3 = vpop.f32.mrf.mxu1 }
 0x8ab   : > { %3548 = vmax.xlane.f32.xlu2 %v3547_v29 }
 0x8b0   : > { %v10171_v19 = vpop.f32.mrf.mxu0  ;;  %v10173_v36 = vpop.f32.mrf.mxu1 }
 0x8b3   : > { %3545 = vmax.xlane.f32.xlu2 %v3544_v60 }
 0x8b6   : > { %v10205_v53 = vpop.xlane.xlu0 %3515 }
 0x8b8   : > { %v10177_v16 = vpop.f32.mrf.mxu0  ;;  %v10179_v34 = vpop.f32.mrf.mxu1 }
 0x8c0   : > { %v10181_v7 = vpop.f32.mrf.mxu0 }
 0x8c1   : > { %v10183_v26 = vpop.f32.mrf.mxu1 }
 0x8c6   : > { %v3522_v25 = vpop.xlane.xlu0 %3521 }
 0x8c7   : > { %v3608_v5 = vsub.f32 %v10085_v42, %v3522_v25  ;;  %v3609_v29 = vsub.f32 %v10087_v8, %v3522_v25  ;;  %v3508_v42 = vmax.f32 %v10057_v39, %v10059_v35 }
 0x8c8   : > { %v10185_v15 = vpop.f32.mrf.mxu0 }
 0x8c9   : > { %v10187_v59 = vpop.f32.mrf.mxu1  ;;  %v3688_v55 = vmul.f32 1.442695, %v3608_v5  ;;  %v3690_v56 = vmul.f32 1.442695, %v3609_v29 }
 0x8cb   : > { %6813 = vpow2.f32 %v3688_v55 }
 0x8cc   : > { %6815 = vpow2.f32 %v3690_v56  ;;  %v3505_v56 = vmax.f32 %v10051_v24, %v10053_v50 }
 0x8ce   : > { %v10237_v5 = vpop.xlane.xlu0 %3524 }
 0x8d0   : > { %v10189_v14 = vpop.f32.mrf.mxu0 }
 0x8d1   : > { %v10191_v45 = vpop.f32.mrf.mxu1  ;;  %v10227_v25 = vpop.eup %6813 }
 0x8d2   : > { %13099 = vst [vmem:[#allocation35_spill] sm:$0xff] %v10227_v25 }
 0x8d8   : > { %v10193_v61 = vpop.f32.mrf.mxu0 }
 0x8d9   : > { %v10195_v48 = vpop.f32.mrf.mxu1 }
 0x8e0   : > { %v10197_v41 = vpop.f32.mrf.mxu0 }
 0x8e1   : > { %v10199_v43 = vpop.f32.mrf.mxu1 }
 0x8e2   : > { %13096 = vst [vmem:[#allocation10_spill] sm:$0xff] %v10199_v43 }
 0x8e8   : > { %v10201_v54 = vpop.f32.mrf.mxu0 }
 0x8e9   : > { %v10203_v47 = vpop.f32.mrf.mxu1 }
 0x8ea   : > { %v3577_v29 = vmax.f32 %v10201_v54, %v10203_v47 }
 0x8f0   : > { %v10207_v22 = vpop.f32.mrf.mxu0 }
 0x8f1   : > { %v10209_v23 = vpop.f32.mrf.mxu1 }
 0x8f2   : > { %v3580_v55 = vmax.f32 %v10207_v22, %v10209_v23 }
 0x8f8   : > { %v10212_v44 = vpop.f32.mrf.mxu0 }
 0x8f9   : > { %13097 = vst [vmem:[#allocation23_spill] sm:$0xff] %v10212_v44  ;;  %v10215_v60 = vpop.f32.mrf.mxu1 }
 0x8fa   : > { %13098 = vst [vmem:[#allocation34_spill] sm:$0xff] %v10215_v60  ;;  %v3583_v31 = vmax.f32 %v10212_v44, %v10215_v60  ;;  %v10229_v60 = vpop.eup %6815 }
 0x8fb   : > { %13100 = vst [vmem:[#allocation38_spill] sm:$0xff] %v10229_v60 }
 0x8fc   : > { %3584 = vmax.xlane.f32.xlu0 %v3583_v31  ;;  %v3808_v31 = vadd.f32 %v10229_v60, %v10227_v25  ;;  %v3571_v60 = vmax.f32 %v10193_v61, %v10195_v48 }
 0x900   : > { %v10219_v62 = vpop.f32.mrf.mxu0 }
 0x901   : > { %v10221_v57 = vpop.f32.mrf.mxu1 }
 0x902   : > { %v3586_v8 = vmax.f32 %v10219_v62, %v10221_v57 }
 0x904   : > { %3509 = vmax.xlane.f32.xlu0 %v3508_v42  ;;  %3587 = vmax.xlane.f32.xlu1 %v3586_v8  ;;  %v3528_v42 = vpop.xlane.xlu0 %3527  ;;  %v3502_v8 = vmax.f32 %v10045_v30, %v10047_v2 }
 0x90c   : > { %3581 = vmax.xlane.f32.xlu0 %v3580_v55  ;;  %3809 = vadd.xlane.f32.xlu1 %v3808_v31  ;;  %v3531_v44 = vpop.xlane.xlu0 %3530  ;;  %v3574_v55 = vmax.f32 %v10197_v41, %v10199_v43  ;;  %v3499_v31 = vmax.f32 %v10039_v33, %v10041_v28 }
 0x914   : > { %3506 = vmax.xlane.f32.xlu0 %v3505_v56  ;;  %v3534_v56 = vpop.xlane.xlu0 %3533 }
 0x91c   : > { %3578 = vmax.xlane.f32.xlu0 %v3577_v29  ;;  %v3537_v29 = vpop.xlane.xlu0 %3536 }
 0x91d   : > { %v3618_v25 = vsub.f32 %v10125_v10, %v3537_v29  ;;  %v3619_v50 = vsub.f32 %v10127_v17, %v3537_v29  ;;  %v3616_v10 = vsub.f32 %v10117_v1, %v3534_v56  ;;  %v3617_v17 = vsub.f32 %v10119_v52, %v3534_v56 }
 0x91e   : > { %v3614_v52 = vsub.f32 %v10109_v6, %v3531_v44  ;;  %v3615_v56 = vsub.f32 %v10111_v13, %v3531_v44  ;;  %v3612_v6 = vsub.f32 %v10101_v40, %v3528_v42  ;;  %v3613_v44 = vsub.f32 %v10103_v51, %v3528_v42 }
 0x91f   : > { %v3708_v24 = vmul.f32 1.442695, %v3618_v25  ;;  %v3559_v42 = vmax.f32 %v10177_v16, %v10179_v34 }
 0x921   : > { %6817 = vpow2.f32 %v3708_v24  ;;  %v3706_v24 = vmul.f32 1.442695, %v3617_v17  ;;  %v3700_v17 = vmul.f32 1.442695, %v3614_v52 }
 0x924   : > { %3503 = vmax.xlane.f32.xlu0 %v3502_v8  ;;  %v3496_v8 = vmax.f32 %v10033_v0, %v10035_v18  ;;  %v3540_v25 = vpop.xlane.xlu0 %3539 }
 0x925   : > { %v3621_v51 = vsub.f32 %v10135_v63, %v3540_v25 }
 0x927   : > { %v10255_v43 = vpop.eup %6817 }
 0x928   : > { %13101 = vst [vmem:[#allocation8_spill] sm:$0xff] %v10255_v43 }
 0x92c   : > { %3575 = vmax.xlane.f32.xlu0 %v3574_v55  ;;  %v3710_v55 = vmul.f32 1.442695, %v3619_v50  ;;  %v3565_v50 = vmax.f32 %v10185_v15, %v10187_v59 }
 0x92e   : > { %6819 = vpow2.f32 %v3710_v55  ;;  %v10265_v55 = vpop.xlane.xlu0 %3542 }
 0x934   : > { %3500 = vmax.xlane.f32.xlu0 %v3499_v31  ;;  %v3568_v31 = vmax.f32 %v10189_v14, %v10191_v45 }
 0x93c   : > { %3572 = vmax.xlane.f32.xlu0 %v3571_v60  ;;  %v10257_v60 = vpop.eup %6819 }
 0x93d   : > { %13102 = vst [vmem:[#allocation36_spill] sm:$0xff] %v10257_v60  ;;  %v3823_v29 = vadd.f32 %v10257_v60, %v10255_v43 }
 0x944   : > { %3497 = vmax.xlane.f32.xlu0 %v3496_v8  ;;  %v3704_v8 = vmul.f32 1.442695, %v3616_v10 }
 0x946   : > { %6821 = vpow2.f32 %v3704_v8  ;;  %v10275_v8 = vpop.xlane.xlu0 %3512 }
 0x947   : > { %6823 = vpow2.f32 %v3706_v24  ;;  %v3562_v24 = vmax.f32 %v10181_v7, %v10183_v26 }
 0x948   : > { %6825 = vpow2.f32 %v3700_v17  ;;  %v3620_v17 = vsub.f32 %v10133_v9, %v3540_v25 }
 0x94c   : > { %3569 = vmax.xlane.f32.xlu0 %v3568_v31  ;;  %v10267_v31 = vpop.eup %6821 }
 0x94d   : > { %13103 = vst [vmem:[#allocation32_spill] sm:$0xff] %v10267_v31  ;;  %v10269_v1 = vpop.eup %6823 }
 0x94e   : > { %13104 = vst [vmem:[#allocation12_spill] sm:$0xff] %v10269_v1  ;;  %v3820_v10 = vadd.f32 %v10269_v1, %v10267_v31 }
 0x954   : > { %3824 = vadd.xlane.f32.xlu0 %v3823_v29  ;;  %v3702_v29 = vmul.f32 1.442695, %v3615_v56  ;;  %v3696_v56 = vmul.f32 1.442695, %v3612_v6 }
 0x956   : > { %6827 = vpow2.f32 %v3702_v29 }
 0x957   : > { %6829 = vpow2.f32 %v3696_v56  ;;  %v3712_v56 = vmul.f32 1.442695, %v3620_v17 }
 0x95c   : > { %3566 = vmax.xlane.f32.xlu0 %v3565_v50  ;;  %v10279_v50 = vpop.eup %6825 }
 0x95d   : > { %v10281_v60 = vpop.eup %6827 }
 0x95e   : > { %v3817_v52 = vadd.f32 %v10281_v60, %v10279_v50 }
 0x964   : > { %3821 = vadd.xlane.f32.xlu0 %v3820_v10  ;;  %v3698_v10 = vmul.f32 1.442695, %v3613_v44 }
 0x966   : > { %6831 = vpow2.f32 %v3698_v10 }
 0x96c   : > { %3563 = vmax.xlane.f32.xlu0 %v3562_v24 }
 0x96f   : > { %v10284_v13 = vpop.xlane.xlu0 %3584 }
 0x974   : > { %3818 = vadd.xlane.f32.xlu0 %v3817_v52 }
 0x977   : > { %v3510_v29 = vpop.xlane.xlu0 %3509  ;;  %v3588_v24 = vpop.xlane.xlu1 %3587 }
 0x978   : > { %v3600_v1 = vsub.f32 %v10057_v39, %v3510_v29  ;;  %v3601_v31 = vsub.f32 %v10059_v35, %v3510_v29  ;;  %v3652_v40 = vsub.f32 %v10219_v62, %v3588_v24  ;;  %v3653_v43 = vsub.f32 %v10221_v57, %v3588_v24  ;;  %v10297_v39 = vpop.eup %6829 }
 0x979   : > { %v3714_v35 = vmul.f32 1.442695, %v3621_v51  ;;  %v10299_v62 = vpop.eup %6831 }
 0x97a   : > { %v3672_v6 = vmul.f32 1.442695, %v3600_v1  ;;  %v3674_v44 = vmul.f32 1.442695, %v3601_v31  ;;  %v3776_v52 = vmul.f32 1.442695, %v3652_v40 }
 0x97b   : > { %v3778_v9 = vmul.f32 1.442695, %v3653_v43  ;;  %v3814_v43 = vadd.f32 %v10299_v62, %v10297_v39 }
 0x97c   : > { %6833 = vpow2.f32 %v3672_v6  ;;  %3560 = vmax.xlane.f32.xlu0 %v3559_v42  ;;  %v10325_v42 = vpop.f32.mrf.mxu0  ;;  %v10327_v6 = vpop.f32.mrf.mxu1 }
 0x97d   : > { %6835 = vpow2.f32 %v3674_v44 }
 0x97e   : > { %6837 = vpow2.f32 %v3776_v52  ;;  %v3610_v52 = vsub.f32 %v10093_v20, %v10237_v5  ;;  %v3622_v20 = vsub.f32 %v10141_v4, %v10265_v55 }
 0x97f   : > { %6839 = vpow2.f32 %v3778_v9  ;;  %v10301_v57 = vpop.xlane.xlu0 %3581 }
 0x980   : > { %6841 = vpow2.f32 %v3712_v56 }
 0x981   : > { %6843 = vpow2.f32 %v3714_v35  ;;  %v3589_v35 = vmax.f32 %v10325_v42, %v10327_v6 }
 0x982   : > { %v10303_v63 = vpop.eup %6833 }
 0x983   : > { %v10307_v25 = vpop.eup %6835 }
 0x984   : > { %v10309_v31 = vpop.eup %6837  ;;  %3815 = vadd.xlane.f32.xlu0 %v3814_v43  ;;  %v3796_v1 = vadd.f32 %v10307_v25, %v10303_v63  ;;  %v3611_v43 = vsub.f32 %v10095_v58, %v10237_v5  ;;  %v3556_v58 = vmax.f32 %v10171_v19, %v10173_v36 }
 0x985   : > { %13105 = vst [vmem:[#allocation39_spill] sm:$0xff] %v10309_v31  ;;  %v10313_v10 = vpop.eup %6839 }
 0x986   : > { %13106 = vst [vmem:[#allocation30_spill] sm:$0xff] %v10313_v10  ;;  %v10315_v17 = vpop.eup %6841  ;;  %3797 = vadd.xlane.f32.xlu2 %v3796_v1  ;;  %v3874_v29 = vadd.f32 %v10313_v10, %v10309_v31  ;;  %v3694_v10 = vmul.f32 1.442695, %v3611_v43 }
 0x987   : > { %v10319_v24 = vpop.eup %6843  ;;  %v10321_v40 = vpop.xlane.xlu0 %3506 }
 0x988   : > { %3875 = vadd.xlane.f32.xlu1 %v3874_v29  ;;  %v3826_v51 = vadd.f32 %v10319_v24, %v10315_v17 }
 0x98c   : > { %3827 = vadd.xlane.f32.xlu0 %v3826_v51  ;;  %v3692_v51 = vmul.f32 1.442695, %v3610_v52 }
 0x98f   : > { %v3579_v44 = vpop.xlane.xlu0 %3578 }
 0x990   : > { %v3646_v9 = vsub.f32 %v10201_v54, %v3579_v44  ;;  %v3647_v56 = vsub.f32 %v10203_v47, %v3579_v44  ;;  %v3623_v54 = vsub.f32 %v10143_v11, %v10265_v55  ;;  %v3716_v44 = vmul.f32 1.442695, %v3622_v20  ;;  %v3519_v55 = vpop.xlane.xlu2 %3518 }
 0x992   : > { %v3764_v1 = vmul.f32 1.442695, %v3646_v9  ;;  %v3766_v29 = vmul.f32 1.442695, %v3647_v56  ;;  %v3718_v9 = vmul.f32 1.442695, %v3623_v54  ;;  %v3607_v54 = vsub.f32 %v10079_v21, %v3519_v55 }
 0x993   : > { %v3553_v21 = vmax.f32 %v10165_v37, %v10167_v3 }
 0x994   : > { %6845 = vpow2.f32 %v3764_v1  ;;  %3590 = vmax.xlane.f32.xlu0 %v3589_v35 }
 0x995   : > { %6847 = vpow2.f32 %v3766_v29  ;;  %v3606_v29 = vsub.f32 %v10077_v49, %v3519_v55  ;;  %v3604_v49 = vsub.f32 %v10069_v38, %v10205_v53 }
 0x996   : > { %6849 = vpow2.f32 %v3692_v51 }
 0x997   : > { %v10337_v31 = vpop.xlane.xlu0 %3503  ;;  %6851 = vpow2.f32 %v3694_v10 }
 0x998   : > { %6853 = vpow2.f32 %v3716_v44 }
 0x999   : > { %6855 = vpow2.f32 %v3718_v9  ;;  %v3684_v9 = vmul.f32 1.442695, %v3606_v29 }
 0x99a   : > { %v10343_v47 = vpop.eup %6845 }
 0x99b   : > { %13107 = vst [vmem:[#allocation31_spill] sm:$0xff] %v10343_v47  ;;  %v10347_v5 = vpop.eup %6847 }
 0x99c   : > { %13108 = vst [vmem:[#allocation13_spill] sm:$0xff] %v10347_v5  ;;  %3557 = vmax.xlane.f32.xlu0 %v3556_v58  ;;  %v3865_v52 = vadd.f32 %v10347_v5, %v10343_v47  ;;  %v10351_v56 = vpop.eup %6849 }
 0x99d   : > { %v10353_v4 = vpop.eup %6851 }
 0x99e   : > { %3866 = vadd.xlane.f32.xlu2 %v3865_v52  ;;  %v3811_v11 = vadd.f32 %v10353_v4, %v10351_v56  ;;  %v10359_v35 = vpop.eup %6853 }
 0x99f   : > { %v10355_v10 = vpop.xlane.xlu0 %3575  ;;  %v10361_v43 = vpop.eup %6855 }
 0x9a0   : > { %v3829_v52 = vadd.f32 %v10361_v43, %v10359_v35 }
 0x9a4   : > { %3812 = vadd.xlane.f32.xlu0 %v3811_v11  ;;  %v3686_v11 = vmul.f32 1.442695, %v3607_v54  ;;  %v3603_v54 = vsub.f32 %v10065_v32, %v10275_v8  ;;  %v3649_v32 = vsub.f32 %v10209_v23, %v10301_v57  ;;  %v3597_v23 = vsub.f32 %v10047_v2, %v10337_v31 }
 0x9a7   : > { %v3501_v1 = vpop.xlane.xlu0 %3500 }
 0x9a8   : > { %v3594_v51 = vsub.f32 %v10039_v33, %v3501_v1  ;;  %v3595_v20 = vsub.f32 %v10041_v28, %v3501_v1  ;;  %v3605_v33 = vsub.f32 %v10071_v46, %v10205_v53  ;;  %v3680_v1 = vmul.f32 1.442695, %v3604_v49 }
 0x9a9   : > { %v3602_v53 = vsub.f32 %v10063_v27, %v10275_v8 }
 0x9aa   : > { %v3660_v58 = vmul.f32 1.442695, %v3594_v51  ;;  %v3662_v44 = vmul.f32 1.442695, %v3595_v20  ;;  %v3682_v51 = vmul.f32 1.442695, %v3605_v33  ;;  %v3648_v33 = vsub.f32 %v10207_v22, %v10301_v57 }
 0x9ac   : > { %6857 = vpow2.f32 %v3660_v58  ;;  %3830 = vadd.xlane.f32.xlu0 %v3829_v52  ;;  %v3678_v52 = vmul.f32 1.442695, %v3603_v54 }
 0x9ad   : > { %6859 = vpow2.f32 %v3662_v44  ;;  %v3676_v44 = vmul.f32 1.442695, %v3602_v53  ;;  %v3770_v53 = vmul.f32 1.442695, %v3649_v32 }
 0x9ae   : > { %6861 = vpow2.f32 %v3684_v9 }
 0x9af   : > { %v10369_v5 = vpop.xlane.xlu0 %3572  ;;  %6863 = vpow2.f32 %v3686_v11 }
 0x9b0   : > { %6865 = vpow2.f32 %v3680_v1  ;;  %v3642_v2 = vsub.f32 %v10193_v61, %v10369_v5 }
 0x9b1   : > { %6867 = vpow2.f32 %v3682_v51  ;;  %v3768_v51 = vmul.f32 1.442695, %v3648_v33  ;;  %v3666_v33 = vmul.f32 1.442695, %v3597_v23 }
 0x9b2   : > { %v10375_v28 = vpop.eup %6857  ;;  %6869 = vpow2.f32 %v3676_v44 }
 0x9b3   : > { %13109 = vst [vmem:[#allocation44_spill] sm:$0xff] %v10375_v28  ;;  %v10379_v55 = vpop.eup %6859  ;;  %6871 = vpow2.f32 %v3678_v52 }
 0x9b4   : > { %13110 = vst [vmem:[#allocation43_spill] sm:$0xff] %v10379_v55  ;;  %3554 = vmax.xlane.f32.xlu0 %v3553_v21  ;;  %v3787_v29 = vadd.f32 %v10379_v55, %v10375_v28  ;;  %v10383_v20 = vpop.eup %6861 }
 0x9b5   : > { %v10385_v38 = vpop.eup %6863 }
 0x9b6   : > { %3788 = vadd.xlane.f32.xlu2 %v3787_v29  ;;  %v3805_v58 = vadd.f32 %v10385_v38, %v10383_v20  ;;  %v10395_v9 = vpop.eup %6865 }
 0x9b7   : > { %v10387_v46 = vpop.xlane.xlu0 %3497  ;;  %v10397_v11 = vpop.eup %6867 }
 0x9b8   : > { %v3802_v29 = vadd.f32 %v10397_v11, %v10395_v9  ;;  %v10407_v54 = vpop.eup %6869 }
 0x9b9   : > { %v10409_v22 = vpop.eup %6871 }
 0x9bc   : > { %3806 = vadd.xlane.f32.xlu0 %v3805_v58  ;;  %v3799_v58 = vadd.f32 %v10409_v22, %v10407_v54 }
 0x9bf   : > { %v3570_v49 = vpop.xlane.xlu0 %3569 }
 0x9c0   : > { %v3640_v27 = vsub.f32 %v10189_v14, %v3570_v49  ;;  %v3641_v21 = vsub.f32 %v10191_v45, %v3570_v49  ;;  %v3596_v45 = vsub.f32 %v10045_v30, %v10337_v31  ;;  %v3643_v31 = vsub.f32 %v10195_v48, %v10369_v5 }
 0x9c2   : > { %v3752_v8 = vmul.f32 1.442695, %v3640_v27  ;;  %v3754_v1 = vmul.f32 1.442695, %v3641_v21  ;;  %v3664_v52 = vmul.f32 1.442695, %v3596_v45 }
 0x9c4   : > { %6873 = vpow2.f32 %v3752_v8  ;;  %3803 = vadd.xlane.f32.xlu0 %v3802_v29  ;;  %v3756_v8 = vmul.f32 1.442695, %v3642_v2 }
 0x9c5   : > { %6875 = vpow2.f32 %v3754_v1  ;;  %v3758_v1 = vmul.f32 1.442695, %v3643_v31  ;;  %v3552_v31 = vpop.xlane.xlu2 %3551 }
 0x9c6   : > { %6877 = vpow2.f32 %v3768_v51 }
 0x9c7   : > { %v10411_v14 = vpop.xlane.xlu0 %3824  ;;  %6879 = vpow2.f32 %v3770_v53 }
 0x9c8   : > { %6881 = vpow2.f32 %v3664_v52  ;;  %vm4080_vm3 = vweird.f32 %v10411_v14 }
 0x9c9   : > { %6883 = vpow2.f32 %v3666_v33 }
 0x9ca   : > { %v10417_v57 = vpop.eup %6873  ;;  %6885 = vpow2.f32 %v3756_v8 }
 0x9cb   : > { %13111 = vst [vmem:[#allocation11_spill] sm:$0xff] %v10417_v57  ;;  %v10421_v44 = vpop.eup %6875  ;;  %6887 = vpow2.f32 %v3758_v1 }
 0x9cc   : > { %13112 = vst [vmem:[#allocation33_spill] sm:$0xff] %v10421_v44  ;;  %3800 = vadd.xlane.f32.xlu0 %v3799_v58  ;;  %v3856_v49 = vadd.f32 %v10421_v44, %v10417_v57  ;;  %v10425_v27 = vpop.eup %6877  ;;  %v4086_v57 = vand.u32 2147483648, %v10411_v14 }
 0x9cd   : > { %13113 = vst [vmem:[#allocation37_spill] sm:$0xff] %v10425_v27  ;;  %v10427_v30 = vpop.eup %6879 }
 0x9ce   : > { %3857 = vadd.xlane.f32.xlu2 %v3856_v49  ;;  %13114 = vst [vmem:[#allocation40_spill] sm:$0xff] %v10427_v30  ;;  %v3868_v32 = vadd.f32 %v10427_v30, %v10425_v27  ;;  %v10435_v29 = vpop.eup %6881 }
 0x9cf   : > { %v3567_v21 = vpop.xlane.xlu0 %3566  ;;  %13115 = vst [vmem:[#allocation42_spill] sm:$0xff] %v10435_v29  ;;  %v10437_v51 = vpop.eup %6883 }
 0x9d0   : > { %13116 = vst [vmem:[#allocation41_spill] sm:$0xff] %v10437_v51  ;;  %v3638_v45 = vsub.f32 %v10185_v15, %v3567_v21  ;;  %v3639_v61 = vsub.f32 %v10187_v59, %v3567_v21  ;;  %v3790_v48 = vadd.f32 %v10437_v51, %v10435_v29  ;;  %v10445_v58 = vpop.eup %6885 }
 0x9d1   : > { %13117 = vst [vmem:[#allocation45_spill] sm:$0xff] %v10445_v58  ;;  %v10447_v52 = vpop.eup %6887 }
 0x9d2   : > { %v3748_v5 = vmul.f32 1.442695, %v3638_v45  ;;  %v3750_v23 = vmul.f32 1.442695, %v3639_v61  ;;  %13118 = vst [vmem:[#allocation46_spill] sm:$0xff] %v10447_v52  ;;  %v3859_v15 = vadd.f32 %v10447_v52, %v10445_v58  ;;  %v3628_v45 = vsub.f32 %v10159_v12, %v3552_v31 }
 0x9d4   : > { %3869 = vadd.xlane.f32.xlu0 %v3868_v32  ;;  %6889 = vpow2.f32 %v3748_v5  ;;  %v13121_v5 = vld [vmem:[#allocation9_spill] sm:$0xff] }
 0x9d5   : > { %6891 = vpow2.f32 %v3750_v23  ;;  %v3629_v23 = vsub.f32 %v13121_v5, %v3552_v31 }
 0x9d7   : > { %v10439_v53 = vpop.xlane.xlu0 %3821  ;;  %v3730_v44 = vmul.f32 1.442695, %v3629_v23  ;;  %v13127_v23 = vld [vmem:[#allocation34_spill] sm:$0xff] }
 0x9d8   : > { %vm4065_vm5 = vweird.f32 %v10439_v53 }
 0x9da   : > { %v10453_v33 = vpop.eup %6889 }
 0x9db   : > { %13119 = vst [vmem:[#allocation26_spill] sm:$0xff] %v10453_v33  ;;  %v10455_v59 = vpop.eup %6891 }
 0x9dc   : > { %3791 = vadd.xlane.f32.xlu0 %v3790_v48  ;;  %13120 = vst [vmem:[#allocation27_spill] sm:$0xff] %v10455_v59  ;;  %v3853_v2 = vadd.f32 %v10455_v59, %v10453_v33  ;;  %v13129_v33 = vld [vmem:[#allocation25_spill] sm:$0xff] }
 0x9df   : > { %v10449_v49 = vpop.xlane.xlu0 %3563 }
 0x9e4   : > { %3860 = vadd.xlane.f32.xlu0 %v3859_v15  ;;  %v3728_v15 = vmul.f32 1.442695, %v3628_v45 }
 0x9e7   : > { %v10457_v21 = vpop.xlane.xlu0 %3818 }
 0x9ec   : > { %3854 = vadd.xlane.f32.xlu0 %v3853_v2 }
 0x9ef   : > { %v3561_v32 = vpop.xlane.xlu0 %3560 }
 0x9f0   : > { %v3634_v8 = vsub.f32 %v10177_v16, %v3561_v32  ;;  %v3635_v1 = vsub.f32 %v10179_v34, %v3561_v32 }
 0x9f2   : > { %v3740_v61 = vmul.f32 1.442695, %v3634_v8  ;;  %v3742_v48 = vmul.f32 1.442695, %v3635_v1 }
 0x9f4   : > { %6893 = vpow2.f32 %v3740_v61 }
 0x9f5   : > { %6895 = vpow2.f32 %v3742_v48 }
 0x9f6   : > { %6897 = vpow2.f32 %v3728_v15  ;;  %v3651_v15 = vsub.f32 %v13127_v23, %v10284_v13 }
 0x9f7   : > { %v10465_v52 = vpop.xlane.xlu0 %3815  ;;  %6899 = vpow2.f32 %v3730_v44  ;;  %v13126_v44 = vld [vmem:[#allocation23_spill] sm:$0xff] }
 0x9f8   : > { %v3650_v61 = vsub.f32 %v13126_v44, %v10284_v13  ;;  %v13132_v44 = vld [vmem:[#allocation15_spill] sm:$0xff] }
 0x9fa   : > { %v10467_v59 = vpop.eup %6893 }
 0x9fb   : > { %13122 = vst [vmem:[#allocation21_spill] sm:$0xff] %v10467_v59  ;;  %v10469_v2 = vpop.eup %6895 }
 0x9fc   : > { %13123 = vst [vmem:[#allocation28_spill] sm:$0xff] %v10469_v2  ;;  %v3847_v16 = vadd.f32 %v10469_v2, %v10467_v59  ;;  %v10475_v34 = vpop.eup %6897  ;;  %v3772_v2 = vmul.f32 1.442695, %v3650_v61  ;;  %v13128_v59 = vld [vmem:[#allocation24_spill] sm:$0xff]  ;;  %v3599_v61 = vsub.f32 %v13132_v44, %v10321_v40 }
 0x9fd   : > { %13124 = vst [vmem:[#allocation29_spill] sm:$0xff] %v10475_v34  ;;  %v10477_v31 = vpop.eup %6899 }
 0x9fe   : > { %3848 = vadd.xlane.f32.xlu2 %v3847_v16  ;;  %13125 = vst [vmem:[#allocation20_spill] sm:$0xff] %v10477_v31  ;;  %v3838_v32 = vadd.f32 %v10477_v31, %v10475_v34  ;;  %v3549_v16 = vpop.xlane.xlu2 %3548 }
 0x9ff   : > { %v10473_v12 = vpop.xlane.xlu0 %3827  ;;  %v3626_v31 = vsub.f32 %v13128_v59, %v3549_v16 }
 0xa00   : > { %vm4095_vm8 = vweird.f32 %v10473_v12 }
 0xa06   : > { %3839 = vadd.xlane.f32.xlu2 %v3838_v32  ;;  %v3774_v32 = vmul.f32 1.442695, %v3651_v15 }
 0xa07   : > { %v3591_v8 = vpop.xlane.xlu0 %3590 }
 0xa08   : > { %v3654_v1 = vsub.f32 %v10325_v42, %v3591_v8  ;;  %v3655_v45 = vsub.f32 %v10327_v6, %v3591_v8  ;;  %v3627_v42 = vsub.f32 %v13129_v33, %v3549_v16  ;;  %v3724_v33 = vmul.f32 1.442695, %v3626_v31 }
 0xa09   : > { %v3670_v16 = vmul.f32 1.442695, %v3599_v61 }
 0xa0a   : > { %v3780_v48 = vmul.f32 1.442695, %v3654_v1  ;;  %v3782_v5 = vmul.f32 1.442695, %v3655_v45  ;;  %v13130_v1 = vld [vmem:[#allocation18_spill] sm:$0xff] }
 0xa0b   : > { %v3598_v45 = vsub.f32 %v13130_v1, %v10321_v40  ;;  %v3726_v23 = vmul.f32 1.442695, %v3627_v42 }
 0xa0c   : > { %6901 = vpow2.f32 %v3780_v48 }
 0xa0d   : > { %6903 = vpow2.f32 %v3782_v5 }
 0xa0e   : > { %6905 = vrcp.f32 %v10411_v14 }
 0xa0f   : > { %v3558_v34 = vpop.xlane.xlu0 %3557  ;;  %6907 = vpow2.f32 %v3772_v2  ;;  %v13134_v2 = vld [vmem:[#allocation10_spill] sm:$0xff] }
 0xa10   : > { %v3632_v6 = vsub.f32 %v10171_v19, %v3558_v34  ;;  %v3633_v8 = vsub.f32 %v10173_v36, %v3558_v34  ;;  %6909 = vpow2.f32 %v3774_v32  ;;  %v3644_v19 = vsub.f32 %v10197_v41, %v10355_v10 }
 0xa11   : > { %v3668_v34 = vmul.f32 1.442695, %v3598_v45  ;;  %v3645_v15 = vsub.f32 %v13134_v2, %v10355_v10 }
 0xa12   : > { %v10494_v13 = vpop.eup %6901  ;;  %v3736_v59 = vmul.f32 1.442695, %v3632_v6  ;;  %v3738_v48 = vmul.f32 1.442695, %v3633_v8  ;;  %v3760_v41 = vmul.f32 1.442695, %v3644_v19 }
 0xa13   : > { %13131 = vst [vmem:[#allocation14_spill] sm:$0xff] %v10494_v13  ;;  %v10498_v5 = vpop.eup %6903  ;;  %v3762_v6 = vmul.f32 1.442695, %v3645_v15 }
 0xa14   : > { %13133 = vst [vmem:[#allocation22_spill] sm:$0xff] %v10498_v5  ;;  %6911 = vpow2.f32 %v3736_v59  ;;  %v3877_v36 = vadd.f32 %v10498_v5, %v10494_v13  ;;  %v10506_v40 = vpop.eup %6905 }
 0xa15   : > { %6913 = vpow2.f32 %v3738_v48  ;;  %v10511_v32 = vpop.eup %6907  ;;  %v4076_v10 = vmul.f32 %v10506_v40, %v10411_v14  ;;  %v3592_v48 = vsub.f32 %v10033_v0, %v10387_v46  ;;  %vm4081_vm2 = vweird.f32 %v10506_v40 }
 0xa16   : > { %6915 = vrcp.f32 %v10473_v12  ;;  %3878 = vadd.xlane.f32.xlu1 %v3877_v36  ;;  %13135 = vst [vmem:[#allocation19_spill] sm:$0xff] %v10511_v32  ;;  %v10513_v42 = vpop.eup %6909  ;;  %v10536_v36 = vpop.xlane.xlu2 %3545  ;;  %vm10591_vm4 = vmor %vm4080_vm3, %vm4081_vm2 }
 0xa17   : > { %6917 = vpow2.f32 %v3724_v33  ;;  %v10509_v31 = vpop.xlane.xlu0 %3812  ;;  %13136 = vst [vmem:[#allocation9_spill] sm:$0xff] %v10513_v42  ;;  %v3871_v44 = vadd.f32 %v10513_v42, %v10511_v32  ;;  %v4077_v33 = vsub.f32 1.0, %v4076_v10  ;;  %v10585_v42 = vor.u32 1.1754944e-38, %v4086_v57 }
 0xa18   : > { %6919 = vpow2.f32 %v3726_v23 }
 0xa19   : > { %6921 = vpow2.f32 %v3668_v34  ;;  %v3593_v34 = vsub.f32 %v10035_v18, %v10387_v46  ;;  %v4078_v10 = vmul.f32 %v10506_v40, %v4077_v33  ;;  %v13144_v18 = vld [vmem:[#allocation16_spill] sm:$0xff] }
 0xa1a   : > { %v10517_v8 = vpop.eup %6911  ;;  %6923 = vpow2.f32 %v3670_v16  ;;  %v3624_v46 = vsub.f32 %v13144_v18, %v10536_v36 }
 0xa1b   : > { %13137 = vst [vmem:[#allocation23_spill] sm:$0xff] %v10517_v8  ;;  %v10519_v1 = vpop.eup %6913  ;;  %6925 = vrcp.f32 %v10439_v53  ;;  %v10570_v18 = vadd.f32 %v10506_v40, %v4078_v10 }
 0xa1c   : > { %13138 = vst [vmem:[#allocation34_spill] sm:$0xff] %v10519_v1  ;;  %v10522_v45 = vpop.eup %6915  ;;  %6927 = vpow2.f32 %v3760_v41  ;;  %v3844_v61 = vadd.f32 %v10519_v1, %v10517_v8  ;;  %v10550_v41 = vpop.xlane.xlu1 %3809  ;;  %v3658_v1 = vmul.f32 1.442695, %v3593_v34 }
 0xa1d   : > { %v10528_v59 = vpop.eup %6917  ;;  %6929 = vpow2.f32 %v3762_v6  ;;  %v4091_v2 = vmul.f32 %v10522_v45, %v10473_v12  ;;  %v3656_v6 = vmul.f32 1.442695, %v3592_v48  ;;  %v4083_v57 = vsel %vm10591_vm4, %v10506_v40, %v10570_v18 }
 0xa1e   : > { %13139 = vst [vmem:[#allocation24_spill] sm:$0xff] %v10528_v59  ;;  %v10532_v23 = vpop.eup %6919  ;;  %3872 = vadd.xlane.f32.xlu1 %v3871_v44  ;;  %3845 = vadd.xlane.f32.xlu0 %v3844_v61  ;;  %6931 = vrcp.f32 %v10457_v21  ;;  %vm4096_vm6 = vweird.f32 %v10522_v45  ;;  %vm4050_vm4 = vweird.f32 %v10457_v21 }
 0xa1f   : > { %13140 = vst [vmem:[#allocation25_spill] sm:$0xff] %v10532_v23  ;;  %v10534_v19 = vpop.eup %6921  ;;  %v10543_v15 = vpop.xlane.xlu0 %3830  ;;  %v4092_v8 = vsub.f32 1.0, %v4091_v2  ;;  %v3835_v58 = vadd.f32 %v10532_v23, %v10528_v59  ;;  %v13146_v2 = vld [vmem:[#allocation17_spill] sm:$0xff]  ;;  %v10575_v59 = vmul.f32 1.442695, %v3624_v46  ;;  %v3636_v23 = vsub.f32 %v10181_v7, %v10449_v49  ;;  %vm10625_vm11 = vmor %vm4095_vm8, %vm4096_vm6 }
 0xa20   : > { %13141 = vst [vmem:[#allocation18_spill] sm:$0xff] %v10534_v19  ;;  %v10545_v0 = vpop.eup %6923  ;;  %6933 = vrcp.f32 %v10543_v15  ;;  %vm4110_vm9 = vweird.f32 %v10543_v15 }
 0xa21   : > { %13142 = vst [vmem:[#allocation15_spill] sm:$0xff] %v10545_v0  ;;  %v10548_v16 = vpop.eup %6925  ;;  %6935 = vrcp.f32 %v10550_v41  ;;  %v3793_v33 = vadd.f32 %v10545_v0, %v10534_v19  ;;  %v3744_v5 = vmul.f32 1.442695, %v3636_v23 }
 0xa22   : > { %v10553_v44 = vpop.eup %6927  ;;  %v4061_v48 = vmul.f32 %v10548_v16, %v10439_v53  ;;  %6937 = vpow2.f32 %v3656_v6  ;;  %v4093_v6 = vmul.f32 %v10522_v45, %v4092_v8  ;;  %vm4066_vm13 = vweird.f32 %v10548_v16 }
 0xa23   : > { %13143 = vst [vmem:[#allocation10_spill] sm:$0xff] %v10553_v44  ;;  %v10557_v61 = vpop.eup %6929  ;;  %6939 = vrcp.f32 %v10465_v52  ;;  %vm10657_vm1 = vmor %vm4065_vm5, %vm4066_vm13 }
 0xa24   : > { %13145 = vst [vmem:[#allocation16_spill] sm:$0xff] %v10557_v61  ;;  %v10567_v30 = vpop.eup %6931  ;;  %v3862_v27 = vadd.f32 %v10557_v61, %v10553_v44  ;;  %6941 = vpow2.f32 %v3658_v1  ;;  %v4062_v46 = vsub.f32 1.0, %v4061_v48  ;;  %v4084_v1 = vand.u32 2147483647, %v10411_v14 }
 0xa25   : > { %v4046_v8 = vmul.f32 %v10567_v30, %v10457_v21  ;;  %6943 = vrcp.f32 %v10509_v31  ;;  %v4071_v48 = vand.u32 2147483648, %v10439_v53  ;;  %v3637_v14 = vsub.f32 %v10183_v26, %v10449_v49 }
 0xa26   : > { %v6934_v34 = vpop.eup %6933  ;;  %3794 = vadd.xlane.f32.xlu1 %v3793_v33  ;;  %3836 = vadd.xlane.f32.xlu0 %v3835_v58  ;;  %v4116_v61 = vand.u32 2147483648, %v10543_v15  ;;  %v4114_v58 = vand.u32 2147483647, %v10543_v15  ;;  %v4094_v40 = vadd.f32 %v10522_v45, %v4093_v6  ;;  %v4063_v32 = vmul.f32 %v10548_v16, %v4062_v46 }
 0xa27   : > { %v4106_v10 = vmul.f32 %v6934_v34, %v10543_v15  ;;  %v10583_v47 = vpop.xlane.xlu0 %3554  ;;  %v10603_v7 = vpop.eup %6935  ;;  %vm4111_vm7 = vweird.f32 %v6934_v34  ;;  %v4101_v26 = vand.u32 2147483648, %v10473_v12  ;;  %v4047_v13 = vsub.f32 1.0, %v4046_v8 }
 0xa28   : > { %v10611_v44 = vpop.eup %6937  ;;  %v4099_v6 = vand.u32 2147483647, %v10473_v12  ;;  %v3746_v46 = vmul.f32 1.442695, %v3637_v14  ;;  %vm4112_vm12 = vmor %vm4110_vm9, %vm4111_vm7  ;;  %v4117_v23 = vor.u32 1.1754944e-38, %v4116_v61  ;;  %vm4115_vm10 = vcmp.eq.f32.partialorder %v4114_v58, 8.507059e+37 }
 0xa29   : > { %v4107_v33 = vsub.f32 1.0, %v4106_v10  ;;  %v10615_v18 = vpop.eup %6939  ;;  %v4069_v8 = vand.u32 2147483647, %v10439_v53  ;;  %v4098_v12 = vsel %vm10625_vm11, %v10522_v45, %v4094_v40  ;;  %6945 = vpow2.f32 %v3744_v5 }
 0xa2a   : > { %v10620_v49 = vpop.eup %6941  ;;  %v4031_v15 = vmul.f32 %v10615_v18, %v10465_v52  ;;  %v4102_v61 = vor.u32 1.1754944e-38, %v4101_v26  ;;  %v4064_v14 = vadd.f32 %v10548_v16, %v4063_v32  ;;  %v4048_v29 = vmul.f32 %v10567_v30, %v4047_v13 }
 0xa2b   : > { %v4108_v10 = vmul.f32 %v6934_v34, %v4107_v33  ;;  %vm4100_vm14 = vcmp.eq.f32.partialorder %v4099_v6, 8.507059e+37  ;;  %v3631_v32 = vsub.f32 %v10167_v3, %v10583_v47  ;;  %vm4085_vm15 = vcmp.eq.f32.partialorder %v4084_v1, 8.507059e+37  ;;  %v13154_v33 = vld [vmem:[#allocation8_spill] sm:$0xff] }
 0xa2c   : > { %v4103_v5 = vsel %vm4100_vm14, %v4102_v61, %v4098_v12  ;;  %v4088_v13 = vsel %vm4085_vm15, %v10585_v42, %v4083_v57  ;;  %v4068_v3 = vsel %vm10657_vm1, %v10548_v16, %v4064_v14  ;;  %vm4070_vm2 = vcmp.eq.f32.partialorder %v4069_v8, 8.507059e+37  ;;  %v13158_v12 = vld [vmem:[#allocation32_spill] sm:$0xff] }
 0xa2d   : > { %v4109_v55 = vadd.f32 %v6934_v34, %v4108_v10  ;;  %v10633_v10 = vpop.eup %6943  ;;  %v4388_v45 = vmul.f32 %v10315_v17, %v4103_v5  ;;  %v4389_v53 = vmul.f32 %v10319_v24, %v4103_v5  ;;  %v4049_v1 = vadd.f32 %v10567_v30, %v4048_v29 }
 0xa2e   : > { %3863 = vadd.xlane.f32.xlu1 %v3862_v27  ;;  %v4016_v58 = vmul.f32 %v10633_v10, %v10509_v31  ;;  %vm4051_vm3 = vweird.f32 %v10567_v30  ;;  %v3734_v16 = vmul.f32 1.442695, %v3631_v32  ;;  %v4056_v29 = vand.u32 2147483648, %v10457_v21 }
 0xa2f   : > { %v10637_v28 = vpop.xlane.xlu0 %3806  ;;  %v4113_v51 = vsel %vm4112_vm12, %v6934_v34, %v4109_v55  ;;  %v3630_v55 = vsub.f32 %v10165_v37, %v10583_v47  ;;  %v4001_v37 = vmul.f32 %v10603_v7, %v10550_v41  ;;  %v4072_v47 = vor.u32 1.1754944e-38, %v4071_v48  ;;  %vm10693_vm5 = vmor %vm4050_vm4, %vm4051_vm3 }
 0xa30   : > { %v4118_v27 = vsel %vm4115_vm10, %v4117_v23, %v4113_v51  ;;  %6947 = vrcp.f32 %v10637_v28  ;;  %v4032_v51 = vsub.f32 1.0, %v4031_v15  ;;  %v13153_v48 = vsub.f32 %v13146_v2, %v10536_v36  ;;  %v10698_v2 = vpop.xlane.xlu2 %3797 }
 0xa31   : > { %v4390_v0 = vmul.f32 %v10359_v35, %v4118_v27  ;;  %v4391_v19 = vmul.f32 %v10361_v43, %v4118_v27  ;;  %6949 = vpow2.f32 %v3746_v46  ;;  %v3784_v43 = vadd.f32 %v10620_v49, %v10611_v44  ;;  %v13155_v46 = vld [vmem:[#allocation36_spill] sm:$0xff] }
 0xa32   : > { %v3732_v34 = vmul.f32 1.442695, %v3630_v55  ;;  %6951 = vpow2.f32 %v10575_v59  ;;  %v4033_v42 = vmul.f32 %v10615_v18, %v4032_v51  ;;  %v4073_v24 = vsel %vm4070_vm2, %v4072_v47, %v4068_v3  ;;  %v13159_v51 = vld [vmem:[#allocation12_spill] sm:$0xff] }
 0xa33   : > { %4424 = vmatpush.xpose.msrb.mxu2 %v4390_v0  ;;  %4453 = vmatpush.xpose.msrb.mxu3 %v4391_v19  ;;  %v10671_v19 = vpop.eup %6945  ;;  %v4017_v0 = vsub.f32 1.0, %v4016_v58  ;;  %v3722_v40 = vmul.f32 1.442695, %v13153_v48  ;;  %v4002_v26 = vsub.f32 1.0, %v4001_v37  ;;  %v4386_v6 = vmul.f32 %v13154_v33, %v4088_v13 }
 0xa34   : > { %v4387_v23 = vmul.f32 %v13155_v46, %v4088_v13  ;;  %v4054_v36 = vand.u32 2147483647, %v10457_v21  ;;  %v4384_v61 = vmul.f32 %v13158_v12, %v4073_v24  ;;  %v4053_v27 = vsel %vm10693_vm5, %v10567_v30, %v4049_v1 }
 0xa35   : > { %v4018_v15 = vmul.f32 %v10633_v10, %v4017_v0  ;;  %v4034_v58 = vadd.f32 %v10615_v18, %v4033_v42  ;;  %vm4036_vm6 = vweird.f32 %v10615_v18  ;;  %v4057_v21 = vor.u32 1.1754944e-38, %v4056_v29 }
 0xa36   : > { %3785 = vadd.xlane.f32.xlu1 %v3784_v43  ;;  %v10679_v57 = vpop.eup %6947  ;;  %v4041_v55 = vand.u32 2147483648, %v10465_v52  ;;  %v4385_v32 = vmul.f32 %v13159_v51, %v4073_v24  ;;  %vm4035_vm7 = vweird.f32 %v10465_v52  ;;  %vm4055_vm8 = vcmp.eq.f32.partialorder %v4054_v36, 8.507059e+37 }
 0xa37   : > { %4425 = vmatpush.xpose.msrb.mxu2 %v4388_v45  ;;  %4454 = vmatpush.xpose.msrb.mxu3 %v4389_v53  ;;  %v10677_v17 = vpop.xlane.xlu0 %3803  ;;  %v10687_v59 = vpop.eup %6949  ;;  %v3986_v14 = vmul.f32 %v10679_v57, %v10637_v28  ;;  %v4039_v30 = vand.u32 2147483647, %v10465_v52  ;;  %v4058_v43 = vsel %vm4055_vm8, %v4057_v21, %v4053_v27  ;;  %vm10720_vm9 = vmor %vm4035_vm7, %vm4036_vm6  ;;  %v4019_v3 = vadd.f32 %v10633_v10, %v4018_v15 }
 0xa38   : > { %6953 = vrcp.f32 %v10677_v17  ;;  %v3850_v5 = vadd.f32 %v10687_v59, %v10671_v19  ;;  %v10713_v35 = vpop.eup %6951  ;;  %vm4021_vm11 = vweird.f32 %v10633_v10  ;;  %v4003_v47 = vmul.f32 %v10603_v7, %v4002_v26 }
 0xa39   : > { %6955 = vpow2.f32 %v3732_v34  ;;  %v4026_v45 = vand.u32 2147483648, %v10509_v31  ;;  %v3987_v53 = vsub.f32 1.0, %v3986_v14  ;;  %v4038_v34 = vsel %vm10720_vm9, %v10615_v18, %v4034_v58 }
 0xa3a   : > { %6957 = vpow2.f32 %v3734_v16  ;;  %v4042_v42 = vor.u32 1.1754944e-38, %v4041_v55  ;;  %vm4020_vm12 = vweird.f32 %v10509_v31  ;;  %v4024_v16 = vand.u32 2147483647, %v10509_v31 }
 0xa3b   : > { %4426 = vmatpush.xpose.msrb.mxu2 %v4386_v6  ;;  %4455 = vmatpush.xpose.msrb.mxu3 %v4387_v23  ;;  %6959 = vrcp.f32 %v10698_v2  ;;  %v4382_v48 = vmul.f32 %v10279_v50, %v4058_v43  ;;  %v4383_v29 = vmul.f32 %v10281_v60, %v4058_v43  ;;  %vm4040_vm13 = vcmp.eq.f32.partialorder %v4039_v30, 8.507059e+37  ;;  %vm10746_vm10 = vmor %vm4020_vm12, %vm4021_vm11 }
 0xa3c   : > { %v4043_v26 = vsel %vm4040_vm13, %v4042_v42, %v4038_v34  ;;  %v4023_v33 = vsel %vm10746_vm10, %v10633_v10, %v4019_v3  ;;  %v4004_v31 = vadd.f32 %v10603_v7, %v4003_v47  ;;  %vm4006_vm14 = vweird.f32 %v10603_v7  ;;  %v13169_v42 = vld [vmem:[#allocation38_spill] sm:$0xff] }
 0xa3d   : > { %v4027_v50 = vor.u32 1.1754944e-38, %v4026_v45  ;;  %v3988_v60 = vmul.f32 %v10679_v57, %v3987_v53  ;;  %vm4005_vm15 = vweird.f32 %v10550_v41  ;;  %vm4025_vm1 = vcmp.eq.f32.partialorder %v4024_v16, 8.507059e+37 }
 0xa3e   : > { %v10718_v37 = vpop.eup %6953  ;;  %3851 = vadd.xlane.f32.xlu1 %v3850_v5  ;;  %v4009_v10 = vand.u32 2147483647, %v10550_v41  ;;  %v4011_v23 = vand.u32 2147483648, %v10550_v41  ;;  %v4380_v8 = vmul.f32 %v10297_v39, %v4043_v26  ;;  %v4381_v36 = vmul.f32 %v10299_v62, %v4043_v26  ;;  %vm10767_vm2 = vmor %vm4005_vm15, %vm4006_vm14 }
 0xa3f   : > { %v3971_v52 = vmul.f32 %v10718_v37, %v10677_v17  ;;  %4427 = vmatpush.xpose.msrb.mxu2 %v4384_v61  ;;  %4456 = vmatpush.xpose.msrb.mxu3 %v4385_v32  ;;  %v10730_v0 = vpop.xlane.xlu0 %3800  ;;  %v10735_v1 = vpop.eup %6955  ;;  %v4028_v15 = vsel %vm4025_vm1, %v4027_v50, %v4023_v33  ;;  %v4008_v41 = vsel %vm10767_vm2, %v10603_v7, %v4004_v31  ;;  %vm3991_vm3 = vweird.f32 %v10679_v57 }
 0xa40   : > { %6961 = vrcp.f32 %v10730_v0  ;;  %v10740_v24 = vpop.eup %6957  ;;  %v3989_v58 = vadd.f32 %v10679_v57, %v3988_v60  ;;  %v3996_v21 = vand.u32 2147483648, %v10637_v28  ;;  %v4378_v55 = vmul.f32 %v10351_v56, %v4028_v15 }
 0xa41   : > { %6963 = vpow2.f32 %v3722_v40  ;;  %v10755_v40 = vpop.eup %6959  ;;  %v3972_v6 = vsub.f32 1.0, %v3971_v52  ;;  %v3841_v46 = vadd.f32 %v10740_v24, %v10735_v1  ;;  %vm4010_vm4 = vcmp.eq.f32.partialorder %v4009_v10, 8.507059e+37  ;;  %v13168_v52 = vld [vmem:[#allocation35_spill] sm:$0xff] }
 0xa42   : > { %v3941_v27 = vmul.f32 %v10755_v40, %v10698_v2  ;;  %v4012_v5 = vor.u32 1.1754944e-38, %v4011_v23  ;;  %vm3990_vm5 = vweird.f32 %v10637_v28  ;;  %v4379_v51 = vmul.f32 %v10353_v4, %v4028_v15 }
 0xa43   : > { %4428 = vmatpush.xpose.msrb.mxu2 %v4382_v48  ;;  %4457 = vmatpush.xpose.msrb.mxu3 %v4383_v29  ;;  %v3973_v62 = vmul.f32 %v10718_v37, %v3972_v6  ;;  %v3994_v32 = vand.u32 2147483647, %v10637_v28  ;;  %vm10790_vm6 = vmor %vm3990_vm5, %vm3991_vm3  ;;  %vm3976_vm7 = vweird.f32 %v10718_v37  ;;  %v3997_v4 = vor.u32 1.1754944e-38, %v3996_v21 }
 0xa44   : > { %v3942_v30 = vsub.f32 1.0, %v3941_v27  ;;  %v4013_v43 = vsel %vm4010_vm4, %v4012_v5, %v4008_v41  ;;  %v3993_v56 = vsel %vm10790_vm6, %v10679_v57, %v3989_v58  ;;  %v3981_v28 = vand.u32 2147483648, %v10677_v17 }
 0xa45   : > { %v3974_v47 = vadd.f32 %v10718_v37, %v3973_v62  ;;  %v3979_v53 = vand.u32 2147483647, %v10677_v17  ;;  %vm3975_vm8 = vweird.f32 %v10677_v17  ;;  %v4376_v34 = vmul.f32 %v13168_v52, %v4013_v43 }
 0xa46   : > { %v10771_v61 = vpop.eup %6961  ;;  %3842 = vadd.xlane.f32.xlu1 %v3841_v46  ;;  %v4377_v16 = vmul.f32 %v13169_v42, %v4013_v43  ;;  %vm3995_vm9 = vcmp.eq.f32.partialorder %v3994_v32, 8.507059e+37  ;;  %vm3977_vm11 = vmor %vm3975_vm8, %vm3976_vm7  ;;  %v3943_v48 = vmul.f32 %v10755_v40, %v3942_v30  ;;  %v3982_v26 = vor.u32 1.1754944e-38, %v3981_v28 }
 0xa47   : > { %v10778_v39 = vpop.eup %6963  ;;  %v3956_v14 = vmul.f32 %v10771_v61, %v10730_v0  ;;  %4429 = vmatpush.xpose.msrb.mxu2 %v4380_v8  ;;  %4458 = vmatpush.xpose.msrb.mxu3 %v4381_v36  ;;  %v3998_v57 = vsel %vm3995_vm9, %v3997_v4, %v3993_v56  ;;  %v3978_v29 = vsel %vm3977_vm11, %v10718_v37, %v3974_v47  ;;  %vm3961_vm12 = vweird.f32 %v10771_v61  ;;  %v10835_v58 = vpop.xlane.xlu0 %3869 }
 0xa48   : > { %v3832_v45 = vadd.f32 %v10778_v39, %v10713_v35  ;;  %v3966_v17 = vand.u32 2147483648, %v10730_v0  ;;  %vm3980_vm13 = vcmp.eq.f32.partialorder %v3979_v53, 8.507059e+37  ;;  %vm3960_vm10 = vweird.f32 %v10730_v0 }
 0xa49   : > { %v3957_v7 = vsub.f32 1.0, %v3956_v14  ;;  %v4374_v33 = vmul.f32 %v10383_v20, %v3998_v57  ;;  %v4375_v31 = vmul.f32 %v10385_v38, %v3998_v57  ;;  %v3964_v50 = vand.u32 2147483647, %v10730_v0  ;;  %vm3962_vm14 = vmor %vm3960_vm10, %vm3961_vm12  ;;  %v4554_v14 = vld [vmem:[%s7389_s23 + $0xf0] sm:$0xff] }
 0xa4a   : > { %v3983_v60 = vsel %vm3980_vm13, %v3982_v26, %v3978_v29  ;;  %v3944_v6 = vadd.f32 %v10755_v40, %v3943_v48  ;;  %vm3946_vm15 = vweird.f32 %v10755_v40  ;;  %vm3945_vm1 = vweird.f32 %v10698_v2 }
 0xa4b   : > { %v3958_v3 = vmul.f32 %v10771_v61, %v3957_v7  ;;  %4430 = vmatpush.xpose.msrb.mxu2 %v4378_v55  ;;  %4459 = vmatpush.xpose.msrb.mxu3 %v4379_v51  ;;  %v3951_v46 = vand.u32 2147483648, %v10698_v2  ;;  %v3967_v10 = vor.u32 1.1754944e-38, %v3966_v17  ;;  %v4372_v20 = vmul.f32 %v10395_v9, %v3983_v60  ;;  %vm3947_vm3 = vmor %vm3945_vm1, %vm3946_vm15 }
 0xa4c   : > { %v4373_v38 = vmul.f32 %v10397_v11, %v3983_v60  ;;  %vm3965_vm2 = vcmp.eq.f32.partialorder %v3964_v50, 8.507059e+37  ;;  %v3949_v0 = vand.u32 2147483647, %v10698_v2  ;;  %v3948_v8 = vsel %vm3947_vm3, %v10755_v40, %v3944_v6  ;;  %v4550_v40 = vld [vmem:[%s7389_s23 + $0xd0] sm:$0xff] }
 0xa4d   : > { %v3959_v18 = vadd.f32 %v10771_v61, %v3958_v3  ;;  %v3952_v36 = vor.u32 1.1754944e-38, %v3951_v46  ;;  %v4558_v41 = vmul.f32 0.17677669, %v4550_v40  ;;  %v4562_v21 = vmul.f32 0.17677669, %v4554_v14  ;;  %v13174_v40 = vld [vmem:[#allocation18_spill] sm:$0xff] }
 0xa4e   : > { %3833 = vadd.xlane.f32.xlu1 %v3832_v45  ;;  %vm3950_vm4 = vcmp.eq.f32.partialorder %v3949_v0, 8.507059e+37 }
 0xa4f   : > { %4431 = vmatpush.xpose.msrb.mxu2 %v4376_v34  ;;  %4460 = vmatpush.xpose.msrb.mxu3 %v4377_v16  ;;  %v3963_v37 = vsel %vm3962_vm14, %v10771_v61, %v3959_v18  ;;  %v3953_v9 = vsel %vm3950_vm4, %v3952_v36, %v3948_v8  ;;  %v4548_v61 = vld [vmem:[%s7389_s23 + $0xc0] sm:$0xff]  ;;  %v10841_v55 = vpop.xlane.xlu0 %3791 }
 0xa50   : > { %v3968_v23 = vsel %vm3965_vm2, %v3967_v10, %v3963_v37  ;;  %v4368_v11 = vmul.f32 %v10303_v63, %v3953_v9  ;;  %v4369_v2 = vmul.f32 %v10307_v25, %v3953_v9  ;;  %v4556_v27 = vmul.f32 0.17677669, %v4548_v61  ;;  %v10837_v63 = vpop.xlane.xlu2 %3866 }
 0xa51   : > { %v4370_v15 = vmul.f32 %v10407_v54, %v3968_v23  ;;  %v4371_v12 = vmul.f32 %v10409_v22, %v3968_v23  ;;  %v4552_v54 = vld [vmem:[%s7389_s23 + $0xe0] sm:$0xff]  ;;  %v10832_v22 = vpop.xlane.xlu1 %3875  ;;  %vm3915_vm9 = vweird.f32 %v10841_v55  ;;  %v3921_v6 = vand.u32 2147483648, %v10841_v55 }
 0xa52   : > { %4580 = vxpose.xlu2.b32.start [1/4] (short) %v4556_v27, 128  ;;  %v4560_v62 = vmul.f32 0.17677669, %v4552_v54  ;;  %6965 = vrcp.f32 %v10832_v22  ;;  %vm4335_vm5 = vweird.f32 %v10832_v22  ;;  %v4339_v57 = vand.u32 2147483647, %v10832_v22  ;;  %v13175_v54 = vld [vmem:[#allocation15_spill] sm:$0xff] }
 0xa53   : > { %4432 = vmatpush.xpose.msrb.mxu2 %v4374_v33  ;;  %4461 = vmatpush.xpose.msrb.mxu3 %v4375_v31  ;;  %6967 = vrcp.f32 %v10841_v55  ;;  %v4341_v26 = vand.u32 2147483648, %v10832_v22  ;;  %v3922_v9 = vor.u32 1.1754944e-38, %v3921_v6 }
 0xa54   : > { %vm10937_vm4 = vcmp.eq.f32.partialorder %v4339_v57, 8.507059e+37 }
 0xa57   : > { %4433 = vmatpush.xpose.msrb.mxu2 %v4372_v20  ;;  %4462 = vmatpush.xpose.msrb.mxu3 %v4373_v38  ;;  %v3919_v38 = vand.u32 2147483647, %v10841_v55 }
 0xa58   : > { %v10845_v5 = vpop.xlane.xlu2 %3788  ;;  %v10850_v51 = vpop.eup %6965 }
 0xa59   : > { %6969 = vrcp.f32 %v10845_v5  ;;  %v10852_v32 = vpop.eup %6967  ;;  %v4331_v30 = vmul.f32 %v10850_v51, %v10832_v22  ;;  %vm4336_vm6 = vweird.f32 %v10850_v51  ;;  %vm3900_vm13 = vweird.f32 %v10845_v5 }
 0xa5a   : > { %4581 = vxpose.xlu2.b32.cont [2/4] (short) %v4558_v41, 128  ;;  %v3911_v43 = vmul.f32 %v10852_v32, %v10841_v55  ;;  %vm3916_vm7 = vweird.f32 %v10852_v32  ;;  %v3906_v0 = vand.u32 2147483648, %v10845_v5  ;;  %vm10909_vm1 = vmor %vm4335_vm5, %vm4336_vm6  ;;  %vm3920_vm2 = vcmp.eq.f32.partialorder %v3919_v38, 8.507059e+37 }
 0xa5b   : > { %4434 = vmatpush.xpose.msrb.mxu2 %v4370_v15  ;;  %4463 = vmatpush.xpose.msrb.mxu3 %v4371_v12  ;;  %v4332_v56 = vsub.f32 1.0, %v4331_v30  ;;  %vm10890_vm12 = vmor %vm3915_vm9, %vm3916_vm7  ;;  %v3904_v14 = vand.u32 2147483647, %v10845_v5 }
 0xa5c   : > { %v3912_v4 = vsub.f32 1.0, %v3911_v43 }
 0xa5d   : > { %v4333_v28 = vmul.f32 %v10850_v51, %v4332_v56  ;;  %vm3905_vm5 = vcmp.eq.f32.partialorder %v3904_v14, 8.507059e+37 }
 0xa5e   : > { %v3913_v52 = vmul.f32 %v10852_v32, %v3912_v4  ;;  %v10941_v4 = vpop.xlane.xlu0 %3860 }
 0xa5f   : > { %4435 = vmatpush.xpose.msrb.mxu2 %v4368_v11  ;;  %4464 = vmatpush.xpose.msrb.mxu3 %v4369_v2  ;;  %v10858_v13 = vpop.eup %6969  ;;  %v10875_v18 = vadd.f32 %v10850_v51, %v4333_v28 }
 0xa60   : > { %v3896_v47 = vmul.f32 %v10858_v13, %v10845_v5  ;;  %v3914_v31 = vadd.f32 %v10852_v32, %v3913_v52  ;;  %vm3901_vm14 = vweird.f32 %v10858_v13  ;;  %v4342_v5 = vor.u32 1.1754944e-38, %v4341_v26  ;;  %v13181_v52 = vld [vmem:[#allocation41_spill] sm:$0xff] }
 0xa61   : > { %vm10924_vm3 = vmor %vm3900_vm13, %vm3901_vm14  ;;  %v4338_v43 = vsel %vm10909_vm1, %v10850_v51, %v10875_v18 }
 0xa62   : > { %4582 = vxpose.xlu2.b32.cont [3/4] (short) %v4560_v62, 128  ;;  %v3897_v53 = vsub.f32 1.0, %v3896_v47  ;;  %v3918_v15 = vsel %vm10890_vm12, %v10852_v32, %v3914_v31  ;;  %v3907_v47 = vor.u32 1.1754944e-38, %v3906_v0  ;;  %v10955_v26 = vsel %vm10937_vm4, %v4342_v5, %v4338_v43 }
 0xa63   : > { %v3923_v55 = vsel %vm3920_vm2, %v3922_v9, %v3918_v15  ;;  %v4296_v9 = vand.u32 2147483648, %v10837_v63 }
 0xa64   : > { %v3898_v17 = vmul.f32 %v10858_v13, %v3897_v53  ;;  %v4365_v51 = vmul.f32 %v13181_v52, %v3923_v55 }
 0xa66   : > { %v3899_v12 = vadd.f32 %v10858_v13, %v3898_v17 }
 0xa68   : > { %v3903_v30 = vsel %vm10924_vm3, %v10858_v13, %v3899_v12  ;;  %v13180_v13 = vld [vmem:[#allocation42_spill] sm:$0xff] }
 0xa69   : > { %v4364_v53 = vmul.f32 %v13180_v13, %v3923_v55  ;;  %v13187_v13 = vld [vmem:[#allocation22_spill] sm:$0xff] }
 0xa6a   : > { %4583 = vxpose.xlu2.b32.end [4/4] (short) %v4562_v21, 128  ;;  %v10918_v21 = vpop.xlane.xlu2 %3857 }
 0xa89   : > { %v10839_v25 = vpop.xlane.xlu1 %3878 }
 0xa8a   : > { %vm4350_vm7 = vweird.f32 %v10839_v25  ;;  %v4354_v0 = vand.u32 2147483647, %v10839_v25 }
 0xa8c   : > { %vm4355_vm14 = vcmp.eq.f32.partialorder %v4354_v0, 8.507059e+37 }
 0xa91   : > { %v10847_v7 = vpop.xlane.xlu1 %3872 }
 0xa92   : > { %vm4320_vm2 = vweird.f32 %v10847_v7  ;;  %v4324_v52 = vand.u32 2147483647, %v10847_v7 }
 0xa99   : > { %v3795_v3 = vpop.xlane.xlu1 %3794 }
 0xa9a   : > { %6971 = vrcp.f32 %v3795_v3  ;;  %v3936_v33 = vand.u32 2147483648, %v3795_v3  ;;  %v3934_v60 = vand.u32 2147483647, %v3795_v3  ;;  %vm3930_vm11 = vweird.f32 %v3795_v3 }
 0xa9b   : > { %6973 = vrcp.f32 %v10837_v63 }
 0xa9c   : > { %6975 = vrcp.f32 %v10839_v25  ;;  %v3937_v23 = vor.u32 1.1754944e-38, %v3936_v33  ;;  %vm3935_vm15 = vcmp.eq.f32.partialorder %v3934_v60, 8.507059e+37 }
 0xa9d   : > { %6977 = vrcp.f32 %v10847_v7 }
 0xa9e   : > { %6979 = vrcp.f32 %v10835_v58 }
 0xaa0   : > { %v6972_v45 = vpop.eup %6971 }
 0xaa1   : > { %v3926_v34 = vmul.f32 %v6972_v45, %v3795_v3  ;;  %v10866_v42 = vpop.xlane.xlu1 %3863  ;;  %v10868_v16 = vpop.eup %6973  ;;  %vm3931_vm8 = vweird.f32 %v6972_v45 }
 0xaa2   : > { %v10872_v48 = vpop.eup %6975  ;;  %v4286_v37 = vmul.f32 %v10868_v16, %v10837_v63  ;;  %vm3932_vm10 = vmor %vm3930_vm11, %vm3931_vm8  ;;  %vm4290_vm11 = vweird.f32 %v10837_v63  ;;  %vm4291_vm13 = vweird.f32 %v10868_v16 }
 0xaa3   : > { %v3927_v29 = vsub.f32 1.0, %v3926_v34  ;;  %v4346_v46 = vmul.f32 %v10872_v48, %v10839_v25  ;;  %v10913_v27 = vpop.eup %6977  ;;  %vm4351_vm6 = vweird.f32 %v10872_v48  ;;  %vm11010_vm3 = vmor %vm4290_vm11, %vm4291_vm13 }
 0xaa4   : > { %v10928_v32 = vpop.eup %6979  ;;  %v4287_v56 = vsub.f32 1.0, %v4286_v37  ;;  %v13182_v37 = vld [vmem:[#allocation44_spill] sm:$0xff]  ;;  %vm10969_vm8 = vmor %vm4350_vm7, %vm4351_vm6  ;;  %vm4321_vm1 = vweird.f32 %v10913_v27  ;;  %vm4305_vm6 = vweird.f32 %v10835_v58  ;;  %vm4325_vm7 = vcmp.eq.f32.partialorder %v4324_v52, 8.507059e+37 }
 0xaa5   : > { %v3928_v50 = vmul.f32 %v6972_v45, %v3927_v29  ;;  %v4347_v11 = vsub.f32 1.0, %v4346_v46  ;;  %v4301_v57 = vmul.f32 %v10928_v32, %v10835_v58  ;;  %v3908_v29 = vsel %vm3905_vm5, %v3907_v47, %v3903_v30  ;;  %v13183_v46 = vld [vmem:[#allocation43_spill] sm:$0xff]  ;;  %vm11014_vm4 = vmor %vm4320_vm2, %vm4321_vm1 }
 0xaa6   : > { %v4288_v17 = vmul.f32 %v10868_v16, %v4287_v56  ;;  %v4362_v6 = vmul.f32 %v13182_v37, %v3908_v29  ;;  %v4326_v47 = vand.u32 2147483648, %v10847_v7  ;;  %vm4306_vm5 = vweird.f32 %v10928_v32 }
 0xaa7   : > { %v3929_v10 = vadd.f32 %v6972_v45, %v3928_v50  ;;  %v4348_v28 = vmul.f32 %v10872_v48, %v4347_v11  ;;  %v4356_v50 = vand.u32 2147483648, %v10839_v25  ;;  %v4302_v20 = vsub.f32 1.0, %v4301_v57  ;;  %v11025_v57 = vld [vmem:[%s7389_s23 + $0x280] sm:$0xff] }
 0xaa8   : > { %v4297_v37 = vor.u32 1.1754944e-38, %v4296_v9 }
 0xaa9   : > { %v10898_v8 = vpop.xlane.xlu1 %3785  ;;  %v3933_v36 = vsel %vm3932_vm10, %v6972_v45, %v3929_v10  ;;  %v4316_v45 = vmul.f32 %v10913_v27, %v10847_v7  ;;  %v4349_v31 = vadd.f32 %v10872_v48, %v4348_v28  ;;  %v4363_v10 = vmul.f32 %v13183_v46, %v3908_v29  ;;  %v13186_v28 = vld [vmem:[#allocation14_spill] sm:$0xff]  ;;  %v11028_v29 = vld [vmem:[%s7389_s23 + $0x288] sm:$0xff]  ;;  %v13192_v46 = vld [vmem:[#allocation39_spill] sm:$0xff] }
 0xaaa   : > { %6981 = vrcp.f32 %v10898_v8  ;;  %v3938_v2 = vsel %vm3935_vm15, %v3937_v23, %v3933_v36  ;;  %v3891_v38 = vand.u32 2147483648, %v10898_v8  ;;  %v3889_v12 = vand.u32 2147483647, %v10898_v8 }
 0xaab   : > { %v4366_v41 = vmul.f32 %v13174_v40, %v3938_v2  ;;  %v4367_v62 = vmul.f32 %v13175_v54, %v3938_v2  ;;  %6983 = vrcp.f32 %v10918_v21  ;;  %v4317_v33 = vsub.f32 1.0, %v4316_v45  ;;  %v10988_v54 = vpop.xlane.xlu0 %3854 }
 0xaac   : > { %6985 = vrcp.f32 %v10866_v42  ;;  %v4353_v25 = vsel %vm10969_vm8, %v10872_v48, %v4349_v31  ;;  %v4357_v61 = vor.u32 1.1754944e-38, %v4356_v50  ;;  %vm3885_vm12 = vweird.f32 %v10898_v8  ;;  %vm11049_vm8 = vmor %vm4305_vm6, %vm4306_vm5 }
 0xaad   : > { %4436 = vmatpush.xpose.msrb.mxu2 %v4366_v41  ;;  %4465 = vmatpush.xpose.msrb.mxu3 %v4367_v62  ;;  %6987 = vrcp.f32 %v10941_v4  ;;  %v4318_v11 = vmul.f32 %v10913_v27, %v4317_v33  ;;  %v3892_v62 = vor.u32 1.1754944e-38, %v3891_v38  ;;  %v4289_v48 = vadd.f32 %v10868_v16, %v4288_v17 }
 0xaae   : > { %v4303_v14 = vmul.f32 %v10928_v32, %v4302_v20  ;;  %vm3890_vm15 = vcmp.eq.f32.partialorder %v3889_v12, 8.507059e+37  ;;  %v4358_v22 = vsel %vm4355_vm14, %v4357_v61, %v4353_v25  ;;  %6989 = vrcp.f32 %v10988_v54  ;;  %v13193_v20 = vld [vmem:[#allocation30_spill] sm:$0xff]  ;;  %v13196_v61 = vld [vmem:[#allocation19_spill] sm:$0xff] }
 0xaaf   : > { %v4319_v43 = vadd.f32 %v10913_v27, %v4318_v11  ;;  %v4422_v45 = vmul.f32 %v13186_v28, %v4358_v22  ;;  %v4293_v7 = vsel %vm11010_vm3, %v10868_v16, %v4289_v48  ;;  %v4327_v50 = vor.u32 1.1754944e-38, %v4326_v47  ;;  %v13199_v28 = vld [vmem:[#allocation37_spill] sm:$0xff] }
 0xab0   : > { %v6982_v34 = vpop.eup %6981  ;;  %v4421_v38 = vmul.f32 %v13193_v20, %v10955_v26  ;;  %v4251_v48 = vand.u32 2147483648, %v10918_v21  ;;  %v4281_v47 = vand.u32 2147483648, %v10866_v42  ;;  %vm4245_vm14 = vweird.f32 %v10918_v21 }
 0xab1   : > { %v3881_v18 = vmul.f32 %v6982_v34, %v10898_v8  ;;  %4437 = vmatpush.xpose.msrb.mxu2 %v4364_v53  ;;  %4466 = vmatpush.xpose.msrb.mxu3 %v4365_v51  ;;  %v10966_v23 = vpop.eup %6983  ;;  %vm3886_vm9 = vweird.f32 %v6982_v34  ;;  %v4423_v53 = vmul.f32 %v13187_v13, %v4358_v22  ;;  %v11033_v31 = vpop.xlane.xlu1 %3851  ;;  %v4323_v16 = vsel %vm11014_vm4, %v10913_v27, %v4319_v43  ;;  %v13200_v13 = vld [vmem:[#allocation40_spill] sm:$0xff] }
 0xab2   : > { %v10980_v2 = vpop.eup %6985  ;;  %v10986_v41 = vmul.f32 %v10966_v23, %v10918_v21  ;;  %vm3887_vm10 = vmor %vm3885_vm12, %vm3886_vm9  ;;  %6991 = vrcp.f32 %v11033_v31  ;;  %v4328_v0 = vsel %vm4325_vm7, %v4327_v50, %v4323_v16  ;;  %vm4246_vm13 = vweird.f32 %v10966_v23 }
 0xab3   : > { %v3882_v60 = vsub.f32 1.0, %v3881_v18  ;;  %v4271_v8 = vmul.f32 %v10980_v2, %v10866_v42  ;;  %v10996_v3 = vpop.eup %6987  ;;  %v4311_v18 = vand.u32 2147483648, %v10835_v58  ;;  %vm4276_vm12 = vweird.f32 %v10980_v2  ;;  %vm11115_vm2 = vmor %vm4245_vm14, %vm4246_vm13 }
 0xab4   : > { %v4256_v17 = vmul.f32 %v10996_v3, %v10941_v4  ;;  %vm4261_vm1 = vweird.f32 %v10996_v3  ;;  %vm4260_vm3 = vweird.f32 %v10941_v4  ;;  %vm4215_vm14 = vweird.f32 %v11033_v31 }
 0xab5   : > { %v3883_v15 = vmul.f32 %v6982_v34, %v3882_v60  ;;  %4438 = vmatpush.xpose.msrb.mxu2 %v4362_v6  ;;  %4467 = vmatpush.xpose.msrb.mxu3 %v4363_v10  ;;  %v4272_v33 = vsub.f32 1.0, %v4271_v8  ;;  %v4309_v60 = vand.u32 2147483647, %v10835_v58  ;;  %v11041_v6 = vpop.xlane.xlu2 %3848  ;;  %v4420_v10 = vmul.f32 %v13192_v46, %v10955_v26  ;;  %v11055_v58 = vpop.eup %6989  ;;  %v11073_v8 = vld [vmem:[%s7389_s23 + $0x290] sm:$0xff]  ;;  %vm11131_vm5 = vmor %vm4260_vm3, %vm4261_vm1 }
 0xab6   : > { %v4312_v36 = vor.u32 1.1754944e-38, %v4311_v18  ;;  %6993 = vrcp.f32 %v11041_v6  ;;  %v4226_v11 = vmul.f32 %v11055_v58, %v10988_v54  ;;  %v4264_v46 = vand.u32 2147483647, %v10941_v4 }
 0xab7   : > { %v3884_v40 = vadd.f32 %v6982_v34, %v3883_v15  ;;  %v4257_v15 = vsub.f32 1.0, %v4256_v17  ;;  %v4273_v12 = vmul.f32 %v10980_v2, %v4272_v33  ;;  %vm4310_vm11 = vcmp.eq.f32.partialorder %v4309_v60, 8.507059e+37  ;;  %v13215_v17 = vld [vmem:[#allocation33_spill] sm:$0xff] }
 0xab8   : > { %v4227_v51 = vsub.f32 1.0, %v4226_v11  ;;  %v4249_v33 = vand.u32 2147483647, %v10918_v21  ;;  %v4266_v60 = vand.u32 2147483648, %v10941_v4  ;;  %vm4265_vm7 = vcmp.eq.f32.partialorder %v4264_v46, 8.507059e+37  ;;  %v13208_v11 = vld [vmem:[#allocation10_spill] sm:$0xff] }
 0xab9   : > { %v3888_v55 = vsel %vm3887_vm10, %v6982_v34, %v3884_v40  ;;  %v4294_v34 = vand.u32 2147483647, %v10837_v63  ;;  %v4242_v63 = vsub.f32 1.0, %v10986_v41  ;;  %v13197_v40 = vld [vmem:[#allocation9_spill] sm:$0xff]  ;;  %v4258_v43 = vmul.f32 %v10996_v3, %v4257_v15  ;;  %v11106_v16 = vpop.xlane.xlu1 %3842 }
 0xaba   : > { %v3893_v30 = vsel %vm3890_vm15, %v3892_v62, %v3888_v55  ;;  %v4419_v41 = vmul.f32 %v13197_v40, %v4328_v0  ;;  %v13198_v55 = vld [vmem:[#allocation31_spill] sm:$0xff]  ;;  %vm4275_vm10 = vweird.f32 %v10866_v42  ;;  %vm4250_vm6 = vcmp.eq.f32.partialorder %v4249_v33, 8.507059e+37 }
 0xabb   : > { %v4360_v5 = vmul.f32 %v10611_v44, %v3893_v30  ;;  %v4361_v56 = vmul.f32 %v10620_v49, %v3893_v30  ;;  %v4304_v49 = vadd.f32 %v10928_v32, %v4303_v14  ;;  %vm4295_vm9 = vcmp.eq.f32.partialorder %v4294_v34, 8.507059e+37  ;;  %v11069_v14 = vpop.xlane.xlu0 %3845  ;;  %v11076_v30 = vld [vmem:[%s7389_s23 + $0x298] sm:$0xff]  ;;  %v13201_v34 = vld [vmem:[#allocation13_spill] sm:$0xff]  ;;  %vm11099_vm15 = vmor %vm4275_vm10, %vm4276_vm12 }
 0xabc   : > { %v4298_v9 = vsel %vm4295_vm9, %v4297_v37, %v4293_v7  ;;  %v4243_v25 = vmul.f32 %v10966_v23, %v4242_v63  ;;  %6995 = vrcp.f32 %v11069_v14  ;;  %v4279_v44 = vand.u32 2147483647, %v10866_v42 }
 0xabd   : > { %4439 = vmatpush.xpose.msrb.mxu2 %v4360_v5  ;;  %4468 = vmatpush.xpose.msrb.mxu3 %v4361_v56  ;;  %v4308_v26 = vsel %vm11049_vm8, %v10928_v32, %v4304_v49  ;;  %v4418_v32 = vmul.f32 %v13196_v61, %v4328_v0  ;;  %v4414_v22 = vmul.f32 %v13198_v55, %v4298_v9  ;;  %v11082_v56 = vpop.eup %6991  ;;  %v4252_v7 = vor.u32 1.1754944e-38, %v4251_v48 }
 0xabe   : > { %v4313_v62 = vsel %vm4310_vm11, %v4312_v36, %v4308_v26  ;;  %v4274_v5 = vadd.f32 %v10980_v2, %v4273_v12  ;;  %v4244_v52 = vadd.f32 %v10966_v23, %v4243_v25  ;;  %v11093_v49 = vpop.eup %6993  ;;  %v4415_v18 = vmul.f32 %v13201_v34, %v4298_v9  ;;  %v11136_v26 = vld [vmem:[%s7389_s23 + $0x2a0] sm:$0xff] }
 0xabf   : > { %v4211_v42 = vmul.f32 %v11082_v56, %v11033_v31  ;;  %v4259_v50 = vadd.f32 %v10996_v3, %v4258_v43  ;;  %v4282_v37 = vor.u32 1.1754944e-38, %v4281_v47  ;;  %v4196_v20 = vmul.f32 %v11093_v49, %v11041_v6  ;;  %v13210_v47 = vld [vmem:[#allocation11_spill] sm:$0xff] }
 0xac0   : > { %4440 = vmatmul.f32.vlgmr.msrb.gmra.mxu2 %v11025_v57  ;;  %4469 = vmatmul.f32.vlgmr.msrb.gmra.mxu3 %v11028_v29  ;;  %v4278_v63 = vsel %vm11099_vm15, %v10980_v2, %v4274_v5  ;;  %v4248_v2 = vsel %vm11115_vm2, %v10966_v23, %v4244_v52  ;;  %vm4280_vm4 = vcmp.eq.f32.partialorder %v4279_v44, 8.507059e+37  ;;  %6997 = vrcp.f32 %v11106_v16  ;;  %v11139_v23 = vld [vmem:[%s7389_s23 + $0x2a8] sm:$0xff] }
 0xac1   : > { %4482 = vmatpush.xpose.msra.mxu2 %v4422_v45  ;;  %4511 = vmatpush.xpose.msra.mxu3 %v4423_v53  ;;  %v4416_v45 = vmul.f32 %v13199_v28, %v4313_v62  ;;  %v4417_v53 = vmul.f32 %v13200_v13, %v4313_v62  ;;  %v4283_v27 = vsel %vm4280_vm4, %v4282_v37, %v4278_v63  ;;  %v4212_v36 = vsub.f32 1.0, %v4211_v42  ;;  %v11181_v42 = vld [vmem:[%s7389_s23 + $0x2b0] sm:$0xff]  ;;  %v11184_v63 = vld [vmem:[%s7389_s23 + $0x2b8] sm:$0xff]  ;;  %v11188_v21 = vpop.xlane.xlu1 %3833 }
 0xac2   : > { %v11141_v4 = vpop.eup %6995  ;;  %v4263_v15 = vsel %vm11131_vm5, %v10996_v3, %v4259_v50  ;;  %v4253_v12 = vsel %vm4250_vm6, %v4252_v7, %v4248_v2  ;;  %v4267_v9 = vor.u32 1.1754944e-38, %v4266_v60  ;;  %vm4231_vm8 = vweird.f32 %v11055_v58  ;;  %v4549_v60 = vld [vmem:[%s7389_s23 + $0xc8] sm:$0xff] }
 0xac3   : > { %v4197_v25 = vsub.f32 1.0, %v4196_v20  ;;  %v4412_v61 = vmul.f32 %v13208_v11, %v4283_v27  ;;  %v4236_v3 = vand.u32 2147483648, %v10988_v54  ;;  %v4181_v62 = vmul.f32 %v11141_v4, %v11069_v14  ;;  %v11157_v55 = vpop.xlane.xlu0 %3836 }
 0xac4   : > { %v4268_v48 = vsel %vm4265_vm7, %v4267_v9, %v4263_v15  ;;  %vm4230_vm9 = vweird.f32 %v10988_v54  ;;  %v4234_v43 = vand.u32 2147483647, %v10988_v54  ;;  %v4408_v28 = vmul.f32 %v13210_v47, %v4253_v12 }
 0xac5   : > { %4483 = vmatpush.xpose.msra.mxu2 %v4420_v10  ;;  %4512 = vmatpush.xpose.msra.mxu3 %v4421_v38  ;;  %v4228_v10 = vmul.f32 %v11055_v58, %v4227_v51  ;;  %v11128_v38 = vpop.xlane.xlu2 %3839  ;;  %vm11166_vm11 = vmor %vm4230_vm9, %vm4231_vm8  ;;  %v4198_v13 = vmul.f32 %v11093_v49, %v4197_v25  ;;  %v13214_v51 = vld [vmem:[#allocation46_spill] sm:$0xff]  ;;  %v4237_v34 = vor.u32 1.1754944e-38, %v4236_v3  ;;  %v4409_v33 = vmul.f32 %v13215_v17, %v4253_v12  ;;  %v13221_v3 = vld [vmem:[#allocation27_spill] sm:$0xff] }
 0xac6   : > { %6999 = vrcp.f32 %v11128_v38  ;;  %v11161_v5 = vpop.eup %6997  ;;  %v4411_v44 = vmul.f32 %v13214_v51, %v4268_v48  ;;  %vm4235_vm12 = vcmp.eq.f32.partialorder %v4234_v43, 8.507059e+37  ;;  %vm4216_vm13 = vweird.f32 %v11082_v56  ;;  %v4551_v43 = vld [vmem:[%s7389_s23 + $0xd8] sm:$0xff] }
 0xac7   : > { %7001 = vrcp.f32 %v11157_v55  ;;  %v4166_v50 = vmul.f32 %v11161_v5, %v11106_v16  ;;  %v4221_v37 = vand.u32 2147483648, %v11033_v31  ;;  %vm4201_vm10 = vweird.f32 %v11093_v49  ;;  %vm11207_vm15 = vmor %vm4215_vm14, %vm4216_vm13 }
 0xac8   : > { %4443 = vmatmul.f32.gmra.mxu2 %v11073_v8  ;;  %4472 = vmatmul.f32.gmra.mxu3 %v11076_v30  ;;  %v4557_v2 = vmul.f32 0.17677669, %v4549_v60  ;;  %v4219_v20 = vand.u32 2147483647, %v11033_v31  ;;  %v4206_v0 = vand.u32 2147483648, %v11041_v6  ;;  %7003 = vrcp.f32 %v11188_v21 }
 0xac9   : > { %4484 = vmatpush.xpose.msra.mxu2 %v4418_v32  ;;  %4513 = vmatpush.xpose.msra.mxu3 %v4419_v41  ;;  %v13209_v32 = vld [vmem:[#allocation16_spill] sm:$0xff]  ;;  %v4229_v41 = vadd.f32 %v11055_v58, %v4228_v10  ;;  %vm4200_vm1 = vweird.f32 %v11041_v6  ;;  %v4167_v31 = vsub.f32 1.0, %v4166_v50  ;;  %v4204_v9 = vand.u32 2147483647, %v11041_v6  ;;  %v13224_v50 = vld [vmem:[#allocation21_spill] sm:$0xff] }
 0xaca   : > { %v4413_v40 = vmul.f32 %v13209_v32, %v4283_v27  ;;  %v4199_v27 = vadd.f32 %v11093_v49, %v4198_v13  ;;  %4612 = vxpose.xlu0.b32.start [1/4] (short) %v4557_v2, 128  ;;  %v4222_v11 = vor.u32 1.1754944e-38, %v4221_v37  ;;  %vm11221_vm2 = vmor %vm4200_vm1, %vm4201_vm10  ;;  %vm4220_vm3 = vcmp.eq.f32.partialorder %v4219_v20, 8.507059e+37 }
 0xacb   : > { %v4233_v54 = vsel %vm11166_vm11, %v11055_v58, %v4229_v41  ;;  %v4207_v6 = vor.u32 1.1754944e-38, %v4206_v0  ;;  %vm4186_vm4 = vweird.f32 %v11141_v4  ;;  %vm4205_vm5 = vcmp.eq.f32.partialorder %v4204_v9, 8.507059e+37  ;;  %v4553_v0 = vld [vmem:[%s7389_s23 + $0xe8] sm:$0xff] }
 0xacc   : > { %v11176_v7 = vpop.eup %6999  ;;  %v4238_v46 = vsel %vm4235_vm12, %v4237_v34, %v4233_v54  ;;  %vm4185_vm6 = vweird.f32 %v11069_v14  ;;  %v4189_v34 = vand.u32 2147483647, %v11069_v14  ;;  %vm4171_vm9 = vweird.f32 %v11161_v5 }
 0xacd   : > { %4485 = vmatpush.xpose.msra.mxu2 %v4416_v45  ;;  %4514 = vmatpush.xpose.msra.mxu3 %v4417_v53  ;;  %v13213_v53 = vld [vmem:[#allocation45_spill] sm:$0xff]  ;;  %v4151_v10 = vmul.f32 %v11176_v7, %v11128_v38  ;;  %v11216_v25 = vpop.eup %7001  ;;  %v4559_v45 = vmul.f32 0.17677669, %v4551_v43  ;;  %vm11244_vm7 = vmor %vm4185_vm6, %vm4186_vm4  ;;  %vm4156_vm8 = vweird.f32 %v11176_v7  ;;  %vm4170_vm11 = vweird.f32 %v11106_v16 }
 0xace   : > { %v4410_v52 = vmul.f32 %v13213_v53, %v4268_v48  ;;  %v4136_v47 = vmul.f32 %v11216_v25, %v11157_v55  ;;  %v11235_v13 = vpop.eup %7003  ;;  %vm4190_vm12 = vcmp.eq.f32.partialorder %v4189_v34, 8.507059e+37  ;;  %v4174_v37 = vand.u32 2147483647, %v11106_v16  ;;  %vm11265_vm10 = vmor %vm4170_vm11, %vm4171_vm9 }
 0xacf   : > { %v4152_v41 = vsub.f32 1.0, %v4151_v10  ;;  %vm4155_vm13 = vweird.f32 %v11128_v38  ;;  %v4161_v2 = vand.u32 2147483648, %v11128_v38  ;;  %vm4125_vm6 = vweird.f32 %v11188_v21 }
 0xad0   : > { %4446 = vmatmul.f32.gmra.mxu2 %v11136_v26  ;;  %4475 = vmatmul.f32.gmra.mxu3 %v11139_v23  ;;  %v4137_v17 = vsub.f32 1.0, %v4136_v47  ;;  %vm11277_vm14 = vmor %vm4155_vm13, %vm4156_vm8  ;;  %v4555_v47 = vld [vmem:[%s7389_s23 + $0xf8] sm:$0xff] }
 0xad1   : > { %4486 = vmatpush.xpose.msra.mxu2 %v4414_v22  ;;  %4515 = vmatpush.xpose.msra.mxu3 %v4415_v18  ;;  %v4213_v22 = vmul.f32 %v11082_v56, %v4212_v36  ;;  %v4182_v18 = vsub.f32 1.0, %v4181_v62  ;;  %v4407_v62 = vmul.f32 %v13221_v3, %v4238_v46 }
 0xad2   : > { %4613 = vxpose.xlu0.b32.cont [2/4] (short) %v4559_v45, 128 }
 0xad3   : > { %v4214_v58 = vadd.f32 %v11082_v56, %v4213_v22  ;;  %v4183_v36 = vmul.f32 %v11141_v4, %v4182_v18 }
 0xad5   : > { %4487 = vmatpush.xpose.msra.mxu2 %v4412_v61  ;;  %4516 = vmatpush.xpose.msra.mxu3 %v4413_v40  ;;  %v4218_v12 = vsel %vm11207_vm15, %v11082_v56, %v4214_v58  ;;  %v13218_v61 = vld [vmem:[#allocation26_spill] sm:$0xff]  ;;  %v4203_v56 = vsel %vm11221_vm2, %v11093_v49, %v4199_v27  ;;  %v4184_v22 = vadd.f32 %v11141_v4, %v4183_v36  ;;  %v4191_v49 = vand.u32 2147483648, %v11069_v14 }
 0xad6   : > { %v4406_v32 = vmul.f32 %v13218_v61, %v4238_v46  ;;  %v4223_v48 = vsel %vm4220_vm3, %v4222_v11, %v4218_v12  ;;  %v4208_v53 = vsel %vm4205_vm5, %v4207_v6, %v4203_v56  ;;  %v4176_v14 = vand.u32 2147483648, %v11106_v16  ;;  %v13230_v11 = vld [vmem:[#allocation23_spill] sm:$0xff]  ;;  %v13231_v61 = vld [vmem:[#allocation34_spill] sm:$0xff] }
 0xad7   : > { %v4404_v51 = vmul.f32 %v10671_v19, %v4223_v48  ;;  %v4188_v18 = vsel %vm11244_vm7, %v11141_v4, %v4184_v22  ;;  %v4121_v19 = vmul.f32 %v11235_v13, %v11188_v21  ;;  %v4402_v58 = vmul.f32 %v13224_v50, %v4208_v53  ;;  %v13225_v4 = vld [vmem:[#allocation28_spill] sm:$0xff]  ;;  %v4571_v50 = vld [vmem:[%s7389_s23 + $0x1f8] sm:$0xff] }
 0xad8   : > { %4449 = vmatmul.f32.gmra.mxu2 %v11181_v42  ;;  %4478 = vmatmul.f32.gmra.mxu3 %v11184_v63  ;;  %v4403_v60 = vmul.f32 %v13225_v4, %v4208_v53  ;;  %v4159_v27 = vand.u32 2147483647, %v11128_v38  ;;  %v4138_v36 = vmul.f32 %v11216_v25, %v4137_v17  ;;  %v4177_v12 = vor.u32 1.1754944e-38, %v4176_v14  ;;  %v4569_v4 = vld [vmem:[%s7389_s23 + $0x1e8] sm:$0xff] }
 0xad9   : > { %4488 = vmatpush.xpose.msra.mxu2 %v4410_v52  ;;  %4517 = vmatpush.xpose.msra.mxu3 %v4411_v44  ;;  %v4153_v52 = vmul.f32 %v11176_v7, %v4152_v41  ;;  %v4405_v44 = vmul.f32 %v10687_v59, %v4223_v48  ;;  %v4122_v15 = vsub.f32 1.0, %v4121_v19  ;;  %vm4175_vm15 = vcmp.eq.f32.partialorder %v4174_v37, 8.507059e+37  ;;  %v13237_v19 = vld [vmem:[#allocation25_spill] sm:$0xff]  ;;  %v4567_v37 = vld [vmem:[%s7389_s23 + $0x1d8] sm:$0xff] }
 0xada   : > { %v4162_v41 = vor.u32 1.1754944e-38, %v4161_v2  ;;  %vm4160_vm1 = vcmp.eq.f32.partialorder %v4159_v27, 8.507059e+37  ;;  %vm4141_vm2 = vweird.f32 %v11216_v25  ;;  %v4146_v56 = vand.u32 2147483648, %v11157_v55 }
 0xadb   : > { %v4154_v46 = vadd.f32 %v11176_v7, %v4153_v52  ;;  %v4123_v3 = vmul.f32 %v11235_v13, %v4122_v15  ;;  %vm4140_vm3 = vweird.f32 %v11157_v55  ;;  %v4144_v22 = vand.u32 2147483647, %v11157_v55  ;;  %v13234_v55 = vld [vmem:[#allocation29_spill] sm:$0xff]  ;;  %v13235_v52 = vld [vmem:[#allocation20_spill] sm:$0xff] }
 0xadc   : > { %vm11294_vm4 = vmor %vm4140_vm3, %vm4141_vm2  ;;  %vm4126_vm5 = vweird.f32 %v11235_v13 }
 0xadd   : > { %4489 = vmatpush.xpose.msra.mxu2 %v4408_v28  ;;  %4518 = vmatpush.xpose.msra.mxu3 %v4409_v33  ;;  %v4168_v28 = vmul.f32 %v11161_v5, %v4167_v31  ;;  %v4192_v33 = vor.u32 1.1754944e-38, %v4191_v49  ;;  %v4561_v31 = vmul.f32 0.17677669, %v4553_v0  ;;  %v4158_v40 = vsel %vm11277_vm14, %v11176_v7, %v4154_v46  ;;  %vm4127_vm8 = vmor %vm4125_vm6, %vm4126_vm5  ;;  %v4565_v46 = vld [vmem:[%s7389_s23 + $0x1c8] sm:$0xff] }
 0xade   : > { %v4163_v6 = vsel %vm4160_vm1, %v4162_v41, %v4158_v40  ;;  %v4124_v45 = vadd.f32 %v11235_v13, %v4123_v3  ;;  %v4147_v49 = vor.u32 1.1754944e-38, %v4146_v56  ;;  %vm4145_vm7 = vcmp.eq.f32.partialorder %v4144_v22, 8.507059e+37 }
 0xadf   : > { %v4169_v59 = vadd.f32 %v11161_v5, %v4168_v28  ;;  %v4193_v10 = vsel %vm4190_vm12, %v4192_v33, %v4188_v18  ;;  %4614 = vxpose.xlu0.b32.cont [3/4] (short) %v4561_v31, 128  ;;  %v4396_v53 = vmul.f32 %v13234_v55, %v4163_v6  ;;  %v13236_v18 = vld [vmem:[#allocation24_spill] sm:$0xff] }
 0xae0   : > { %v4400_v38 = vmul.f32 %v13230_v11, %v4193_v10 }
 0xae1   : > { %4490 = vmatpush.xpose.msra.mxu2 %v4406_v32  ;;  %4519 = vmatpush.xpose.msra.mxu3 %v4407_v62  ;;  %v4173_v16 = vsel %vm11265_vm10, %v11161_v5, %v4169_v59  ;;  %v4401_v32 = vmul.f32 %v13231_v61, %v4193_v10  ;;  %v4139_v62 = vadd.f32 %v11216_v25, %v4138_v36 }
 0xae2   : > { %v4178_v5 = vsel %vm4175_vm15, %v4177_v12, %v4173_v16 }
 0xae3   : > { %v4398_v7 = vmul.f32 %v10735_v1, %v4178_v5  ;;  %v4399_v48 = vmul.f32 %v10740_v24, %v4178_v5  ;;  %v4143_v28 = vsel %vm11294_vm4, %v11216_v25, %v4139_v62  ;;  %v4563_v1 = vmul.f32 0.17677669, %v4555_v47 }
 0xae4   : > { %v4131_v24 = vand.u32 2147483648, %v11188_v21  ;;  %v4148_v54 = vsel %vm4145_vm7, %v4147_v49, %v4143_v28  ;;  %v4128_v25 = vsel %vm4127_vm8, %v11235_v13, %v4124_v45  ;;  %v4570_v13 = vld [vmem:[%s7389_s23 + $0x1f0] sm:$0xff] }
 0xae5   : > { %4491 = vmatpush.xpose.msra.mxu2 %v4404_v51  ;;  %4520 = vmatpush.xpose.msra.mxu3 %v4405_v44  ;;  %v4397_v51 = vmul.f32 %v13235_v52, %v4163_v6  ;;  %v4129_v44 = vand.u32 2147483647, %v11188_v21  ;;  %v4394_v17 = vmul.f32 %v13236_v18, %v4148_v54  ;;  %v4395_v59 = vmul.f32 %v13237_v19, %v4148_v54 }
 0xae6   : > { %v4132_v34 = vor.u32 1.1754944e-38, %v4131_v24 }
 0xae7   : > { %4615 = vxpose.xlu0.b32.end [4/4] (short) %v4563_v1, 128  ;;  %vm4130_vm9 = vcmp.eq.f32.partialorder %v4129_v44, 8.507059e+37 }
 0xae8   : > { %v4133_v33 = vsel %vm4130_vm9, %v4132_v34, %v4128_v25 }
 0xae9   : > { %4492 = vmatpush.xpose.msra.mxu2 %v4402_v58  ;;  %4521 = vmatpush.xpose.msra.mxu3 %v4403_v60  ;;  %v4392_v21 = vmul.f32 %v10713_v35, %v4133_v33  ;;  %v4393_v14 = vmul.f32 %v10778_v39, %v4133_v33  ;;  %v4568_v58 = vld [vmem:[%s7389_s23 + $0x1e0] sm:$0xff]  ;;  %v4566_v60 = vld [vmem:[%s7389_s23 + $0x1d0] sm:$0xff] }
 0xaea   : > { %v4564_v35 = vld [vmem:[%s7389_s23 + $0x1c0] sm:$0xff] }
 0xaeb   : > { %v4596_v39 = vpop.trf.xlu2 }
 0xaed   : > { %4493 = vmatpush.xpose.msra.mxu2 %v4400_v38  ;;  %4522 = vmatpush.xpose.msra.mxu3 %v4401_v32 }
 0xaf1   : > { %4494 = vmatpush.xpose.msra.mxu2 %v4398_v7  ;;  %4523 = vmatpush.xpose.msra.mxu3 %v4399_v48 }
 0xaf5   : > { %4495 = vmatpush.xpose.msra.mxu2 %v4396_v53  ;;  %4524 = vmatpush.xpose.msra.mxu3 %v4397_v51 }
 0xaf9   : > { %4496 = vmatpush.xpose.msra.mxu2 %v4394_v17  ;;  %4525 = vmatpush.xpose.msra.mxu3 %v4395_v59 }
 0xafd   : > { %4497 = vmatpush.xpose.msra.mxu2 %v4392_v21  ;;  %4526 = vmatpush.xpose.msra.mxu3 %v4393_v14 }
 0xb00   : > { %4498 = vmatmul.f32.vlgmr.msra.gmra.mxu2 %v11025_v57  ;;  %4527 = vmatmul.f32.vlgmr.msra.gmra.mxu3 %v11028_v29  ;;  %v4597_v57 = vpop.trf.xlu2 }
 0xb01   : > { %4752 = vmatpush.msrb.mxu2 %v4570_v13  ;;  %4865 = vmatpush.msrb.mxu3 %v4571_v50 }
 0xb03   : > { %4753 = vmatpush.msrb.mxu2 %v4568_v58  ;;  %4866 = vmatpush.msrb.mxu3 %v4569_v4 }
 0xb05   : > { %4754 = vmatpush.msrb.mxu2 %v4566_v60  ;;  %4867 = vmatpush.msrb.mxu3 %v4567_v37 }
 0xb07   : > { %4755 = vmatpush.msrb.mxu2 %v4564_v35  ;;  %4868 = vmatpush.msrb.mxu3 %v4565_v46 }
 0xb08   : > { %4501 = vmatmul.f32.gmra.mxu2 %v11073_v8  ;;  %4530 = vmatmul.f32.gmra.mxu3 %v11076_v30  ;;  %v4598_v29 = vpop.trf.xlu2 }
 0xb10   : > { %4504 = vmatmul.f32.gmra.mxu2 %v11136_v26  ;;  %4533 = vmatmul.f32.gmra.mxu3 %v11139_v23  ;;  %v4599_v2 = vpop.trf.xlu2 }
 0xb18   : > { %4507 = vmatmul.f32.gmra.mxu2 %v11181_v42  ;;  %4536 = vmatmul.f32.gmra.mxu3 %v11184_v63  ;;  %v4600_v8 = vpop.trf.xlu2 }
 0xb20   : > { %6305 = vmatmul.msk.f32.vlgmr.msrb.gmra.mxu2 %vm233_vm0, %v4596_v39  ;;  %6337 = vmatmul.msk.f32.vlgmr.msrb.gmra.mxu3 %vm233_vm0, %v4596_v39  ;;  %v4601_v30 = vpop.trf.xlu2 }
 0xb28   : > { %6306 = vmatmul.msk.f32.gmra.mxu2 %vm233_vm0, %v4597_v57  ;;  %6338 = vmatmul.msk.f32.gmra.mxu3 %vm233_vm0, %v4597_v57  ;;  %v4602_v26 = vpop.trf.xlu2 }
 0xb30   : > { %6307 = vmatmul.msk.f32.gmra.mxu2 %vm233_vm0, %v4598_v29  ;;  %6339 = vmatmul.msk.f32.gmra.mxu3 %vm233_vm0, %v4598_v29  ;;  %v4603_v23 = vpop.trf.xlu2 }
 0xb38   : > { %6308 = vmatmul.msk.f32.gmra.mxu2 %vm233_vm0, %v4599_v2  ;;  %6340 = vmatmul.msk.f32.gmra.mxu3 %vm233_vm0, %v4599_v2  ;;  %v4604_v20 = vpop.trf.xlu2 }
 0xb40   : > { %6309 = vmatmul.msk.f32.gmra.mxu2 %vm233_vm0, %v4600_v8  ;;  %6341 = vmatmul.msk.f32.gmra.mxu3 %vm233_vm0, %v4600_v8  ;;  %v4605_v12 = vpop.trf.xlu2 }
 0xb43   : > { %v4441_v42 = vpop.f32.mrf.mxu2  ;;  %v4470_v63 = vpop.f32.mrf.mxu3 }
 0xb44   : > { %v4471_v10 = vadd.f32 %v4470_v63, %v4441_v42 }
 0xb46   : > { %4540 = vst [vmem:[%s8730_s24 + $0x80] sm:$0xff] %v4471_v10 }
 0xb48   : > { %6310 = vmatmul.msk.f32.gmra.mxu2 %vm233_vm0, %v4601_v30  ;;  %6342 = vmatmul.msk.f32.gmra.mxu3 %vm233_vm0, %v4601_v30  ;;  %v4606_v61 = vpop.trf.xlu2 }
 0xb4b   : > { %v4444_v27 = vpop.f32.mrf.mxu2  ;;  %v4473_v0 = vpop.f32.mrf.mxu3 }
 0xb4c   : > { %v4474_v36 = vadd.f32 %v4473_v0, %v4444_v27 }
 0xb4e   : > { %4542 = vst [vmem:[%s8730_s24 + $0x90] sm:$0xff] %v4474_v36 }
 0xb50   : > { %6311 = vmatmul.msk.f32.gmra.mxu2 %vm233_vm0, %v4602_v26  ;;  %6343 = vmatmul.msk.f32.gmra.mxu3 %vm233_vm0, %v4602_v26  ;;  %v4607_v32 = vpop.trf.xlu2 }
 0xb53   : > { %v4447_v15 = vpop.f32.mrf.mxu2  ;;  %v4476_v16 = vpop.f32.mrf.mxu3 }
 0xb54   : > { %v4477_v31 = vadd.f32 %v4476_v16, %v4447_v15 }
 0xb56   : > { %4544 = vst [vmem:[%s8730_s24 + $0xa0] sm:$0xff] %v4477_v31 }
 0xb58   : > { %6312 = vmatmul.msk.f32.gmra.mxu2 %vm233_vm0, %v4603_v23  ;;  %6344 = vmatmul.msk.f32.gmra.mxu3 %vm233_vm0, %v4603_v23  ;;  %v4608_v40 = vpop.trf.xlu2 }
 0xb5b   : > { %v4450_v9 = vpop.f32.mrf.mxu2  ;;  %v4479_v11 = vpop.f32.mrf.mxu3 }
 0xb5c   : > { %v4480_v38 = vadd.f32 %v4479_v11, %v4450_v9 }
 0xb5e   : > { %4546 = vst [vmem:[%s8730_s24 + $0xb0] sm:$0xff] %v4480_v38 }
 0xb60   : > { %6313 = vmatmul.msk.f32.gmra.mxu2 %vm233_vm0, %v4604_v20  ;;  %6345 = vmatmul.msk.f32.gmra.mxu3 %vm233_vm0, %v4604_v20  ;;  %v4609_v41 = vpop.trf.xlu2 }
 0xb68   : > { %6314 = vmatmul.msk.f32.gmra.mxu2 %vm233_vm0, %v4605_v12  ;;  %6346 = vmatmul.msk.f32.gmra.mxu3 %vm233_vm0, %v4605_v12  ;;  %v4610_v7 = vpop.trf.xlu2 }
 0xb70   : > { %6315 = vmatmul.msk.f32.gmra.mxu2 %vm233_vm0, %v4606_v61  ;;  %6347 = vmatmul.msk.f32.gmra.mxu3 %vm233_vm0, %v4606_v61  ;;  %v4611_v49 = vpop.trf.xlu2 }
 0xb73   : > { %v4628_v5 = vpop.trf.xlu0 }
 0xb78   : > { %6316 = vmatmul.msk.f32.gmra.mxu2 %vm233_vm0, %v4607_v32  ;;  %6348 = vmatmul.msk.f32.gmra.mxu3 %vm233_vm0, %v4607_v32 }
 0xb7b   : > { %v4629_v6 = vpop.trf.xlu0 }
 0xb80   : > { %6317 = vmatmul.msk.f32.gmra.mxu2 %vm233_vm0, %v4608_v40  ;;  %6349 = vmatmul.msk.f32.gmra.mxu3 %vm233_vm0, %v4608_v40 }
 0xb83   : > { %v4499_v3 = vpop.f32.mrf.mxu2  ;;  %v4528_v62 = vpop.f32.mrf.mxu3 }
 0xb84   : > { %v4529_v56 = vadd.f32 %v4528_v62, %v4499_v3  ;;  %v4630_v47 = vpop.trf.xlu0 }
 0xb86   : > { %4541 = vst [vmem:[%s8730_s24 + $0x88] sm:$0xff] %v4529_v56 }
 0xb88   : > { %6318 = vmatmul.msk.f32.gmra.mxu2 %vm233_vm0, %v4609_v41  ;;  %6350 = vmatmul.msk.f32.gmra.mxu3 %vm233_vm0, %v4609_v41 }
 0xb8b   : > { %v4502_v48 = vpop.f32.mrf.mxu2  ;;  %v4531_v22 = vpop.f32.mrf.mxu3 }
 0xb8c   : > { %v4532_v43 = vadd.f32 %v4531_v22, %v4502_v48  ;;  %v4631_v52 = vpop.trf.xlu0 }
 0xb8e   : > { %4543 = vst [vmem:[%s8730_s24 + $0x98] sm:$0xff] %v4532_v43 }
 0xb90   : > { %6319 = vmatmul.msk.f32.gmra.mxu2 %vm233_vm0, %v4610_v7  ;;  %6351 = vmatmul.msk.f32.gmra.mxu3 %vm233_vm0, %v4610_v7 }
 0xb93   : > { %v4505_v28 = vpop.f32.mrf.mxu2  ;;  %v4534_v45 = vpop.f32.mrf.mxu3 }
 0xb94   : > { %v4535_v1 = vadd.f32 %v4534_v45, %v4505_v28  ;;  %v4632_v54 = vpop.trf.xlu0 }
 0xb96   : > { %4545 = vst [vmem:[%s8730_s24 + $0xa8] sm:$0xff] %v4535_v1 }
 0xb98   : > { %6320 = vmatmul.msk.f32.gmra.mxu2 %vm233_vm0, %v4611_v49  ;;  %6352 = vmatmul.msk.f32.gmra.mxu3 %vm233_vm0, %v4611_v49 }
 0xb9b   : > { %v4508_v24 = vpop.f32.mrf.mxu2  ;;  %v4537_v55 = vpop.f32.mrf.mxu3 }
 0xb9c   : > { %v4538_v53 = vadd.f32 %v4537_v55, %v4508_v24  ;;  %v4633_v18 = vpop.trf.xlu0 }
 0xb9e   : > { %4547 = vst [vmem:[%s8730_s24 + $0xb8] sm:$0xff] %v4538_v53 }
 0xba0   : > { %6321 = vmatmul.msk.f32.gmra.mxu2 %vm233_vm0, %v4628_v5  ;;  %6353 = vmatmul.msk.f32.gmra.mxu3 %vm233_vm0, %v4628_v5 }
 0xba3   : > { %v11372_v51 = vpop.f32.mrf.mxu2  ;;  %v11374_v44 = vpop.f32.mrf.mxu3 }
 0xba4   : > { %v4634_v59 = vpop.trf.xlu0 }
 0xba8   : > { %6322 = vmatmul.msk.f32.gmra.mxu2 %vm233_vm0, %v4629_v6  ;;  %6354 = vmatmul.msk.f32.gmra.mxu3 %vm233_vm0, %v4629_v6 }
 0xbab   : > { %v11378_v25 = vpop.f32.mrf.mxu2  ;;  %v11380_v34 = vpop.f32.mrf.mxu3 }
 0xbac   : > { %v4635_v50 = vpop.trf.xlu0 }
 0xbb0   : > { %6323 = vmatmul.msk.f32.gmra.mxu2 %vm233_vm0, %v4630_v47  ;;  %6355 = vmatmul.msk.f32.gmra.mxu3 %vm233_vm0, %v4630_v47 }
 0xbb3   : > { %v11384_v17 = vpop.f32.mrf.mxu2  ;;  %v11386_v19 = vpop.f32.mrf.mxu3 }
 0xbb4   : > { %13238 = vst [vmem:[#allocation17_spill] sm:$0xff] %v11386_v19  ;;  %v4636_v60 = vpop.trf.xlu0 }
 0xbb8   : > { %6324 = vmatmul.msk.f32.gmra.mxu2 %vm233_vm0, %v4631_v52  ;;  %6356 = vmatmul.msk.f32.gmra.mxu3 %vm233_vm0, %v4631_v52 }
 0xbbb   : > { %v11390_v33 = vpop.f32.mrf.mxu2  ;;  %v11392_v21 = vpop.f32.mrf.mxu3 }
 0xbbc   : > { %v4637_v46 = vpop.trf.xlu0 }
 0xbc0   : > { %6325 = vmatmul.msk.f32.gmra.mxu2 %vm233_vm0, %v4632_v54  ;;  %6357 = vmatmul.msk.f32.gmra.mxu3 %vm233_vm0, %v4632_v54 }
 0xbc3   : > { %v11396_v14 = vpop.f32.mrf.mxu2  ;;  %v11398_v13 = vpop.f32.mrf.mxu3 }
 0xbc4   : > { %v4638_v2 = vpop.trf.xlu0 }
 0xbc8   : > { %6326 = vmatmul.msk.f32.gmra.mxu2 %vm233_vm0, %v4633_v18  ;;  %6358 = vmatmul.msk.f32.gmra.mxu3 %vm233_vm0, %v4633_v18 }
 0xbcb   : > { %v11402_v58 = vpop.f32.mrf.mxu2  ;;  %v11404_v4 = vpop.f32.mrf.mxu3 }
 0xbcc   : > { %13239 = vst [vmem:[#allocation8_spill] sm:$0xff] %v11404_v4  ;;  %v4639_v10 = vpop.trf.xlu0 }
 0xbd0   : > { %6327 = vmatmul.msk.f32.gmra.mxu2 %vm233_vm0, %v4634_v59  ;;  %6359 = vmatmul.msk.f32.gmra.mxu3 %vm233_vm0, %v4634_v59 }
 0xbd3   : > { %v11408_v37 = vpop.f32.mrf.mxu2  ;;  %v11410_v35 = vpop.f32.mrf.mxu3 }
 0xbd4   : > { %13240 = vst [vmem:[#allocation36_spill] sm:$0xff] %v11408_v37  ;;  %v4640_v36 = vpop.trf.xlu0  ;;  %v4984_v47 = vmax.f32 %v11408_v37, %v11410_v35 }
 0xbd5   : > { %13241 = vst [vmem:[#allocation32_spill] sm:$0xff] %v11410_v35 }
 0xbd8   : > { %6328 = vmatmul.msk.f32.gmra.mxu2 %vm233_vm0, %v4635_v50  ;;  %6360 = vmatmul.msk.f32.gmra.mxu3 %vm233_vm0, %v4635_v50 }
 0xbdb   : > { %v11414_v39 = vpop.f32.mrf.mxu2  ;;  %v11416_v57 = vpop.f32.mrf.mxu3 }
 0xbdc   : > { %v4987_v29 = vmax.f32 %v11414_v39, %v11416_v57  ;;  %v4641_v12 = vpop.trf.xlu0 }
 0xbde   : > { %4988 = vmax.xlane.f32.xlu2 %v4987_v29 }
 0xbe0   : > { %6329 = vmatmul.msk.f32.gmra.mxu2 %vm233_vm0, %v4636_v60  ;;  %6361 = vmatmul.msk.f32.gmra.mxu3 %vm233_vm0, %v4636_v60 }
 0xbe3   : > { %v11422_v8 = vpop.f32.mrf.mxu2  ;;  %v11424_v30 = vpop.f32.mrf.mxu3 }
 0xbe4   : > { %v4990_v26 = vmax.f32 %v11422_v8, %v11424_v30  ;;  %v4642_v61 = vpop.trf.xlu0 }
 0xbe6   : > { %4991 = vmax.xlane.f32.xlu1 %v4990_v26 }
 0xbe8   : > { %6330 = vmatmul.msk.f32.gmra.mxu2 %vm233_vm0, %v4637_v46  ;;  %6362 = vmatmul.msk.f32.gmra.mxu3 %vm233_vm0, %v4637_v46 }
 0xbeb   : > { %v11430_v23 = vpop.f32.mrf.mxu2  ;;  %v11432_v42 = vpop.f32.mrf.mxu3 }
 0xbec   : > { %v4993_v63 = vmax.f32 %v11430_v23, %v11432_v42  ;;  %v4643_v56 = vpop.trf.xlu0 }
 0xbee   : > { %4994 = vmax.xlane.f32.xlu1 %v4993_v63 }
 0xbf0   : > { %6331 = vmatmul.msk.f32.gmra.mxu2 %vm233_vm0, %v4638_v2  ;;  %6363 = vmatmul.msk.f32.gmra.mxu3 %vm233_vm0, %v4638_v2 }
 0xbf3   : > { %v11438_v20 = vpop.f32.mrf.mxu2  ;;  %v11440_v27 = vpop.f32.mrf.mxu3 }
 0xbf4   : > { %v4996_v0 = vmax.f32 %v11438_v20, %v11440_v27 }
 0xbf6   : > { %4997 = vmax.xlane.f32.xlu1 %v4996_v0 }
 0xbf8   : > { %6332 = vmatmul.msk.f32.gmra.mxu2 %vm233_vm0, %v4639_v10  ;;  %6364 = vmatmul.msk.f32.gmra.mxu3 %vm233_vm0, %v4639_v10 }
 0xbfb   : > { %v11446_v15 = vpop.f32.mrf.mxu2  ;;  %v11448_v16 = vpop.f32.mrf.mxu3 }
 0xbfc   : > { %v4999_v31 = vmax.f32 %v11446_v15, %v11448_v16 }
 0xbfe   : > { %5000 = vmax.xlane.f32.xlu1 %v4999_v31 }
 0xc00   : > { %6333 = vmatmul.msk.f32.gmra.mxu2 %vm233_vm0, %v4640_v36  ;;  %6365 = vmatmul.msk.f32.gmra.mxu3 %vm233_vm0, %v4640_v36 }
 0xc03   : > { %v11454_v9 = vpop.f32.mrf.mxu2  ;;  %v11456_v11 = vpop.f32.mrf.mxu3 }
 0xc04   : > { %v5002_v38 = vmax.f32 %v11454_v9, %v11456_v11 }
 0xc06   : > { %5003 = vmax.xlane.f32.xlu1 %v5002_v38 }
 0xc08   : > { %6334 = vmatmul.msk.f32.gmra.mxu2 %vm233_vm0, %v4641_v12  ;;  %6366 = vmatmul.msk.f32.gmra.mxu3 %vm233_vm0, %v4641_v12 }
 0xc0b   : > { %v11462_v32 = vpop.f32.mrf.mxu2  ;;  %v11464_v40 = vpop.f32.mrf.mxu3 }
 0xc0c   : > { %v5005_v41 = vmax.f32 %v11462_v32, %v11464_v40 }
 0xc0e   : > { %5006 = vmax.xlane.f32.xlu1 %v5005_v41 }
 0xc10   : > { %6335 = vmatmul.msk.f32.gmra.mxu2 %vm233_vm0, %v4642_v61  ;;  %6367 = vmatmul.msk.f32.gmra.mxu3 %vm233_vm0, %v4642_v61 }
 0xc13   : > { %v11470_v5 = vpop.f32.mrf.mxu2  ;;  %v11472_v3 = vpop.f32.mrf.mxu3 }
 0xc14   : > { %v5008_v62 = vmax.f32 %v11470_v5, %v11472_v3 }
 0xc16   : > { %5009 = vmax.xlane.f32.xlu1 %v5008_v62 }
 0xc18   : > { %6336 = vmatmul.msk.f32.gmra.mxu2 %vm233_vm0, %v4643_v56  ;;  %6368 = vmatmul.msk.f32.gmra.mxu3 %vm233_vm0, %v4643_v56 }
 0xc1b   : > { %v11478_v6 = vpop.f32.mrf.mxu2  ;;  %v11480_v7 = vpop.f32.mrf.mxu3 }
 0xc1c   : > { %v5011_v48 = vmax.f32 %v11478_v6, %v11480_v7 }
 0xc1e   : > { %5012 = vmax.xlane.f32.xlu1 %v5011_v48 }
 0xc23   : > { %v11484_v22 = vpop.f32.mrf.mxu2  ;;  %v11486_v43 = vpop.f32.mrf.mxu3 }
 0xc24   : > { %13242 = vst [vmem:[#allocation12_spill] sm:$0xff] %v11484_v22 }
 0xc25   : > { %13243 = vst [vmem:[#allocation35_spill] sm:$0xff] %v11486_v43 }
 0xc26   : > { %4985 = vmax.xlane.f32.xlu1 %v4984_v47 }
 0xc2b   : > { %v11490_v28 = vpop.f32.mrf.mxu2  ;;  %v11492_v45 = vpop.f32.mrf.mxu3 }
 0xc2c   : > { %13244 = vst [vmem:[#allocation38_spill] sm:$0xff] %v11490_v28 }
 0xc2d   : > { %13245 = vst [vmem:[#allocation18_spill] sm:$0xff] %v11492_v45 }
 0xc33   : > { %v11494_v1 = vpop.f32.mrf.mxu2  ;;  %v11496_v49 = vpop.f32.mrf.mxu3 }
 0xc34   : > { %13246 = vst [vmem:[#allocation15_spill] sm:$0xff] %v11494_v1 }
 0xc35   : > { %13247 = vst [vmem:[#allocation42_spill] sm:$0xff] %v11496_v49 }
 0xc3b   : > { %v11498_v24 = vpop.f32.mrf.mxu2  ;;  %v11500_v55 = vpop.f32.mrf.mxu3 }
 0xc3c   : > { %13248 = vst [vmem:[#allocation41_spill] sm:$0xff] %v11498_v24 }
 0xc3d   : > { %13249 = vst [vmem:[#allocation44_spill] sm:$0xff] %v11500_v55  ;;  %v5020_v55 = vmax.f32 %v11494_v1, %v11496_v49 }
 0xc43   : > { %v11502_v53 = vpop.f32.mrf.mxu2  ;;  %v11504_v52 = vpop.f32.mrf.mxu3 }
 0xc4b   : > { %v11506_v54 = vpop.f32.mrf.mxu2  ;;  %v11508_v18 = vpop.f32.mrf.mxu3 }
 0xc53   : > { %v11510_v59 = vpop.f32.mrf.mxu2  ;;  %v11512_v50 = vpop.f32.mrf.mxu3 }
 0xc59   : > { %v4992_v60 = vpop.xlane.xlu1 %4991 }
 0xc5a   : > { %v5078_v46 = vsub.f32 %v11422_v8, %v4992_v60  ;;  %v5079_v29 = vsub.f32 %v11424_v30, %v4992_v60 }
 0xc5b   : > { %v11516_v2 = vpop.f32.mrf.mxu2  ;;  %v11518_v26 = vpop.f32.mrf.mxu3 }
 0xc5c   : > { %v5158_v63 = vmul.f32 1.442695, %v5078_v46  ;;  %v5160_v10 = vmul.f32 1.442695, %v5079_v29 }
 0xc5e   : > { %7005 = vpow2.f32 %v5158_v63 }
 0xc5f   : > { %7007 = vpow2.f32 %v5160_v10 }
 0xc61   : > { %v11568_v37 = vpop.xlane.xlu1 %4994 }
 0xc63   : > { %v11520_v0 = vpop.f32.mrf.mxu2  ;;  %v11522_v36 = vpop.f32.mrf.mxu3 }
 0xc64   : > { %v11524_v31 = vpop.eup %7005 }
 0xc65   : > { %13250 = vst [vmem:[#allocation43_spill] sm:$0xff] %v11524_v31  ;;  %v11526_v12 = vpop.eup %7007 }
 0xc66   : > { %13251 = vst [vmem:[#allocation14_spill] sm:$0xff] %v11526_v12  ;;  %v5278_v8 = vadd.f32 %v11526_v12, %v11524_v31  ;;  %v4981_v31 = vmax.f32 %v11402_v58, %v11404_v4  ;;  %v5017_v4 = vmax.f32 %v11490_v28, %v11492_v45 }
 0xc68   : > { %5279 = vadd.xlane.f32.xlu2 %v5278_v8 }
 0xc6b   : > { %v11530_v30 = vpop.f32.mrf.mxu2  ;;  %v11532_v38 = vpop.f32.mrf.mxu3 }
 0xc73   : > { %v11534_v61 = vpop.f32.mrf.mxu2  ;;  %v11536_v41 = vpop.f32.mrf.mxu3 }
 0xc7b   : > { %v11538_v62 = vpop.f32.mrf.mxu2  ;;  %v11540_v56 = vpop.f32.mrf.mxu3 }
 0xc83   : > { %v11542_v48 = vpop.f32.mrf.mxu2  ;;  %v11544_v47 = vpop.f32.mrf.mxu3 }
 0xc84   : > { %v5050_v49 = vmax.f32 %v11542_v48, %v11544_v47 }
 0xc8b   : > { %v11546_v60 = vpop.f32.mrf.mxu2  ;;  %v11548_v46 = vpop.f32.mrf.mxu3 }
 0xc8c   : > { %v5053_v35 = vmax.f32 %v11546_v60, %v11548_v46 }
 0xc93   : > { %v11550_v29 = vpop.f32.mrf.mxu2  ;;  %v11552_v63 = vpop.f32.mrf.mxu3 }
 0xc94   : > { %v5056_v10 = vmax.f32 %v11550_v29, %v11552_v63 }
 0xc96   : > { %5057 = vmax.xlane.f32.xlu1 %v5056_v10  ;;  %v4978_v10 = vmax.f32 %v11396_v14, %v11398_v13 }
 0xc9b   : > { %v11556_v8 = vpop.f32.mrf.mxu2  ;;  %v11558_v12 = vpop.f32.mrf.mxu3 }
 0xc9c   : > { %v5059_v24 = vmax.f32 %v11556_v8, %v11558_v12 }
 0xc9e   : > { %4982 = vmax.xlane.f32.xlu1 %v4981_v31  ;;  %5060 = vmax.xlane.f32.xlu0 %v5059_v24  ;;  %v11574_v31 = vpop.xlane.xlu1 %4997  ;;  %v5014_v24 = vmax.f32 %v11484_v22, %v11486_v43 }
 0xca6   : > { %5054 = vmax.xlane.f32.xlu1 %v5053_v35  ;;  %5021 = vmax.xlane.f32.xlu0 %v5020_v55  ;;  %v11580_v35 = vpop.xlane.xlu1 %5000  ;;  %v4975_v55 = vmax.f32 %v11390_v33, %v11392_v21 }
 0xcae   : > { %4979 = vmax.xlane.f32.xlu1 %v4978_v10  ;;  %5018 = vmax.xlane.f32.xlu0 %v5017_v4  ;;  %v5004_v1 = vpop.xlane.xlu1 %5003  ;;  %v5047_v4 = vmax.f32 %v11538_v62, %v11540_v56  ;;  %v4972_v10 = vmax.f32 %v11384_v17, %v11386_v19 }
 0xcb6   : > { %5051 = vmax.xlane.f32.xlu1 %v5050_v49  ;;  %5015 = vmax.xlane.f32.xlu0 %v5014_v24  ;;  %v5007_v43 = vpop.xlane.xlu1 %5006  ;;  %v5044_v49 = vmax.f32 %v11534_v61, %v11536_v41 }
 0xcbe   : > { %4976 = vmax.xlane.f32.xlu1 %v4975_v55  ;;  %v5010_v24 = vpop.xlane.xlu1 %5009  ;;  %v4969_v55 = vmax.f32 %v11378_v25, %v11380_v34 }
 0xcbf   : > { %v5090_v22 = vsub.f32 %v11470_v5, %v5010_v24  ;;  %v5091_v45 = vsub.f32 %v11472_v3, %v5010_v24  ;;  %v5088_v3 = vsub.f32 %v11462_v32, %v5007_v43 }
 0xcc1   : > { %v5182_v28 = vmul.f32 1.442695, %v5090_v22  ;;  %v5089_v22 = vsub.f32 %v11464_v40, %v5007_v43  ;;  %v5086_v40 = vsub.f32 %v11454_v9, %v5004_v1  ;;  %v5087_v43 = vsub.f32 %v11456_v11, %v5004_v1 }
 0xcc3   : > { %7009 = vpow2.f32 %v5182_v28  ;;  %v4966_v28 = vmax.f32 %v11372_v51, %v11374_v44  ;;  %v5180_v24 = vmul.f32 1.442695, %v5089_v22  ;;  %v5174_v22 = vmul.f32 1.442695, %v5086_v40 }
 0xcc6   : > { %5048 = vmax.xlane.f32.xlu1 %v5047_v4  ;;  %v5184_v4 = vmul.f32 1.442695, %v5091_v45  ;;  %v5178_v45 = vmul.f32 1.442695, %v5088_v3 }
 0xcc8   : > { %7011 = vpow2.f32 %v5184_v4  ;;  %v5038_v4 = vmax.f32 %v11520_v0, %v11522_v36 }
 0xcc9   : > { %v11596_v19 = vpop.eup %7009  ;;  %7013 = vpow2.f32 %v5178_v45 }
 0xcca   : > { %13252 = vst [vmem:[#allocation22_spill] sm:$0xff] %v11596_v19  ;;  %7015 = vpow2.f32 %v5180_v24 }
 0xccb   : > { %7017 = vpow2.f32 %v5174_v22  ;;  %v5085_v22 = vsub.f32 %v11448_v16, %v11580_v35 }
 0xcce   : > { %4973 = vmax.xlane.f32.xlu1 %v4972_v10  ;;  %v5041_v10 = vmax.f32 %v11530_v30, %v11532_v38 }
 0xcd6   : > { %5045 = vmax.xlane.f32.xlu1 %v5044_v49  ;;  %v11598_v49 = vpop.eup %7011 }
 0xcd7   : > { %13253 = vst [vmem:[#allocation39_spill] sm:$0xff] %v11598_v49  ;;  %v5296_v5 = vadd.f32 %v11598_v49, %v11596_v19  ;;  %v5035_v49 = vmax.f32 %v11516_v2, %v11518_v26 }
 0xcde   : > { %4970 = vmax.xlane.f32.xlu1 %v4969_v55  ;;  %v11606_v55 = vpop.xlane.xlu1 %5012 }
 0xce6   : > { %5042 = vmax.xlane.f32.xlu1 %v5041_v10  ;;  %v11610_v10 = vpop.eup %7013  ;;  %v11614_v32 = vpop.xlane.xlu1 %4985 }
 0xcee   : > { %5297 = vadd.xlane.f32.xlu1 %v5296_v5  ;;  %v11612_v5 = vpop.eup %7015 }
 0xcef   : > { %v5293_v3 = vadd.f32 %v11612_v5, %v11610_v10  ;;  %v11624_v11 = vpop.eup %7017 }
 0xcf6   : > { %4967 = vmax.xlane.f32.xlu1 %v4966_v28  ;;  %v5176_v28 = vmul.f32 1.442695, %v5087_v43 }
 0xcf8   : > { %7019 = vpow2.f32 %v5176_v28 }
 0xcfe   : > { %5039 = vmax.xlane.f32.xlu1 %v5038_v4  ;;  %v11626_v1 = vpop.eup %7019 }
 0xcff   : > { %v5290_v28 = vadd.f32 %v11626_v1, %v11624_v11 }
 0xd06   : > { %5294 = vadd.xlane.f32.xlu1 %v5293_v3 }
 0xd09   : > { %v5058_v45 = vpop.xlane.xlu1 %5057 }
 0xd0a   : > { %v5122_v24 = vsub.f32 %v11550_v29, %v5058_v45  ;;  %v5123_v4 = vsub.f32 %v11552_v63, %v5058_v45  ;;  %v5084_v29 = vsub.f32 %v11446_v15, %v11580_v35 }
 0xd0c   : > { %v5246_v19 = vmul.f32 1.442695, %v5122_v24  ;;  %v5248_v9 = vmul.f32 1.442695, %v5123_v4  ;;  %v5170_v4 = vmul.f32 1.442695, %v5084_v29 }
 0xd0e   : > { %7021 = vpow2.f32 %v5246_v19  ;;  %5036 = vmax.xlane.f32.xlu1 %v5035_v49 }
 0xd0f   : > { %7023 = vpow2.f32 %v5248_v9  ;;  %v5032_v9 = vmax.f32 %v11510_v59, %v11512_v50 }
 0xd11   : > { %v11628_v40 = vpop.xlane.xlu1 %4982  ;;  %v5061_v43 = vpop.xlane.xlu0 %5060 }
 0xd12   : > { %v5124_v63 = vsub.f32 %v11556_v8, %v5061_v43  ;;  %v5125_v3 = vsub.f32 %v11558_v12, %v5061_v43  ;;  %v5172_v8 = vmul.f32 1.442695, %v5085_v22 }
 0xd14   : > { %v11636_v19 = vpop.eup %7021  ;;  %v5250_v49 = vmul.f32 1.442695, %v5124_v63  ;;  %v5252_v24 = vmul.f32 1.442695, %v5125_v3 }
 0xd15   : > { %13254 = vst [vmem:[#allocation30_spill] sm:$0xff] %v11636_v19  ;;  %v11640_v45 = vpop.eup %7023 }
 0xd16   : > { %13255 = vst [vmem:[#allocation19_spill] sm:$0xff] %v11640_v45  ;;  %5291 = vadd.xlane.f32.xlu1 %v5290_v28  ;;  %v5344_v15 = vadd.f32 %v11640_v45, %v11636_v19  ;;  %7025 = vpow2.f32 %v5250_v49  ;;  %v5082_v28 = vsub.f32 %v11438_v20, %v11574_v31 }
 0xd17   : > { %7027 = vpow2.f32 %v5252_v24 }
 0xd18   : > { %5345 = vadd.xlane.f32.xlu2 %v5344_v15  ;;  %7029 = vpow2.f32 %v5170_v4  ;;  %v5083_v15 = vsub.f32 %v11440_v27, %v11574_v31  ;;  %v5029_v31 = vmax.f32 %v11506_v54, %v11508_v18 }
 0xd19   : > { %v5055_v12 = vpop.xlane.xlu1 %5054  ;;  %7031 = vpow2.f32 %v5172_v8 }
 0xd1a   : > { %v5120_v16 = vsub.f32 %v11546_v60, %v5055_v12  ;;  %v5121_v35 = vsub.f32 %v11548_v46, %v5055_v12  ;;  %v5168_v20 = vmul.f32 1.442695, %v5083_v15 }
 0xd1c   : > { %v5242_v43 = vmul.f32 1.442695, %v5120_v16  ;;  %v5244_v29 = vmul.f32 1.442695, %v5121_v35  ;;  %v11648_v63 = vpop.eup %7025 }
 0xd1d   : > { %13256 = vst [vmem:[#allocation9_spill] sm:$0xff] %v11648_v63  ;;  %v11650_v3 = vpop.eup %7027 }
 0xd1e   : > { %7033 = vpow2.f32 %v5242_v43  ;;  %5033 = vmax.xlane.f32.xlu1 %v5032_v9  ;;  %13257 = vst [vmem:[#allocation31_spill] sm:$0xff] %v11650_v3  ;;  %v11652_v22 = vpop.eup %7029  ;;  %v5347_v60 = vadd.f32 %v11650_v3, %v11648_v63  ;;  %v5166_v43 = vmul.f32 1.442695, %v5082_v28 }
 0xd1f   : > { %7035 = vpow2.f32 %v5244_v29  ;;  %v11656_v49 = vpop.eup %7031 }
 0xd20   : > { %5348 = vadd.xlane.f32.xlu2 %v5347_v60  ;;  %v5287_v35 = vadd.f32 %v11656_v49, %v11652_v22 }
 0xd21   : > { %v4980_v46 = vpop.xlane.xlu1 %4979 }
 0xd22   : > { %v5070_v24 = vsub.f32 %v11396_v14, %v4980_v46  ;;  %v5071_v4 = vsub.f32 %v11398_v13, %v4980_v46 }
 0xd24   : > { %v11664_v8 = vpop.eup %7033  ;;  %v5142_v12 = vmul.f32 1.442695, %v5070_v24  ;;  %v5144_v16 = vmul.f32 1.442695, %v5071_v4  ;;  %v5080_v4 = vsub.f32 %v11430_v23, %v11568_v37 }
 0xd25   : > { %13258 = vst [vmem:[#allocation37_spill] sm:$0xff] %v11664_v8  ;;  %v11668_v9 = vpop.eup %7035 }
 0xd26   : > { %13259 = vst [vmem:[#allocation40_spill] sm:$0xff] %v11668_v9  ;;  %7037 = vpow2.f32 %v5142_v12  ;;  %5288 = vadd.xlane.f32.xlu1 %v5287_v35  ;;  %v5341_v14 = vadd.f32 %v11668_v9, %v11664_v8 }
 0xd27   : > { %7039 = vpow2.f32 %v5144_v16  ;;  %v5081_v16 = vsub.f32 %v11432_v42, %v11568_v37  ;;  %v5093_v37 = vsub.f32 %v11480_v7, %v11606_v55 }
 0xd28   : > { %7041 = vpow2.f32 %v5166_v43  ;;  %5342 = vadd.xlane.f32.xlu2 %v5341_v14 }
 0xd29   : > { %v11672_v13 = vpop.xlane.xlu1 %5051  ;;  %7043 = vpow2.f32 %v5168_v20  ;;  %v5162_v20 = vmul.f32 1.442695, %v5080_v4 }
 0xd2c   : > { %v11674_v27 = vpop.eup %7037 }
 0xd2d   : > { %v11678_v29 = vpop.eup %7039 }
 0xd2e   : > { %5030 = vmax.xlane.f32.xlu1 %v5029_v31  ;;  %v5266_v60 = vadd.f32 %v11678_v29, %v11674_v27  ;;  %v11682_v46 = vpop.eup %7041  ;;  %v5164_v31 = vmul.f32 1.442695, %v5081_v16 }
 0xd2f   : > { %v11684_v28 = vpop.eup %7043 }
 0xd30   : > { %5267 = vadd.xlane.f32.xlu0 %v5266_v60  ;;  %v5284_v14 = vadd.f32 %v11684_v28, %v11682_v46 }
 0xd31   : > { %v4977_v24 = vpop.xlane.xlu1 %4976 }
 0xd32   : > { %v5068_v15 = vsub.f32 %v11390_v33, %v4977_v24  ;;  %v5069_v12 = vsub.f32 %v11392_v21, %v4977_v24  ;;  %v5092_v33 = vsub.f32 %v11478_v6, %v11606_v55  ;;  %v5026_v24 = vmax.f32 %v11502_v53, %v11504_v52 }
 0xd34   : > { %v5138_v35 = vmul.f32 1.442695, %v5068_v15  ;;  %v5140_v43 = vmul.f32 1.442695, %v5069_v12  ;;  %v5186_v16 = vmul.f32 1.442695, %v5092_v33 }
 0xd36   : > { %7045 = vpow2.f32 %v5138_v35  ;;  %5285 = vadd.xlane.f32.xlu1 %v5284_v14 }
 0xd37   : > { %7047 = vpow2.f32 %v5140_v43 }
 0xd38   : > { %7049 = vpow2.f32 %v5162_v20 }
 0xd39   : > { %v5049_v60 = vpop.xlane.xlu1 %5048  ;;  %7051 = vpow2.f32 %v5164_v31  ;;  %v4989_v31 = vpop.xlane.xlu2 %4988 }
 0xd3a   : > { %v5116_v21 = vsub.f32 %v11538_v62, %v5049_v60  ;;  %v5117_v23 = vsub.f32 %v11540_v56, %v5049_v60  ;;  %v5188_v62 = vmul.f32 1.442695, %v5093_v37 }
 0xd3c   : > { %v11700_v42 = vpop.eup %7045  ;;  %v5234_v4 = vmul.f32 1.442695, %v5116_v21  ;;  %v5236_v15 = vmul.f32 1.442695, %v5117_v23  ;;  %v5076_v23 = vsub.f32 %v11414_v39, %v4989_v31  ;;  %v13262_v39 = vld [vmem:[#allocation36_spill] sm:$0xff] }
 0xd3d   : > { %v11704_v12 = vpop.eup %7047 }
 0xd3e   : > { %7053 = vpow2.f32 %v5234_v4  ;;  %5027 = vmax.xlane.f32.xlu1 %v5026_v24  ;;  %v5263_v6 = vadd.f32 %v11704_v12, %v11700_v42  ;;  %v11708_v56 = vpop.eup %7049  ;;  %v5077_v4 = vsub.f32 %v11416_v57, %v4989_v31  ;;  %v13263_v57 = vld [vmem:[#allocation32_spill] sm:$0xff] }
 0xd3f   : > { %7055 = vpow2.f32 %v5236_v15  ;;  %v11710_v7 = vpop.eup %7051  ;;  %v5075_v31 = vsub.f32 %v13263_v57, %v11614_v32 }
 0xd40   : > { %5264 = vadd.xlane.f32.xlu2 %v5263_v6  ;;  %7057 = vpow2.f32 %v5186_v16  ;;  %v5281_v43 = vadd.f32 %v11710_v7, %v11708_v56 }
 0xd41   : > { %v11712_v55 = vpop.xlane.xlu1 %4973  ;;  %7059 = vpow2.f32 %v5188_v62  ;;  %v5154_v62 = vmul.f32 1.442695, %v5076_v23  ;;  %v13265_v23 = vld [vmem:[#allocation44_spill] sm:$0xff] }
 0xd44   : > { %v11714_v35 = vpop.eup %7053 }
 0xd45   : > { %13260 = vst [vmem:[#allocation13_spill] sm:$0xff] %v11714_v35  ;;  %v11718_v14 = vpop.eup %7055 }
 0xd46   : > { %13261 = vst [vmem:[#allocation10_spill] sm:$0xff] %v11718_v14  ;;  %5282 = vadd.xlane.f32.xlu1 %v5281_v43  ;;  %v5335_v20 = vadd.f32 %v11718_v14, %v11714_v35  ;;  %v11722_v60 = vpop.eup %7057  ;;  %v5156_v43 = vmul.f32 1.442695, %v5077_v4  ;;  %v5074_v14 = vsub.f32 %v13262_v39, %v11614_v32 }
 0xd47   : > { %v11724_v33 = vpop.eup %7059 }
 0xd48   : > { %5336 = vadd.xlane.f32.xlu0 %v5335_v20  ;;  %v5299_v6 = vadd.f32 %v11724_v33, %v11722_v60 }
 0xd49   : > { %v5046_v21 = vpop.xlane.xlu1 %5045 }
 0xd4a   : > { %v5114_v37 = vsub.f32 %v11534_v61, %v5046_v21  ;;  %v5115_v24 = vsub.f32 %v11536_v41, %v5046_v21 }
 0xd4c   : > { %v5230_v15 = vmul.f32 1.442695, %v5114_v37  ;;  %v5232_v16 = vmul.f32 1.442695, %v5115_v24  ;;  %v13266_v37 = vld [vmem:[#allocation41_spill] sm:$0xff] }
 0xd4d   : > { %v5023_v24 = vmax.f32 %v13266_v37, %v13265_v23 }
 0xd4e   : > { %7061 = vpow2.f32 %v5230_v15  ;;  %5300 = vadd.xlane.f32.xlu1 %v5299_v6  ;;  %v5150_v6 = vmul.f32 1.442695, %v5074_v14  ;;  %v13268_v14 = vld [vmem:[#allocation8_spill] sm:$0xff] }
 0xd4f   : > { %7063 = vpow2.f32 %v5232_v16  ;;  %v5073_v39 = vsub.f32 %v13268_v14, %v11628_v40 }
 0xd50   : > { %7065 = vpow2.f32 %v5154_v62 }
 0xd51   : > { %v4971_v20 = vpop.xlane.xlu1 %4970  ;;  %7067 = vpow2.f32 %v5156_v43 }
 0xd52   : > { %v5064_v61 = vsub.f32 %v11378_v25, %v4971_v20  ;;  %v5065_v41 = vsub.f32 %v11380_v34, %v4971_v20  ;;  %v5152_v34 = vmul.f32 1.442695, %v5075_v31  ;;  %v5072_v20 = vsub.f32 %v11402_v58, %v11628_v40 }
 0xd53   : > { %v5118_v40 = vsub.f32 %v11542_v48, %v11672_v13 }
 0xd54   : > { %v11738_v21 = vpop.eup %7061  ;;  %v5130_v4 = vmul.f32 1.442695, %v5064_v61  ;;  %v5132_v15 = vmul.f32 1.442695, %v5065_v41  ;;  %v5146_v31 = vmul.f32 1.442695, %v5072_v20 }
 0xd55   : > { %13264 = vst [vmem:[#allocation16_spill] sm:$0xff] %v11738_v21  ;;  %v11742_v16 = vpop.eup %7063  ;;  %v5238_v20 = vmul.f32 1.442695, %v5118_v40 }
 0xd56   : > { %13267 = vst [vmem:[#allocation11_spill] sm:$0xff] %v11742_v16  ;;  %7069 = vpow2.f32 %v5130_v4  ;;  %5024 = vmax.xlane.f32.xlu1 %v5023_v24  ;;  %v5332_v25 = vadd.f32 %v11742_v16, %v11738_v21  ;;  %v11746_v62 = vpop.eup %7065  ;;  %v5148_v4 = vmul.f32 1.442695, %v5073_v39 }
 0xd57   : > { %7071 = vpow2.f32 %v5132_v15  ;;  %v11748_v32 = vpop.eup %7067 }
 0xd58   : > { %5333 = vadd.xlane.f32.xlu2 %v5332_v25  ;;  %7073 = vpow2.f32 %v5150_v6  ;;  %v5275_v41 = vadd.f32 %v11748_v32, %v11746_v62  ;;  %v5119_v25 = vsub.f32 %v11544_v47, %v11672_v13  ;;  %v13269_v47 = vld [vmem:[#allocation17_spill] sm:$0xff] }
 0xd59   : > { %v5043_v43 = vpop.xlane.xlu1 %5042  ;;  %7075 = vpow2.f32 %v5152_v34  ;;  %v5067_v13 = vsub.f32 %v13269_v47, %v11712_v55 }
 0xd5a   : > { %7077 = vpow2.f32 %v5146_v31  ;;  %v5240_v14 = vmul.f32 1.442695, %v5119_v25  ;;  %v5066_v31 = vsub.f32 %v11384_v17, %v11712_v55 }
 0xd5b   : > { %7079 = vpow2.f32 %v5148_v4 }
 0xd5c   : > { %v11754_v61 = vpop.eup %7069  ;;  %7081 = vpow2.f32 %v5238_v20  ;;  %v5134_v16 = vmul.f32 1.442695, %v5066_v31  ;;  %v5136_v20 = vmul.f32 1.442695, %v5067_v13 }
 0xd5d   : > { %v11758_v57 = vpop.eup %7071  ;;  %7083 = vpow2.f32 %v5240_v14 }
 0xd5e   : > { %5276 = vadd.xlane.f32.xlu1 %v5275_v41  ;;  %v5257_v24 = vadd.f32 %v11758_v57, %v11754_v61  ;;  %v11762_v15 = vpop.eup %7073 }
 0xd5f   : > { %v11764_v58 = vpop.eup %7075 }
 0xd60   : > { %5258 = vadd.xlane.f32.xlu0 %v5257_v24  ;;  %v5272_v34 = vadd.f32 %v11764_v58, %v11762_v15  ;;  %v11774_v39 = vpop.eup %7077 }
 0xd61   : > { %v11766_v6 = vpop.xlane.xlu1 %5297  ;;  %v11776_v41 = vpop.eup %7079 }
 0xd62   : > { %v5269_v25 = vadd.f32 %v11776_v41, %v11774_v39  ;;  %v11786_v21 = vpop.eup %7081  ;;  %v5571_v35 = vand.u32 2147483648, %v11766_v6  ;;  %vm5565_vm11 = vweird.f32 %v11766_v6 }
 0xd63   : > { %13270 = vst [vmem:[#allocation45_spill] sm:$0xff] %v11786_v21  ;;  %v11788_v17 = vpop.eup %7083 }
 0xd64   : > { %13271 = vst [vmem:[#allocation46_spill] sm:$0xff] %v11788_v17  ;;  %v5338_v47 = vadd.f32 %v11788_v17, %v11786_v21 }
 0xd66   : > { %5273 = vadd.xlane.f32.xlu1 %v5272_v34 }
 0xd69   : > { %v4968_v24 = vpop.xlane.xlu1 %4967 }
 0xd6a   : > { %v5062_v48 = vsub.f32 %v11372_v51, %v4968_v24  ;;  %v5063_v4 = vsub.f32 %v11374_v44, %v4968_v24  ;;  %v5112_v44 = vsub.f32 %v11530_v30, %v5043_v43  ;;  %v5113_v24 = vsub.f32 %v11532_v38, %v5043_v43 }
 0xd6c   : > { %v5126_v40 = vmul.f32 1.442695, %v5062_v48  ;;  %v5128_v34 = vmul.f32 1.442695, %v5063_v4  ;;  %v5228_v30 = vmul.f32 1.442695, %v5113_v24 }
 0xd6e   : > { %7085 = vpow2.f32 %v5126_v40  ;;  %5270 = vadd.xlane.f32.xlu1 %v5269_v25  ;;  %v5226_v40 = vmul.f32 1.442695, %v5112_v44 }
 0xd6f   : > { %7087 = vpow2.f32 %v5128_v34 }
 0xd70   : > { %7089 = vpow2.f32 %v5134_v16 }
 0xd71   : > { %v5040_v51 = vpop.xlane.xlu1 %5039  ;;  %7091 = vpow2.f32 %v5136_v20 }
 0xd72   : > { %v5110_v55 = vsub.f32 %v11520_v0, %v5040_v51  ;;  %v5111_v14 = vsub.f32 %v11522_v36, %v5040_v51 }
 0xd74   : > { %v11794_v31 = vpop.eup %7085  ;;  %v5222_v48 = vmul.f32 1.442695, %v5110_v55  ;;  %v5224_v4 = vmul.f32 1.442695, %v5111_v14 }
 0xd75   : > { %v11798_v13 = vpop.eup %7087 }
 0xd76   : > { %7093 = vpow2.f32 %v5222_v48  ;;  %5339 = vadd.xlane.f32.xlu1 %v5338_v47  ;;  %v5254_v0 = vadd.f32 %v11798_v13, %v11794_v31  ;;  %v11802_v36 = vpop.eup %7089 }
 0xd77   : > { %7095 = vpow2.f32 %v5224_v4  ;;  %v11804_v38 = vpop.eup %7091 }
 0xd78   : > { %5255 = vadd.xlane.f32.xlu2 %v5254_v0  ;;  %7097 = vpow2.f32 %v5226_v40  ;;  %v5260_v34 = vadd.f32 %v11804_v38, %v11802_v36 }
 0xd79   : > { %v11806_v16 = vpop.xlane.xlu1 %5294  ;;  %7099 = vpow2.f32 %v5228_v30 }
 0xd7a   : > { %vm5550_vm15 = vweird.f32 %v11806_v16 }
 0xd7c   : > { %v11808_v43 = vpop.eup %7093 }
 0xd7d   : > { %13272 = vst [vmem:[#allocation33_spill] sm:$0xff] %v11808_v43  ;;  %v11812_v25 = vpop.eup %7095 }
 0xd7e   : > { %13273 = vst [vmem:[#allocation26_spill] sm:$0xff] %v11812_v25  ;;  %5261 = vadd.xlane.f32.xlu1 %v5260_v34  ;;  %v5326_v20 = vadd.f32 %v11812_v25, %v11808_v43  ;;  %v11816_v51 = vpop.eup %7097 }
 0xd7f   : > { %13274 = vst [vmem:[#allocation27_spill] sm:$0xff] %v11816_v51  ;;  %v11818_v44 = vpop.eup %7099 }
 0xd80   : > { %5327 = vadd.xlane.f32.xlu0 %v5326_v20  ;;  %13275 = vst [vmem:[#allocation21_spill] sm:$0xff] %v11818_v44  ;;  %v5329_v47 = vadd.f32 %v11818_v44, %v11816_v51 }
 0xd81   : > { %v5037_v55 = vpop.xlane.xlu1 %5036 }
 0xd82   : > { %v5108_v14 = vsub.f32 %v11516_v2, %v5037_v55  ;;  %v5109_v24 = vsub.f32 %v11518_v26, %v5037_v55 }
 0xd84   : > { %v5218_v48 = vmul.f32 1.442695, %v5108_v14  ;;  %v5220_v4 = vmul.f32 1.442695, %v5109_v24 }
 0xd86   : > { %7101 = vpow2.f32 %v5218_v48  ;;  %5330 = vadd.xlane.f32.xlu1 %v5329_v47 }
 0xd87   : > { %7103 = vpow2.f32 %v5220_v4 }
 0xd89   : > { %v11824_v40 = vpop.xlane.xlu1 %5291 }
 0xd8a   : > { %vm5535_vm7 = vweird.f32 %v11824_v40 }
 0xd8c   : > { %v11826_v0 = vpop.eup %7101 }
 0xd8d   : > { %13276 = vst [vmem:[#allocation28_spill] sm:$0xff] %v11826_v0  ;;  %v11828_v30 = vpop.eup %7103 }
 0xd8e   : > { %13277 = vst [vmem:[#allocation23_spill] sm:$0xff] %v11828_v30  ;;  %v5323_v34 = vadd.f32 %v11828_v30, %v11826_v0 }
 0xd90   : > { %5324 = vadd.xlane.f32.xlu1 %v5323_v34  ;;  %v5022_v34 = vpop.xlane.xlu0 %5021 }
 0xd91   : > { %v5034_v2 = vpop.xlane.xlu1 %5033 }
 0xd92   : > { %v5106_v26 = vsub.f32 %v11510_v59, %v5034_v2  ;;  %v5107_v20 = vsub.f32 %v11512_v50, %v5034_v2  ;;  %v13280_v2 = vld [vmem:[#allocation15_spill] sm:$0xff] }
 0xd94   : > { %v5214_v55 = vmul.f32 1.442695, %v5106_v26  ;;  %v5216_v14 = vmul.f32 1.442695, %v5107_v20  ;;  %v5098_v26 = vsub.f32 %v13280_v2, %v5022_v34 }
 0xd96   : > { %7105 = vpow2.f32 %v5214_v55  ;;  %v5198_v25 = vmul.f32 1.442695, %v5098_v26 }
 0xd97   : > { %7107 = vpow2.f32 %v5216_v14  ;;  %v13281_v14 = vld [vmem:[#allocation42_spill] sm:$0xff] }
 0xd98   : > { %v5099_v0 = vsub.f32 %v13281_v14, %v5022_v34 }
 0xd99   : > { %v11834_v24 = vpop.xlane.xlu1 %5288 }
 0xd9a   : > { %v5200_v43 = vmul.f32 1.442695, %v5099_v0 }
 0xd9c   : > { %v11836_v48 = vpop.eup %7105 }
 0xd9d   : > { %13278 = vst [vmem:[#allocation34_spill] sm:$0xff] %v11836_v48  ;;  %v11838_v4 = vpop.eup %7107 }
 0xd9e   : > { %13279 = vst [vmem:[#allocation29_spill] sm:$0xff] %v11838_v4  ;;  %v5320_v47 = vadd.f32 %v11838_v4, %v11836_v48 }
 0xda0   : > { %5321 = vadd.xlane.f32.xlu2 %v5320_v47 }
 0xda1   : > { %v5031_v30 = vpop.xlane.xlu1 %5030 }
 0xda2   : > { %v5104_v59 = vsub.f32 %v11506_v54, %v5031_v30  ;;  %v5105_v50 = vsub.f32 %v11508_v18, %v5031_v30  ;;  %v5019_v18 = vpop.xlane.xlu0 %5018 }
 0xda4   : > { %v5210_v20 = vmul.f32 1.442695, %v5104_v59  ;;  %v5212_v55 = vmul.f32 1.442695, %v5105_v50 }
 0xda6   : > { %7109 = vpow2.f32 %v5210_v20  ;;  %v13287_v20 = vld [vmem:[#allocation18_spill] sm:$0xff] }
 0xda7   : > { %7111 = vpow2.f32 %v5212_v55  ;;  %v5097_v55 = vsub.f32 %v13287_v20, %v5019_v18  ;;  %v13290_v20 = vld [vmem:[#allocation12_spill] sm:$0xff] }
 0xda8   : > { %7113 = vpow2.f32 %v5198_v25  ;;  %v13286_v25 = vld [vmem:[#allocation38_spill] sm:$0xff] }
 0xda9   : > { %v11846_v44 = vpop.xlane.xlu1 %5285  ;;  %7115 = vpow2.f32 %v5200_v43  ;;  %v5096_v2 = vsub.f32 %v13286_v25, %v5019_v18 }
 0xdaa   : > { %7117 = vrcp.f32 %v11766_v6  ;;  %v5016_v25 = vpop.xlane.xlu0 %5015 }
 0xdac   : > { %v11848_v4 = vpop.eup %7109 }
 0xdad   : > { %13282 = vst [vmem:[#allocation20_spill] sm:$0xff] %v11848_v4  ;;  %v11850_v47 = vpop.eup %7111 }
 0xdae   : > { %13283 = vst [vmem:[#allocation24_spill] sm:$0xff] %v11850_v47  ;;  %v5317_v54 = vadd.f32 %v11850_v47, %v11848_v4  ;;  %v11854_v59 = vpop.eup %7113  ;;  %v5194_v47 = vmul.f32 1.442695, %v5096_v2 }
 0xdaf   : > { %13284 = vst [vmem:[#allocation25_spill] sm:$0xff] %v11854_v59  ;;  %v11859_v50 = vpop.eup %7115 }
 0xdb0   : > { %5318 = vadd.xlane.f32.xlu0 %v5317_v54  ;;  %13285 = vst [vmem:[#allocation36_spill] sm:$0xff] %v11859_v50  ;;  %v5308_v14 = vadd.f32 %v11859_v50, %v11854_v59  ;;  %v11865_v54 = vpop.eup %7117 }
 0xdb1   : > { %v5028_v30 = vpop.xlane.xlu1 %5027  ;;  %vm5566_vm0 = vweird.f32 %v11865_v54 }
 0xdb2   : > { %v5102_v0 = vsub.f32 %v11502_v53, %v5028_v30  ;;  %v5103_v34 = vsub.f32 %v11504_v52, %v5028_v30  ;;  %v11867_v53 = vpop.xlane.xlu2 %5279  ;;  %v5196_v52 = vmul.f32 1.442695, %v5097_v55  ;;  %v5094_v55 = vsub.f32 %v13290_v20, %v5016_v25  ;;  %v13293_v20 = vld [vmem:[#allocation35_spill] sm:$0xff]  ;;  %vm11924_vm12 = vmor %vm5565_vm11, %vm5566_vm0 }
 0xdb3   : > { %vm5475_vm9 = vweird.f32 %v11867_v53 }
 0xdb4   : > { %v5206_v26 = vmul.f32 1.442695, %v5102_v0  ;;  %v5208_v43 = vmul.f32 1.442695, %v5103_v34  ;;  %v5561_v0 = vmul.f32 %v11865_v54, %v11766_v6  ;;  %v5190_v4 = vmul.f32 1.442695, %v5094_v55 }
 0xdb6   : > { %7119 = vpow2.f32 %v5206_v26 }
 0xdb7   : > { %7121 = vpow2.f32 %v5208_v43  ;;  %v5562_v43 = vsub.f32 1.0, %v5561_v0 }
 0xdb8   : > { %5309 = vadd.xlane.f32.xlu0 %v5308_v14  ;;  %7123 = vrcp.f32 %v11806_v16 }
 0xdb9   : > { %v11870_v30 = vpop.xlane.xlu1 %5282  ;;  %7125 = vpow2.f32 %v5194_v47  ;;  %v5563_v0 = vmul.f32 %v11865_v54, %v5562_v43 }
 0xdba   : > { %7127 = vpow2.f32 %v5196_v52  ;;  %v11885_v14 = vpop.xlane.xlu2 %5345 }
 0xdbb   : > { %7129 = vrcp.f32 %v11867_v53  ;;  %v5564_v17 = vadd.f32 %v11865_v54, %v5563_v0 }
 0xdbc   : > { %v11874_v18 = vpop.eup %7119  ;;  %7131 = vrcp.f32 %v11824_v40 }
 0xdbd   : > { %13288 = vst [vmem:[#allocation32_spill] sm:$0xff] %v11874_v18  ;;  %v11876_v34 = vpop.eup %7121 }
 0xdbe   : > { %13289 = vst [vmem:[#allocation44_spill] sm:$0xff] %v11876_v34  ;;  %v5314_v2 = vadd.f32 %v11876_v34, %v11874_v18  ;;  %v11881_v26 = vpop.eup %7123  ;;  %v5095_v18 = vsub.f32 %v13293_v20, %v5016_v25 }
 0xdbf   : > { %v11889_v50 = vpop.eup %7125  ;;  %v5546_v52 = vmul.f32 %v11881_v26, %v11806_v16  ;;  %vm5551_vm10 = vweird.f32 %v11881_v26 }
 0xdc0   : > { %5315 = vadd.xlane.f32.xlu1 %v5314_v2  ;;  %13291 = vst [vmem:[#allocation41_spill] sm:$0xff] %v11889_v50  ;;  %v11894_v59 = vpop.eup %7127  ;;  %v5192_v25 = vmul.f32 1.442695, %v5095_v18  ;;  %vm11958_vm4 = vmor %vm5550_vm15, %vm5551_vm10  ;;  %vm5505_vm15 = vweird.f32 %v11846_v44 }
 0xdc1   : > { %v11887_v47 = vpop.xlane.xlu1 %5300  ;;  %13292 = vst [vmem:[#allocation8_spill] sm:$0xff] %v11894_v59  ;;  %v11897_v34 = vpop.eup %7129  ;;  %v5547_v48 = vsub.f32 1.0, %v5546_v52  ;;  %v5305_v51 = vadd.f32 %v11894_v59, %v11889_v50 }
 0xdc2   : > { %7133 = vrcp.f32 %v11887_v47  ;;  %v11900_v2 = vpop.eup %7131  ;;  %v11910_v21 = vmul.f32 %v11897_v34, %v11867_v53  ;;  %v11929_v18 = vpop.xlane.xlu2 %5348  ;;  %vm5580_vm14 = vweird.f32 %v11887_v47  ;;  %vm5476_vm10 = vweird.f32 %v11897_v34 }
 0xdc3   : > { %7135 = vrcp.f32 %v11834_v24  ;;  %v5531_v9 = vmul.f32 %v11900_v2, %v11824_v40  ;;  %v5548_v20 = vmul.f32 %v11881_v26, %v5547_v48  ;;  %vm5536_vm6 = vweird.f32 %v11900_v2 }
 0xdc4   : > { %7137 = vrcp.f32 %v11846_v44  ;;  %vm11989_vm8 = vmor %vm5535_vm7, %vm5536_vm6 }
 0xdc5   : > { %7139 = vpow2.f32 %v5190_v4  ;;  %v5572_v4 = vor.u32 1.1754944e-38, %v5571_v35  ;;  %v5532_v48 = vsub.f32 1.0, %v5531_v9  ;;  %v5584_v35 = vand.u32 2147483647, %v11887_v47 }
 0xdc6   : > { %7141 = vrcp.f32 %v11870_v30  ;;  %v5549_v8 = vadd.f32 %v11881_v26, %v5548_v20 }
 0xdc7   : > { %vm5585_vm3 = vcmp.eq.f32.partialorder %v5584_v35, 8.507059e+37 }
 0xdc8   : > { %v7134_v43 = vpop.eup %7133  ;;  %5306 = vadd.xlane.f32.xlu1 %v5305_v51  ;;  %v5569_v51 = vand.u32 2147483647, %v11766_v6 }
 0xdc9   : > { %v5576_v55 = vmul.f32 %v7134_v43, %v11887_v47  ;;  %v5025_v52 = vpop.xlane.xlu1 %5024  ;;  %v11917_v0 = vpop.eup %7135  ;;  %vm5581_vm13 = vweird.f32 %v7134_v43 }
 0xdca   : > { %v5100_v59 = vsub.f32 %v13266_v37, %v5025_v52  ;;  %v5101_v50 = vsub.f32 %v13265_v23, %v5025_v52  ;;  %v5568_v37 = vsel %vm11924_vm12, %v11865_v54, %v5564_v17  ;;  %v5586_v23 = vand.u32 2147483648, %v11887_v47  ;;  %v11939_v6 = vpop.eup %7137  ;;  %vm5582_vm1 = vmor %vm5580_vm14, %vm5581_vm13 }
 0xdcb   : > { %v5577_v45 = vsub.f32 1.0, %v5576_v55  ;;  %v5516_v3 = vmul.f32 %v11917_v0, %v11834_v24  ;;  %v5556_v55 = vand.u32 2147483648, %v11806_v16  ;;  %v11944_v9 = vpop.eup %7139  ;;  %vm5570_vm2 = vcmp.eq.f32.partialorder %v5569_v51, 8.507059e+37 }
 0xdcc   : > { %v5202_v52 = vmul.f32 1.442695, %v5100_v59  ;;  %v5204_v19 = vmul.f32 1.442695, %v5101_v50  ;;  %v5533_v59 = vmul.f32 %v11900_v2, %v5532_v48  ;;  %v5587_v50 = vor.u32 1.1754944e-38, %v5586_v23  ;;  %v11950_v54 = vpop.eup %7141 }
 0xdcd   : > { %v5578_v63 = vmul.f32 %v7134_v43, %v5577_v45  ;;  %v5554_v45 = vand.u32 2147483647, %v11806_v16  ;;  %v5517_v20 = vsub.f32 1.0, %v5516_v3  ;;  %v5573_v48 = vsel %vm5570_vm2, %v5572_v4, %v5568_v37  ;;  %v11978_v37 = vpop.xlane.xlu2 %5342 }
 0xdce   : > { %7143 = vpow2.f32 %v5202_v52  ;;  %v5501_v52 = vmul.f32 %v11939_v6, %v11846_v44  ;;  %v5553_v3 = vsel %vm11958_vm4, %v11881_v26, %v5549_v8  ;;  %v5557_v51 = vor.u32 1.1754944e-38, %v5556_v55 }
 0xdcf   : > { %v5579_v17 = vadd.f32 %v7134_v43, %v5578_v63  ;;  %7145 = vpow2.f32 %v5204_v19  ;;  %vm5555_vm5 = vcmp.eq.f32.partialorder %v5554_v45, 8.507059e+37  ;;  %v5541_v26 = vand.u32 2147483648, %v11824_v40  ;;  %v13299_v19 = vld [vmem:[#allocation39_spill] sm:$0xff] }
 0xdd0   : > { %7147 = vpow2.f32 %v5192_v25  ;;  %v5534_v25 = vadd.f32 %v11900_v2, %v5533_v59  ;;  %v5558_v55 = vsel %vm5555_vm5, %v5557_v51, %v5553_v3  ;;  %v5539_v45 = vand.u32 2147483647, %v11824_v40  ;;  %vm12068_vm5 = vmor %vm5475_vm9, %vm5476_vm10 }
 0xdd1   : > { %v11954_v63 = vpop.xlane.xlu1 %5276  ;;  %v5583_v47 = vsel %vm5582_vm1, %v7134_v43, %v5579_v17  ;;  %v5486_v17 = vmul.f32 %v11950_v54, %v11870_v30  ;;  %v5481_v59 = vand.u32 2147483648, %v11867_v53  ;;  %v5472_v51 = vsub.f32 1.0, %v11910_v21 }
 0xdd2   : > { %v5588_v16 = vsel %vm5585_vm3, %v5587_v50, %v5583_v47  ;;  %7149 = vrcp.f32 %v11954_v63  ;;  %v13298_v50 = vld [vmem:[#allocation22_spill] sm:$0xff]  ;;  %vm5521_vm0 = vweird.f32 %v11917_v0  ;;  %vm5540_vm11 = vcmp.eq.f32.partialorder %v5539_v45, 8.507059e+37 }
 0xdd3   : > { %v5860_v23 = vmul.f32 %v11722_v60, %v5588_v16  ;;  %v5861_v35 = vmul.f32 %v11724_v33, %v5588_v16  ;;  %v5518_v60 = vmul.f32 %v11917_v0, %v5517_v20  ;;  %v5502_v33 = vsub.f32 1.0, %v5501_v52 }
 0xdd4   : > { %v11967_v43 = vpop.eup %7143  ;;  %v5858_v47 = vmul.f32 %v13298_v50, %v5573_v48  ;;  %v5859_v16 = vmul.f32 %v13299_v19, %v5573_v48  ;;  %v5487_v40 = vsub.f32 1.0, %v5486_v17  ;;  %v5538_v48 = vsel %vm11989_vm8, %v11900_v2, %v5534_v25 }
 0xdd5   : > { %v11974_v4 = vpop.eup %7145  ;;  %5894 = vmatpush.xpose.msra.mxu0 %v5860_v23  ;;  %5923 = vmatpush.xpose.msra.mxu1 %v5861_v35  ;;  %v11997_v23 = vpop.xlane.xlu0 %5267  ;;  %v5856_v35 = vmul.f32 %v11610_v10, %v5558_v55  ;;  %v5542_v50 = vor.u32 1.1754944e-38, %v5541_v26  ;;  %v5503_v19 = vmul.f32 %v11939_v6, %v5502_v33  ;;  %v5519_v21 = vadd.f32 %v11917_v0, %v5518_v60 }
 0xdd6   : > { %v5311_v8 = vadd.f32 %v11974_v4, %v11967_v43  ;;  %v11994_v3 = vpop.eup %7147  ;;  %v5526_v10 = vand.u32 2147483648, %v11834_v24  ;;  %v5857_v2 = vmul.f32 %v11612_v5, %v5558_v55  ;;  %vm5520_vm12 = vweird.f32 %v11834_v24  ;;  %v12024_v5 = vpop.xlane.xlu2 %5264 }
 0xdd7   : > { %v5543_v25 = vsel %vm5540_vm11, %v5542_v50, %v5538_v48  ;;  %v5524_v26 = vand.u32 2147483647, %v11834_v24  ;;  %v5473_v60 = vmul.f32 %v11897_v34, %v5472_v51  ;;  %v5482_v33 = vor.u32 1.1754944e-38, %v5481_v59  ;;  %vm12019_vm13 = vmor %vm5520_vm12, %vm5521_vm0 }
 0xdd8   : > { %5312 = vadd.xlane.f32.xlu2 %v5311_v8  ;;  %v12009_v17 = vpop.eup %7149  ;;  %v5488_v8 = vmul.f32 %v11950_v54, %v5487_v40  ;;  %v5523_v24 = vsel %vm12019_vm13, %v11917_v0, %v5519_v21  ;;  %v5504_v45 = vadd.f32 %v11939_v6, %v5503_v19  ;;  %vm5506_vm14 = vweird.f32 %v11939_v6 }
 0xdd9   : > { %5895 = vmatpush.xpose.msra.mxu0 %v5858_v47  ;;  %5924 = vmatpush.xpose.msra.mxu1 %v5859_v16  ;;  %v12005_v52 = vpop.xlane.xlu1 %5273  ;;  %v5456_v55 = vmul.f32 %v12009_v17, %v11954_v63  ;;  %v5527_v59 = vor.u32 1.1754944e-38, %v5526_v10  ;;  %v5511_v16 = vand.u32 2147483648, %v11846_v44  ;;  %v5302_v20 = vadd.f32 %v11994_v3, %v11944_v9  ;;  %vm12044_vm2 = vmor %vm5505_vm15, %vm5506_vm14 }
 0xdda   : > { %7151 = vrcp.f32 %v12005_v52  ;;  %v5854_v51 = vmul.f32 %v11624_v11, %v5543_v25  ;;  %v5855_v40 = vmul.f32 %v11626_v1, %v5543_v25  ;;  %vm5525_vm1 = vcmp.eq.f32.partialorder %v5524_v26, 8.507059e+37 }
 0xddb   : > { %7153 = vrcp.f32 %v11997_v23  ;;  %v5528_v50 = vsel %vm5525_vm1, %v5527_v59, %v5523_v24  ;;  %v5489_v21 = vadd.f32 %v11950_v54, %v5488_v8  ;;  %vm5491_vm3 = vweird.f32 %v11950_v54 }
 0xddc   : > { %v5474_v11 = vadd.f32 %v11897_v34, %v5473_v60  ;;  %v5457_v10 = vsub.f32 1.0, %v5456_v55  ;;  %v5508_v26 = vsel %vm12044_vm2, %v11939_v6, %v5504_v45  ;;  %v5512_v8 = vor.u32 1.1754944e-38, %v5511_v16 }
 0xddd   : > { %5896 = vmatpush.xpose.msra.mxu0 %v5856_v35  ;;  %5925 = vmatpush.xpose.msra.mxu1 %v5857_v2  ;;  %v5509_v35 = vand.u32 2147483647, %v11846_v44  ;;  %v12042_v48 = vpop.xlane.xlu0 %5336  ;;  %v5496_v44 = vand.u32 2147483648, %v11870_v30  ;;  %vm5490_vm4 = vweird.f32 %v11870_v30  ;;  %v5494_v60 = vand.u32 2147483647, %v11870_v30 }
 0xdde   : > { %v5852_v55 = vmul.f32 %v11652_v22, %v5528_v50  ;;  %v5853_v6 = vmul.f32 %v11656_v49, %v5528_v50  ;;  %vm12077_vm7 = vmor %vm5490_vm4, %vm5491_vm3  ;;  %v5478_v22 = vsel %vm12068_vm5, %v11897_v34, %v5474_v11  ;;  %v12090_v16 = vpop.xlane.xlu2 %5333  ;;  %vm5461_vm0 = vweird.f32 %v12009_v17 }
 0xddf   : > { %vm5510_vm6 = vcmp.eq.f32.partialorder %v5509_v35, 8.507059e+37  ;;  %v5493_v59 = vsel %vm12077_vm7, %v11950_v54, %v5489_v21  ;;  %v5497_v49 = vor.u32 1.1754944e-38, %v5496_v44  ;;  %vm5495_vm8 = vcmp.eq.f32.partialorder %v5494_v60, 8.507059e+37 }
 0xde0   : > { %v12040_v0 = vpop.eup %7151  ;;  %5303 = vadd.xlane.f32.xlu2 %v5302_v20  ;;  %v5513_v45 = vsel %vm5510_vm6, %v5512_v8, %v5508_v26  ;;  %v5458_v20 = vmul.f32 %v12009_v17, %v5457_v10  ;;  %v13311_v8 = vld [vmem:[#allocation43_spill] sm:$0xff]  ;;  %vm5460_vm11 = vweird.f32 %v11954_v63  ;;  %vm5445_vm10 = vweird.f32 %v12005_v52 }
 0xde1   : > { %v12051_v1 = vpop.eup %7153  ;;  %v5441_v2 = vmul.f32 %v12040_v0, %v12005_v52  ;;  %5897 = vmatpush.xpose.msra.mxu0 %v5854_v51  ;;  %5926 = vmatpush.xpose.msra.mxu1 %v5855_v40  ;;  %v12056_v25 = vpop.xlane.xlu1 %5270  ;;  %v13310_v40 = vand.u32 2147483647, %v11867_v53  ;;  %v5850_v54 = vmul.f32 %v11682_v46, %v5513_v45  ;;  %v5851_v35 = vmul.f32 %v11684_v28, %v5513_v45  ;;  %vm12124_vm12 = vmor %vm5460_vm11, %vm5461_vm0 }
 0xde2   : > { %7155 = vrcp.f32 %v12056_v25  ;;  %v5411_v30 = vmul.f32 %v12051_v1, %v11997_v23  ;;  %v5498_v50 = vsel %vm5495_vm8, %v5497_v49, %v5493_v59  ;;  %v5459_v46 = vadd.f32 %v12009_v17, %v5458_v20 }
 0xde3   : > { %7157 = vrcp.f32 %v12024_v5  ;;  %v5442_v51 = vsub.f32 1.0, %v5441_v2  ;;  %vm5480_vm9 = vcmp.eq.f32.partialorder %v13310_v40, 8.507059e+37  ;;  %v5466_v28 = vand.u32 2147483648, %v11954_v63 }
 0xde4   : > { %7159 = vrcp.f32 %v11885_v14  ;;  %v5483_v34 = vsel %vm5480_vm9, %v5482_v33, %v5478_v22  ;;  %v5412_v21 = vsub.f32 1.0, %v5411_v30  ;;  %v5848_v33 = vmul.f32 %v11708_v56, %v5498_v50  ;;  %v13312_v30 = vld [vmem:[#allocation14_spill] sm:$0xff] }
 0xde5   : > { %5898 = vmatpush.xpose.msra.mxu0 %v5852_v55  ;;  %5927 = vmatpush.xpose.msra.mxu1 %v5853_v6  ;;  %v12099_v11 = vpop.xlane.xlu0 %5258  ;;  %v5443_v10 = vmul.f32 %v12040_v0, %v5442_v51  ;;  %v5849_v26 = vmul.f32 %v11710_v7, %v5498_v50  ;;  %v5846_v60 = vmul.f32 %v13311_v8, %v5483_v34  ;;  %v5464_v6 = vand.u32 2147483647, %v11954_v63 }
 0xde6   : > { %7161 = vrcp.f32 %v12099_v11  ;;  %v5413_v24 = vmul.f32 %v12051_v1, %v5412_v21  ;;  %v5847_v7 = vmul.f32 %v13312_v30, %v5483_v34  ;;  %v5463_v63 = vsel %vm12124_vm12, %v12009_v17, %v5459_v46 }
 0xde7   : > { %7163 = vrcp.f32 %v11929_v18  ;;  %v5444_v49 = vadd.f32 %v12040_v0, %v5443_v10  ;;  %vm5446_vm13 = vweird.f32 %v12040_v0  ;;  %v5467_v51 = vor.u32 1.1754944e-38, %v5466_v28 }
 0xde8   : > { %v12097_v19 = vpop.eup %7155  ;;  %v5451_v40 = vand.u32 2147483648, %v12005_v52  ;;  %vm5465_vm14 = vcmp.eq.f32.partialorder %v5464_v6, 8.507059e+37  ;;  %v5419_v17 = vand.u32 2147483647, %v11997_v23  ;;  %vm12146_vm15 = vmor %vm5445_vm10, %vm5446_vm13  ;;  %vm5416_vm1 = vweird.f32 %v12051_v1 }
 0xde9   : > { %v12101_v44 = vpop.eup %7157  ;;  %v5426_v2 = vmul.f32 %v12097_v19, %v12056_v25  ;;  %5899 = vmatpush.xpose.msra.mxu0 %v5850_v54  ;;  %5928 = vmatpush.xpose.msra.mxu1 %v5851_v35  ;;  %v12106_v53 = vpop.xlane.xlu1 %5339  ;;  %v5449_v54 = vand.u32 2147483647, %v12005_v52  ;;  %v5421_v35 = vand.u32 2147483648, %v11997_v23  ;;  %v5468_v34 = vsel %vm5465_vm14, %v5467_v51, %v5463_v63 }
 0xdea   : > { %v12114_v47 = vpop.eup %7159  ;;  %v5396_v56 = vmul.f32 %v12101_v44, %v12024_v5  ;;  %v5448_v52 = vsel %vm12146_vm15, %v12040_v0, %v5444_v49  ;;  %vm5431_vm2 = vweird.f32 %v12097_v19  ;;  %v5414_v28 = vadd.f32 %v12051_v1, %v5413_v24 }
 0xdeb   : > { %v5427_v55 = vsub.f32 1.0, %v5426_v2  ;;  %v12129_v22 = vpop.xlane.xlu2 %5255  ;;  %v12138_v20 = vmul.f32 %v12114_v47, %v11885_v14  ;;  %v5436_v8 = vand.u32 2147483648, %v12056_v25  ;;  %vm5450_vm3 = vcmp.eq.f32.partialorder %v5449_v54, 8.507059e+37 }
 0xdec   : > { %v5397_v50 = vsub.f32 1.0, %v5396_v56  ;;  %7165 = vrcp.f32 %v12129_v22  ;;  %v12151_v10 = vpop.eup %7161  ;;  %vm5430_vm4 = vweird.f32 %v12056_v25  ;;  %v5845_v0 = vmul.f32 %v11748_v32, %v5468_v34 }
 0xded   : > { %v5428_v59 = vmul.f32 %v12097_v19, %v5427_v55  ;;  %5900 = vmatpush.xpose.msra.mxu0 %v5848_v33  ;;  %5929 = vmatpush.xpose.msra.mxu1 %v5849_v26  ;;  %v12161_v33 = vpop.eup %7163  ;;  %v5452_v26 = vor.u32 1.1754944e-38, %v5451_v40  ;;  %v5434_v55 = vand.u32 2147483647, %v12056_v25  ;;  %vm5415_vm5 = vweird.f32 %v11997_v23  ;;  %vm12175_vm6 = vmor %vm5430_vm4, %vm5431_vm2 }
 0xdee   : > { %v5398_v6 = vmul.f32 %v12101_v44, %v5397_v50  ;;  %v5366_v24 = vmul.f32 %v12151_v10, %v12099_v11  ;;  %vm12186_vm7 = vmor %vm5415_vm5, %vm5416_vm1  ;;  %v5422_v45 = vor.u32 1.1754944e-38, %v5421_v35  ;;  %vm5420_vm9 = vcmp.eq.f32.partialorder %v5419_v17, 8.507059e+37 }
 0xdef   : > { %v5429_v46 = vadd.f32 %v12097_v19, %v5428_v59  ;;  %v5453_v56 = vsel %vm5450_vm3, %v5452_v26, %v5448_v52  ;;  %v5437_v59 = vor.u32 1.1754944e-38, %v5436_v8  ;;  %v5418_v63 = vsel %vm12186_vm7, %v12051_v1, %v5414_v28 }
 0xdf0   : > { %v5842_v49 = vmul.f32 %v11762_v15, %v5453_v56  ;;  %vm5435_vm8 = vcmp.eq.f32.partialorder %v5434_v55, 8.507059e+37  ;;  %v5367_v51 = vsub.f32 1.0, %v5366_v24  ;;  %v5399_v54 = vadd.f32 %v12101_v44, %v5398_v6 }
 0xdf1   : > { %v12153_v2 = vpop.xlane.xlu1 %5261  ;;  %5901 = vmatpush.xpose.msra.mxu0 %v5846_v60  ;;  %5930 = vmatpush.xpose.msra.mxu1 %v5847_v7  ;;  %v5844_v60 = vmul.f32 %v11746_v62, %v5468_v34  ;;  %v5802_v62 = vsub.f32 1.0, %v12138_v20  ;;  %v5433_v32 = vsel %vm12175_vm6, %v12097_v19, %v5429_v46  ;;  %v5816_v7 = vmul.f32 %v12161_v33, %v11929_v18 }
 0xdf2   : > { %7167 = vrcp.f32 %v12153_v2  ;;  %v12190_v25 = vpop.eup %7165  ;;  %v5843_v19 = vmul.f32 %v11764_v58, %v5453_v56  ;;  %v5438_v40 = vsel %vm5435_vm8, %v5437_v59, %v5433_v32  ;;  %vm5401_vm0 = vweird.f32 %v12101_v44 }
 0xdf3   : > { %7169 = vrcp.f32 %v11978_v37  ;;  %v5811_v35 = vand.u32 2147483648, %v11885_v14  ;;  %v5351_v50 = vmul.f32 %v12190_v25, %v12129_v22  ;;  %v5423_v58 = vsel %vm5420_vm9, %v5422_v45, %v5418_v63 }
 0xdf4   : > { %vm5400_vm11 = vweird.f32 %v12024_v5  ;;  %v5406_v1 = vand.u32 2147483648, %v12024_v5  ;;  %v5404_v17 = vand.u32 2147483647, %v12024_v5  ;;  %v5809_v34 = vand.u32 2147483647, %v11885_v14 }
 0xdf5   : > { %5902 = vmatpush.xpose.msra.mxu0 %v5844_v60  ;;  %5931 = vmatpush.xpose.msra.mxu1 %v5845_v0  ;;  %v5803_v52 = vmul.f32 %v12114_v47, %v5802_v62  ;;  %v5840_v28 = vmul.f32 %v11774_v39, %v5438_v40  ;;  %v5841_v26 = vmul.f32 %v11776_v41, %v5438_v40  ;;  %vm12219_vm12 = vmor %vm5400_vm11, %vm5401_vm0  ;;  %v5817_v60 = vsub.f32 1.0, %v5816_v7 }
 0xdf6   : > { %v5368_v5 = vmul.f32 %v12151_v10, %v5367_v51  ;;  %v5838_v0 = vmul.f32 %v11674_v27, %v5423_v58  ;;  %v5403_v55 = vsel %vm12219_vm12, %v12101_v44, %v5399_v54  ;;  %7171 = vrcp.f32 %v12106_v53 }
 0xdf7   : > { %v5352_v39 = vsub.f32 1.0, %v5351_v50  ;;  %v5407_v6 = vor.u32 1.1754944e-38, %v5406_v1  ;;  %v5391_v24 = vand.u32 2147483648, %v12153_v2  ;;  %v5839_v56 = vmul.f32 %v11678_v29, %v5423_v58 }
 0xdf8   : > { %v12199_v20 = vpop.eup %7167  ;;  %vm5405_vm10 = vcmp.eq.f32.partialorder %v5404_v17, 8.507059e+37  ;;  %7173 = vrcp.f32 %v12042_v48  ;;  %vm5385_vm14 = vweird.f32 %v12153_v2  ;;  %v5389_v44 = vand.u32 2147483647, %v12153_v2 }
 0xdf9   : > { %v5381_v15 = vmul.f32 %v12199_v20, %v12153_v2  ;;  %5903 = vmatpush.xpose.msra.mxu0 %v5842_v49  ;;  %5932 = vmatpush.xpose.msra.mxu1 %v5843_v19  ;;  %v12212_v21 = vpop.eup %7169  ;;  %vm5386_vm13 = vweird.f32 %v12199_v20  ;;  %vm5806_vm15 = vweird.f32 %v12114_v47  ;;  %v5818_v30 = vmul.f32 %v12161_v33, %v5817_v60  ;;  %v12266_v50 = vpop.xlane.xlu1 %5330 }
 0xdfa   : > { %v5826_v62 = vand.u32 2147483648, %v11929_v18  ;;  %v5786_v32 = vmul.f32 %v12212_v21, %v11978_v37  ;;  %v5408_v23 = vsel %vm5405_vm10, %v5407_v6, %v5403_v55  ;;  %vm12242_vm1 = vmor %vm5385_vm14, %vm5386_vm13  ;;  %vm5805_vm2 = vweird.f32 %v11885_v14 }
 0xdfb   : > { %v5382_v46 = vsub.f32 1.0, %v5381_v15  ;;  %v5353_v7 = vmul.f32 %v12190_v25, %v5352_v39  ;;  %v5369_v45 = vadd.f32 %v12151_v10, %v5368_v5  ;;  %vm5371_vm3 = vweird.f32 %v12151_v10  ;;  %vm12320_vm10 = vmor %vm5805_vm2, %vm5806_vm15 }
 0xdfc   : > { %v5376_v59 = vand.u32 2147483648, %v12099_v11  ;;  %v5392_v63 = vor.u32 1.1754944e-38, %v5391_v24  ;;  %v5374_v49 = vand.u32 2147483647, %v12099_v11  ;;  %v12256_v19 = vadd.f32 %v12114_v47, %v5803_v52  ;;  %v12258_v51 = vpop.eup %7171 }
 0xdfd   : > { %v5383_v41 = vmul.f32 %v12199_v20, %v5382_v46  ;;  %5904 = vmatpush.xpose.msra.mxu0 %v5840_v28  ;;  %5933 = vmatpush.xpose.msra.mxu1 %v5841_v26  ;;  %vm5370_vm4 = vweird.f32 %v12099_v11  ;;  %v5836_v40 = vmul.f32 %v11700_v42, %v5408_v23  ;;  %vm5390_vm5 = vcmp.eq.f32.partialorder %v5389_v44, 8.507059e+37 }
 0xdfe   : > { %v5819_v54 = vadd.f32 %v12161_v33, %v5818_v30  ;;  %vm5821_vm6 = vweird.f32 %v12161_v33  ;;  %7175 = vrcp.f32 %v12090_v16  ;;  %vm12270_vm7 = vmor %vm5370_vm4, %vm5371_vm3  ;;  %v12274_v11 = vpop.eup %7173  ;;  %v5787_v42 = vsub.f32 1.0, %v5786_v32 }
 0xdff   : > { %v5384_v27 = vadd.f32 %v12199_v20, %v5383_v41  ;;  %v5354_v1 = vadd.f32 %v12190_v25, %v5353_v7  ;;  %vm5356_vm8 = vweird.f32 %v12190_v25  ;;  %v5377_v17 = vor.u32 1.1754944e-38, %v5376_v59  ;;  %v13333_v59 = vld [vmem:[#allocation9_spill] sm:$0xff] }
 0xe00   : > { %v5771_v52 = vmul.f32 %v12258_v51, %v12106_v53  ;;  %v5361_v46 = vand.u32 2147483648, %v12129_v22  ;;  %vm5375_vm9 = vcmp.eq.f32.partialorder %v5374_v49, 8.507059e+37  ;;  %vm5355_vm0 = vweird.f32 %v12129_v22  ;;  %v13334_v49 = vld [vmem:[#allocation31_spill] sm:$0xff] }
 0xe01   : > { %5905 = vmatpush.xpose.msra.mxu0 %v5838_v0  ;;  %5934 = vmatpush.xpose.msra.mxu1 %v5839_v56  ;;  %v5388_v2 = vsel %vm12242_vm1, %v12199_v20, %v5384_v27  ;;  %v5837_v20 = vmul.f32 %v11704_v12, %v5408_v23  ;;  %v5373_v12 = vsel %vm12270_vm7, %v12151_v10, %v5369_v45  ;;  %v5359_v8 = vand.u32 2147483647, %v12129_v22  ;;  %vm12292_vm12 = vmor %vm5355_vm0, %vm5356_vm8  ;;  %v12304_v22 = vpop.xlane.xlu0 %5327 }
 0xe02   : > { %v5393_v15 = vsel %vm5390_vm5, %v5392_v63, %v5388_v2  ;;  %vm5820_vm11 = vweird.f32 %v11929_v18  ;;  %v5824_v10 = vand.u32 2147483647, %v11929_v18  ;;  %v5756_v60 = vmul.f32 %v12274_v11, %v12042_v48 }
 0xe03   : > { %v5834_v28 = vmul.f32 %v11802_v36, %v5393_v15  ;;  %v5835_v26 = vmul.f32 %v11804_v38, %v5393_v15  ;;  %v5378_v5 = vsel %vm5375_vm9, %v5377_v17, %v5373_v12  ;;  %v5812_v55 = vor.u32 1.1754944e-38, %v5811_v35  ;;  %vm12300_vm13 = vmor %vm5820_vm11, %vm5821_vm6  ;;  %v13338_v17 = vld [vmem:[#allocation19_spill] sm:$0xff]  ;;  %v13356_v36 = vld [vmem:[#allocation21_spill] sm:$0xff] }
 0xe04   : > { %v5827_v38 = vor.u32 1.1754944e-38, %v5826_v62  ;;  %7177 = vrcp.f32 %v12266_v50  ;;  %v5358_v18 = vsel %vm12292_vm12, %v12190_v25, %v5354_v1  ;;  %v12310_v39 = vpop.eup %7175  ;;  %v5788_v35 = vmul.f32 %v12212_v21, %v5787_v42 }
 0xe05   : > { %5906 = vmatpush.xpose.msra.mxu0 %v5836_v40  ;;  %5935 = vmatpush.xpose.msra.mxu1 %v5837_v20  ;;  %v5772_v41 = vsub.f32 1.0, %v5771_v52  ;;  %v5362_v6 = vor.u32 1.1754944e-38, %v5361_v46  ;;  %v5823_v24 = vsel %vm12300_vm13, %v12161_v33, %v5819_v54  ;;  %v5832_v25 = vmul.f32 %v11754_v61, %v5378_v5  ;;  %v13335_v20 = vld [vmem:[#allocation30_spill] sm:$0xff] }
 0xe06   : > { %v5833_v27 = vmul.f32 %v11758_v57, %v5378_v5  ;;  %vm5360_vm14 = vcmp.eq.f32.partialorder %v5359_v8, 8.507059e+37  ;;  %v5808_v44 = vsel %vm12320_vm10, %v12114_v47, %v12256_v19  ;;  %vm5825_vm1 = vcmp.eq.f32.partialorder %v5824_v10, 8.507059e+37  ;;  %v12336_v57 = vpop.xlane.xlu1 %5324 }
 0xe07   : > { %v5757_v33 = vsub.f32 1.0, %v5756_v60  ;;  %7179 = vrcp.f32 %v12304_v22  ;;  %v5363_v30 = vsel %vm5360_vm14, %v5362_v6, %v5358_v18  ;;  %v5741_v62 = vmul.f32 %v12310_v39, %v12090_v16  ;;  %v13343_v18 = vld [vmem:[#allocation37_spill] sm:$0xff] }
 0xe08   : > { %v5828_v32 = vsel %vm5825_vm1, %v5827_v38, %v5823_v24  ;;  %vm5810_vm15 = vcmp.eq.f32.partialorder %v5809_v34, 8.507059e+37  ;;  %v5773_v61 = vmul.f32 %v12258_v51, %v5772_v41  ;;  %v5789_v47 = vadd.f32 %v12212_v21, %v5788_v35  ;;  %v13344_v41 = vld [vmem:[#allocation40_spill] sm:$0xff] }
 0xe09   : > { %5907 = vmatpush.xpose.msra.mxu0 %v5834_v28  ;;  %5936 = vmatpush.xpose.msra.mxu1 %v5835_v26  ;;  %v5813_v23 = vsel %vm5810_vm15, %v5812_v55, %v5808_v44  ;;  %vm5791_vm2 = vweird.f32 %v12212_v21  ;;  %v5796_v7 = vand.u32 2147483648, %v11978_v37  ;;  %v5830_v2 = vmul.f32 %v11794_v31, %v5363_v30  ;;  %v13365_v31 = vld [vmem:[#allocation20_spill] sm:$0xff] }
 0xe0a   : > { %v12340_v29 = vpop.eup %7177  ;;  %v5831_v45 = vmul.f32 %v11798_v13, %v5363_v30  ;;  %v5794_v14 = vand.u32 2147483647, %v11978_v37  ;;  %vm5790_vm3 = vweird.f32 %v11978_v37  ;;  %v5758_v34 = vmul.f32 %v12274_v11, %v5757_v33  ;;  %v13345_v30 = vld [vmem:[#allocation45_spill] sm:$0xff] }
 0xe0b   : > { %v5892_v63 = vmul.f32 %v13333_v59, %v5828_v32  ;;  %v5893_v19 = vmul.f32 %v13334_v49, %v5828_v32  ;;  %v5742_v40 = vsub.f32 1.0, %v5741_v62  ;;  %7181 = vrcp.f32 %v12336_v57  ;;  %vm12354_vm4 = vmor %vm5790_vm3, %vm5791_vm2  ;;  %v13346_v32 = vld [vmem:[#allocation46_spill] sm:$0xff] }
 0xe0c   : > { %v5890_v54 = vmul.f32 %v13335_v20, %v5813_v23  ;;  %v5726_v37 = vmul.f32 %v12340_v29, %v12266_v50  ;;  %v5793_v15 = vsel %vm12354_vm4, %v12212_v21, %v5789_v47  ;;  %v5774_v58 = vadd.f32 %v12258_v51, %v5773_v61  ;;  %v13361_v47 = vld [vmem:[#allocation28_spill] sm:$0xff] }
 0xe0d   : > { %5908 = vmatpush.xpose.msra.mxu0 %v5832_v25  ;;  %5937 = vmatpush.xpose.msra.mxu1 %v5833_v27  ;;  %v12358_v13 = vpop.eup %7179  ;;  %vm5776_vm5 = vweird.f32 %v12258_v51  ;;  %v5797_v42 = vor.u32 1.1754944e-38, %v5796_v7  ;;  %v5781_v12 = vand.u32 2147483648, %v12106_v53  ;;  %v5891_v52 = vmul.f32 %v13338_v17, %v5813_v23 }
 0xe0e   : > { %vm5795_vm6 = vcmp.eq.f32.partialorder %v5794_v14, 8.507059e+37  ;;  %vm5775_vm7 = vweird.f32 %v12106_v53  ;;  %v5779_v46 = vand.u32 2147483647, %v12106_v53  ;;  %v5759_v28 = vadd.f32 %v12274_v11, %v5758_v34 }
 0xe0f   : > { %vm5761_vm8 = vweird.f32 %v12274_v11  ;;  %v5743_v21 = vmul.f32 %v12310_v39, %v5742_v40  ;;  %v5711_v26 = vmul.f32 %v12358_v13, %v12304_v22  ;;  %v5798_v8 = vsel %vm5795_vm6, %v5797_v42, %v5793_v15  ;;  %vm12379_vm9 = vmor %vm5775_vm7, %vm5776_vm5  ;;  %v13350_v40 = vld [vmem:[#allocation10_spill] sm:$0xff] }
 0xe10   : > { %vm5760_vm0 = vweird.f32 %v12042_v48  ;;  %v5766_v53 = vand.u32 2147483648, %v12042_v48  ;;  %v5727_v60 = vsub.f32 1.0, %v5726_v37  ;;  %v5778_v5 = vsel %vm12379_vm9, %v12258_v51, %v5774_v58 }
 0xe11   : > { %5909 = vmatpush.xpose.msra.mxu0 %v5830_v2  ;;  %5938 = vmatpush.xpose.msra.mxu1 %v5831_v45  ;;  %v12388_v0 = vpop.eup %7181  ;;  %v5782_v55 = vor.u32 1.1754944e-38, %v5781_v12  ;;  %vm12390_vm11 = vmor %vm5760_vm0, %vm5761_vm8  ;;  %v5764_v38 = vand.u32 2147483647, %v12042_v48  ;;  %v5888_v35 = vmul.f32 %v13343_v18, %v5798_v8  ;;  %v5889_v6 = vmul.f32 %v13344_v41, %v5798_v8 }
 0xe12   : > { %vm5780_vm12 = vcmp.eq.f32.partialorder %v5779_v46, 8.507059e+37  ;;  %v5763_v24 = vsel %vm12390_vm11, %v12274_v11, %v5759_v28  ;;  %v5712_v56 = vsub.f32 1.0, %v5711_v26  ;;  %v5744_v25 = vadd.f32 %v12310_v39, %v5743_v21  ;;  %v13353_v46 = vld [vmem:[#allocation16_spill] sm:$0xff]  ;;  %v13354_v21 = vld [vmem:[#allocation11_spill] sm:$0xff] }
 0xe13   : > { %v12368_v1 = vpop.xlane.xlu2 %5321  ;;  %v5783_v51 = vsel %vm5780_vm12, %v5782_v55, %v5778_v5  ;;  %vm5746_vm13 = vweird.f32 %v12310_v39  ;;  %v5767_v27 = vor.u32 1.1754944e-38, %v5766_v53  ;;  %v5728_v44 = vmul.f32 %v12340_v29, %v5727_v60  ;;  %v13355_v5 = vld [vmem:[#allocation27_spill] sm:$0xff] }
 0xe14   : > { %7183 = vrcp.f32 %v12368_v1  ;;  %v5696_v48 = vmul.f32 %v12388_v0, %v12336_v57  ;;  %vm5745_vm10 = vweird.f32 %v12090_v16  ;;  %v5751_v11 = vand.u32 2147483648, %v12090_v16 }
 0xe15   : > { %5952 = vmatpush.xpose.msrb.mxu0 %v5892_v63  ;;  %5981 = vmatpush.xpose.msrb.mxu1 %v5893_v19  ;;  %vm5765_vm14 = vcmp.eq.f32.partialorder %v5764_v38, 8.507059e+37  ;;  %v5886_v62 = vmul.f32 %v13345_v30, %v5783_v51  ;;  %v5887_v61 = vmul.f32 %v13346_v32, %v5783_v51  ;;  %vm12411_vm1 = vmor %vm5745_vm10, %vm5746_vm13  ;;  %v5749_v7 = vand.u32 2147483647, %v12090_v16  ;;  %v13349_v16 = vld [vmem:[#allocation13_spill] sm:$0xff] }
 0xe16   : > { %v5768_v23 = vsel %vm5765_vm14, %v5767_v27, %v5763_v24  ;;  %v5713_v2 = vmul.f32 %v12358_v13, %v5712_v56  ;;  %v5748_v45 = vsel %vm12411_vm1, %v12310_v39, %v5744_v25  ;;  %v5697_v14 = vsub.f32 1.0, %v5696_v48  ;;  %v13359_v25 = vld [vmem:[#allocation33_spill] sm:$0xff] }
 0xe17   : > { %v5729_v59 = vadd.f32 %v12340_v29, %v5728_v44  ;;  %vm5731_vm15 = vweird.f32 %v12340_v29  ;;  %v5752_v63 = vor.u32 1.1754944e-38, %v5751_v11  ;;  %v5736_v49 = vand.u32 2147483648, %v12266_v50  ;;  %v13360_v44 = vld [vmem:[#allocation26_spill] sm:$0xff] }
 0xe18   : > { %v5884_v19 = vmul.f32 %v13349_v16, %v5768_v23  ;;  %vm5730_vm2 = vweird.f32 %v12266_v50  ;;  %v5885_v20 = vmul.f32 %v13350_v40, %v5768_v23  ;;  %vm5750_vm3 = vcmp.eq.f32.partialorder %v5749_v7, 8.507059e+37 }
 0xe19   : > { %5953 = vmatpush.xpose.msrb.mxu0 %v5890_v54  ;;  %5982 = vmatpush.xpose.msrb.mxu1 %v5891_v52  ;;  %v5734_v39 = vand.u32 2147483647, %v12266_v50  ;;  %v5753_v54 = vsel %vm5750_vm3, %v5752_v63, %v5748_v45  ;;  %vm12429_vm4 = vmor %vm5730_vm2, %vm5731_vm15  ;;  %v5714_v37 = vadd.f32 %v12358_v13, %v5713_v2  ;;  %vm5716_vm5 = vweird.f32 %v12358_v13  ;;  %v13362_v2 = vld [vmem:[#allocation23_spill] sm:$0xff] }
 0xe1a   : > { %v12405_v33 = vpop.eup %7183  ;;  %v5721_v15 = vand.u32 2147483648, %v12304_v22  ;;  %v5698_v58 = vmul.f32 %v12388_v0, %v5697_v14  ;;  %v5733_v50 = vsel %vm12429_vm4, %v12340_v29, %v5729_v59  ;;  %vm5715_vm6 = vweird.f32 %v12304_v22 }
 0xe1b   : > { %v5681_v34 = vmul.f32 %v12405_v33, %v12368_v1  ;;  %v5737_v12 = vor.u32 1.1754944e-38, %v5736_v49  ;;  %v5719_v52 = vand.u32 2147483647, %v12304_v22  ;;  %v5882_v28 = vmul.f32 %v13353_v46, %v5753_v54  ;;  %vm5717_vm8 = vmor %vm5715_vm6, %vm5716_vm5  ;;  %v13363_v49 = vld [vmem:[#allocation34_spill] sm:$0xff] }
 0xe1c   : > { %v5883_v26 = vmul.f32 %v13354_v21, %v5753_v54  ;;  %vm5735_vm7 = vcmp.eq.f32.partialorder %v5734_v39, 8.507059e+37  ;;  %v5718_v29 = vsel %vm5717_vm8, %v12358_v13, %v5714_v37  ;;  %v5722_v10 = vor.u32 1.1754944e-38, %v5721_v15  ;;  %v12482_v39 = vld [vmem:[%s7389_s23 + $0x2c0] sm:$0xff]  ;;  %v12485_v54 = vld [vmem:[%s7389_s23 + $0x2c8] sm:$0xff] }
 0xe1d   : > { %5954 = vmatpush.xpose.msrb.mxu0 %v5888_v35  ;;  %5983 = vmatpush.xpose.msrb.mxu1 %v5889_v6  ;;  %v5682_v42 = vsub.f32 1.0, %v5681_v34  ;;  %v5738_v8 = vsel %vm5735_vm7, %v5737_v12, %v5733_v50  ;;  %v5699_v22 = vadd.f32 %v12388_v0, %v5698_v58  ;;  %vm5701_vm9 = vweird.f32 %v12388_v0  ;;  %v13366_v15 = vld [vmem:[#allocation24_spill] sm:$0xff] }
 0xe1e   : > { %vm5700_vm0 = vweird.f32 %v12336_v57  ;;  %v5706_v60 = vand.u32 2147483648, %v12336_v57  ;;  %vm5720_vm11 = vcmp.eq.f32.partialorder %v5719_v52, 8.507059e+37  ;;  %v5880_v55 = vmul.f32 %v13355_v5, %v5738_v8  ;;  %5910 = vmatmul.f32.vlgmr.msra.gmra.mxu0 %v12482_v39  ;;  %5939 = vmatmul.f32.vlgmr.msra.gmra.mxu1 %v12485_v54  ;;  %v12495_v52 = vld [vmem:[%s7389_s23 + $0x2d8] sm:$0xff] }
 0xe1f   : > { %v5683_v53 = vmul.f32 %v12405_v33, %v5682_v42  ;;  %v5881_v38 = vmul.f32 %v13356_v36, %v5738_v8  ;;  %v5723_v18 = vsel %vm5720_vm11, %v5722_v10, %v5718_v29  ;;  %v5704_v13 = vand.u32 2147483647, %v12336_v57  ;;  %vm12458_vm12 = vmor %vm5700_vm0, %vm5701_vm9 }
 0xe20   : > { %v5703_v6 = vsel %vm12458_vm12, %v12388_v0, %v5699_v22  ;;  %vm5686_vm13 = vweird.f32 %v12405_v33  ;;  %v5707_v56 = vor.u32 1.1754944e-38, %v5706_v60  ;;  %v5691_v51 = vand.u32 2147483648, %v12368_v1  ;;  %v13367_v60 = vld [vmem:[#allocation32_spill] sm:$0xff] }
 0xe21   : > { %5955 = vmatpush.xpose.msrb.mxu0 %v5886_v62  ;;  %5984 = vmatpush.xpose.msrb.mxu1 %v5887_v61  ;;  %v5684_v24 = vadd.f32 %v12405_v33, %v5683_v53  ;;  %v5878_v27 = vmul.f32 %v13359_v25, %v5723_v18  ;;  %vm5685_vm10 = vweird.f32 %v12368_v1  ;;  %v5879_v48 = vmul.f32 %v13360_v44, %v5723_v18  ;;  %v12507_v18 = vld [vmem:[%s7389_s23 + $0x2e8] sm:$0xff] }
 0xe22   : > { %vm5705_vm14 = vcmp.eq.f32.partialorder %v5704_v13, 8.507059e+37  ;;  %v5689_v11 = vand.u32 2147483647, %v12368_v1  ;;  %vm5687_vm1 = vmor %vm5685_vm10, %vm5686_vm13  ;;  %v5692_v32 = vor.u32 1.1754944e-38, %v5691_v51 }
 0xe23   : > { %v12441_v17 = vpop.xlane.xlu0 %5318  ;;  %v5708_v0 = vsel %vm5705_vm14, %v5707_v56, %v5703_v6  ;;  %v5688_v62 = vsel %vm5687_vm1, %v12405_v33, %v5684_v24  ;;  %v12515_v24 = vld [vmem:[%s7389_s23 + $0x2f0] sm:$0xff]  ;;  %v12518_v56 = vld [vmem:[%s7389_s23 + $0x2f8] sm:$0xff] }
 0xe24   : > { %7185 = vrcp.f32 %v12441_v17  ;;  %v5676_v23 = vand.u32 2147483648, %v12441_v17  ;;  %v5876_v7 = vmul.f32 %v13361_v47, %v5708_v0  ;;  %v5877_v45 = vmul.f32 %v13362_v2, %v5708_v0 }
 0xe25   : > { %5956 = vmatpush.xpose.msrb.mxu0 %v5884_v19  ;;  %5985 = vmatpush.xpose.msrb.mxu1 %v5885_v20  ;;  %vm5690_vm2 = vcmp.eq.f32.partialorder %v5689_v11, 8.507059e+37  ;;  %v5674_v1 = vand.u32 2147483647, %v12441_v17  ;;  %vm5670_vm3 = vweird.f32 %v12441_v17  ;;  %v13364_v19 = vld [vmem:[#allocation29_spill] sm:$0xff] }
 0xe26   : > { %v5693_v14 = vsel %vm5690_vm2, %v5692_v32, %v5688_v62  ;;  %v5677_v33 = vor.u32 1.1754944e-38, %v5676_v23  ;;  %5942 = vmatmul.f32.gmra.mxu1 %v12495_v52 }
 0xe27   : > { %v5874_v16 = vmul.f32 %v13363_v49, %v5693_v14  ;;  %v5875_v40 = vmul.f32 %v13364_v19, %v5693_v14  ;;  %vm5675_vm5 = vcmp.eq.f32.partialorder %v5674_v1, 8.507059e+37 }
 0xe29   : > { %5957 = vmatpush.xpose.msrb.mxu0 %v5882_v28  ;;  %5986 = vmatpush.xpose.msrb.mxu1 %v5883_v26 }
 0xe2a   : > { %v7186_v41 = vpop.eup %7185 }
 0xe2b   : > { %v5666_v57 = vmul.f32 %v7186_v41, %v12441_v17  ;;  %vm5671_vm15 = vweird.f32 %v7186_v41  ;;  %v12492_v17 = vld [vmem:[%s7389_s23 + $0x2d0] sm:$0xff]  ;;  %v5310_v46 = vpop.xlane.xlu0 %5309 }
 0xe2c   : > { %vm5672_vm4 = vmor %vm5670_vm3, %vm5671_vm15  ;;  %5913 = vmatmul.f32.gmra.mxu0 %v12492_v17  ;;  %v5631_v32 = vand.u32 2147483648, %v5310_v46  ;;  %vm5625_vm12 = vweird.f32 %v5310_v46 }
 0xe2d   : > { %5958 = vmatpush.xpose.msrb.mxu0 %v5880_v55  ;;  %5987 = vmatpush.xpose.msrb.mxu1 %v5881_v38  ;;  %v5667_v30 = vsub.f32 1.0, %v5666_v57  ;;  %v13368_v55 = vld [vmem:[#allocation44_spill] sm:$0xff] }
 0xe2e   : > { %v12504_v38 = vld [vmem:[%s7389_s23 + $0x2e0] sm:$0xff]  ;;  %5945 = vmatmul.f32.gmra.mxu1 %v12507_v18 }
 0xe2f   : > { %v5668_v61 = vmul.f32 %v7186_v41, %v5667_v30  ;;  %v5629_v30 = vand.u32 2147483647, %v5310_v46 }
 0xe31   : > { %5959 = vmatpush.xpose.msrb.mxu0 %v5878_v27  ;;  %5988 = vmatpush.xpose.msrb.mxu1 %v5879_v48  ;;  %v5669_v34 = vadd.f32 %v7186_v41, %v5668_v61  ;;  %vm12529_vm10 = vcmp.eq.f32.partialorder %v5629_v30, 8.507059e+37 }
 0xe33   : > { %v5316_v59 = vpop.xlane.xlu1 %5315  ;;  %v5673_v63 = vsel %vm5672_vm4, %v7186_v41, %v5669_v34  ;;  %v5632_v34 = vor.u32 1.1754944e-38, %v5631_v32 }
 0xe34   : > { %7187 = vrcp.f32 %v5316_v59  ;;  %v5678_v20 = vsel %vm5675_vm5, %v5677_v33, %v5673_v63  ;;  %v5661_v28 = vand.u32 2147483648, %v5316_v59  ;;  %v5659_v26 = vand.u32 2147483647, %v5316_v59  ;;  %5916 = vmatmul.f32.gmra.mxu0 %v12504_v38 }
 0xe35   : > { %5960 = vmatpush.xpose.msrb.mxu0 %v5876_v7  ;;  %5989 = vmatpush.xpose.msrb.mxu1 %v5877_v45  ;;  %v5872_v37 = vmul.f32 %v13365_v31, %v5678_v20  ;;  %v5873_v58 = vmul.f32 %v13366_v15, %v5678_v20  ;;  %7189 = vrcp.f32 %v5310_v46  ;;  %vm5655_vm7 = vweird.f32 %v5316_v59 }
 0xe36   : > { %v5662_v29 = vor.u32 1.1754944e-38, %v5661_v28  ;;  %vm5660_vm9 = vcmp.eq.f32.partialorder %v5659_v26, 8.507059e+37  ;;  %5948 = vmatmul.f32.gmra.mxu1 %v12518_v56 }
 0xe39   : > { %5961 = vmatpush.xpose.msrb.mxu0 %v5874_v16  ;;  %5990 = vmatpush.xpose.msrb.mxu1 %v5875_v40 }
 0xe3a   : > { %v7188_v42 = vpop.eup %7187 }
 0xe3b   : > { %v5651_v50 = vmul.f32 %v7188_v42, %v5316_v59  ;;  %vm5656_vm6 = vweird.f32 %v7188_v42  ;;  %v12499_v10 = vpop.xlane.xlu1 %5306  ;;  %v7190_v13 = vpop.eup %7189 }
 0xe3c   : > { %vm5657_vm8 = vmor %vm5655_vm7, %vm5656_vm6  ;;  %7191 = vrcp.f32 %v12499_v10  ;;  %v5621_v35 = vmul.f32 %v7190_v13, %v5310_v46  ;;  %5919 = vmatmul.f32.gmra.mxu0 %v12515_v24  ;;  %vm5626_vm0 = vweird.f32 %v7190_v13  ;;  %vm5610_vm3 = vweird.f32 %v12499_v10  ;;  %v13375_v46 = vld [vmem:[#allocation25_spill] sm:$0xff] }
 0xe3d   : > { %5962 = vmatpush.xpose.msrb.mxu0 %v5872_v37  ;;  %5991 = vmatpush.xpose.msrb.mxu1 %v5873_v58  ;;  %v5652_v12 = vsub.f32 1.0, %v5651_v50  ;;  %vm12525_vm13 = vmor %vm5625_vm12, %vm5626_vm0  ;;  %v5614_v19 = vand.u32 2147483647, %v12499_v10  ;;  %v5616_v40 = vand.u32 2147483648, %v12499_v10 }
 0xe3e   : > { %v5622_v51 = vsub.f32 1.0, %v5621_v35 }
 0xe3f   : > { %v5653_v21 = vmul.f32 %v7188_v42, %v5652_v12  ;;  %vm5615_vm6 = vcmp.eq.f32.partialorder %v5614_v19, 8.507059e+37 }
 0xe40   : > { %v5623_v27 = vmul.f32 %v7190_v13, %v5622_v51 }
 0xe41   : > { %v5654_v8 = vadd.f32 %v7188_v42, %v5653_v21 }
 0xe42   : > { %v12512_v6 = vpop.eup %7191  ;;  %v5624_v62 = vadd.f32 %v7190_v13, %v5623_v27 }
 0xe43   : > { %v5658_v53 = vsel %vm5657_vm8, %v7188_v42, %v5654_v8  ;;  %v5606_v57 = vmul.f32 %v12512_v6, %v12499_v10  ;;  %vm5611_vm1 = vweird.f32 %v12512_v6  ;;  %v13376_v8 = vld [vmem:[#allocation36_spill] sm:$0xff] }
 0xe44   : > { %v5663_v22 = vsel %vm5660_vm9, %v5662_v29, %v5658_v53  ;;  %v5628_v59 = vsel %vm12525_vm13, %v7190_v13, %v5624_v62  ;;  %vm12546_vm4 = vmor %vm5610_vm3, %vm5611_vm1 }
 0xe45   : > { %v5870_v5 = vmul.f32 %v13367_v60, %v5663_v22  ;;  %v5871_v36 = vmul.f32 %v13368_v55, %v5663_v22  ;;  %v5607_v44 = vsub.f32 1.0, %v5606_v57  ;;  %v5633_v58 = vsel %vm12529_vm10, %v5632_v34, %v5628_v59  ;;  %v13377_v60 = vld [vmem:[#allocation41_spill] sm:$0xff]  ;;  %v13378_v55 = vld [vmem:[#allocation8_spill] sm:$0xff] }
 0xe46   : > { %v5866_v28 = vmul.f32 %v13375_v46, %v5633_v58  ;;  %v5867_v29 = vmul.f32 %v13376_v8, %v5633_v58 }
 0xe47   : > { %5963 = vmatpush.xpose.msrb.mxu0 %v5870_v5  ;;  %5992 = vmatpush.xpose.msrb.mxu1 %v5871_v36  ;;  %v5608_v23 = vmul.f32 %v12512_v6, %v5607_v44 }
 0xe49   : > { %v5609_v63 = vadd.f32 %v12512_v6, %v5608_v23 }
 0xe4b   : > { %v5313_v41 = vpop.xlane.xlu2 %5312  ;;  %v5613_v12 = vsel %vm12546_vm4, %v12512_v6, %v5609_v63 }
 0xe4c   : > { %7193 = vrcp.f32 %v5313_v41  ;;  %v5646_v61 = vand.u32 2147483648, %v5313_v41  ;;  %v5644_v7 = vand.u32 2147483647, %v5313_v41  ;;  %vm5640_vm14 = vweird.f32 %v5313_v41 }
 0xe4e   : > { %v5647_v33 = vor.u32 1.1754944e-38, %v5646_v61  ;;  %vm5645_vm2 = vcmp.eq.f32.partialorder %v5644_v7, 8.507059e+37 }
 0xe52   : > { %v7194_v25 = vpop.eup %7193 }
 0xe53   : > { %v5636_v48 = vmul.f32 %v7194_v25, %v5313_v41  ;;  %v5304_v11 = vpop.xlane.xlu2 %5303  ;;  %vm5641_vm11 = vweird.f32 %v7194_v25 }
 0xe54   : > { %7195 = vrcp.f32 %v5304_v11  ;;  %vm5642_vm15 = vmor %vm5640_vm14, %vm5641_vm11  ;;  %vm5595_vm7 = vweird.f32 %v5304_v11  ;;  %v5599_v26 = vand.u32 2147483647, %v5304_v11 }
 0xe55   : > { %v5637_v0 = vsub.f32 1.0, %v5636_v48 }
 0xe56   : > { %vm5600_vm9 = vcmp.eq.f32.partialorder %v5599_v26, 8.507059e+37 }
 0xe57   : > { %v5638_v47 = vmul.f32 %v7194_v25, %v5637_v0 }
 0xe59   : > { %v5639_v1 = vadd.f32 %v7194_v25, %v5638_v47 }
 0xe5a   : > { %v7196_v14 = vpop.eup %7195 }
 0xe5b   : > { %v5591_v49 = vmul.f32 %v7196_v14, %v5304_v11  ;;  %v5643_v16 = vsel %vm5642_vm15, %v7194_v25, %v5639_v1  ;;  %vm5596_vm5 = vweird.f32 %v7196_v14 }
 0xe5c   : > { %v5648_v20 = vsel %vm5645_vm2, %v5647_v33, %v5643_v16  ;;  %vm5597_vm8 = vmor %vm5595_vm7, %vm5596_vm5 }
 0xe5d   : > { %v5592_v31 = vsub.f32 1.0, %v5591_v49  ;;  %v5868_v37 = vmul.f32 %v11967_v43, %v5648_v20  ;;  %v5869_v15 = vmul.f32 %v11974_v4, %v5648_v20  ;;  %v5617_v43 = vor.u32 1.1754944e-38, %v5616_v40 }
 0xe5e   : > { %v5601_v4 = vand.u32 2147483648, %v5304_v11 }
 0xe5f   : > { %v5593_v50 = vmul.f32 %v7196_v14, %v5592_v31  ;;  %5964 = vmatpush.xpose.msrb.mxu0 %v5868_v37  ;;  %5993 = vmatpush.xpose.msrb.mxu1 %v5869_v15  ;;  %v5618_v10 = vsel %vm5615_vm6, %v5617_v43, %v5613_v12 }
 0xe60   : > { %v5602_v22 = vor.u32 1.1754944e-38, %v5601_v4  ;;  %v5864_v5 = vmul.f32 %v13377_v60, %v5618_v10  ;;  %v5865_v36 = vmul.f32 %v13378_v55, %v5618_v10 }
 0xe61   : > { %v5594_v21 = vadd.f32 %v7196_v14, %v5593_v50 }
 0xe63   : > { %5965 = vmatpush.xpose.msrb.mxu0 %v5866_v28  ;;  %5994 = vmatpush.xpose.msrb.mxu1 %v5867_v29  ;;  %v5598_v53 = vsel %vm5597_vm8, %v7196_v14, %v5594_v21 }
 0xe64   : > { %v5603_v13 = vsel %vm5600_vm9, %v5602_v22, %v5598_v53 }
 0xe65   : > { %v5862_v35 = vmul.f32 %v11944_v9, %v5603_v13  ;;  %v5863_v41 = vmul.f32 %v11994_v3, %v5603_v13 }
 0xe67   : > { %5966 = vmatpush.xpose.msrb.mxu0 %v5864_v5  ;;  %5995 = vmatpush.xpose.msrb.mxu1 %v5865_v36 }
 0xe6b   : > { %5967 = vmatpush.xpose.msrb.mxu0 %v5862_v35  ;;  %5996 = vmatpush.xpose.msrb.mxu1 %v5863_v41 }
 0xe6e   : > { %5968 = vmatmul.f32.vlgmr.msrb.gmra.mxu0 %v12482_v39  ;;  %5997 = vmatmul.f32.vlgmr.msrb.gmra.mxu1 %v12485_v54 }
 0xe76   : > { %5971 = vmatmul.f32.gmra.mxu0 %v12492_v17  ;;  %6000 = vmatmul.f32.gmra.mxu1 %v12495_v52 }
 0xe7e   : > { %5974 = vmatmul.f32.gmra.mxu0 %v12504_v38  ;;  %6003 = vmatmul.f32.gmra.mxu1 %v12507_v18 }
 0xe86   : > { %5977 = vmatmul.f32.gmra.mxu0 %v12515_v24  ;;  %6006 = vmatmul.f32.gmra.mxu1 %v12518_v56 }
 0xe9b   : > { %v5911_v9 = vpop.f32.mrf.mxu0  ;;  %v5940_v3 = vpop.f32.mrf.mxu1 }
 0xe9c   : > { %v5941_v6 = vadd.f32 %v5940_v3, %v5911_v9 }
 0xe9e   : > { %6010 = vst [vmem:[%s8730_s24 + $0xc0] sm:$0xff] %v5941_v6 }
 0xea3   : > { %v5943_v54 = vpop.f32.mrf.mxu1 }
 0xea9   : > { %v5914_v39 = vpop.f32.mrf.mxu0 }
 0xeaa   : > { %v5944_v17 = vadd.f32 %v5943_v54, %v5914_v39 }
 0xeab   : > { %v5946_v38 = vpop.f32.mrf.mxu1 }
 0xeac   : > { %6012 = vst [vmem:[%s8730_s24 + $0xd0] sm:$0xff] %v5944_v17 }
 0xeb1   : > { %v5917_v52 = vpop.f32.mrf.mxu0 }
 0xeb2   : > { %v5947_v51 = vadd.f32 %v5946_v38, %v5917_v52 }
 0xeb3   : > { %v5949_v24 = vpop.f32.mrf.mxu1 }
 0xeb4   : > { %6014 = vst [vmem:[%s8730_s24 + $0xe0] sm:$0xff] %v5947_v51 }
 0xeb9   : > { %v5920_v18 = vpop.f32.mrf.mxu0 }
 0xeba   : > { %v5950_v56 = vadd.f32 %v5949_v24, %v5920_v18 }
 0xebc   : > { %6016 = vst [vmem:[%s8730_s24 + $0xf0] sm:$0xff] %v5950_v56 }
 0xeeb   : > { %v5969_v57 = vpop.f32.mrf.mxu0  ;;  %v5998_v25 = vpop.f32.mrf.mxu1 }
 0xeec   : > { %v5999_v27 = vadd.f32 %v5998_v25, %v5969_v57 }
 0xeee   : > { %6011 = vst [vmem:[%s8730_s24 + $0xc8] sm:$0xff] %v5999_v27 }
 0xef3   : > { %v5972_v44 = vpop.f32.mrf.mxu0  ;;  %v6001_v48 = vpop.f32.mrf.mxu1 }
 0xef4   : > { %v6002_v11 = vadd.f32 %v6001_v48, %v5972_v44 }
 0xef6   : > { %6013 = vst [vmem:[%s8730_s24 + $0xd8] sm:$0xff] %v6002_v11 }
 0xefb   : > { %v5975_v30 = vpop.f32.mrf.mxu0  ;;  %v6004_v0 = vpop.f32.mrf.mxu1 }
 0xefc   : > { %v6005_v62 = vadd.f32 %v6004_v0, %v5975_v30 }
 0xefe   : > { %6015 = vst [vmem:[%s8730_s24 + $0xe8] sm:$0xff] %v6005_v62 }
 0xf03   : > { %v5978_v32 = vpop.f32.mrf.mxu0  ;;  %v6007_v61 = vpop.f32.mrf.mxu1 }
 0xf04   : > { %v6008_v23 = vadd.f32 %v6007_v61, %v5978_v32 }
 0xf06   : > { %6017 = vst [vmem:[%s8730_s24 + $0xf8] sm:$0xff] %v6008_v23 }
 0xf07   : > { %7254 = shalt.err (!%p7251_p7)
}
 0xf08   : > { %s7297_s19 = smov 256   ;;  %s7298_s20 = smov 16  }
 0xf09   : > { %6380 = dma.vmem_to_hbm [thread:$0]  (%p7355_p11), %s6032_s29, 4096, %s6034_s30, %s6019_s2, %s7297_s19, %s7297_s19, %s7298_s20  }
 0xf0a PF: > { %s6048_s21 = sand.u32 1, %s7281_s6   ;;  %p6387_p8 = pnand %p6109_p9, %p7359_p12 }
 0xf0b   : > { %s6049_s22 = scalar_lea.sflag [#allocation4], %s6048_s21 }
 0xf0c   : > { %p6388_p10 = pneg %p6387_p8 }
 0xf0e   : > { %7276 = dma.done.wait (%p6388_p10), %s6049_s22, 4096  }
 0xf0f   : > { %7278 = vsyncadd (%p6388_p10), %s6049_s22, 4294963200  ;;  %p14_p0 = scmp.ge.s32.totalorder %s7334_s12, 4   ;;  %s13379_s6 = smov %s7285_s7 }
 0xf10   : > { %s13380_s7 = smov %s7289_s8  ;;  %s13381_s8 = smov %s7346_s15 }
 0xf11   : > { %s13382_s9 = smov %s7334_s12  ;;  %16 = sbr.rel (!%p14_p0) target bundleno = 5 (0x5), region = 69 }
 0xf16   :  { %6055 = vsyncpa [#allocation3], 1 }
 0xf17   :  { %6057 = vsyncpa [#allocation3 + $0x1], 1 }
 0xf18   :  { %6058 = vsyncpa [#allocation4], 1 }
 0xf19   :  { %6060 = vsyncpa [#allocation4 + $0x1], 1 }

</bundles_post_ra>
